<compile_context>
chip_gen: v7x
topology: tpu7x:2x2x1
jax: 0.10.0
libtpu: 0.0.40
codegen_flags: <defaults>
</compile_context>

<pallas_src>
import functools
import math

import jax
import jax.numpy as jnp
from jax.experimental import pallas as pl
from jax.experimental.pallas import tpu as pltpu

# ---- config mirroring TransformerModel.__init__ ----
INPUT_DIM = 16
MODEL_DIM = 32
OUTPUT_DIM = 12
NUM_HEADS = 4
HEAD_DIM = MODEL_DIM // NUM_HEADS
NUM_ENC_LAYERS = 2
NUM_DEC_LAYERS = 2
N_LAYERS = NUM_ENC_LAYERS + NUM_DEC_LAYERS
DIM_FEEDFORWARD = 2048          # nn.TransformerEncoder/DecoderLayer default
LN_EPS = 1e-5                   # layer_norm_eps default
MAX_POS = 1000                  # positional_encoding parameter length
OUT_PAD = 128                   # lane-dense padding for the final projection

ENC_PAD = ((INPUT_DIM + 15) // 16) * 16    # 16 (bf16 sublane-tile friendly)
DEC_PAD = ((OUTPUT_DIM + 15) // 16) * 16   # 16
EMB_ROWS = ENC_PAD + DEC_PAD               # 32


def _round128(n):
    return ((n + 127) // 128) * 128


# ---------------- static slab layouts (shared by prep + kernel) ----------------

def _build_wmat_layout():
    """(D, W_TOT) bf16 slab of all non-FFN matrices, 128-lane-aligned segments."""
    segs = []
    for l in range(NUM_ENC_LAYERS):
        segs += [(f"enc{l}.wqkv", 3 * MODEL_DIM), (f"enc{l}.wo", MODEL_DIM)]
    for l in range(NUM_DEC_LAYERS):
        segs += [(f"dec{l}.wqkv", 3 * MODEL_DIM), (f"dec{l}.wo", MODEL_DIM),
                 (f"dec{l}.cwq", MODEL_DIM), (f"dec{l}.cwkv", 2 * MODEL_DIM),
                 (f"dec{l}.cwo", MODEL_DIM)]
    segs += [("out_w", OUT_PAD)]
    layout, off = {}, 0
    for name, w in segs:
        layout[name] = (off, w)
        off += _round128(w)
    return layout, off


def _build_vec_layout():
    """(N_ROWS, 128) f32 slab: one row per bias / LN vector."""
    rows = [("enc_emb_b", MODEL_DIM), ("dec_emb_b", MODEL_DIM), ("out_b", OUT_PAD)]
    for l in range(NUM_ENC_LAYERS):
        p = f"enc{l}"
        rows += [(f"{p}.bqkv", 3 * MODEL_DIM), (f"{p}.bo", MODEL_DIM),
                 (f"{p}.g1", MODEL_DIM), (f"{p}.be1", MODEL_DIM),
                 (f"{p}.b2", MODEL_DIM),
                 (f"{p}.g2", MODEL_DIM), (f"{p}.be2", MODEL_DIM)]
    for l in range(NUM_DEC_LAYERS):
        p = f"dec{l}"
        rows += [(f"{p}.bqkv", 3 * MODEL_DIM), (f"{p}.bo", MODEL_DIM),
                 (f"{p}.g1", MODEL_DIM), (f"{p}.be1", MODEL_DIM),
                 (f"{p}.cbq", MODEL_DIM), (f"{p}.cbkv", 2 * MODEL_DIM),
                 (f"{p}.cbo", MODEL_DIM),
                 (f"{p}.g2", MODEL_DIM), (f"{p}.be2", MODEL_DIM),
                 (f"{p}.b2", MODEL_DIM),
                 (f"{p}.g3", MODEL_DIM), (f"{p}.be3", MODEL_DIM)]
    layout = {name: (i, w) for i, (name, w) in enumerate(rows)}
    return layout, len(rows)


W_LAYOUT, W_TOT = _build_wmat_layout()
V_LAYOUT, V_ROWS = _build_vec_layout()


# ---------------- the fused whole-model kernel ----------------

def _transformer_kernel(src_ref, tgt_ref, pos_s_ref, pos_t_ref, emb_ref,
                        wmat_ref, vec_ref, ffnb1_ref, ffnw_hbm,
                        out_ref, ffn_buf, ffn_sem, *, B, Ss, St):
    f32, bf16 = jnp.float32, jnp.bfloat16
    D, H, Dh, F = MODEL_DIM, NUM_HEADS, HEAD_DIM, DIM_FEEDFORWARD

    # ---- packed-parameter accessors (static, lane-aligned slices) ----
    def wmat(name):
        off, w = W_LAYOUT[name]
        return wmat_ref[:, off:off + w]            # (D, w) bf16

    def vrow(name):
        r, w = V_LAYOUT[name]
        return vec_ref[r:r + 1, 0:w]               # (1, w) f32

    # ---- manual double-buffered DMA for the per-layer FFN weight slab ----
    def ffn_copy(layer, slot):
        return pltpu.make_async_copy(ffnw_hbm.at[layer], ffn_buf.at[slot],
                                     ffn_sem.at[slot])

    ffn_copy(0, 0).start()                         # prime layer 0's FFN weights

    # ---- fused building blocks ----
    def layernorm(x, g_name, b_name):
        mu = jnp.mean(x, axis=-1, keepdims=True)
        xc = x - mu
        var = jnp.mean(xc * xc, axis=-1, keepdims=True)
        return xc * jax.lax.rsqrt(var + LN_EPS) * vrow(g_name) + vrow(b_name)

    def mha_core(q, k, v, wo_name, bo_name, Sq, Sk):
        """softmax(q k^T) v per (batch, head); 1/sqrt(Dh) already folded into q."""
        q3 = q.reshape(B, Sq, D)
        k3 = k.reshape(B, Sk, D)
        v3 = v.reshape(B, Sk, D)
        heads = []
        for h in range(H):
            lo = h * Dh
            s = jnp.einsum("bqd,bkd->bqk", q3[:, :, lo:lo + Dh],
                           k3[:, :, lo:lo + Dh], preferred_element_type=f32)
            s = s - jnp.max(s, axis=-1, keepdims=True)
            p = jnp.exp(s)
            p = p / jnp.sum(p, axis=-1, keepdims=True)        # exact softmax
            heads.append(jnp.einsum("bqk,bkd->bqd", p, v3[:, :, lo:lo + Dh],
                                    preferred_element_type=f32))
        ctx = jnp.concatenate(heads, axis=-1).reshape(B * Sq, D)
        return (jnp.dot(ctx.astype(bf16), wmat(wo_name),
                        preferred_element_type=f32) + vrow(bo_name))

    def self_attn(x, pre, S):
        qkv = (jnp.dot(x.astype(bf16), wmat(f"{pre}.wqkv"),
                       preferred_element_type=f32) + vrow(f"{pre}.bqkv"))
        return mha_core(qkv[:, 0:D], qkv[:, D:2 * D], qkv[:, 2 * D:3 * D],
                        f"{pre}.wo", f"{pre}.bo", S, S)

    def cross_attn(y, mem_bf, pre, Sq, Sk):
        q = (jnp.dot(y.astype(bf16), wmat(f"{pre}.cwq"),
                     preferred_element_type=f32) + vrow(f"{pre}.cbq"))
        kv = (jnp.dot(mem_bf, wmat(f"{pre}.cwkv"),
                      preferred_element_type=f32) + vrow(f"{pre}.cbkv"))
        return mha_core(q, kv[:, 0:D], kv[:, D:2 * D],
                        f"{pre}.cwo", f"{pre}.cbo", Sq, Sk)

    def ffn(x, slot, gl, b2_name):
        w1 = ffn_buf[slot, :, 0:F]                 # (D, F) bf16
        w2t = ffn_buf[slot, :, F:2 * F]            # (D, F) bf16 == w2^T
        h = (jnp.dot(x.astype(bf16), w1, preferred_element_type=f32)
             + ffnb1_ref[gl:gl + 1, :])
        h = jnp.maximum(h, 0.0).astype(bf16)
        y = jax.lax.dot_general(h, w2t, (((1,), (1,)), ((), ())),
                                preferred_element_type=f32)
        return y + vrow(b2_name)

    # ---- encoder embedding + positional encoding ----
    enc_w = emb_ref[0:ENC_PAD, :]
    x = (jnp.dot(src_ref[...].astype(bf16), enc_w, preferred_element_type=f32)
         + vrow("enc_emb_b") + pos_s_ref[...])

    # ---- encoder stack (no final norm: nn.TransformerEncoder(norm=None)) ----
    gl = 0
    for l in range(NUM_ENC_LAYERS):
        slot = gl & 1
        if gl + 1 < N_LAYERS:                      # prefetch next layer's FFN weights
            ffn_copy(gl + 1, 1 - slot).start()
        pre = f"enc{l}"
        x = layernorm(x + self_attn(x, pre, Ss), f"{pre}.g1", f"{pre}.be1")
        ffn_copy(gl, slot).wait()
        x = layernorm(x + ffn(x, slot, gl, f"{pre}.b2"), f"{pre}.g2", f"{pre}.be2")
        gl += 1
    mem_bf = x.astype(bf16)                        # hoisted: reused by both decoder layers

    # ---- decoder embedding + positional encoding ----
    dec_w = emb_ref[ENC_PAD:ENC_PAD + DEC_PAD, :]
    y = (jnp.dot(tgt_ref[...].astype(bf16), dec_w, preferred_element_type=f32)
         + vrow("dec_emb_b") + pos_t_ref[...])

    # ---- decoder stack (no tgt mask — matches the reference forward) ----
    for l in range(NUM_DEC_LAYERS):
        slot = gl & 1
        if gl + 1 < N_LAYERS:
            ffn_copy(gl + 1, 1 - slot).start()
        pre = f"dec{l}"
        y = layernorm(y + self_attn(y, pre, St), f"{pre}.g1", f"{pre}.be1")
        y = layernorm(y + cross_attn(y, mem_bf, pre, St, Ss),
                      f"{pre}.g2", f"{pre}.be2")
        ffn_copy(gl, slot).wait()
        y = layernorm(y + ffn(y, slot, gl, f"{pre}.b2"), f"{pre}.g3", f"{pre}.be3")
        gl += 1

    # ---- output projection (lane-padded to OUT_PAD for a dense store) ----
    out_ref[...] = (jnp.dot(y.astype(bf16), wmat("out_w"),
                            preferred_element_type=f32) + vrow("out_b"))


# ---------------- wrapper: single pallas_call for the whole forward ----------------

def _pad_last(x, target):
    pad = target - x.shape[-1]
    return x if pad == 0 else jnp.pad(x, ((0, 0), (0, pad)))


def transformer_forward(src, tgt, packed, pos_enc):
    B, Ss, _ = src.shape
    _, St, _ = tgt.shape

    src2d = _pad_last(src.reshape(B * Ss, INPUT_DIM), ENC_PAD)
    tgt2d = _pad_last(tgt.reshape(B * St, OUTPUT_DIM), DEC_PAD)
    pos_s = jnp.tile(pos_enc[0, :Ss, :], (B, 1))
    pos_t = jnp.tile(pos_enc[0, :St, :], (B, 1))

    inputs = [src2d, tgt2d, pos_s, pos_t,
              packed["emb"], packed["wmat"], packed["vec"],
              packed["ffnb1"], packed["ffnw"]]

    def vmem_spec(a):
        nd = a.ndim
        return pl.BlockSpec(a.shape, lambda i, nd=nd: (0,) * nd)

    in_specs = ([vmem_spec(a) for a in inputs[:-1]]
                + [pl.BlockSpec(memory_space=pl.ANY)])      # FFN weights stay in HBM

    out = pl.pallas_call(
        functools.partial(_transformer_kernel, B=B, Ss=Ss, St=St),
        out_shape=jax.ShapeDtypeStruct((B * St, OUT_PAD), jnp.float32),
        grid=(1,),
        in_specs=in_specs,
        out_specs=pl.BlockSpec((B * St, OUT_PAD), lambda i: (0, 0)),
        scratch_shapes=[
            pltpu.VMEM((2, MODEL_DIM, 2 * DIM_FEEDFORWARD), jnp.bfloat16),
            pltpu.SemaphoreType.DMA((2,)),
        ],
        compiler_params=pltpu.CompilerParams(
            dimension_semantics=("arbitrary",)),
    )(*inputs)
    return out[:, :OUTPUT_DIM].reshape(B, St, OUTPUT_DIM)


# ---------------- parameter prep: pack into the kernel's slab layout ----------------

def prepare_params(params):
    D = MODEL_DIM
    scale = 1.0 / math.sqrt(HEAD_DIM)      # folded into wq / bq
    f32, bf16 = jnp.float32, jnp.bfloat16

    wmat = jnp.zeros((D, W_TOT), f32)
    vec = jnp.zeros((V_ROWS, 128), f32)

    def set_w(name, mat):
        nonlocal wmat
        off, _ = W_LAYOUT[name]
        wmat = wmat.at[:, off:off + mat.shape[1]].set(mat)

    def set_v(name, v):
        nonlocal vec
        r, _ = V_LAYOUT[name]
        vec = vec.at[r, :v.shape[0]].set(v)

    def pack_self(pre, p):
        set_w(f"{pre}.wqkv", jnp.concatenate([p["wq"] * scale, p["wk"], p["wv"]], axis=1))
        set_v(f"{pre}.bqkv", jnp.concatenate([p["bq"] * scale, p["bk"], p["bv"]]))
        set_w(f"{pre}.wo", p["wo"])
        set_v(f"{pre}.bo", p["bo"])

    def pack_cross(pre, p):
        set_w(f"{pre}.cwq", p["wq"] * scale)
        set_v(f"{pre}.cbq", p["bq"] * scale)
        set_w(f"{pre}.cwkv", jnp.concatenate([p["wk"], p["wv"]], axis=1))
        set_v(f"{pre}.cbkv", jnp.concatenate([p["bk"], p["bv"]]))
        set_w(f"{pre}.cwo", p["wo"])
        set_v(f"{pre}.cbo", p["bo"])

    set_v("enc_emb_b", params["enc_emb_b"])
    set_v("dec_emb_b", params["dec_emb_b"])
    set_v("out_b", params["out_b"])
    set_w("out_w", params["out_w"])

    ffn_w_rows, ffn_b1_rows = [], []

    for l, lp in enumerate(params["enc_layers"]):
        pre = f"enc{l}"
        pack_self(pre, lp["self_attn"])
        set_v(f"{pre}.g1", lp["ln1_g"]); set_v(f"{pre}.be1", lp["ln1_b"])
        set_v(f"{pre}.b2", lp["ffn_b2"])
        set_v(f"{pre}.g2", lp["ln2_g"]); set_v(f"{pre}.be2", lp["ln2_b"])
        ffn_w_rows.append(jnp.concatenate([lp["ffn_w1"], lp["ffn_w2"].T], axis=1))
        ffn_b1_rows.append(lp["ffn_b1"])

    for l, lp in enumerate(params["dec_layers"]):
        pre = f"dec{l}"
        pack_self(pre, lp["self_attn"])
        pack_cross(pre, lp["cross_attn"])
        set_v(f"{pre}.g1", lp["ln1_g"]); set_v(f"{pre}.be1", lp["ln1_b"])
        set_v(f"{pre}.g2", lp["ln2_g"]); set_v(f"{pre}.be2", lp["ln2_b"])
        set_v(f"{pre}.b2", lp["ffn_b2"])
        set_v(f"{pre}.g3", lp["ln3_g"]); set_v(f"{pre}.be3", lp["ln3_b"])
        ffn_w_rows.append(jnp.concatenate([lp["ffn_w1"], lp["ffn_w2"].T], axis=1))
        ffn_b1_rows.append(lp["ffn_b1"])

    emb = jnp.zeros((EMB_ROWS, D), f32)
    emb = emb.at[:INPUT_DIM, :].set(params["enc_emb_w"])
    emb = emb.at[ENC_PAD:ENC_PAD + OUTPUT_DIM, :].set(params["dec_emb_w"])

    return dict(emb=emb.astype(bf16),
                wmat=wmat.astype(bf16),
                vec=vec,
                ffnb1=jnp.stack(ffn_b1_rows),                  # (4, 2048) f32
                ffnw=jnp.stack(ffn_w_rows).astype(bf16))       # (4, 32, 4096) bf16


# ---------------- deterministic parameter init ----------------

def _uniform(key, shape, s):
    return jax.random.uniform(key, shape, jnp.float32, -s, s)


def init_linear_params(key, in_dim, out_dim):
    kw, kb = jax.random.split(key)
    s = 1.0 / math.sqrt(in_dim)
    return _uniform(kw, (in_dim, out_dim), s), _uniform(kb, (out_dim,), s)


def init_mha_params(key, D):
    keys = jax.random.split(key, 4)
    wq, bq = init_linear_params(keys[0], D, D)
    wk, bk = init_linear_params(keys[1], D, D)
    wv, bv = init_linear_params(keys[2], D, D)
    wo, bo = init_linear_params(keys[3], D, D)
    return dict(wq=wq, bq=bq, wk=wk, bk=bk, wv=wv, bv=bv, wo=wo, bo=bo)


def _ln_params(D):
    return jnp.ones((D,), jnp.float32), jnp.zeros((D,), jnp.float32)


def init_encoder_layer_params(key, D):
    k = jax.random.split(key, 3)
    w1, b1 = init_linear_params(k[1], D, DIM_FEEDFORWARD)
    w2, b2 = init_linear_params(k[2], DIM_FEEDFORWARD, D)
    g1, be1 = _ln_params(D)
    g2, be2 = _ln_params(D)
    return dict(self_attn=init_mha_params(k[0], D),
                ffn_w1=w1, ffn_b1=b1, ffn_w2=w2, ffn_b2=b2,
                ln1_g=g1, ln1_b=be1, ln2_g=g2, ln2_b=be2)


def init_decoder_layer_params(key, D):
    k = jax.random.split(key, 4)
    w1, b1 = init_linear_params(k[2], D, DIM_FEEDFORWARD)
    w2, b2 = init_linear_params(k[3], DIM_FEEDFORWARD, D)
    g1, be1 = _ln_params(D)
    g2, be2 = _ln_params(D)
    g3, be3 = _ln_params(D)
    return dict(self_attn=init_mha_params(k[0], D),
                cross_attn=init_mha_params(k[1], D),
                ffn_w1=w1, ffn_b1=b1, ffn_w2=w2, ffn_b2=b2,
                ln1_g=g1, ln1_b=be1, ln2_g=g2, ln2_b=be2, ln3_g=g3, ln3_b=be3)


def init_model_params(key):
    keys = jax.random.split(key, 4 + NUM_ENC_LAYERS + NUM_DEC_LAYERS)
    enc_emb_w, enc_emb_b = init_linear_params(keys[0], INPUT_DIM, MODEL_DIM)
    dec_emb_w, dec_emb_b = init_linear_params(keys[1], OUTPUT_DIM, MODEL_DIM)
    out_w, out_b = init_linear_params(keys[2], MODEL_DIM, OUTPUT_DIM)
    pos_enc = jnp.zeros((1, MAX_POS, MODEL_DIM), jnp.float32)   # torch.zeros(1,1000,D)
    enc_layers = [init_encoder_layer_params(keys[4 + i], MODEL_DIM)
                  for i in range(NUM_ENC_LAYERS)]
    dec_layers = [init_decoder_layer_params(keys[4 + NUM_ENC_LAYERS + i], MODEL_DIM)
                  for i in range(NUM_DEC_LAYERS)]
    return dict(enc_emb_w=enc_emb_w, enc_emb_b=enc_emb_b,
                dec_emb_w=dec_emb_w, dec_emb_b=dec_emb_b,
                out_w=out_w, out_b=out_b, pos_enc=pos_enc,
                enc_layers=enc_layers, dec_layers=dec_layers)


if __name__ == "__main__":
    key = jax.random.PRNGKey(0)
    kp, ksrc, ktgt = jax.random.split(key, 3)
    params = init_model_params(kp)
    packed = prepare_params(params)

    B, S_SRC, S_TGT = 2, 8, 8
    src = jax.random.normal(ksrc, (B, S_SRC, INPUT_DIM), jnp.float32)
    tgt = jax.random.normal(ktgt, (B, S_TGT, OUTPUT_DIM), jnp.float32)

    fwd = jax.jit(transformer_forward)
    out = jax.block_until_ready(fwd(src, tgt, packed, params["pos_enc"]))
    assert out.shape == (B, S_TGT, OUTPUT_DIM)
    assert bool(jnp.all(jnp.isfinite(out)))
    print("KERNEL_OK")
</pallas_src>

<mosaic_0001>
module attributes {stable_mosaic.version = 11 : i64} {
  func.func @_transformer_kernel(%arg0: i32, %arg1: memref<16x16xf32, #tpu.memory_space<vmem>>, %arg2: memref<16x16xf32, #tpu.memory_space<vmem>>, %arg3: memref<16x32xf32, #tpu.memory_space<vmem>>, %arg4: memref<16x32xf32, #tpu.memory_space<vmem>>, %arg5: memref<32x32xbf16, #tpu.memory_space<vmem>>, %arg6: memref<32x1920xbf16, #tpu.memory_space<vmem>>, %arg7: memref<41x128xf32, #tpu.memory_space<vmem>>, %arg8: memref<4x2048xf32, #tpu.memory_space<vmem>>, %arg9: memref<4x32x4096xbf16, #tpu.memory_space<any>>, %arg10: memref<16x128xf32, #tpu.memory_space<vmem>>, %arg11: memref<2x32x4096xbf16, #tpu.memory_space<vmem>>, %arg12: memref<2x!tpu.dma_semaphore, #tpu.memory_space<semaphore_mem>>) attributes {dimension_semantics = [#tpu.dimension_semantics<arbitrary>], iteration_bounds = array<i64: 1>, scalar_prefetch = 0 : i64, scratch_operands = 2 : i64, tpu.core_type = #tpu.core_type<tc>, window_params = [{pipeline_mode = #tpu.pipeline_mode<synchronous>, transform_indices = @transform_0, window_bounds = array<i64: 16, 16>}, {pipeline_mode = #tpu.pipeline_mode<synchronous>, transform_indices = @transform_1, window_bounds = array<i64: 16, 16>}, {pipeline_mode = #tpu.pipeline_mode<synchronous>, transform_indices = @transform_2, window_bounds = array<i64: 16, 32>}, {pipeline_mode = #tpu.pipeline_mode<synchronous>, transform_indices = @transform_3, window_bounds = array<i64: 16, 32>}, {pipeline_mode = #tpu.pipeline_mode<synchronous>, transform_indices = @transform_4, window_bounds = array<i64: 32, 32>}, {pipeline_mode = #tpu.pipeline_mode<synchronous>, transform_indices = @transform_5, window_bounds = array<i64: 32, 1920>}, {pipeline_mode = #tpu.pipeline_mode<synchronous>, transform_indices = @transform_6, window_bounds = array<i64: 41, 128>}, {pipeline_mode = #tpu.pipeline_mode<synchronous>, transform_indices = @transform_7, window_bounds = array<i64: 4, 2048>}, {}, {pipeline_mode = #tpu.pipeline_mode<synchronous>, transform_indices = @transform_9, window_bounds = array<i64: 16, 128>}]} {
    %c0_i32 = arith.constant 0 : i32
    %c0_i32_0 = arith.constant 0 : i32
    %c0_i32_1 = arith.constant 0 : i32
    %c0_i32_2 = arith.constant 0 : i32
    %c0_i32_3 = arith.constant 0 : i32
    %0 = tpu.memref_slice %arg9[%c0_i32, %c0_i32_2, %c0_i32_3] : memref<4x32x4096xbf16, #tpu.memory_space<any>> -> memref<1x32x4096xbf16, #tpu.memory_space<any>>
    %1 = tpu.memref_squeeze %0 : memref<1x32x4096xbf16, #tpu.memory_space<any>> -> memref<32x4096xbf16, #tpu.memory_space<any>>
    %c0_i32_4 = arith.constant 0 : i32
    %c0_i32_5 = arith.constant 0 : i32
    %2 = tpu.memref_slice %arg11[%c0_i32_0, %c0_i32_4, %c0_i32_5] : memref<2x32x4096xbf16, #tpu.memory_space<vmem>> -> memref<1x32x4096xbf16, #tpu.memory_space<vmem>>
    %3 = tpu.memref_squeeze %2 : memref<1x32x4096xbf16, #tpu.memory_space<vmem>> -> memref<32x4096xbf16, #tpu.memory_space<vmem>>
    %4 = tpu.memref_slice %arg12[%c0_i32_1] : memref<2x!tpu.dma_semaphore, #tpu.memory_space<semaphore_mem>> -> memref<1x!tpu.dma_semaphore, #tpu.memory_space<semaphore_mem>>
    %5 = tpu.memref_squeeze %4 : memref<1x!tpu.dma_semaphore, #tpu.memory_space<semaphore_mem>> -> memref<!tpu.dma_semaphore, #tpu.memory_space<semaphore_mem>>
    tpu.enqueue_dma source(%1 : memref<32x4096xbf16, #tpu.memory_space<any>>) target(%3 : memref<32x4096xbf16, #tpu.memory_space<vmem>>) target_semaphore(%5 : memref<!tpu.dma_semaphore, #tpu.memory_space<semaphore_mem>>)
    %c0 = arith.constant 0 : index
    %c0_6 = arith.constant 0 : index
    %6 = vector.load %arg5[%c0, %c0_6] : memref<32x32xbf16, #tpu.memory_space<vmem>>, vector<16x32xbf16>
    %c0_7 = arith.constant 0 : index
    %c0_8 = arith.constant 0 : index
    %7 = vector.load %arg1[%c0_7, %c0_8] : memref<16x16xf32, #tpu.memory_space<vmem>>, vector<16x16xf32>
    %8 = arith.truncf %7 : vector<16x16xf32> to vector<16x16xbf16>
    %cst = arith.constant dense<0.000000e+00> : vector<16x32xf32>
    %9 = tpu.matmul %8, %6, %cst {dimension_numbers = #tpu.dot_dimension_numbers<[1], [0], [0], [1], [0, 0, 1, 1], [], []>} : vector<16x16xbf16>, vector<16x32xbf16>, vector<16x32xf32> -> vector<16x32xf32>
    %c0_9 = arith.constant 0 : index
    %c0_10 = arith.constant 0 : index
    %10 = vector.load %arg7[%c0_9, %c0_10] : memref<41x128xf32, #tpu.memory_space<vmem>>, vector<1x32xf32>
    %11 = vector.broadcast %10 : vector<1x32xf32> to vector<16x32xf32>
    %12 = arith.addf %9, %11 : vector<16x32xf32>
    %c0_11 = arith.constant 0 : index
    %c0_12 = arith.constant 0 : index
    %13 = vector.load %arg3[%c0_11, %c0_12] : memref<16x32xf32, #tpu.memory_space<vmem>>, vector<16x32xf32>
    %14 = arith.addf %12, %13 : vector<16x32xf32>
    %c1_i32 = arith.constant 1 : i32
    %c1_i32_13 = arith.constant 1 : i32
    %c1_i32_14 = arith.constant 1 : i32
    %c0_i32_15 = arith.constant 0 : i32
    %c0_i32_16 = arith.constant 0 : i32
    %15 = tpu.memref_slice %arg9[%c1_i32, %c0_i32_15, %c0_i32_16] : memref<4x32x4096xbf16, #tpu.memory_space<any>> -> memref<1x32x4096xbf16, #tpu.memory_space<any>>
    %16 = tpu.memref_squeeze %15 : memref<1x32x4096xbf16, #tpu.memory_space<any>> -> memref<32x4096xbf16, #tpu.memory_space<any>>
    %c0_i32_17 = arith.constant 0 : i32
    %c0_i32_18 = arith.constant 0 : i32
    %17 = tpu.memref_slice %arg11[%c1_i32_13, %c0_i32_17, %c0_i32_18] : memref<2x32x4096xbf16, #tpu.memory_space<vmem>> -> memref<1x32x4096xbf16, #tpu.memory_space<vmem>>
    %18 = tpu.memref_squeeze %17 : memref<1x32x4096xbf16, #tpu.memory_space<vmem>> -> memref<32x4096xbf16, #tpu.memory_space<vmem>>
    %19 = tpu.memref_slice %arg12[%c1_i32_14] : memref<2x!tpu.dma_semaphore, #tpu.memory_space<semaphore_mem>> -> memref<1x!tpu.dma_semaphore, #tpu.memory_space<semaphore_mem>>
    %20 = tpu.memref_squeeze %19 : memref<1x!tpu.dma_semaphore, #tpu.memory_space<semaphore_mem>> -> memref<!tpu.dma_semaphore, #tpu.memory_space<semaphore_mem>>
    tpu.enqueue_dma source(%16 : memref<32x4096xbf16, #tpu.memory_space<any>>) target(%18 : memref<32x4096xbf16, #tpu.memory_space<vmem>>) target_semaphore(%20 : memref<!tpu.dma_semaphore, #tpu.memory_space<semaphore_mem>>)
    %21 = arith.truncf %14 : vector<16x32xf32> to vector<16x32xbf16>
    %c0_19 = arith.constant 0 : index
    %c0_20 = arith.constant 0 : index
    %22 = vector.load %arg6[%c0_19, %c0_20] : memref<32x1920xbf16, #tpu.memory_space<vmem>>, vector<32x96xbf16>
    %cst_21 = arith.constant dense<0.000000e+00> : vector<16x96xf32>
    %23 = tpu.matmul %21, %22, %cst_21 {dimension_numbers = #tpu.dot_dimension_numbers<[1], [0], [0], [1], [0, 0, 1, 1], [], []>} : vector<16x32xbf16>, vector<32x96xbf16>, vector<16x96xf32> -> vector<16x96xf32>
    %c3 = arith.constant 3 : index
    %c0_22 = arith.constant 0 : index
    %24 = vector.load %arg7[%c3, %c0_22] : memref<41x128xf32, #tpu.memory_space<vmem>>, vector<1x96xf32>
    %25 = vector.broadcast %24 : vector<1x96xf32> to vector<16x96xf32>
    %26 = arith.addf %23, %25 : vector<16x96xf32>
    %27 = vector.extract_strided_slice %26 {offsets = [0, 0], sizes = [16, 32], strides = [1, 1]} : vector<16x96xf32> to vector<16x32xf32>
    %28 = vector.extract_strided_slice %26 {offsets = [0, 32], sizes = [16, 32], strides = [1, 1]} : vector<16x96xf32> to vector<16x32xf32>
    %29 = vector.extract_strided_slice %26 {offsets = [0, 64], sizes = [16, 32], strides = [1, 1]} : vector<16x96xf32> to vector<16x32xf32>
    %30 = vector.shape_cast %27 : vector<16x32xf32> to vector<2x8x32xf32>
    %31 = vector.shape_cast %28 : vector<16x32xf32> to vector<2x8x32xf32>
    %32 = vector.shape_cast %29 : vector<16x32xf32> to vector<2x8x32xf32>
    %33 = vector.extract_strided_slice %30 {offsets = [0, 0, 0], sizes = [2, 8, 8], strides = [1, 1, 1]} : vector<2x8x32xf32> to vector<2x8x8xf32>
    %34 = vector.extract_strided_slice %31 {offsets = [0, 0, 0], sizes = [2, 8, 8], strides = [1, 1, 1]} : vector<2x8x32xf32> to vector<2x8x8xf32>
    "tpu.trace_start"() <{level = 10 : i32, message = "bqd,bkd->bqk"}> : () -> ()
    %cst_23 = arith.constant dense<0.000000e+00> : vector<2x8x8xf32>
    %35 = tpu.matmul %33, %34, %cst_23 {dimension_numbers = #tpu.dot_dimension_numbers<[2], [2], [1], [1], [0, 0, 0, 1, 1, 1], [0], [0]>} : vector<2x8x8xf32>, vector<2x8x8xf32>, vector<2x8x8xf32> -> vector<2x8x8xf32>
    "tpu.trace_stop"() : () -> ()
    %cst_24 = arith.constant dense<0xFF800000> : vector<2x8xf32>
    %36 = vector.multi_reduction <maximumf>, %35, %cst_24 [2] : vector<2x8x8xf32> to vector<2x8xf32>
    %37 = vector.shape_cast %36 : vector<2x8xf32> to vector<2x8x1xf32>
    %38 = vector.broadcast %37 : vector<2x8x1xf32> to vector<2x8x8xf32>
    %39 = arith.subf %35, %38 : vector<2x8x8xf32>
    %40 = math.exp %39 : vector<2x8x8xf32>
    %cst_25 = arith.constant dense<0.000000e+00> : vector<2x8xf32>
    %41 = vector.multi_reduction <add>, %40, %cst_25 [2] : vector<2x8x8xf32> to vector<2x8xf32>
    %42 = vector.shape_cast %41 : vector<2x8xf32> to vector<2x8x1xf32>
    %43 = vector.broadcast %42 : vector<2x8x1xf32> to vector<2x8x8xf32>
    %44 = arith.divf %40, %43 : vector<2x8x8xf32>
    %45 = vector.extract_strided_slice %32 {offsets = [0, 0, 0], sizes = [2, 8, 8], strides = [1, 1, 1]} : vector<2x8x32xf32> to vector<2x8x8xf32>
    "tpu.trace_start"() <{level = 10 : i32, message = "bqk,bkd->bqd"}> : () -> ()
    %cst_26 = arith.constant dense<0.000000e+00> : vector<2x8x8xf32>
    %46 = tpu.matmul %44, %45, %cst_26 {dimension_numbers = #tpu.dot_dimension_numbers<[2], [1], [1], [2], [0, 0, 0, 1, 1, 2], [0], [0]>} : vector<2x8x8xf32>, vector<2x8x8xf32>, vector<2x8x8xf32> -> vector<2x8x8xf32>
    "tpu.trace_stop"() : () -> ()
    %47 = vector.extract_strided_slice %30 {offsets = [0, 0, 8], sizes = [2, 8, 8], strides = [1, 1, 1]} : vector<2x8x32xf32> to vector<2x8x8xf32>
    %48 = vector.extract_strided_slice %31 {offsets = [0, 0, 8], sizes = [2, 8, 8], strides = [1, 1, 1]} : vector<2x8x32xf32> to vector<2x8x8xf32>
    "tpu.trace_start"() <{level = 10 : i32, message = "bqd,bkd->bqk"}> : () -> ()
    %cst_27 = arith.constant dense<0.000000e+00> : vector<2x8x8xf32>
    %49 = tpu.matmul %47, %48, %cst_27 {dimension_numbers = #tpu.dot_dimension_numbers<[2], [2], [1], [1], [0, 0, 0, 1, 1, 1], [0], [0]>} : vector<2x8x8xf32>, vector<2x8x8xf32>, vector<2x8x8xf32> -> vector<2x8x8xf32>
    "tpu.trace_stop"() : () -> ()
    %cst_28 = arith.constant dense<0xFF800000> : vector<2x8xf32>
    %50 = vector.multi_reduction <maximumf>, %49, %cst_28 [2] : vector<2x8x8xf32> to vector<2x8xf32>
    %51 = vector.shape_cast %50 : vector<2x8xf32> to vector<2x8x1xf32>
    %52 = vector.broadcast %51 : vector<2x8x1xf32> to vector<2x8x8xf32>
    %53 = arith.subf %49, %52 : vector<2x8x8xf32>
    %54 = math.exp %53 : vector<2x8x8xf32>
    %cst_29 = arith.constant dense<0.000000e+00> : vector<2x8xf32>
    %55 = vector.multi_reduction <add>, %54, %cst_29 [2] : vector<2x8x8xf32> to vector<2x8xf32>
    %56 = vector.shape_cast %55 : vector<2x8xf32> to vector<2x8x1xf32>
    %57 = vector.broadcast %56 : vector<2x8x1xf32> to vector<2x8x8xf32>
    %58 = arith.divf %54, %57 : vector<2x8x8xf32>
    %59 = vector.extract_strided_slice %32 {offsets = [0, 0, 8], sizes = [2, 8, 8], strides = [1, 1, 1]} : vector<2x8x32xf32> to vector<2x8x8xf32>
    "tpu.trace_start"() <{level = 10 : i32, message = "bqk,bkd->bqd"}> : () -> ()
    %cst_30 = arith.constant dense<0.000000e+00> : vector<2x8x8xf32>
    %60 = tpu.matmul %58, %59, %cst_30 {dimension_numbers = #tpu.dot_dimension_numbers<[2], [1], [1], [2], [0, 0, 0, 1, 1, 2], [0], [0]>} : vector<2x8x8xf32>, vector<2x8x8xf32>, vector<2x8x8xf32> -> vector<2x8x8xf32>
    "tpu.trace_stop"() : () -> ()
    %61 = vector.extract_strided_slice %30 {offsets = [0, 0, 16], sizes = [2, 8, 8], strides = [1, 1, 1]} : vector<2x8x32xf32> to vector<2x8x8xf32>
    %62 = vector.extract_strided_slice %31 {offsets = [0, 0, 16], sizes = [2, 8, 8], strides = [1, 1, 1]} : vector<2x8x32xf32> to vector<2x8x8xf32>
    "tpu.trace_start"() <{level = 10 : i32, message = "bqd,bkd->bqk"}> : () -> ()
    %cst_31 = arith.constant dense<0.000000e+00> : vector<2x8x8xf32>
    %63 = tpu.matmul %61, %62, %cst_31 {dimension_numbers = #tpu.dot_dimension_numbers<[2], [2], [1], [1], [0, 0, 0, 1, 1, 1], [0], [0]>} : vector<2x8x8xf32>, vector<2x8x8xf32>, vector<2x8x8xf32> -> vector<2x8x8xf32>
    "tpu.trace_stop"() : () -> ()
    %cst_32 = arith.constant dense<0xFF800000> : vector<2x8xf32>
    %64 = vector.multi_reduction <maximumf>, %63, %cst_32 [2] : vector<2x8x8xf32> to vector<2x8xf32>
    %65 = vector.shape_cast %64 : vector<2x8xf32> to vector<2x8x1xf32>
    %66 = vector.broadcast %65 : vector<2x8x1xf32> to vector<2x8x8xf32>
    %67 = arith.subf %63, %66 : vector<2x8x8xf32>
    %68 = math.exp %67 : vector<2x8x8xf32>
    %cst_33 = arith.constant dense<0.000000e+00> : vector<2x8xf32>
    %69 = vector.multi_reduction <add>, %68, %cst_33 [2] : vector<2x8x8xf32> to vector<2x8xf32>
    %70 = vector.shape_cast %69 : vector<2x8xf32> to vector<2x8x1xf32>
    %71 = vector.broadcast %70 : vector<2x8x1xf32> to vector<2x8x8xf32>
    %72 = arith.divf %68, %71 : vector<2x8x8xf32>
    %73 = vector.extract_strided_slice %32 {offsets = [0, 0, 16], sizes = [2, 8, 8], strides = [1, 1, 1]} : vector<2x8x32xf32> to vector<2x8x8xf32>
    "tpu.trace_start"() <{level = 10 : i32, message = "bqk,bkd->bqd"}> : () -> ()
    %cst_34 = arith.constant dense<0.000000e+00> : vector<2x8x8xf32>
    %74 = tpu.matmul %72, %73, %cst_34 {dimension_numbers = #tpu.dot_dimension_numbers<[2], [1], [1], [2], [0, 0, 0, 1, 1, 2], [0], [0]>} : vector<2x8x8xf32>, vector<2x8x8xf32>, vector<2x8x8xf32> -> vector<2x8x8xf32>
    "tpu.trace_stop"() : () -> ()
    %75 = vector.extract_strided_slice %30 {offsets = [0, 0, 24], sizes = [2, 8, 8], strides = [1, 1, 1]} : vector<2x8x32xf32> to vector<2x8x8xf32>
    %76 = vector.extract_strided_slice %31 {offsets = [0, 0, 24], sizes = [2, 8, 8], strides = [1, 1, 1]} : vector<2x8x32xf32> to vector<2x8x8xf32>
    "tpu.trace_start"() <{level = 10 : i32, message = "bqd,bkd->bqk"}> : () -> ()
    %cst_35 = arith.constant dense<0.000000e+00> : vector<2x8x8xf32>
    %77 = tpu.matmul %75, %76, %cst_35 {dimension_numbers = #tpu.dot_dimension_numbers<[2], [2], [1], [1], [0, 0, 0, 1, 1, 1], [0], [0]>} : vector<2x8x8xf32>, vector<2x8x8xf32>, vector<2x8x8xf32> -> vector<2x8x8xf32>
    "tpu.trace_stop"() : () -> ()
    %cst_36 = arith.constant dense<0xFF800000> : vector<2x8xf32>
    %78 = vector.multi_reduction <maximumf>, %77, %cst_36 [2] : vector<2x8x8xf32> to vector<2x8xf32>
    %79 = vector.shape_cast %78 : vector<2x8xf32> to vector<2x8x1xf32>
    %80 = vector.broadcast %79 : vector<2x8x1xf32> to vector<2x8x8xf32>
    %81 = arith.subf %77, %80 : vector<2x8x8xf32>
    %82 = math.exp %81 : vector<2x8x8xf32>
    %cst_37 = arith.constant dense<0.000000e+00> : vector<2x8xf32>
    %83 = vector.multi_reduction <add>, %82, %cst_37 [2] : vector<2x8x8xf32> to vector<2x8xf32>
    %84 = vector.shape_cast %83 : vector<2x8xf32> to vector<2x8x1xf32>
    %85 = vector.broadcast %84 : vector<2x8x1xf32> to vector<2x8x8xf32>
    %86 = arith.divf %82, %85 : vector<2x8x8xf32>
    %87 = vector.extract_strided_slice %32 {offsets = [0, 0, 24], sizes = [2, 8, 8], strides = [1, 1, 1]} : vector<2x8x32xf32> to vector<2x8x8xf32>
    "tpu.trace_start"() <{level = 10 : i32, message = "bqk,bkd->bqd"}> : () -> ()
    %cst_38 = arith.constant dense<0.000000e+00> : vector<2x8x8xf32>
    %88 = tpu.matmul %86, %87, %cst_38 {dimension_numbers = #tpu.dot_dimension_numbers<[2], [1], [1], [2], [0, 0, 0, 1, 1, 2], [0], [0]>} : vector<2x8x8xf32>, vector<2x8x8xf32>, vector<2x8x8xf32> -> vector<2x8x8xf32>
    "tpu.trace_stop"() : () -> ()
    %89 = tpu.concatenate %46, %60, %74, %88 in 2 : vector<2x8x8xf32>, vector<2x8x8xf32>, vector<2x8x8xf32>, vector<2x8x8xf32> -> vector<2x8x32xf32>
    %90 = vector.shape_cast %89 : vector<2x8x32xf32> to vector<16x32xf32>
    %91 = arith.truncf %90 : vector<16x32xf32> to vector<16x32xbf16>
    %c0_39 = arith.constant 0 : index
    %c128 = arith.constant 128 : index
    %92 = vector.load %arg6[%c0_39, %c128] : memref<32x1920xbf16, #tpu.memory_space<vmem>>, vector<32x32xbf16>
    %cst_40 = arith.constant dense<0.000000e+00> : vector<16x32xf32>
    %93 = tpu.matmul %91, %92, %cst_40 {dimension_numbers = #tpu.dot_dimension_numbers<[1], [0], [0], [1], [0, 0, 1, 1], [], []>} : vector<16x32xbf16>, vector<32x32xbf16>, vector<16x32xf32> -> vector<16x32xf32>
    %c4 = arith.constant 4 : index
    %c0_41 = arith.constant 0 : index
    %94 = vector.load %arg7[%c4, %c0_41] : memref<41x128xf32, #tpu.memory_space<vmem>>, vector<1x32xf32>
    %95 = vector.broadcast %94 : vector<1x32xf32> to vector<16x32xf32>
    %96 = arith.addf %93, %95 : vector<16x32xf32>
    %97 = arith.addf %14, %96 : vector<16x32xf32>
    %cst_42 = arith.constant dense<0.000000e+00> : vector<16xf32>
    %98 = vector.multi_reduction <add>, %97, %cst_42 [1] : vector<16x32xf32> to vector<16xf32>
    %99 = vector.shape_cast %98 : vector<16xf32> to vector<16x1xf32>
    %cst_43 = arith.constant 3.200000e+01 : f32
    %100 = vector.broadcast %cst_43 : f32 to vector<16x1xf32>
    %101 = arith.divf %99, %100 : vector<16x1xf32>
    %102 = vector.broadcast %101 : vector<16x1xf32> to vector<16x32xf32>
    %103 = arith.subf %97, %102 : vector<16x32xf32>
    %104 = arith.mulf %103, %103 : vector<16x32xf32>
    %cst_44 = arith.constant dense<0.000000e+00> : vector<16xf32>
    %105 = vector.multi_reduction <add>, %104, %cst_44 [1] : vector<16x32xf32> to vector<16xf32>
    %106 = vector.shape_cast %105 : vector<16xf32> to vector<16x1xf32>
    %cst_45 = arith.constant 3.200000e+01 : f32
    %107 = vector.broadcast %cst_45 : f32 to vector<16x1xf32>
    %108 = arith.divf %106, %107 : vector<16x1xf32>
    %cst_46 = arith.constant 9.99999974E-6 : f32
    %109 = vector.broadcast %cst_46 : f32 to vector<16x1xf32>
    %110 = arith.addf %108, %109 : vector<16x1xf32>
    %111 = math.rsqrt %110 : vector<16x1xf32>
    %112 = vector.broadcast %111 : vector<16x1xf32> to vector<16x32xf32>
    %113 = arith.mulf %103, %112 : vector<16x32xf32>
    %c5 = arith.constant 5 : index
    %c0_47 = arith.constant 0 : index
    %114 = vector.load %arg7[%c5, %c0_47] : memref<41x128xf32, #tpu.memory_space<vmem>>, vector<1x32xf32>
    %115 = vector.broadcast %114 : vector<1x32xf32> to vector<16x32xf32>
    %116 = arith.mulf %113, %115 : vector<16x32xf32>
    %c6 = arith.constant 6 : index
    %c0_48 = arith.constant 0 : index
    %117 = vector.load %arg7[%c6, %c0_48] : memref<41x128xf32, #tpu.memory_space<vmem>>, vector<1x32xf32>
    %118 = vector.broadcast %117 : vector<1x32xf32> to vector<16x32xf32>
    %119 = arith.addf %116, %118 : vector<16x32xf32>
    %c0_i32_49 = arith.constant 0 : i32
    %c0_i32_50 = arith.constant 0 : i32
    %c0_i32_51 = arith.constant 0 : i32
    %c0_i32_52 = arith.constant 0 : i32
    %c0_i32_53 = arith.constant 0 : i32
    %120 = tpu.memref_slice %arg9[%c0_i32_49, %c0_i32_52, %c0_i32_53] : memref<4x32x4096xbf16, #tpu.memory_space<any>> -> memref<1x32x4096xbf16, #tpu.memory_space<any>>
    %121 = tpu.memref_squeeze %120 : memref<1x32x4096xbf16, #tpu.memory_space<any>> -> memref<32x4096xbf16, #tpu.memory_space<any>>
    %c0_i32_54 = arith.constant 0 : i32
    %c0_i32_55 = arith.constant 0 : i32
    %122 = tpu.memref_slice %arg11[%c0_i32_50, %c0_i32_54, %c0_i32_55] : memref<2x32x4096xbf16, #tpu.memory_space<vmem>> -> memref<1x32x4096xbf16, #tpu.memory_space<vmem>>
    %123 = tpu.memref_squeeze %122 : memref<1x32x4096xbf16, #tpu.memory_space<vmem>> -> memref<32x4096xbf16, #tpu.memory_space<vmem>>
    %124 = tpu.memref_slice %arg12[%c0_i32_51] : memref<2x!tpu.dma_semaphore, #tpu.memory_space<semaphore_mem>> -> memref<1x!tpu.dma_semaphore, #tpu.memory_space<semaphore_mem>>
    %125 = tpu.memref_squeeze %124 : memref<1x!tpu.dma_semaphore, #tpu.memory_space<semaphore_mem>> -> memref<!tpu.dma_semaphore, #tpu.memory_space<semaphore_mem>>
    tpu.wait_dma2 semaphore(%125 : memref<!tpu.dma_semaphore, #tpu.memory_space<semaphore_mem>>) src(%121 : memref<32x4096xbf16, #tpu.memory_space<any>>) dst(%123 : memref<32x4096xbf16, #tpu.memory_space<vmem>>)
    %c0_56 = arith.constant 0 : index
    %c0_57 = arith.constant 0 : index
    %c0_58 = arith.constant 0 : index
    %126 = vector.load %arg11[%c0_56, %c0_57, %c0_58] : memref<2x32x4096xbf16, #tpu.memory_space<vmem>>, vector<1x32x2048xbf16>
    %127 = vector.shape_cast %126 : vector<1x32x2048xbf16> to vector<32x2048xbf16>
    %c0_59 = arith.constant 0 : index
    %c0_60 = arith.constant 0 : index
    %c2048 = arith.constant 2048 : index
    %128 = vector.load %arg11[%c0_59, %c0_60, %c2048] : memref<2x32x4096xbf16, #tpu.memory_space<vmem>>, vector<1x32x2048xbf16>
    %129 = vector.shape_cast %128 : vector<1x32x2048xbf16> to vector<32x2048xbf16>
    %130 = arith.truncf %119 : vector<16x32xf32> to vector<16x32xbf16>
    %cst_61 = arith.constant dense<0.000000e+00> : vector<16x2048xf32>
    %131 = tpu.matmul %130, %127, %cst_61 {dimension_numbers = #tpu.dot_dimension_numbers<[1], [0], [0], [1], [0, 0, 1, 1], [], []>} : vector<16x32xbf16>, vector<32x2048xbf16>, vector<16x2048xf32> -> vector<16x2048xf32>
    %c0_62 = arith.constant 0 : index
    %c0_63 = arith.constant 0 : index
    %132 = vector.load %arg8[%c0_62, %c0_63] : memref<4x2048xf32, #tpu.memory_space<vmem>>, vector<1x2048xf32>
    %133 = vector.broadcast %132 : vector<1x2048xf32> to vector<16x2048xf32>
    %134 = arith.addf %131, %133 : vector<16x2048xf32>
    %cst_64 = arith.constant 0.000000e+00 : f32
    %135 = vector.broadcast %cst_64 : f32 to vector<16x2048xf32>
    %136 = arith.maximumf %134, %135 : vector<16x2048xf32>
    %137 = arith.truncf %136 : vector<16x2048xf32> to vector<16x2048xbf16>
    %cst_65 = arith.constant dense<0.000000e+00> : vector<16x32xf32>
    %138 = tpu.matmul %137, %129, %cst_65 {dimension_numbers = #tpu.dot_dimension_numbers<[1], [1], [0], [0], [0, 0, 1, 0], [], []>} : vector<16x2048xbf16>, vector<32x2048xbf16>, vector<16x32xf32> -> vector<16x32xf32>
    %c7 = arith.constant 7 : index
    %c0_66 = arith.constant 0 : index
    %139 = vector.load %arg7[%c7, %c0_66] : memref<41x128xf32, #tpu.memory_space<vmem>>, vector<1x32xf32>
    %140 = vector.broadcast %139 : vector<1x32xf32> to vector<16x32xf32>
    %141 = arith.addf %138, %140 : vector<16x32xf32>
    %142 = arith.addf %119, %141 : vector<16x32xf32>
    %cst_67 = arith.constant dense<0.000000e+00> : vector<16xf32>
    %143 = vector.multi_reduction <add>, %142, %cst_67 [1] : vector<16x32xf32> to vector<16xf32>
    %144 = vector.shape_cast %143 : vector<16xf32> to vector<16x1xf32>
    %cst_68 = arith.constant 3.200000e+01 : f32
    %145 = vector.broadcast %cst_68 : f32 to vector<16x1xf32>
    %146 = arith.divf %144, %145 : vector<16x1xf32>
    %147 = vector.broadcast %146 : vector<16x1xf32> to vector<16x32xf32>
    %148 = arith.subf %142, %147 : vector<16x32xf32>
    %149 = arith.mulf %148, %148 : vector<16x32xf32>
    %cst_69 = arith.constant dense<0.000000e+00> : vector<16xf32>
    %150 = vector.multi_reduction <add>, %149, %cst_69 [1] : vector<16x32xf32> to vector<16xf32>
    %151 = vector.shape_cast %150 : vector<16xf32> to vector<16x1xf32>
    %cst_70 = arith.constant 3.200000e+01 : f32
    %152 = vector.broadcast %cst_70 : f32 to vector<16x1xf32>
    %153 = arith.divf %151, %152 : vector<16x1xf32>
    %cst_71 = arith.constant 9.99999974E-6 : f32
    %154 = vector.broadcast %cst_71 : f32 to vector<16x1xf32>
    %155 = arith.addf %153, %154 : vector<16x1xf32>
    %156 = math.rsqrt %155 : vector<16x1xf32>
    %157 = vector.broadcast %156 : vector<16x1xf32> to vector<16x32xf32>
    %158 = arith.mulf %148, %157 : vector<16x32xf32>
    %c8 = arith.constant 8 : index
    %c0_72 = arith.constant 0 : index
    %159 = vector.load %arg7[%c8, %c0_72] : memref<41x128xf32, #tpu.memory_space<vmem>>, vector<1x32xf32>
    %160 = vector.broadcast %159 : vector<1x32xf32> to vector<16x32xf32>
    %161 = arith.mulf %158, %160 : vector<16x32xf32>
    %c9 = arith.constant 9 : index
    %c0_73 = arith.constant 0 : index
    %162 = vector.load %arg7[%c9, %c0_73] : memref<41x128xf32, #tpu.memory_space<vmem>>, vector<1x32xf32>
    %163 = vector.broadcast %162 : vector<1x32xf32> to vector<16x32xf32>
    %164 = arith.addf %161, %163 : vector<16x32xf32>
    %c2_i32 = arith.constant 2 : i32
    %c0_i32_74 = arith.constant 0 : i32
    %c0_i32_75 = arith.constant 0 : i32
    %c0_i32_76 = arith.constant 0 : i32
    %c0_i32_77 = arith.constant 0 : i32
    %165 = tpu.memref_slice %arg9[%c2_i32, %c0_i32_76, %c0_i32_77] : memref<4x32x4096xbf16, #tpu.memory_space<any>> -> memref<1x32x4096xbf16, #tpu.memory_space<any>>
    %166 = tpu.memref_squeeze %165 : memref<1x32x4096xbf16, #tpu.memory_space<any>> -> memref<32x4096xbf16, #tpu.memory_space<any>>
    %c0_i32_78 = arith.constant 0 : i32
    %c0_i32_79 = arith.constant 0 : i32
    %167 = tpu.memref_slice %arg11[%c0_i32_74, %c0_i32_78, %c0_i32_79] : memref<2x32x4096xbf16, #tpu.memory_space<vmem>> -> memref<1x32x4096xbf16, #tpu.memory_space<vmem>>
    %168 = tpu.memref_squeeze %167 : memref<1x32x4096xbf16, #tpu.memory_space<vmem>> -> memref<32x4096xbf16, #tpu.memory_space<vmem>>
    %169 = tpu.memref_slice %arg12[%c0_i32_75] : memref<2x!tpu.dma_semaphore, #tpu.memory_space<semaphore_mem>> -> memref<1x!tpu.dma_semaphore, #tpu.memory_space<semaphore_mem>>
    %170 = tpu.memref_squeeze %169 : memref<1x!tpu.dma_semaphore, #tpu.memory_space<semaphore_mem>> -> memref<!tpu.dma_semaphore, #tpu.memory_space<semaphore_mem>>
    tpu.enqueue_dma source(%166 : memref<32x4096xbf16, #tpu.memory_space<any>>) target(%168 : memref<32x4096xbf16, #tpu.memory_space<vmem>>) target_semaphore(%170 : memref<!tpu.dma_semaphore, #tpu.memory_space<semaphore_mem>>)
    %171 = arith.truncf %164 : vector<16x32xf32> to vector<16x32xbf16>
    %c0_80 = arith.constant 0 : index
    %c256 = arith.constant 256 : index
    %172 = vector.load %arg6[%c0_80, %c256] : memref<32x1920xbf16, #tpu.memory_space<vmem>>, vector<32x96xbf16>
    %cst_81 = arith.constant dense<0.000000e+00> : vector<16x96xf32>
    %173 = tpu.matmul %171, %172, %cst_81 {dimension_numbers = #tpu.dot_dimension_numbers<[1], [0], [0], [1], [0, 0, 1, 1], [], []>} : vector<16x32xbf16>, vector<32x96xbf16>, vector<16x96xf32> -> vector<16x96xf32>
    %c10 = arith.constant 10 : index
    %c0_82 = arith.constant 0 : index
    %174 = vector.load %arg7[%c10, %c0_82] : memref<41x128xf32, #tpu.memory_space<vmem>>, vector<1x96xf32>
    %175 = vector.broadcast %174 : vector<1x96xf32> to vector<16x96xf32>
    %176 = arith.addf %173, %175 : vector<16x96xf32>
    %177 = vector.extract_strided_slice %176 {offsets = [0, 0], sizes = [16, 32], strides = [1, 1]} : vector<16x96xf32> to vector<16x32xf32>
    %178 = vector.extract_strided_slice %176 {offsets = [0, 32], sizes = [16, 32], strides = [1, 1]} : vector<16x96xf32> to vector<16x32xf32>
    %179 = vector.extract_strided_slice %176 {offsets = [0, 64], sizes = [16, 32], strides = [1, 1]} : vector<16x96xf32> to vector<16x32xf32>
    %180 = vector.shape_cast %177 : vector<16x32xf32> to vector<2x8x32xf32>
    %181 = vector.shape_cast %178 : vector<16x32xf32> to vector<2x8x32xf32>
    %182 = vector.shape_cast %179 : vector<16x32xf32> to vector<2x8x32xf32>
    %183 = vector.extract_strided_slice %180 {offsets = [0, 0, 0], sizes = [2, 8, 8], strides = [1, 1, 1]} : vector<2x8x32xf32> to vector<2x8x8xf32>
    %184 = vector.extract_strided_slice %181 {offsets = [0, 0, 0], sizes = [2, 8, 8], strides = [1, 1, 1]} : vector<2x8x32xf32> to vector<2x8x8xf32>
    "tpu.trace_start"() <{level = 10 : i32, message = "bqd,bkd->bqk"}> : () -> ()
    %cst_83 = arith.constant dense<0.000000e+00> : vector<2x8x8xf32>
    %185 = tpu.matmul %183, %184, %cst_83 {dimension_numbers = #tpu.dot_dimension_numbers<[2], [2], [1], [1], [0, 0, 0, 1, 1, 1], [0], [0]>} : vector<2x8x8xf32>, vector<2x8x8xf32>, vector<2x8x8xf32> -> vector<2x8x8xf32>
    "tpu.trace_stop"() : () -> ()
    %cst_84 = arith.constant dense<0xFF800000> : vector<2x8xf32>
    %186 = vector.multi_reduction <maximumf>, %185, %cst_84 [2] : vector<2x8x8xf32> to vector<2x8xf32>
    %187 = vector.shape_cast %186 : vector<2x8xf32> to vector<2x8x1xf32>
    %188 = vector.broadcast %187 : vector<2x8x1xf32> to vector<2x8x8xf32>
    %189 = arith.subf %185, %188 : vector<2x8x8xf32>
    %190 = math.exp %189 : vector<2x8x8xf32>
    %cst_85 = arith.constant dense<0.000000e+00> : vector<2x8xf32>
    %191 = vector.multi_reduction <add>, %190, %cst_85 [2] : vector<2x8x8xf32> to vector<2x8xf32>
    %192 = vector.shape_cast %191 : vector<2x8xf32> to vector<2x8x1xf32>
    %193 = vector.broadcast %192 : vector<2x8x1xf32> to vector<2x8x8xf32>
    %194 = arith.divf %190, %193 : vector<2x8x8xf32>
    %195 = vector.extract_strided_slice %182 {offsets = [0, 0, 0], sizes = [2, 8, 8], strides = [1, 1, 1]} : vector<2x8x32xf32> to vector<2x8x8xf32>
    "tpu.trace_start"() <{level = 10 : i32, message = "bqk,bkd->bqd"}> : () -> ()
    %cst_86 = arith.constant dense<0.000000e+00> : vector<2x8x8xf32>
    %196 = tpu.matmul %194, %195, %cst_86 {dimension_numbers = #tpu.dot_dimension_numbers<[2], [1], [1], [2], [0, 0, 0, 1, 1, 2], [0], [0]>} : vector<2x8x8xf32>, vector<2x8x8xf32>, vector<2x8x8xf32> -> vector<2x8x8xf32>
    "tpu.trace_stop"() : () -> ()
    %197 = vector.extract_strided_slice %180 {offsets = [0, 0, 8], sizes = [2, 8, 8], strides = [1, 1, 1]} : vector<2x8x32xf32> to vector<2x8x8xf32>
    %198 = vector.extract_strided_slice %181 {offsets = [0, 0, 8], sizes = [2, 8, 8], strides = [1, 1, 1]} : vector<2x8x32xf32> to vector<2x8x8xf32>
    "tpu.trace_start"() <{level = 10 : i32, message = "bqd,bkd->bqk"}> : () -> ()
    %cst_87 = arith.constant dense<0.000000e+00> : vector<2x8x8xf32>
    %199 = tpu.matmul %197, %198, %cst_87 {dimension_numbers = #tpu.dot_dimension_numbers<[2], [2], [1], [1], [0, 0, 0, 1, 1, 1], [0], [0]>} : vector<2x8x8xf32>, vector<2x8x8xf32>, vector<2x8x8xf32> -> vector<2x8x8xf32>
    "tpu.trace_stop"() : () -> ()
    %cst_88 = arith.constant dense<0xFF800000> : vector<2x8xf32>
    %200 = vector.multi_reduction <maximumf>, %199, %cst_88 [2] : vector<2x8x8xf32> to vector<2x8xf32>
    %201 = vector.shape_cast %200 : vector<2x8xf32> to vector<2x8x1xf32>
    %202 = vector.broadcast %201 : vector<2x8x1xf32> to vector<2x8x8xf32>
    %203 = arith.subf %199, %202 : vector<2x8x8xf32>
    %204 = math.exp %203 : vector<2x8x8xf32>
    %cst_89 = arith.constant dense<0.000000e+00> : vector<2x8xf32>
    %205 = vector.multi_reduction <add>, %204, %cst_89 [2] : vector<2x8x8xf32> to vector<2x8xf32>
    %206 = vector.shape_cast %205 : vector<2x8xf32> to vector<2x8x1xf32>
    %207 = vector.broadcast %206 : vector<2x8x1xf32> to vector<2x8x8xf32>
    %208 = arith.divf %204, %207 : vector<2x8x8xf32>
    %209 = vector.extract_strided_slice %182 {offsets = [0, 0, 8], sizes = [2, 8, 8], strides = [1, 1, 1]} : vector<2x8x32xf32> to vector<2x8x8xf32>
    "tpu.trace_start"() <{level = 10 : i32, message = "bqk,bkd->bqd"}> : () -> ()
    %cst_90 = arith.constant dense<0.000000e+00> : vector<2x8x8xf32>
    %210 = tpu.matmul %208, %209, %cst_90 {dimension_numbers = #tpu.dot_dimension_numbers<[2], [1], [1], [2], [0, 0, 0, 1, 1, 2], [0], [0]>} : vector<2x8x8xf32>, vector<2x8x8xf32>, vector<2x8x8xf32> -> vector<2x8x8xf32>
    "tpu.trace_stop"() : () -> ()
    %211 = vector.extract_strided_slice %180 {offsets = [0, 0, 16], sizes = [2, 8, 8], strides = [1, 1, 1]} : vector<2x8x32xf32> to vector<2x8x8xf32>
    %212 = vector.extract_strided_slice %181 {offsets = [0, 0, 16], sizes = [2, 8, 8], strides = [1, 1, 1]} : vector<2x8x32xf32> to vector<2x8x8xf32>
    "tpu.trace_start"() <{level = 10 : i32, message = "bqd,bkd->bqk"}> : () -> ()
    %cst_91 = arith.constant dense<0.000000e+00> : vector<2x8x8xf32>
    %213 = tpu.matmul %211, %212, %cst_91 {dimension_numbers = #tpu.dot_dimension_numbers<[2], [2], [1], [1], [0, 0, 0, 1, 1, 1], [0], [0]>} : vector<2x8x8xf32>, vector<2x8x8xf32>, vector<2x8x8xf32> -> vector<2x8x8xf32>
    "tpu.trace_stop"() : () -> ()
    %cst_92 = arith.constant dense<0xFF800000> : vector<2x8xf32>
    %214 = vector.multi_reduction <maximumf>, %213, %cst_92 [2] : vector<2x8x8xf32> to vector<2x8xf32>
    %215 = vector.shape_cast %214 : vector<2x8xf32> to vector<2x8x1xf32>
    %216 = vector.broadcast %215 : vector<2x8x1xf32> to vector<2x8x8xf32>
    %217 = arith.subf %213, %216 : vector<2x8x8xf32>
    %218 = math.exp %217 : vector<2x8x8xf32>
    %cst_93 = arith.constant dense<0.000000e+00> : vector<2x8xf32>
    %219 = vector.multi_reduction <add>, %218, %cst_93 [2] : vector<2x8x8xf32> to vector<2x8xf32>
    %220 = vector.shape_cast %219 : vector<2x8xf32> to vector<2x8x1xf32>
    %221 = vector.broadcast %220 : vector<2x8x1xf32> to vector<2x8x8xf32>
    %222 = arith.divf %218, %221 : vector<2x8x8xf32>
    %223 = vector.extract_strided_slice %182 {offsets = [0, 0, 16], sizes = [2, 8, 8], strides = [1, 1, 1]} : vector<2x8x32xf32> to vector<2x8x8xf32>
    "tpu.trace_start"() <{level = 10 : i32, message = "bqk,bkd->bqd"}> : () -> ()
    %cst_94 = arith.constant dense<0.000000e+00> : vector<2x8x8xf32>
    %224 = tpu.matmul %222, %223, %cst_94 {dimension_numbers = #tpu.dot_dimension_numbers<[2], [1], [1], [2], [0, 0, 0, 1, 1, 2], [0], [0]>} : vector<2x8x8xf32>, vector<2x8x8xf32>, vector<2x8x8xf32> -> vector<2x8x8xf32>
    "tpu.trace_stop"() : () -> ()
    %225 = vector.extract_strided_slice %180 {offsets = [0, 0, 24], sizes = [2, 8, 8], strides = [1, 1, 1]} : vector<2x8x32xf32> to vector<2x8x8xf32>
    %226 = vector.extract_strided_slice %181 {offsets = [0, 0, 24], sizes = [2, 8, 8], strides = [1, 1, 1]} : vector<2x8x32xf32> to vector<2x8x8xf32>
    "tpu.trace_start"() <{level = 10 : i32, message = "bqd,bkd->bqk"}> : () -> ()
    %cst_95 = arith.constant dense<0.000000e+00> : vector<2x8x8xf32>
    %227 = tpu.matmul %225, %226, %cst_95 {dimension_numbers = #tpu.dot_dimension_numbers<[2], [2], [1], [1], [0, 0, 0, 1, 1, 1], [0], [0]>} : vector<2x8x8xf32>, vector<2x8x8xf32>, vector<2x8x8xf32> -> vector<2x8x8xf32>
    "tpu.trace_stop"() : () -> ()
    %cst_96 = arith.constant dense<0xFF800000> : vector<2x8xf32>
    %228 = vector.multi_reduction <maximumf>, %227, %cst_96 [2] : vector<2x8x8xf32> to vector<2x8xf32>
    %229 = vector.shape_cast %228 : vector<2x8xf32> to vector<2x8x1xf32>
    %230 = vector.broadcast %229 : vector<2x8x1xf32> to vector<2x8x8xf32>
    %231 = arith.subf %227, %230 : vector<2x8x8xf32>
    %232 = math.exp %231 : vector<2x8x8xf32>
    %cst_97 = arith.constant dense<0.000000e+00> : vector<2x8xf32>
    %233 = vector.multi_reduction <add>, %232, %cst_97 [2] : vector<2x8x8xf32> to vector<2x8xf32>
    %234 = vector.shape_cast %233 : vector<2x8xf32> to vector<2x8x1xf32>
    %235 = vector.broadcast %234 : vector<2x8x1xf32> to vector<2x8x8xf32>
    %236 = arith.divf %232, %235 : vector<2x8x8xf32>
    %237 = vector.extract_strided_slice %182 {offsets = [0, 0, 24], sizes = [2, 8, 8], strides = [1, 1, 1]} : vector<2x8x32xf32> to vector<2x8x8xf32>
    "tpu.trace_start"() <{level = 10 : i32, message = "bqk,bkd->bqd"}> : () -> ()
    %cst_98 = arith.constant dense<0.000000e+00> : vector<2x8x8xf32>
    %238 = tpu.matmul %236, %237, %cst_98 {dimension_numbers = #tpu.dot_dimension_numbers<[2], [1], [1], [2], [0, 0, 0, 1, 1, 2], [0], [0]>} : vector<2x8x8xf32>, vector<2x8x8xf32>, vector<2x8x8xf32> -> vector<2x8x8xf32>
    "tpu.trace_stop"() : () -> ()
    %239 = tpu.concatenate %196, %210, %224, %238 in 2 : vector<2x8x8xf32>, vector<2x8x8xf32>, vector<2x8x8xf32>, vector<2x8x8xf32> -> vector<2x8x32xf32>
    %240 = vector.shape_cast %239 : vector<2x8x32xf32> to vector<16x32xf32>
    %241 = arith.truncf %240 : vector<16x32xf32> to vector<16x32xbf16>
    %c0_99 = arith.constant 0 : index
    %c384 = arith.constant 384 : index
    %242 = vector.load %arg6[%c0_99, %c384] : memref<32x1920xbf16, #tpu.memory_space<vmem>>, vector<32x32xbf16>
    %cst_100 = arith.constant dense<0.000000e+00> : vector<16x32xf32>
    %243 = tpu.matmul %241, %242, %cst_100 {dimension_numbers = #tpu.dot_dimension_numbers<[1], [0], [0], [1], [0, 0, 1, 1], [], []>} : vector<16x32xbf16>, vector<32x32xbf16>, vector<16x32xf32> -> vector<16x32xf32>
    %c11 = arith.constant 11 : index
    %c0_101 = arith.constant 0 : index
    %244 = vector.load %arg7[%c11, %c0_101] : memref<41x128xf32, #tpu.memory_space<vmem>>, vector<1x32xf32>
    %245 = vector.broadcast %244 : vector<1x32xf32> to vector<16x32xf32>
    %246 = arith.addf %243, %245 : vector<16x32xf32>
    %247 = arith.addf %164, %246 : vector<16x32xf32>
    %cst_102 = arith.constant dense<0.000000e+00> : vector<16xf32>
    %248 = vector.multi_reduction <add>, %247, %cst_102 [1] : vector<16x32xf32> to vector<16xf32>
    %249 = vector.shape_cast %248 : vector<16xf32> to vector<16x1xf32>
    %cst_103 = arith.constant 3.200000e+01 : f32
    %250 = vector.broadcast %cst_103 : f32 to vector<16x1xf32>
    %251 = arith.divf %249, %250 : vector<16x1xf32>
    %252 = vector.broadcast %251 : vector<16x1xf32> to vector<16x32xf32>
    %253 = arith.subf %247, %252 : vector<16x32xf32>
    %254 = arith.mulf %253, %253 : vector<16x32xf32>
    %cst_104 = arith.constant dense<0.000000e+00> : vector<16xf32>
    %255 = vector.multi_reduction <add>, %254, %cst_104 [1] : vector<16x32xf32> to vector<16xf32>
    %256 = vector.shape_cast %255 : vector<16xf32> to vector<16x1xf32>
    %cst_105 = arith.constant 3.200000e+01 : f32
    %257 = vector.broadcast %cst_105 : f32 to vector<16x1xf32>
    %258 = arith.divf %256, %257 : vector<16x1xf32>
    %cst_106 = arith.constant 9.99999974E-6 : f32
    %259 = vector.broadcast %cst_106 : f32 to vector<16x1xf32>
    %260 = arith.addf %258, %259 : vector<16x1xf32>
    %261 = math.rsqrt %260 : vector<16x1xf32>
    %262 = vector.broadcast %261 : vector<16x1xf32> to vector<16x32xf32>
    %263 = arith.mulf %253, %262 : vector<16x32xf32>
    %c12 = arith.constant 12 : index
    %c0_107 = arith.constant 0 : index
    %264 = vector.load %arg7[%c12, %c0_107] : memref<41x128xf32, #tpu.memory_space<vmem>>, vector<1x32xf32>
    %265 = vector.broadcast %264 : vector<1x32xf32> to vector<16x32xf32>
    %266 = arith.mulf %263, %265 : vector<16x32xf32>
    %c13 = arith.constant 13 : index
    %c0_108 = arith.constant 0 : index
    %267 = vector.load %arg7[%c13, %c0_108] : memref<41x128xf32, #tpu.memory_space<vmem>>, vector<1x32xf32>
    %268 = vector.broadcast %267 : vector<1x32xf32> to vector<16x32xf32>
    %269 = arith.addf %266, %268 : vector<16x32xf32>
    %c1_i32_109 = arith.constant 1 : i32
    %c1_i32_110 = arith.constant 1 : i32
    %c1_i32_111 = arith.constant 1 : i32
    %c0_i32_112 = arith.constant 0 : i32
    %c0_i32_113 = arith.constant 0 : i32
    %270 = tpu.memref_slice %arg9[%c1_i32_109, %c0_i32_112, %c0_i32_113] : memref<4x32x4096xbf16, #tpu.memory_space<any>> -> memref<1x32x4096xbf16, #tpu.memory_space<any>>
    %271 = tpu.memref_squeeze %270 : memref<1x32x4096xbf16, #tpu.memory_space<any>> -> memref<32x4096xbf16, #tpu.memory_space<any>>
    %c0_i32_114 = arith.constant 0 : i32
    %c0_i32_115 = arith.constant 0 : i32
    %272 = tpu.memref_slice %arg11[%c1_i32_110, %c0_i32_114, %c0_i32_115] : memref<2x32x4096xbf16, #tpu.memory_space<vmem>> -> memref<1x32x4096xbf16, #tpu.memory_space<vmem>>
    %273 = tpu.memref_squeeze %272 : memref<1x32x4096xbf16, #tpu.memory_space<vmem>> -> memref<32x4096xbf16, #tpu.memory_space<vmem>>
    %274 = tpu.memref_slice %arg12[%c1_i32_111] : memref<2x!tpu.dma_semaphore, #tpu.memory_space<semaphore_mem>> -> memref<1x!tpu.dma_semaphore, #tpu.memory_space<semaphore_mem>>
    %275 = tpu.memref_squeeze %274 : memref<1x!tpu.dma_semaphore, #tpu.memory_space<semaphore_mem>> -> memref<!tpu.dma_semaphore, #tpu.memory_space<semaphore_mem>>
    tpu.wait_dma2 semaphore(%275 : memref<!tpu.dma_semaphore, #tpu.memory_space<semaphore_mem>>) src(%271 : memref<32x4096xbf16, #tpu.memory_space<any>>) dst(%273 : memref<32x4096xbf16, #tpu.memory_space<vmem>>)
    %c1 = arith.constant 1 : index
    %c0_116 = arith.constant 0 : index
    %c0_117 = arith.constant 0 : index
    %276 = vector.load %arg11[%c1, %c0_116, %c0_117] : memref<2x32x4096xbf16, #tpu.memory_space<vmem>>, vector<1x32x2048xbf16>
    %277 = vector.shape_cast %276 : vector<1x32x2048xbf16> to vector<32x2048xbf16>
    %c1_118 = arith.constant 1 : index
    %c0_119 = arith.constant 0 : index
    %c2048_120 = arith.constant 2048 : index
    %278 = vector.load %arg11[%c1_118, %c0_119, %c2048_120] : memref<2x32x4096xbf16, #tpu.memory_space<vmem>>, vector<1x32x2048xbf16>
    %279 = vector.shape_cast %278 : vector<1x32x2048xbf16> to vector<32x2048xbf16>
    %280 = arith.truncf %269 : vector<16x32xf32> to vector<16x32xbf16>
    %cst_121 = arith.constant dense<0.000000e+00> : vector<16x2048xf32>
    %281 = tpu.matmul %280, %277, %cst_121 {dimension_numbers = #tpu.dot_dimension_numbers<[1], [0], [0], [1], [0, 0, 1, 1], [], []>} : vector<16x32xbf16>, vector<32x2048xbf16>, vector<16x2048xf32> -> vector<16x2048xf32>
    %c1_122 = arith.constant 1 : index
    %c0_123 = arith.constant 0 : index
    %282 = vector.load %arg8[%c1_122, %c0_123] : memref<4x2048xf32, #tpu.memory_space<vmem>>, vector<1x2048xf32>
    %283 = vector.broadcast %282 : vector<1x2048xf32> to vector<16x2048xf32>
    %284 = arith.addf %281, %283 : vector<16x2048xf32>
    %cst_124 = arith.constant 0.000000e+00 : f32
    %285 = vector.broadcast %cst_124 : f32 to vector<16x2048xf32>
    %286 = arith.maximumf %284, %285 : vector<16x2048xf32>
    %287 = arith.truncf %286 : vector<16x2048xf32> to vector<16x2048xbf16>
    %cst_125 = arith.constant dense<0.000000e+00> : vector<16x32xf32>
    %288 = tpu.matmul %287, %279, %cst_125 {dimension_numbers = #tpu.dot_dimension_numbers<[1], [1], [0], [0], [0, 0, 1, 0], [], []>} : vector<16x2048xbf16>, vector<32x2048xbf16>, vector<16x32xf32> -> vector<16x32xf32>
    %c14 = arith.constant 14 : index
    %c0_126 = arith.constant 0 : index
    %289 = vector.load %arg7[%c14, %c0_126] : memref<41x128xf32, #tpu.memory_space<vmem>>, vector<1x32xf32>
    %290 = vector.broadcast %289 : vector<1x32xf32> to vector<16x32xf32>
    %291 = arith.addf %288, %290 : vector<16x32xf32>
    %292 = arith.addf %269, %291 : vector<16x32xf32>
    %cst_127 = arith.constant dense<0.000000e+00> : vector<16xf32>
    %293 = vector.multi_reduction <add>, %292, %cst_127 [1] : vector<16x32xf32> to vector<16xf32>
    %294 = vector.shape_cast %293 : vector<16xf32> to vector<16x1xf32>
    %cst_128 = arith.constant 3.200000e+01 : f32
    %295 = vector.broadcast %cst_128 : f32 to vector<16x1xf32>
    %296 = arith.divf %294, %295 : vector<16x1xf32>
    %297 = vector.broadcast %296 : vector<16x1xf32> to vector<16x32xf32>
    %298 = arith.subf %292, %297 : vector<16x32xf32>
    %299 = arith.mulf %298, %298 : vector<16x32xf32>
    %cst_129 = arith.constant dense<0.000000e+00> : vector<16xf32>
    %300 = vector.multi_reduction <add>, %299, %cst_129 [1] : vector<16x32xf32> to vector<16xf32>
    %301 = vector.shape_cast %300 : vector<16xf32> to vector<16x1xf32>
    %cst_130 = arith.constant 3.200000e+01 : f32
    %302 = vector.broadcast %cst_130 : f32 to vector<16x1xf32>
    %303 = arith.divf %301, %302 : vector<16x1xf32>
    %cst_131 = arith.constant 9.99999974E-6 : f32
    %304 = vector.broadcast %cst_131 : f32 to vector<16x1xf32>
    %305 = arith.addf %303, %304 : vector<16x1xf32>
    %306 = math.rsqrt %305 : vector<16x1xf32>
    %307 = vector.broadcast %306 : vector<16x1xf32> to vector<16x32xf32>
    %308 = arith.mulf %298, %307 : vector<16x32xf32>
    %c15 = arith.constant 15 : index
    %c0_132 = arith.constant 0 : index
    %309 = vector.load %arg7[%c15, %c0_132] : memref<41x128xf32, #tpu.memory_space<vmem>>, vector<1x32xf32>
    %310 = vector.broadcast %309 : vector<1x32xf32> to vector<16x32xf32>
    %311 = arith.mulf %308, %310 : vector<16x32xf32>
    %c16 = arith.constant 16 : index
    %c0_133 = arith.constant 0 : index
    %312 = vector.load %arg7[%c16, %c0_133] : memref<41x128xf32, #tpu.memory_space<vmem>>, vector<1x32xf32>
    %313 = vector.broadcast %312 : vector<1x32xf32> to vector<16x32xf32>
    %314 = arith.addf %311, %313 : vector<16x32xf32>
    %315 = arith.truncf %314 : vector<16x32xf32> to vector<16x32xbf16>
    %c16_134 = arith.constant 16 : index
    %c0_135 = arith.constant 0 : index
    %316 = vector.load %arg5[%c16_134, %c0_135] : memref<32x32xbf16, #tpu.memory_space<vmem>>, vector<16x32xbf16>
    %c0_136 = arith.constant 0 : index
    %c0_137 = arith.constant 0 : index
    %317 = vector.load %arg2[%c0_136, %c0_137] : memref<16x16xf32, #tpu.memory_space<vmem>>, vector<16x16xf32>
    %318 = arith.truncf %317 : vector<16x16xf32> to vector<16x16xbf16>
    %cst_138 = arith.constant dense<0.000000e+00> : vector<16x32xf32>
    %319 = tpu.matmul %318, %316, %cst_138 {dimension_numbers = #tpu.dot_dimension_numbers<[1], [0], [0], [1], [0, 0, 1, 1], [], []>} : vector<16x16xbf16>, vector<16x32xbf16>, vector<16x32xf32> -> vector<16x32xf32>
    %c1_139 = arith.constant 1 : index
    %c0_140 = arith.constant 0 : index
    %320 = vector.load %arg7[%c1_139, %c0_140] : memref<41x128xf32, #tpu.memory_space<vmem>>, vector<1x32xf32>
    %321 = vector.broadcast %320 : vector<1x32xf32> to vector<16x32xf32>
    %322 = arith.addf %319, %321 : vector<16x32xf32>
    %c0_141 = arith.constant 0 : index
    %c0_142 = arith.constant 0 : index
    %323 = vector.load %arg4[%c0_141, %c0_142] : memref<16x32xf32, #tpu.memory_space<vmem>>, vector<16x32xf32>
    %324 = arith.addf %322, %323 : vector<16x32xf32>
    %c3_i32 = arith.constant 3 : i32
    %c1_i32_143 = arith.constant 1 : i32
    %c1_i32_144 = arith.constant 1 : i32
    %c0_i32_145 = arith.constant 0 : i32
    %c0_i32_146 = arith.constant 0 : i32
    %325 = tpu.memref_slice %arg9[%c3_i32, %c0_i32_145, %c0_i32_146] : memref<4x32x4096xbf16, #tpu.memory_space<any>> -> memref<1x32x4096xbf16, #tpu.memory_space<any>>
    %326 = tpu.memref_squeeze %325 : memref<1x32x4096xbf16, #tpu.memory_space<any>> -> memref<32x4096xbf16, #tpu.memory_space<any>>
    %c0_i32_147 = arith.constant 0 : i32
    %c0_i32_148 = arith.constant 0 : i32
    %327 = tpu.memref_slice %arg11[%c1_i32_143, %c0_i32_147, %c0_i32_148] : memref<2x32x4096xbf16, #tpu.memory_space<vmem>> -> memref<1x32x4096xbf16, #tpu.memory_space<vmem>>
    %328 = tpu.memref_squeeze %327 : memref<1x32x4096xbf16, #tpu.memory_space<vmem>> -> memref<32x4096xbf16, #tpu.memory_space<vmem>>
    %329 = tpu.memref_slice %arg12[%c1_i32_144] : memref<2x!tpu.dma_semaphore, #tpu.memory_space<semaphore_mem>> -> memref<1x!tpu.dma_semaphore, #tpu.memory_space<semaphore_mem>>
    %330 = tpu.memref_squeeze %329 : memref<1x!tpu.dma_semaphore, #tpu.memory_space<semaphore_mem>> -> memref<!tpu.dma_semaphore, #tpu.memory_space<semaphore_mem>>
    tpu.enqueue_dma source(%326 : memref<32x4096xbf16, #tpu.memory_space<any>>) target(%328 : memref<32x4096xbf16, #tpu.memory_space<vmem>>) target_semaphore(%330 : memref<!tpu.dma_semaphore, #tpu.memory_space<semaphore_mem>>)
    %331 = arith.truncf %324 : vector<16x32xf32> to vector<16x32xbf16>
    %c0_149 = arith.constant 0 : index
    %c512 = arith.constant 512 : index
    %332 = vector.load %arg6[%c0_149, %c512] : memref<32x1920xbf16, #tpu.memory_space<vmem>>, vector<32x96xbf16>
    %cst_150 = arith.constant dense<0.000000e+00> : vector<16x96xf32>
    %333 = tpu.matmul %331, %332, %cst_150 {dimension_numbers = #tpu.dot_dimension_numbers<[1], [0], [0], [1], [0, 0, 1, 1], [], []>} : vector<16x32xbf16>, vector<32x96xbf16>, vector<16x96xf32> -> vector<16x96xf32>
    %c17 = arith.constant 17 : index
    %c0_151 = arith.constant 0 : index
    %334 = vector.load %arg7[%c17, %c0_151] : memref<41x128xf32, #tpu.memory_space<vmem>>, vector<1x96xf32>
    %335 = vector.broadcast %334 : vector<1x96xf32> to vector<16x96xf32>
    %336 = arith.addf %333, %335 : vector<16x96xf32>
    %337 = vector.extract_strided_slice %336 {offsets = [0, 0], sizes = [16, 32], strides = [1, 1]} : vector<16x96xf32> to vector<16x32xf32>
    %338 = vector.extract_strided_slice %336 {offsets = [0, 32], sizes = [16, 32], strides = [1, 1]} : vector<16x96xf32> to vector<16x32xf32>
    %339 = vector.extract_strided_slice %336 {offsets = [0, 64], sizes = [16, 32], strides = [1, 1]} : vector<16x96xf32> to vector<16x32xf32>
    %340 = vector.shape_cast %337 : vector<16x32xf32> to vector<2x8x32xf32>
    %341 = vector.shape_cast %338 : vector<16x32xf32> to vector<2x8x32xf32>
    %342 = vector.shape_cast %339 : vector<16x32xf32> to vector<2x8x32xf32>
    %343 = vector.extract_strided_slice %340 {offsets = [0, 0, 0], sizes = [2, 8, 8], strides = [1, 1, 1]} : vector<2x8x32xf32> to vector<2x8x8xf32>
    %344 = vector.extract_strided_slice %341 {offsets = [0, 0, 0], sizes = [2, 8, 8], strides = [1, 1, 1]} : vector<2x8x32xf32> to vector<2x8x8xf32>
    "tpu.trace_start"() <{level = 10 : i32, message = "bqd,bkd->bqk"}> : () -> ()
    %cst_152 = arith.constant dense<0.000000e+00> : vector<2x8x8xf32>
    %345 = tpu.matmul %343, %344, %cst_152 {dimension_numbers = #tpu.dot_dimension_numbers<[2], [2], [1], [1], [0, 0, 0, 1, 1, 1], [0], [0]>} : vector<2x8x8xf32>, vector<2x8x8xf32>, vector<2x8x8xf32> -> vector<2x8x8xf32>
    "tpu.trace_stop"() : () -> ()
    %cst_153 = arith.constant dense<0xFF800000> : vector<2x8xf32>
    %346 = vector.multi_reduction <maximumf>, %345, %cst_153 [2] : vector<2x8x8xf32> to vector<2x8xf32>
    %347 = vector.shape_cast %346 : vector<2x8xf32> to vector<2x8x1xf32>
    %348 = vector.broadcast %347 : vector<2x8x1xf32> to vector<2x8x8xf32>
    %349 = arith.subf %345, %348 : vector<2x8x8xf32>
    %350 = math.exp %349 : vector<2x8x8xf32>
    %cst_154 = arith.constant dense<0.000000e+00> : vector<2x8xf32>
    %351 = vector.multi_reduction <add>, %350, %cst_154 [2] : vector<2x8x8xf32> to vector<2x8xf32>
    %352 = vector.shape_cast %351 : vector<2x8xf32> to vector<2x8x1xf32>
    %353 = vector.broadcast %352 : vector<2x8x1xf32> to vector<2x8x8xf32>
    %354 = arith.divf %350, %353 : vector<2x8x8xf32>
    %355 = vector.extract_strided_slice %342 {offsets = [0, 0, 0], sizes = [2, 8, 8], strides = [1, 1, 1]} : vector<2x8x32xf32> to vector<2x8x8xf32>
    "tpu.trace_start"() <{level = 10 : i32, message = "bqk,bkd->bqd"}> : () -> ()
    %cst_155 = arith.constant dense<0.000000e+00> : vector<2x8x8xf32>
    %356 = tpu.matmul %354, %355, %cst_155 {dimension_numbers = #tpu.dot_dimension_numbers<[2], [1], [1], [2], [0, 0, 0, 1, 1, 2], [0], [0]>} : vector<2x8x8xf32>, vector<2x8x8xf32>, vector<2x8x8xf32> -> vector<2x8x8xf32>
    "tpu.trace_stop"() : () -> ()
    %357 = vector.extract_strided_slice %340 {offsets = [0, 0, 8], sizes = [2, 8, 8], strides = [1, 1, 1]} : vector<2x8x32xf32> to vector<2x8x8xf32>
    %358 = vector.extract_strided_slice %341 {offsets = [0, 0, 8], sizes = [2, 8, 8], strides = [1, 1, 1]} : vector<2x8x32xf32> to vector<2x8x8xf32>
    "tpu.trace_start"() <{level = 10 : i32, message = "bqd,bkd->bqk"}> : () -> ()
    %cst_156 = arith.constant dense<0.000000e+00> : vector<2x8x8xf32>
    %359 = tpu.matmul %357, %358, %cst_156 {dimension_numbers = #tpu.dot_dimension_numbers<[2], [2], [1], [1], [0, 0, 0, 1, 1, 1], [0], [0]>} : vector<2x8x8xf32>, vector<2x8x8xf32>, vector<2x8x8xf32> -> vector<2x8x8xf32>
    "tpu.trace_stop"() : () -> ()
    %cst_157 = arith.constant dense<0xFF800000> : vector<2x8xf32>
    %360 = vector.multi_reduction <maximumf>, %359, %cst_157 [2] : vector<2x8x8xf32> to vector<2x8xf32>
    %361 = vector.shape_cast %360 : vector<2x8xf32> to vector<2x8x1xf32>
    %362 = vector.broadcast %361 : vector<2x8x1xf32> to vector<2x8x8xf32>
    %363 = arith.subf %359, %362 : vector<2x8x8xf32>
    %364 = math.exp %363 : vector<2x8x8xf32>
    %cst_158 = arith.constant dense<0.000000e+00> : vector<2x8xf32>
    %365 = vector.multi_reduction <add>, %364, %cst_158 [2] : vector<2x8x8xf32> to vector<2x8xf32>
    %366 = vector.shape_cast %365 : vector<2x8xf32> to vector<2x8x1xf32>
    %367 = vector.broadcast %366 : vector<2x8x1xf32> to vector<2x8x8xf32>
    %368 = arith.divf %364, %367 : vector<2x8x8xf32>
    %369 = vector.extract_strided_slice %342 {offsets = [0, 0, 8], sizes = [2, 8, 8], strides = [1, 1, 1]} : vector<2x8x32xf32> to vector<2x8x8xf32>
    "tpu.trace_start"() <{level = 10 : i32, message = "bqk,bkd->bqd"}> : () -> ()
    %cst_159 = arith.constant dense<0.000000e+00> : vector<2x8x8xf32>
    %370 = tpu.matmul %368, %369, %cst_159 {dimension_numbers = #tpu.dot_dimension_numbers<[2], [1], [1], [2], [0, 0, 0, 1, 1, 2], [0], [0]>} : vector<2x8x8xf32>, vector<2x8x8xf32>, vector<2x8x8xf32> -> vector<2x8x8xf32>
    "tpu.trace_stop"() : () -> ()
    %371 = vector.extract_strided_slice %340 {offsets = [0, 0, 16], sizes = [2, 8, 8], strides = [1, 1, 1]} : vector<2x8x32xf32> to vector<2x8x8xf32>
    %372 = vector.extract_strided_slice %341 {offsets = [0, 0, 16], sizes = [2, 8, 8], strides = [1, 1, 1]} : vector<2x8x32xf32> to vector<2x8x8xf32>
    "tpu.trace_start"() <{level = 10 : i32, message = "bqd,bkd->bqk"}> : () -> ()
    %cst_160 = arith.constant dense<0.000000e+00> : vector<2x8x8xf32>
    %373 = tpu.matmul %371, %372, %cst_160 {dimension_numbers = #tpu.dot_dimension_numbers<[2], [2], [1], [1], [0, 0, 0, 1, 1, 1], [0], [0]>} : vector<2x8x8xf32>, vector<2x8x8xf32>, vector<2x8x8xf32> -> vector<2x8x8xf32>
    "tpu.trace_stop"() : () -> ()
    %cst_161 = arith.constant dense<0xFF800000> : vector<2x8xf32>
    %374 = vector.multi_reduction <maximumf>, %373, %cst_161 [2] : vector<2x8x8xf32> to vector<2x8xf32>
    %375 = vector.shape_cast %374 : vector<2x8xf32> to vector<2x8x1xf32>
    %376 = vector.broadcast %375 : vector<2x8x1xf32> to vector<2x8x8xf32>
    %377 = arith.subf %373, %376 : vector<2x8x8xf32>
    %378 = math.exp %377 : vector<2x8x8xf32>
    %cst_162 = arith.constant dense<0.000000e+00> : vector<2x8xf32>
    %379 = vector.multi_reduction <add>, %378, %cst_162 [2] : vector<2x8x8xf32> to vector<2x8xf32>
    %380 = vector.shape_cast %379 : vector<2x8xf32> to vector<2x8x1xf32>
    %381 = vector.broadcast %380 : vector<2x8x1xf32> to vector<2x8x8xf32>
    %382 = arith.divf %378, %381 : vector<2x8x8xf32>
    %383 = vector.extract_strided_slice %342 {offsets = [0, 0, 16], sizes = [2, 8, 8], strides = [1, 1, 1]} : vector<2x8x32xf32> to vector<2x8x8xf32>
    "tpu.trace_start"() <{level = 10 : i32, message = "bqk,bkd->bqd"}> : () -> ()
    %cst_163 = arith.constant dense<0.000000e+00> : vector<2x8x8xf32>
    %384 = tpu.matmul %382, %383, %cst_163 {dimension_numbers = #tpu.dot_dimension_numbers<[2], [1], [1], [2], [0, 0, 0, 1, 1, 2], [0], [0]>} : vector<2x8x8xf32>, vector<2x8x8xf32>, vector<2x8x8xf32> -> vector<2x8x8xf32>
    "tpu.trace_stop"() : () -> ()
    %385 = vector.extract_strided_slice %340 {offsets = [0, 0, 24], sizes = [2, 8, 8], strides = [1, 1, 1]} : vector<2x8x32xf32> to vector<2x8x8xf32>
    %386 = vector.extract_strided_slice %341 {offsets = [0, 0, 24], sizes = [2, 8, 8], strides = [1, 1, 1]} : vector<2x8x32xf32> to vector<2x8x8xf32>
    "tpu.trace_start"() <{level = 10 : i32, message = "bqd,bkd->bqk"}> : () -> ()
    %cst_164 = arith.constant dense<0.000000e+00> : vector<2x8x8xf32>
    %387 = tpu.matmul %385, %386, %cst_164 {dimension_numbers = #tpu.dot_dimension_numbers<[2], [2], [1], [1], [0, 0, 0, 1, 1, 1], [0], [0]>} : vector<2x8x8xf32>, vector<2x8x8xf32>, vector<2x8x8xf32> -> vector<2x8x8xf32>
    "tpu.trace_stop"() : () -> ()
    %cst_165 = arith.constant dense<0xFF800000> : vector<2x8xf32>
    %388 = vector.multi_reduction <maximumf>, %387, %cst_165 [2] : vector<2x8x8xf32> to vector<2x8xf32>
    %389 = vector.shape_cast %388 : vector<2x8xf32> to vector<2x8x1xf32>
    %390 = vector.broadcast %389 : vector<2x8x1xf32> to vector<2x8x8xf32>
    %391 = arith.subf %387, %390 : vector<2x8x8xf32>
    %392 = math.exp %391 : vector<2x8x8xf32>
    %cst_166 = arith.constant dense<0.000000e+00> : vector<2x8xf32>
    %393 = vector.multi_reduction <add>, %392, %cst_166 [2] : vector<2x8x8xf32> to vector<2x8xf32>
    %394 = vector.shape_cast %393 : vector<2x8xf32> to vector<2x8x1xf32>
    %395 = vector.broadcast %394 : vector<2x8x1xf32> to vector<2x8x8xf32>
    %396 = arith.divf %392, %395 : vector<2x8x8xf32>
    %397 = vector.extract_strided_slice %342 {offsets = [0, 0, 24], sizes = [2, 8, 8], strides = [1, 1, 1]} : vector<2x8x32xf32> to vector<2x8x8xf32>
    "tpu.trace_start"() <{level = 10 : i32, message = "bqk,bkd->bqd"}> : () -> ()
    %cst_167 = arith.constant dense<0.000000e+00> : vector<2x8x8xf32>
    %398 = tpu.matmul %396, %397, %cst_167 {dimension_numbers = #tpu.dot_dimension_numbers<[2], [1], [1], [2], [0, 0, 0, 1, 1, 2], [0], [0]>} : vector<2x8x8xf32>, vector<2x8x8xf32>, vector<2x8x8xf32> -> vector<2x8x8xf32>
    "tpu.trace_stop"() : () -> ()
    %399 = tpu.concatenate %356, %370, %384, %398 in 2 : vector<2x8x8xf32>, vector<2x8x8xf32>, vector<2x8x8xf32>, vector<2x8x8xf32> -> vector<2x8x32xf32>
    %400 = vector.shape_cast %399 : vector<2x8x32xf32> to vector<16x32xf32>
    %401 = arith.truncf %400 : vector<16x32xf32> to vector<16x32xbf16>
    %c0_168 = arith.constant 0 : index
    %c640 = arith.constant 640 : index
    %402 = vector.load %arg6[%c0_168, %c640] : memref<32x1920xbf16, #tpu.memory_space<vmem>>, vector<32x32xbf16>
    %cst_169 = arith.constant dense<0.000000e+00> : vector<16x32xf32>
    %403 = tpu.matmul %401, %402, %cst_169 {dimension_numbers = #tpu.dot_dimension_numbers<[1], [0], [0], [1], [0, 0, 1, 1], [], []>} : vector<16x32xbf16>, vector<32x32xbf16>, vector<16x32xf32> -> vector<16x32xf32>
    %c18 = arith.constant 18 : index
    %c0_170 = arith.constant 0 : index
    %404 = vector.load %arg7[%c18, %c0_170] : memref<41x128xf32, #tpu.memory_space<vmem>>, vector<1x32xf32>
    %405 = vector.broadcast %404 : vector<1x32xf32> to vector<16x32xf32>
    %406 = arith.addf %403, %405 : vector<16x32xf32>
    %407 = arith.addf %324, %406 : vector<16x32xf32>
    %cst_171 = arith.constant dense<0.000000e+00> : vector<16xf32>
    %408 = vector.multi_reduction <add>, %407, %cst_171 [1] : vector<16x32xf32> to vector<16xf32>
    %409 = vector.shape_cast %408 : vector<16xf32> to vector<16x1xf32>
    %cst_172 = arith.constant 3.200000e+01 : f32
    %410 = vector.broadcast %cst_172 : f32 to vector<16x1xf32>
    %411 = arith.divf %409, %410 : vector<16x1xf32>
    %412 = vector.broadcast %411 : vector<16x1xf32> to vector<16x32xf32>
    %413 = arith.subf %407, %412 : vector<16x32xf32>
    %414 = arith.mulf %413, %413 : vector<16x32xf32>
    %cst_173 = arith.constant dense<0.000000e+00> : vector<16xf32>
    %415 = vector.multi_reduction <add>, %414, %cst_173 [1] : vector<16x32xf32> to vector<16xf32>
    %416 = vector.shape_cast %415 : vector<16xf32> to vector<16x1xf32>
    %cst_174 = arith.constant 3.200000e+01 : f32
    %417 = vector.broadcast %cst_174 : f32 to vector<16x1xf32>
    %418 = arith.divf %416, %417 : vector<16x1xf32>
    %cst_175 = arith.constant 9.99999974E-6 : f32
    %419 = vector.broadcast %cst_175 : f32 to vector<16x1xf32>
    %420 = arith.addf %418, %419 : vector<16x1xf32>
    %421 = math.rsqrt %420 : vector<16x1xf32>
    %422 = vector.broadcast %421 : vector<16x1xf32> to vector<16x32xf32>
    %423 = arith.mulf %413, %422 : vector<16x32xf32>
    %c19 = arith.constant 19 : index
    %c0_176 = arith.constant 0 : index
    %424 = vector.load %arg7[%c19, %c0_176] : memref<41x128xf32, #tpu.memory_space<vmem>>, vector<1x32xf32>
    %425 = vector.broadcast %424 : vector<1x32xf32> to vector<16x32xf32>
    %426 = arith.mulf %423, %425 : vector<16x32xf32>
    %c20 = arith.constant 20 : index
    %c0_177 = arith.constant 0 : index
    %427 = vector.load %arg7[%c20, %c0_177] : memref<41x128xf32, #tpu.memory_space<vmem>>, vector<1x32xf32>
    %428 = vector.broadcast %427 : vector<1x32xf32> to vector<16x32xf32>
    %429 = arith.addf %426, %428 : vector<16x32xf32>
    %430 = arith.truncf %429 : vector<16x32xf32> to vector<16x32xbf16>
    %c0_178 = arith.constant 0 : index
    %c768 = arith.constant 768 : index
    %431 = vector.load %arg6[%c0_178, %c768] : memref<32x1920xbf16, #tpu.memory_space<vmem>>, vector<32x32xbf16>
    %cst_179 = arith.constant dense<0.000000e+00> : vector<16x32xf32>
    %432 = tpu.matmul %430, %431, %cst_179 {dimension_numbers = #tpu.dot_dimension_numbers<[1], [0], [0], [1], [0, 0, 1, 1], [], []>} : vector<16x32xbf16>, vector<32x32xbf16>, vector<16x32xf32> -> vector<16x32xf32>
    %c21 = arith.constant 21 : index
    %c0_180 = arith.constant 0 : index
    %433 = vector.load %arg7[%c21, %c0_180] : memref<41x128xf32, #tpu.memory_space<vmem>>, vector<1x32xf32>
    %434 = vector.broadcast %433 : vector<1x32xf32> to vector<16x32xf32>
    %435 = arith.addf %432, %434 : vector<16x32xf32>
    %c0_181 = arith.constant 0 : index
    %c896 = arith.constant 896 : index
    %436 = vector.load %arg6[%c0_181, %c896] : memref<32x1920xbf16, #tpu.memory_space<vmem>>, vector<32x64xbf16>
    %cst_182 = arith.constant dense<0.000000e+00> : vector<16x64xf32>
    %437 = tpu.matmul %315, %436, %cst_182 {dimension_numbers = #tpu.dot_dimension_numbers<[1], [0], [0], [1], [0, 0, 1, 1], [], []>} : vector<16x32xbf16>, vector<32x64xbf16>, vector<16x64xf32> -> vector<16x64xf32>
    %c22 = arith.constant 22 : index
    %c0_183 = arith.constant 0 : index
    %438 = vector.load %arg7[%c22, %c0_183] : memref<41x128xf32, #tpu.memory_space<vmem>>, vector<1x64xf32>
    %439 = vector.broadcast %438 : vector<1x64xf32> to vector<16x64xf32>
    %440 = arith.addf %437, %439 : vector<16x64xf32>
    %441 = vector.extract_strided_slice %440 {offsets = [0, 0], sizes = [16, 32], strides = [1, 1]} : vector<16x64xf32> to vector<16x32xf32>
    %442 = vector.extract_strided_slice %440 {offsets = [0, 32], sizes = [16, 32], strides = [1, 1]} : vector<16x64xf32> to vector<16x32xf32>
    %443 = vector.shape_cast %435 : vector<16x32xf32> to vector<2x8x32xf32>
    %444 = vector.shape_cast %441 : vector<16x32xf32> to vector<2x8x32xf32>
    %445 = vector.shape_cast %442 : vector<16x32xf32> to vector<2x8x32xf32>
    %446 = vector.extract_strided_slice %443 {offsets = [0, 0, 0], sizes = [2, 8, 8], strides = [1, 1, 1]} : vector<2x8x32xf32> to vector<2x8x8xf32>
    %447 = vector.extract_strided_slice %444 {offsets = [0, 0, 0], sizes = [2, 8, 8], strides = [1, 1, 1]} : vector<2x8x32xf32> to vector<2x8x8xf32>
    "tpu.trace_start"() <{level = 10 : i32, message = "bqd,bkd->bqk"}> : () -> ()
    %cst_184 = arith.constant dense<0.000000e+00> : vector<2x8x8xf32>
    %448 = tpu.matmul %446, %447, %cst_184 {dimension_numbers = #tpu.dot_dimension_numbers<[2], [2], [1], [1], [0, 0, 0, 1, 1, 1], [0], [0]>} : vector<2x8x8xf32>, vector<2x8x8xf32>, vector<2x8x8xf32> -> vector<2x8x8xf32>
    "tpu.trace_stop"() : () -> ()
    %cst_185 = arith.constant dense<0xFF800000> : vector<2x8xf32>
    %449 = vector.multi_reduction <maximumf>, %448, %cst_185 [2] : vector<2x8x8xf32> to vector<2x8xf32>
    %450 = vector.shape_cast %449 : vector<2x8xf32> to vector<2x8x1xf32>
    %451 = vector.broadcast %450 : vector<2x8x1xf32> to vector<2x8x8xf32>
    %452 = arith.subf %448, %451 : vector<2x8x8xf32>
    %453 = math.exp %452 : vector<2x8x8xf32>
    %cst_186 = arith.constant dense<0.000000e+00> : vector<2x8xf32>
    %454 = vector.multi_reduction <add>, %453, %cst_186 [2] : vector<2x8x8xf32> to vector<2x8xf32>
    %455 = vector.shape_cast %454 : vector<2x8xf32> to vector<2x8x1xf32>
    %456 = vector.broadcast %455 : vector<2x8x1xf32> to vector<2x8x8xf32>
    %457 = arith.divf %453, %456 : vector<2x8x8xf32>
    %458 = vector.extract_strided_slice %445 {offsets = [0, 0, 0], sizes = [2, 8, 8], strides = [1, 1, 1]} : vector<2x8x32xf32> to vector<2x8x8xf32>
    "tpu.trace_start"() <{level = 10 : i32, message = "bqk,bkd->bqd"}> : () -> ()
    %cst_187 = arith.constant dense<0.000000e+00> : vector<2x8x8xf32>
    %459 = tpu.matmul %457, %458, %cst_187 {dimension_numbers = #tpu.dot_dimension_numbers<[2], [1], [1], [2], [0, 0, 0, 1, 1, 2], [0], [0]>} : vector<2x8x8xf32>, vector<2x8x8xf32>, vector<2x8x8xf32> -> vector<2x8x8xf32>
    "tpu.trace_stop"() : () -> ()
    %460 = vector.extract_strided_slice %443 {offsets = [0, 0, 8], sizes = [2, 8, 8], strides = [1, 1, 1]} : vector<2x8x32xf32> to vector<2x8x8xf32>
    %461 = vector.extract_strided_slice %444 {offsets = [0, 0, 8], sizes = [2, 8, 8], strides = [1, 1, 1]} : vector<2x8x32xf32> to vector<2x8x8xf32>
    "tpu.trace_start"() <{level = 10 : i32, message = "bqd,bkd->bqk"}> : () -> ()
    %cst_188 = arith.constant dense<0.000000e+00> : vector<2x8x8xf32>
    %462 = tpu.matmul %460, %461, %cst_188 {dimension_numbers = #tpu.dot_dimension_numbers<[2], [2], [1], [1], [0, 0, 0, 1, 1, 1], [0], [0]>} : vector<2x8x8xf32>, vector<2x8x8xf32>, vector<2x8x8xf32> -> vector<2x8x8xf32>
    "tpu.trace_stop"() : () -> ()
    %cst_189 = arith.constant dense<0xFF800000> : vector<2x8xf32>
    %463 = vector.multi_reduction <maximumf>, %462, %cst_189 [2] : vector<2x8x8xf32> to vector<2x8xf32>
    %464 = vector.shape_cast %463 : vector<2x8xf32> to vector<2x8x1xf32>
    %465 = vector.broadcast %464 : vector<2x8x1xf32> to vector<2x8x8xf32>
    %466 = arith.subf %462, %465 : vector<2x8x8xf32>
    %467 = math.exp %466 : vector<2x8x8xf32>
    %cst_190 = arith.constant dense<0.000000e+00> : vector<2x8xf32>
    %468 = vector.multi_reduction <add>, %467, %cst_190 [2] : vector<2x8x8xf32> to vector<2x8xf32>
    %469 = vector.shape_cast %468 : vector<2x8xf32> to vector<2x8x1xf32>
    %470 = vector.broadcast %469 : vector<2x8x1xf32> to vector<2x8x8xf32>
    %471 = arith.divf %467, %470 : vector<2x8x8xf32>
    %472 = vector.extract_strided_slice %445 {offsets = [0, 0, 8], sizes = [2, 8, 8], strides = [1, 1, 1]} : vector<2x8x32xf32> to vector<2x8x8xf32>
    "tpu.trace_start"() <{level = 10 : i32, message = "bqk,bkd->bqd"}> : () -> ()
    %cst_191 = arith.constant dense<0.000000e+00> : vector<2x8x8xf32>
    %473 = tpu.matmul %471, %472, %cst_191 {dimension_numbers = #tpu.dot_dimension_numbers<[2], [1], [1], [2], [0, 0, 0, 1, 1, 2], [0], [0]>} : vector<2x8x8xf32>, vector<2x8x8xf32>, vector<2x8x8xf32> -> vector<2x8x8xf32>
    "tpu.trace_stop"() : () -> ()
    %474 = vector.extract_strided_slice %443 {offsets = [0, 0, 16], sizes = [2, 8, 8], strides = [1, 1, 1]} : vector<2x8x32xf32> to vector<2x8x8xf32>
    %475 = vector.extract_strided_slice %444 {offsets = [0, 0, 16], sizes = [2, 8, 8], strides = [1, 1, 1]} : vector<2x8x32xf32> to vector<2x8x8xf32>
    "tpu.trace_start"() <{level = 10 : i32, message = "bqd,bkd->bqk"}> : () -> ()
    %cst_192 = arith.constant dense<0.000000e+00> : vector<2x8x8xf32>
    %476 = tpu.matmul %474, %475, %cst_192 {dimension_numbers = #tpu.dot_dimension_numbers<[2], [2], [1], [1], [0, 0, 0, 1, 1, 1], [0], [0]>} : vector<2x8x8xf32>, vector<2x8x8xf32>, vector<2x8x8xf32> -> vector<2x8x8xf32>
    "tpu.trace_stop"() : () -> ()
    %cst_193 = arith.constant dense<0xFF800000> : vector<2x8xf32>
    %477 = vector.multi_reduction <maximumf>, %476, %cst_193 [2] : vector<2x8x8xf32> to vector<2x8xf32>
    %478 = vector.shape_cast %477 : vector<2x8xf32> to vector<2x8x1xf32>
    %479 = vector.broadcast %478 : vector<2x8x1xf32> to vector<2x8x8xf32>
    %480 = arith.subf %476, %479 : vector<2x8x8xf32>
    %481 = math.exp %480 : vector<2x8x8xf32>
    %cst_194 = arith.constant dense<0.000000e+00> : vector<2x8xf32>
    %482 = vector.multi_reduction <add>, %481, %cst_194 [2] : vector<2x8x8xf32> to vector<2x8xf32>
    %483 = vector.shape_cast %482 : vector<2x8xf32> to vector<2x8x1xf32>
    %484 = vector.broadcast %483 : vector<2x8x1xf32> to vector<2x8x8xf32>
    %485 = arith.divf %481, %484 : vector<2x8x8xf32>
    %486 = vector.extract_strided_slice %445 {offsets = [0, 0, 16], sizes = [2, 8, 8], strides = [1, 1, 1]} : vector<2x8x32xf32> to vector<2x8x8xf32>
    "tpu.trace_start"() <{level = 10 : i32, message = "bqk,bkd->bqd"}> : () -> ()
    %cst_195 = arith.constant dense<0.000000e+00> : vector<2x8x8xf32>
    %487 = tpu.matmul %485, %486, %cst_195 {dimension_numbers = #tpu.dot_dimension_numbers<[2], [1], [1], [2], [0, 0, 0, 1, 1, 2], [0], [0]>} : vector<2x8x8xf32>, vector<2x8x8xf32>, vector<2x8x8xf32> -> vector<2x8x8xf32>
    "tpu.trace_stop"() : () -> ()
    %488 = vector.extract_strided_slice %443 {offsets = [0, 0, 24], sizes = [2, 8, 8], strides = [1, 1, 1]} : vector<2x8x32xf32> to vector<2x8x8xf32>
    %489 = vector.extract_strided_slice %444 {offsets = [0, 0, 24], sizes = [2, 8, 8], strides = [1, 1, 1]} : vector<2x8x32xf32> to vector<2x8x8xf32>
    "tpu.trace_start"() <{level = 10 : i32, message = "bqd,bkd->bqk"}> : () -> ()
    %cst_196 = arith.constant dense<0.000000e+00> : vector<2x8x8xf32>
    %490 = tpu.matmul %488, %489, %cst_196 {dimension_numbers = #tpu.dot_dimension_numbers<[2], [2], [1], [1], [0, 0, 0, 1, 1, 1], [0], [0]>} : vector<2x8x8xf32>, vector<2x8x8xf32>, vector<2x8x8xf32> -> vector<2x8x8xf32>
    "tpu.trace_stop"() : () -> ()
    %cst_197 = arith.constant dense<0xFF800000> : vector<2x8xf32>
    %491 = vector.multi_reduction <maximumf>, %490, %cst_197 [2] : vector<2x8x8xf32> to vector<2x8xf32>
    %492 = vector.shape_cast %491 : vector<2x8xf32> to vector<2x8x1xf32>
    %493 = vector.broadcast %492 : vector<2x8x1xf32> to vector<2x8x8xf32>
    %494 = arith.subf %490, %493 : vector<2x8x8xf32>
    %495 = math.exp %494 : vector<2x8x8xf32>
    %cst_198 = arith.constant dense<0.000000e+00> : vector<2x8xf32>
    %496 = vector.multi_reduction <add>, %495, %cst_198 [2] : vector<2x8x8xf32> to vector<2x8xf32>
    %497 = vector.shape_cast %496 : vector<2x8xf32> to vector<2x8x1xf32>
    %498 = vector.broadcast %497 : vector<2x8x1xf32> to vector<2x8x8xf32>
    %499 = arith.divf %495, %498 : vector<2x8x8xf32>
    %500 = vector.extract_strided_slice %445 {offsets = [0, 0, 24], sizes = [2, 8, 8], strides = [1, 1, 1]} : vector<2x8x32xf32> to vector<2x8x8xf32>
    "tpu.trace_start"() <{level = 10 : i32, message = "bqk,bkd->bqd"}> : () -> ()
    %cst_199 = arith.constant dense<0.000000e+00> : vector<2x8x8xf32>
    %501 = tpu.matmul %499, %500, %cst_199 {dimension_numbers = #tpu.dot_dimension_numbers<[2], [1], [1], [2], [0, 0, 0, 1, 1, 2], [0], [0]>} : vector<2x8x8xf32>, vector<2x8x8xf32>, vector<2x8x8xf32> -> vector<2x8x8xf32>
    "tpu.trace_stop"() : () -> ()
    %502 = tpu.concatenate %459, %473, %487, %501 in 2 : vector<2x8x8xf32>, vector<2x8x8xf32>, vector<2x8x8xf32>, vector<2x8x8xf32> -> vector<2x8x32xf32>
    %503 = vector.shape_cast %502 : vector<2x8x32xf32> to vector<16x32xf32>
    %504 = arith.truncf %503 : vector<16x32xf32> to vector<16x32xbf16>
    %c0_200 = arith.constant 0 : index
    %c1024 = arith.constant 1024 : index
    %505 = vector.load %arg6[%c0_200, %c1024] : memref<32x1920xbf16, #tpu.memory_space<vmem>>, vector<32x32xbf16>
    %cst_201 = arith.constant dense<0.000000e+00> : vector<16x32xf32>
    %506 = tpu.matmul %504, %505, %cst_201 {dimension_numbers = #tpu.dot_dimension_numbers<[1], [0], [0], [1], [0, 0, 1, 1], [], []>} : vector<16x32xbf16>, vector<32x32xbf16>, vector<16x32xf32> -> vector<16x32xf32>
    %c23 = arith.constant 23 : index
    %c0_202 = arith.constant 0 : index
    %507 = vector.load %arg7[%c23, %c0_202] : memref<41x128xf32, #tpu.memory_space<vmem>>, vector<1x32xf32>
    %508 = vector.broadcast %507 : vector<1x32xf32> to vector<16x32xf32>
    %509 = arith.addf %506, %508 : vector<16x32xf32>
    %510 = arith.addf %429, %509 : vector<16x32xf32>
    %cst_203 = arith.constant dense<0.000000e+00> : vector<16xf32>
    %511 = vector.multi_reduction <add>, %510, %cst_203 [1] : vector<16x32xf32> to vector<16xf32>
    %512 = vector.shape_cast %511 : vector<16xf32> to vector<16x1xf32>
    %cst_204 = arith.constant 3.200000e+01 : f32
    %513 = vector.broadcast %cst_204 : f32 to vector<16x1xf32>
    %514 = arith.divf %512, %513 : vector<16x1xf32>
    %515 = vector.broadcast %514 : vector<16x1xf32> to vector<16x32xf32>
    %516 = arith.subf %510, %515 : vector<16x32xf32>
    %517 = arith.mulf %516, %516 : vector<16x32xf32>
    %cst_205 = arith.constant dense<0.000000e+00> : vector<16xf32>
    %518 = vector.multi_reduction <add>, %517, %cst_205 [1] : vector<16x32xf32> to vector<16xf32>
    %519 = vector.shape_cast %518 : vector<16xf32> to vector<16x1xf32>
    %cst_206 = arith.constant 3.200000e+01 : f32
    %520 = vector.broadcast %cst_206 : f32 to vector<16x1xf32>
    %521 = arith.divf %519, %520 : vector<16x1xf32>
    %cst_207 = arith.constant 9.99999974E-6 : f32
    %522 = vector.broadcast %cst_207 : f32 to vector<16x1xf32>
    %523 = arith.addf %521, %522 : vector<16x1xf32>
    %524 = math.rsqrt %523 : vector<16x1xf32>
    %525 = vector.broadcast %524 : vector<16x1xf32> to vector<16x32xf32>
    %526 = arith.mulf %516, %525 : vector<16x32xf32>
    %c24 = arith.constant 24 : index
    %c0_208 = arith.constant 0 : index
    %527 = vector.load %arg7[%c24, %c0_208] : memref<41x128xf32, #tpu.memory_space<vmem>>, vector<1x32xf32>
    %528 = vector.broadcast %527 : vector<1x32xf32> to vector<16x32xf32>
    %529 = arith.mulf %526, %528 : vector<16x32xf32>
    %c25 = arith.constant 25 : index
    %c0_209 = arith.constant 0 : index
    %530 = vector.load %arg7[%c25, %c0_209] : memref<41x128xf32, #tpu.memory_space<vmem>>, vector<1x32xf32>
    %531 = vector.broadcast %530 : vector<1x32xf32> to vector<16x32xf32>
    %532 = arith.addf %529, %531 : vector<16x32xf32>
    %c2_i32_210 = arith.constant 2 : i32
    %c0_i32_211 = arith.constant 0 : i32
    %c0_i32_212 = arith.constant 0 : i32
    %c0_i32_213 = arith.constant 0 : i32
    %c0_i32_214 = arith.constant 0 : i32
    %533 = tpu.memref_slice %arg9[%c2_i32_210, %c0_i32_213, %c0_i32_214] : memref<4x32x4096xbf16, #tpu.memory_space<any>> -> memref<1x32x4096xbf16, #tpu.memory_space<any>>
    %534 = tpu.memref_squeeze %533 : memref<1x32x4096xbf16, #tpu.memory_space<any>> -> memref<32x4096xbf16, #tpu.memory_space<any>>
    %c0_i32_215 = arith.constant 0 : i32
    %c0_i32_216 = arith.constant 0 : i32
    %535 = tpu.memref_slice %arg11[%c0_i32_211, %c0_i32_215, %c0_i32_216] : memref<2x32x4096xbf16, #tpu.memory_space<vmem>> -> memref<1x32x4096xbf16, #tpu.memory_space<vmem>>
    %536 = tpu.memref_squeeze %535 : memref<1x32x4096xbf16, #tpu.memory_space<vmem>> -> memref<32x4096xbf16, #tpu.memory_space<vmem>>
    %537 = tpu.memref_slice %arg12[%c0_i32_212] : memref<2x!tpu.dma_semaphore, #tpu.memory_space<semaphore_mem>> -> memref<1x!tpu.dma_semaphore, #tpu.memory_space<semaphore_mem>>
    %538 = tpu.memref_squeeze %537 : memref<1x!tpu.dma_semaphore, #tpu.memory_space<semaphore_mem>> -> memref<!tpu.dma_semaphore, #tpu.memory_space<semaphore_mem>>
    tpu.wait_dma2 semaphore(%538 : memref<!tpu.dma_semaphore, #tpu.memory_space<semaphore_mem>>) src(%534 : memref<32x4096xbf16, #tpu.memory_space<any>>) dst(%536 : memref<32x4096xbf16, #tpu.memory_space<vmem>>)
    %c0_217 = arith.constant 0 : index
    %c0_218 = arith.constant 0 : index
    %c0_219 = arith.constant 0 : index
    %539 = vector.load %arg11[%c0_217, %c0_218, %c0_219] : memref<2x32x4096xbf16, #tpu.memory_space<vmem>>, vector<1x32x2048xbf16>
    %540 = vector.shape_cast %539 : vector<1x32x2048xbf16> to vector<32x2048xbf16>
    %c0_220 = arith.constant 0 : index
    %c0_221 = arith.constant 0 : index
    %c2048_222 = arith.constant 2048 : index
    %541 = vector.load %arg11[%c0_220, %c0_221, %c2048_222] : memref<2x32x4096xbf16, #tpu.memory_space<vmem>>, vector<1x32x2048xbf16>
    %542 = vector.shape_cast %541 : vector<1x32x2048xbf16> to vector<32x2048xbf16>
    %543 = arith.truncf %532 : vector<16x32xf32> to vector<16x32xbf16>
    %cst_223 = arith.constant dense<0.000000e+00> : vector<16x2048xf32>
    %544 = tpu.matmul %543, %540, %cst_223 {dimension_numbers = #tpu.dot_dimension_numbers<[1], [0], [0], [1], [0, 0, 1, 1], [], []>} : vector<16x32xbf16>, vector<32x2048xbf16>, vector<16x2048xf32> -> vector<16x2048xf32>
    %c2 = arith.constant 2 : index
    %c0_224 = arith.constant 0 : index
    %545 = vector.load %arg8[%c2, %c0_224] : memref<4x2048xf32, #tpu.memory_space<vmem>>, vector<1x2048xf32>
    %546 = vector.broadcast %545 : vector<1x2048xf32> to vector<16x2048xf32>
    %547 = arith.addf %544, %546 : vector<16x2048xf32>
    %cst_225 = arith.constant 0.000000e+00 : f32
    %548 = vector.broadcast %cst_225 : f32 to vector<16x2048xf32>
    %549 = arith.maximumf %547, %548 : vector<16x2048xf32>
    %550 = arith.truncf %549 : vector<16x2048xf32> to vector<16x2048xbf16>
    %cst_226 = arith.constant dense<0.000000e+00> : vector<16x32xf32>
    %551 = tpu.matmul %550, %542, %cst_226 {dimension_numbers = #tpu.dot_dimension_numbers<[1], [1], [0], [0], [0, 0, 1, 0], [], []>} : vector<16x2048xbf16>, vector<32x2048xbf16>, vector<16x32xf32> -> vector<16x32xf32>
    %c26 = arith.constant 26 : index
    %c0_227 = arith.constant 0 : index
    %552 = vector.load %arg7[%c26, %c0_227] : memref<41x128xf32, #tpu.memory_space<vmem>>, vector<1x32xf32>
    %553 = vector.broadcast %552 : vector<1x32xf32> to vector<16x32xf32>
    %554 = arith.addf %551, %553 : vector<16x32xf32>
    %555 = arith.addf %532, %554 : vector<16x32xf32>
    %cst_228 = arith.constant dense<0.000000e+00> : vector<16xf32>
    %556 = vector.multi_reduction <add>, %555, %cst_228 [1] : vector<16x32xf32> to vector<16xf32>
    %557 = vector.shape_cast %556 : vector<16xf32> to vector<16x1xf32>
    %cst_229 = arith.constant 3.200000e+01 : f32
    %558 = vector.broadcast %cst_229 : f32 to vector<16x1xf32>
    %559 = arith.divf %557, %558 : vector<16x1xf32>
    %560 = vector.broadcast %559 : vector<16x1xf32> to vector<16x32xf32>
    %561 = arith.subf %555, %560 : vector<16x32xf32>
    %562 = arith.mulf %561, %561 : vector<16x32xf32>
    %cst_230 = arith.constant dense<0.000000e+00> : vector<16xf32>
    %563 = vector.multi_reduction <add>, %562, %cst_230 [1] : vector<16x32xf32> to vector<16xf32>
    %564 = vector.shape_cast %563 : vector<16xf32> to vector<16x1xf32>
    %cst_231 = arith.constant 3.200000e+01 : f32
    %565 = vector.broadcast %cst_231 : f32 to vector<16x1xf32>
    %566 = arith.divf %564, %565 : vector<16x1xf32>
    %cst_232 = arith.constant 9.99999974E-6 : f32
    %567 = vector.broadcast %cst_232 : f32 to vector<16x1xf32>
    %568 = arith.addf %566, %567 : vector<16x1xf32>
    %569 = math.rsqrt %568 : vector<16x1xf32>
    %570 = vector.broadcast %569 : vector<16x1xf32> to vector<16x32xf32>
    %571 = arith.mulf %561, %570 : vector<16x32xf32>
    %c27 = arith.constant 27 : index
    %c0_233 = arith.constant 0 : index
    %572 = vector.load %arg7[%c27, %c0_233] : memref<41x128xf32, #tpu.memory_space<vmem>>, vector<1x32xf32>
    %573 = vector.broadcast %572 : vector<1x32xf32> to vector<16x32xf32>
    %574 = arith.mulf %571, %573 : vector<16x32xf32>
    %c28 = arith.constant 28 : index
    %c0_234 = arith.constant 0 : index
    %575 = vector.load %arg7[%c28, %c0_234] : memref<41x128xf32, #tpu.memory_space<vmem>>, vector<1x32xf32>
    %576 = vector.broadcast %575 : vector<1x32xf32> to vector<16x32xf32>
    %577 = arith.addf %574, %576 : vector<16x32xf32>
    %578 = arith.truncf %577 : vector<16x32xf32> to vector<16x32xbf16>
    %c0_235 = arith.constant 0 : index
    %c1152 = arith.constant 1152 : index
    %579 = vector.load %arg6[%c0_235, %c1152] : memref<32x1920xbf16, #tpu.memory_space<vmem>>, vector<32x96xbf16>
    %cst_236 = arith.constant dense<0.000000e+00> : vector<16x96xf32>
    %580 = tpu.matmul %578, %579, %cst_236 {dimension_numbers = #tpu.dot_dimension_numbers<[1], [0], [0], [1], [0, 0, 1, 1], [], []>} : vector<16x32xbf16>, vector<32x96xbf16>, vector<16x96xf32> -> vector<16x96xf32>
    %c29 = arith.constant 29 : index
    %c0_237 = arith.constant 0 : index
    %581 = vector.load %arg7[%c29, %c0_237] : memref<41x128xf32, #tpu.memory_space<vmem>>, vector<1x96xf32>
    %582 = vector.broadcast %581 : vector<1x96xf32> to vector<16x96xf32>
    %583 = arith.addf %580, %582 : vector<16x96xf32>
    %584 = vector.extract_strided_slice %583 {offsets = [0, 0], sizes = [16, 32], strides = [1, 1]} : vector<16x96xf32> to vector<16x32xf32>
    %585 = vector.extract_strided_slice %583 {offsets = [0, 32], sizes = [16, 32], strides = [1, 1]} : vector<16x96xf32> to vector<16x32xf32>
    %586 = vector.extract_strided_slice %583 {offsets = [0, 64], sizes = [16, 32], strides = [1, 1]} : vector<16x96xf32> to vector<16x32xf32>
    %587 = vector.shape_cast %584 : vector<16x32xf32> to vector<2x8x32xf32>
    %588 = vector.shape_cast %585 : vector<16x32xf32> to vector<2x8x32xf32>
    %589 = vector.shape_cast %586 : vector<16x32xf32> to vector<2x8x32xf32>
    %590 = vector.extract_strided_slice %587 {offsets = [0, 0, 0], sizes = [2, 8, 8], strides = [1, 1, 1]} : vector<2x8x32xf32> to vector<2x8x8xf32>
    %591 = vector.extract_strided_slice %588 {offsets = [0, 0, 0], sizes = [2, 8, 8], strides = [1, 1, 1]} : vector<2x8x32xf32> to vector<2x8x8xf32>
    "tpu.trace_start"() <{level = 10 : i32, message = "bqd,bkd->bqk"}> : () -> ()
    %cst_238 = arith.constant dense<0.000000e+00> : vector<2x8x8xf32>
    %592 = tpu.matmul %590, %591, %cst_238 {dimension_numbers = #tpu.dot_dimension_numbers<[2], [2], [1], [1], [0, 0, 0, 1, 1, 1], [0], [0]>} : vector<2x8x8xf32>, vector<2x8x8xf32>, vector<2x8x8xf32> -> vector<2x8x8xf32>
    "tpu.trace_stop"() : () -> ()
    %cst_239 = arith.constant dense<0xFF800000> : vector<2x8xf32>
    %593 = vector.multi_reduction <maximumf>, %592, %cst_239 [2] : vector<2x8x8xf32> to vector<2x8xf32>
    %594 = vector.shape_cast %593 : vector<2x8xf32> to vector<2x8x1xf32>
    %595 = vector.broadcast %594 : vector<2x8x1xf32> to vector<2x8x8xf32>
    %596 = arith.subf %592, %595 : vector<2x8x8xf32>
    %597 = math.exp %596 : vector<2x8x8xf32>
    %cst_240 = arith.constant dense<0.000000e+00> : vector<2x8xf32>
    %598 = vector.multi_reduction <add>, %597, %cst_240 [2] : vector<2x8x8xf32> to vector<2x8xf32>
    %599 = vector.shape_cast %598 : vector<2x8xf32> to vector<2x8x1xf32>
    %600 = vector.broadcast %599 : vector<2x8x1xf32> to vector<2x8x8xf32>
    %601 = arith.divf %597, %600 : vector<2x8x8xf32>
    %602 = vector.extract_strided_slice %589 {offsets = [0, 0, 0], sizes = [2, 8, 8], strides = [1, 1, 1]} : vector<2x8x32xf32> to vector<2x8x8xf32>
    "tpu.trace_start"() <{level = 10 : i32, message = "bqk,bkd->bqd"}> : () -> ()
    %cst_241 = arith.constant dense<0.000000e+00> : vector<2x8x8xf32>
    %603 = tpu.matmul %601, %602, %cst_241 {dimension_numbers = #tpu.dot_dimension_numbers<[2], [1], [1], [2], [0, 0, 0, 1, 1, 2], [0], [0]>} : vector<2x8x8xf32>, vector<2x8x8xf32>, vector<2x8x8xf32> -> vector<2x8x8xf32>
    "tpu.trace_stop"() : () -> ()
    %604 = vector.extract_strided_slice %587 {offsets = [0, 0, 8], sizes = [2, 8, 8], strides = [1, 1, 1]} : vector<2x8x32xf32> to vector<2x8x8xf32>
    %605 = vector.extract_strided_slice %588 {offsets = [0, 0, 8], sizes = [2, 8, 8], strides = [1, 1, 1]} : vector<2x8x32xf32> to vector<2x8x8xf32>
    "tpu.trace_start"() <{level = 10 : i32, message = "bqd,bkd->bqk"}> : () -> ()
    %cst_242 = arith.constant dense<0.000000e+00> : vector<2x8x8xf32>
    %606 = tpu.matmul %604, %605, %cst_242 {dimension_numbers = #tpu.dot_dimension_numbers<[2], [2], [1], [1], [0, 0, 0, 1, 1, 1], [0], [0]>} : vector<2x8x8xf32>, vector<2x8x8xf32>, vector<2x8x8xf32> -> vector<2x8x8xf32>
    "tpu.trace_stop"() : () -> ()
    %cst_243 = arith.constant dense<0xFF800000> : vector<2x8xf32>
    %607 = vector.multi_reduction <maximumf>, %606, %cst_243 [2] : vector<2x8x8xf32> to vector<2x8xf32>
    %608 = vector.shape_cast %607 : vector<2x8xf32> to vector<2x8x1xf32>
    %609 = vector.broadcast %608 : vector<2x8x1xf32> to vector<2x8x8xf32>
    %610 = arith.subf %606, %609 : vector<2x8x8xf32>
    %611 = math.exp %610 : vector<2x8x8xf32>
    %cst_244 = arith.constant dense<0.000000e+00> : vector<2x8xf32>
    %612 = vector.multi_reduction <add>, %611, %cst_244 [2] : vector<2x8x8xf32> to vector<2x8xf32>
    %613 = vector.shape_cast %612 : vector<2x8xf32> to vector<2x8x1xf32>
    %614 = vector.broadcast %613 : vector<2x8x1xf32> to vector<2x8x8xf32>
    %615 = arith.divf %611, %614 : vector<2x8x8xf32>
    %616 = vector.extract_strided_slice %589 {offsets = [0, 0, 8], sizes = [2, 8, 8], strides = [1, 1, 1]} : vector<2x8x32xf32> to vector<2x8x8xf32>
    "tpu.trace_start"() <{level = 10 : i32, message = "bqk,bkd->bqd"}> : () -> ()
    %cst_245 = arith.constant dense<0.000000e+00> : vector<2x8x8xf32>
    %617 = tpu.matmul %615, %616, %cst_245 {dimension_numbers = #tpu.dot_dimension_numbers<[2], [1], [1], [2], [0, 0, 0, 1, 1, 2], [0], [0]>} : vector<2x8x8xf32>, vector<2x8x8xf32>, vector<2x8x8xf32> -> vector<2x8x8xf32>
    "tpu.trace_stop"() : () -> ()
    %618 = vector.extract_strided_slice %587 {offsets = [0, 0, 16], sizes = [2, 8, 8], strides = [1, 1, 1]} : vector<2x8x32xf32> to vector<2x8x8xf32>
    %619 = vector.extract_strided_slice %588 {offsets = [0, 0, 16], sizes = [2, 8, 8], strides = [1, 1, 1]} : vector<2x8x32xf32> to vector<2x8x8xf32>
    "tpu.trace_start"() <{level = 10 : i32, message = "bqd,bkd->bqk"}> : () -> ()
    %cst_246 = arith.constant dense<0.000000e+00> : vector<2x8x8xf32>
    %620 = tpu.matmul %618, %619, %cst_246 {dimension_numbers = #tpu.dot_dimension_numbers<[2], [2], [1], [1], [0, 0, 0, 1, 1, 1], [0], [0]>} : vector<2x8x8xf32>, vector<2x8x8xf32>, vector<2x8x8xf32> -> vector<2x8x8xf32>
    "tpu.trace_stop"() : () -> ()
    %cst_247 = arith.constant dense<0xFF800000> : vector<2x8xf32>
    %621 = vector.multi_reduction <maximumf>, %620, %cst_247 [2] : vector<2x8x8xf32> to vector<2x8xf32>
    %622 = vector.shape_cast %621 : vector<2x8xf32> to vector<2x8x1xf32>
    %623 = vector.broadcast %622 : vector<2x8x1xf32> to vector<2x8x8xf32>
    %624 = arith.subf %620, %623 : vector<2x8x8xf32>
    %625 = math.exp %624 : vector<2x8x8xf32>
    %cst_248 = arith.constant dense<0.000000e+00> : vector<2x8xf32>
    %626 = vector.multi_reduction <add>, %625, %cst_248 [2] : vector<2x8x8xf32> to vector<2x8xf32>
    %627 = vector.shape_cast %626 : vector<2x8xf32> to vector<2x8x1xf32>
    %628 = vector.broadcast %627 : vector<2x8x1xf32> to vector<2x8x8xf32>
    %629 = arith.divf %625, %628 : vector<2x8x8xf32>
    %630 = vector.extract_strided_slice %589 {offsets = [0, 0, 16], sizes = [2, 8, 8], strides = [1, 1, 1]} : vector<2x8x32xf32> to vector<2x8x8xf32>
    "tpu.trace_start"() <{level = 10 : i32, message = "bqk,bkd->bqd"}> : () -> ()
    %cst_249 = arith.constant dense<0.000000e+00> : vector<2x8x8xf32>
    %631 = tpu.matmul %629, %630, %cst_249 {dimension_numbers = #tpu.dot_dimension_numbers<[2], [1], [1], [2], [0, 0, 0, 1, 1, 2], [0], [0]>} : vector<2x8x8xf32>, vector<2x8x8xf32>, vector<2x8x8xf32> -> vector<2x8x8xf32>
    "tpu.trace_stop"() : () -> ()
    %632 = vector.extract_strided_slice %587 {offsets = [0, 0, 24], sizes = [2, 8, 8], strides = [1, 1, 1]} : vector<2x8x32xf32> to vector<2x8x8xf32>
    %633 = vector.extract_strided_slice %588 {offsets = [0, 0, 24], sizes = [2, 8, 8], strides = [1, 1, 1]} : vector<2x8x32xf32> to vector<2x8x8xf32>
    "tpu.trace_start"() <{level = 10 : i32, message = "bqd,bkd->bqk"}> : () -> ()
    %cst_250 = arith.constant dense<0.000000e+00> : vector<2x8x8xf32>
    %634 = tpu.matmul %632, %633, %cst_250 {dimension_numbers = #tpu.dot_dimension_numbers<[2], [2], [1], [1], [0, 0, 0, 1, 1, 1], [0], [0]>} : vector<2x8x8xf32>, vector<2x8x8xf32>, vector<2x8x8xf32> -> vector<2x8x8xf32>
    "tpu.trace_stop"() : () -> ()
    %cst_251 = arith.constant dense<0xFF800000> : vector<2x8xf32>
    %635 = vector.multi_reduction <maximumf>, %634, %cst_251 [2] : vector<2x8x8xf32> to vector<2x8xf32>
    %636 = vector.shape_cast %635 : vector<2x8xf32> to vector<2x8x1xf32>
    %637 = vector.broadcast %636 : vector<2x8x1xf32> to vector<2x8x8xf32>
    %638 = arith.subf %634, %637 : vector<2x8x8xf32>
    %639 = math.exp %638 : vector<2x8x8xf32>
    %cst_252 = arith.constant dense<0.000000e+00> : vector<2x8xf32>
    %640 = vector.multi_reduction <add>, %639, %cst_252 [2] : vector<2x8x8xf32> to vector<2x8xf32>
    %641 = vector.shape_cast %640 : vector<2x8xf32> to vector<2x8x1xf32>
    %642 = vector.broadcast %641 : vector<2x8x1xf32> to vector<2x8x8xf32>
    %643 = arith.divf %639, %642 : vector<2x8x8xf32>
    %644 = vector.extract_strided_slice %589 {offsets = [0, 0, 24], sizes = [2, 8, 8], strides = [1, 1, 1]} : vector<2x8x32xf32> to vector<2x8x8xf32>
    "tpu.trace_start"() <{level = 10 : i32, message = "bqk,bkd->bqd"}> : () -> ()
    %cst_253 = arith.constant dense<0.000000e+00> : vector<2x8x8xf32>
    %645 = tpu.matmul %643, %644, %cst_253 {dimension_numbers = #tpu.dot_dimension_numbers<[2], [1], [1], [2], [0, 0, 0, 1, 1, 2], [0], [0]>} : vector<2x8x8xf32>, vector<2x8x8xf32>, vector<2x8x8xf32> -> vector<2x8x8xf32>
    "tpu.trace_stop"() : () -> ()
    %646 = tpu.concatenate %603, %617, %631, %645 in 2 : vector<2x8x8xf32>, vector<2x8x8xf32>, vector<2x8x8xf32>, vector<2x8x8xf32> -> vector<2x8x32xf32>
    %647 = vector.shape_cast %646 : vector<2x8x32xf32> to vector<16x32xf32>
    %648 = arith.truncf %647 : vector<16x32xf32> to vector<16x32xbf16>
    %c0_254 = arith.constant 0 : index
    %c1280 = arith.constant 1280 : index
    %649 = vector.load %arg6[%c0_254, %c1280] : memref<32x1920xbf16, #tpu.memory_space<vmem>>, vector<32x32xbf16>
    %cst_255 = arith.constant dense<0.000000e+00> : vector<16x32xf32>
    %650 = tpu.matmul %648, %649, %cst_255 {dimension_numbers = #tpu.dot_dimension_numbers<[1], [0], [0], [1], [0, 0, 1, 1], [], []>} : vector<16x32xbf16>, vector<32x32xbf16>, vector<16x32xf32> -> vector<16x32xf32>
    %c30 = arith.constant 30 : index
    %c0_256 = arith.constant 0 : index
    %651 = vector.load %arg7[%c30, %c0_256] : memref<41x128xf32, #tpu.memory_space<vmem>>, vector<1x32xf32>
    %652 = vector.broadcast %651 : vector<1x32xf32> to vector<16x32xf32>
    %653 = arith.addf %650, %652 : vector<16x32xf32>
    %654 = arith.addf %577, %653 : vector<16x32xf32>
    %cst_257 = arith.constant dense<0.000000e+00> : vector<16xf32>
    %655 = vector.multi_reduction <add>, %654, %cst_257 [1] : vector<16x32xf32> to vector<16xf32>
    %656 = vector.shape_cast %655 : vector<16xf32> to vector<16x1xf32>
    %cst_258 = arith.constant 3.200000e+01 : f32
    %657 = vector.broadcast %cst_258 : f32 to vector<16x1xf32>
    %658 = arith.divf %656, %657 : vector<16x1xf32>
    %659 = vector.broadcast %658 : vector<16x1xf32> to vector<16x32xf32>
    %660 = arith.subf %654, %659 : vector<16x32xf32>
    %661 = arith.mulf %660, %660 : vector<16x32xf32>
    %cst_259 = arith.constant dense<0.000000e+00> : vector<16xf32>
    %662 = vector.multi_reduction <add>, %661, %cst_259 [1] : vector<16x32xf32> to vector<16xf32>
    %663 = vector.shape_cast %662 : vector<16xf32> to vector<16x1xf32>
    %cst_260 = arith.constant 3.200000e+01 : f32
    %664 = vector.broadcast %cst_260 : f32 to vector<16x1xf32>
    %665 = arith.divf %663, %664 : vector<16x1xf32>
    %cst_261 = arith.constant 9.99999974E-6 : f32
    %666 = vector.broadcast %cst_261 : f32 to vector<16x1xf32>
    %667 = arith.addf %665, %666 : vector<16x1xf32>
    %668 = math.rsqrt %667 : vector<16x1xf32>
    %669 = vector.broadcast %668 : vector<16x1xf32> to vector<16x32xf32>
    %670 = arith.mulf %660, %669 : vector<16x32xf32>
    %c31 = arith.constant 31 : index
    %c0_262 = arith.constant 0 : index
    %671 = vector.load %arg7[%c31, %c0_262] : memref<41x128xf32, #tpu.memory_space<vmem>>, vector<1x32xf32>
    %672 = vector.broadcast %671 : vector<1x32xf32> to vector<16x32xf32>
    %673 = arith.mulf %670, %672 : vector<16x32xf32>
    %c32 = arith.constant 32 : index
    %c0_263 = arith.constant 0 : index
    %674 = vector.load %arg7[%c32, %c0_263] : memref<41x128xf32, #tpu.memory_space<vmem>>, vector<1x32xf32>
    %675 = vector.broadcast %674 : vector<1x32xf32> to vector<16x32xf32>
    %676 = arith.addf %673, %675 : vector<16x32xf32>
    %677 = arith.truncf %676 : vector<16x32xf32> to vector<16x32xbf16>
    %c0_264 = arith.constant 0 : index
    %c1408 = arith.constant 1408 : index
    %678 = vector.load %arg6[%c0_264, %c1408] : memref<32x1920xbf16, #tpu.memory_space<vmem>>, vector<32x32xbf16>
    %cst_265 = arith.constant dense<0.000000e+00> : vector<16x32xf32>
    %679 = tpu.matmul %677, %678, %cst_265 {dimension_numbers = #tpu.dot_dimension_numbers<[1], [0], [0], [1], [0, 0, 1, 1], [], []>} : vector<16x32xbf16>, vector<32x32xbf16>, vector<16x32xf32> -> vector<16x32xf32>
    %c33 = arith.constant 33 : index
    %c0_266 = arith.constant 0 : index
    %680 = vector.load %arg7[%c33, %c0_266] : memref<41x128xf32, #tpu.memory_space<vmem>>, vector<1x32xf32>
    %681 = vector.broadcast %680 : vector<1x32xf32> to vector<16x32xf32>
    %682 = arith.addf %679, %681 : vector<16x32xf32>
    %c0_267 = arith.constant 0 : index
    %c1536 = arith.constant 1536 : index
    %683 = vector.load %arg6[%c0_267, %c1536] : memref<32x1920xbf16, #tpu.memory_space<vmem>>, vector<32x64xbf16>
    %cst_268 = arith.constant dense<0.000000e+00> : vector<16x64xf32>
    %684 = tpu.matmul %315, %683, %cst_268 {dimension_numbers = #tpu.dot_dimension_numbers<[1], [0], [0], [1], [0, 0, 1, 1], [], []>} : vector<16x32xbf16>, vector<32x64xbf16>, vector<16x64xf32> -> vector<16x64xf32>
    %c34 = arith.constant 34 : index
    %c0_269 = arith.constant 0 : index
    %685 = vector.load %arg7[%c34, %c0_269] : memref<41x128xf32, #tpu.memory_space<vmem>>, vector<1x64xf32>
    %686 = vector.broadcast %685 : vector<1x64xf32> to vector<16x64xf32>
    %687 = arith.addf %684, %686 : vector<16x64xf32>
    %688 = vector.extract_strided_slice %687 {offsets = [0, 0], sizes = [16, 32], strides = [1, 1]} : vector<16x64xf32> to vector<16x32xf32>
    %689 = vector.extract_strided_slice %687 {offsets = [0, 32], sizes = [16, 32], strides = [1, 1]} : vector<16x64xf32> to vector<16x32xf32>
    %690 = vector.shape_cast %682 : vector<16x32xf32> to vector<2x8x32xf32>
    %691 = vector.shape_cast %688 : vector<16x32xf32> to vector<2x8x32xf32>
    %692 = vector.shape_cast %689 : vector<16x32xf32> to vector<2x8x32xf32>
    %693 = vector.extract_strided_slice %690 {offsets = [0, 0, 0], sizes = [2, 8, 8], strides = [1, 1, 1]} : vector<2x8x32xf32> to vector<2x8x8xf32>
    %694 = vector.extract_strided_slice %691 {offsets = [0, 0, 0], sizes = [2, 8, 8], strides = [1, 1, 1]} : vector<2x8x32xf32> to vector<2x8x8xf32>
    "tpu.trace_start"() <{level = 10 : i32, message = "bqd,bkd->bqk"}> : () -> ()
    %cst_270 = arith.constant dense<0.000000e+00> : vector<2x8x8xf32>
    %695 = tpu.matmul %693, %694, %cst_270 {dimension_numbers = #tpu.dot_dimension_numbers<[2], [2], [1], [1], [0, 0, 0, 1, 1, 1], [0], [0]>} : vector<2x8x8xf32>, vector<2x8x8xf32>, vector<2x8x8xf32> -> vector<2x8x8xf32>
    "tpu.trace_stop"() : () -> ()
    %cst_271 = arith.constant dense<0xFF800000> : vector<2x8xf32>
    %696 = vector.multi_reduction <maximumf>, %695, %cst_271 [2] : vector<2x8x8xf32> to vector<2x8xf32>
    %697 = vector.shape_cast %696 : vector<2x8xf32> to vector<2x8x1xf32>
    %698 = vector.broadcast %697 : vector<2x8x1xf32> to vector<2x8x8xf32>
    %699 = arith.subf %695, %698 : vector<2x8x8xf32>
    %700 = math.exp %699 : vector<2x8x8xf32>
    %cst_272 = arith.constant dense<0.000000e+00> : vector<2x8xf32>
    %701 = vector.multi_reduction <add>, %700, %cst_272 [2] : vector<2x8x8xf32> to vector<2x8xf32>
    %702 = vector.shape_cast %701 : vector<2x8xf32> to vector<2x8x1xf32>
    %703 = vector.broadcast %702 : vector<2x8x1xf32> to vector<2x8x8xf32>
    %704 = arith.divf %700, %703 : vector<2x8x8xf32>
    %705 = vector.extract_strided_slice %692 {offsets = [0, 0, 0], sizes = [2, 8, 8], strides = [1, 1, 1]} : vector<2x8x32xf32> to vector<2x8x8xf32>
    "tpu.trace_start"() <{level = 10 : i32, message = "bqk,bkd->bqd"}> : () -> ()
    %cst_273 = arith.constant dense<0.000000e+00> : vector<2x8x8xf32>
    %706 = tpu.matmul %704, %705, %cst_273 {dimension_numbers = #tpu.dot_dimension_numbers<[2], [1], [1], [2], [0, 0, 0, 1, 1, 2], [0], [0]>} : vector<2x8x8xf32>, vector<2x8x8xf32>, vector<2x8x8xf32> -> vector<2x8x8xf32>
    "tpu.trace_stop"() : () -> ()
    %707 = vector.extract_strided_slice %690 {offsets = [0, 0, 8], sizes = [2, 8, 8], strides = [1, 1, 1]} : vector<2x8x32xf32> to vector<2x8x8xf32>
    %708 = vector.extract_strided_slice %691 {offsets = [0, 0, 8], sizes = [2, 8, 8], strides = [1, 1, 1]} : vector<2x8x32xf32> to vector<2x8x8xf32>
    "tpu.trace_start"() <{level = 10 : i32, message = "bqd,bkd->bqk"}> : () -> ()
    %cst_274 = arith.constant dense<0.000000e+00> : vector<2x8x8xf32>
    %709 = tpu.matmul %707, %708, %cst_274 {dimension_numbers = #tpu.dot_dimension_numbers<[2], [2], [1], [1], [0, 0, 0, 1, 1, 1], [0], [0]>} : vector<2x8x8xf32>, vector<2x8x8xf32>, vector<2x8x8xf32> -> vector<2x8x8xf32>
    "tpu.trace_stop"() : () -> ()
    %cst_275 = arith.constant dense<0xFF800000> : vector<2x8xf32>
    %710 = vector.multi_reduction <maximumf>, %709, %cst_275 [2] : vector<2x8x8xf32> to vector<2x8xf32>
    %711 = vector.shape_cast %710 : vector<2x8xf32> to vector<2x8x1xf32>
    %712 = vector.broadcast %711 : vector<2x8x1xf32> to vector<2x8x8xf32>
    %713 = arith.subf %709, %712 : vector<2x8x8xf32>
    %714 = math.exp %713 : vector<2x8x8xf32>
    %cst_276 = arith.constant dense<0.000000e+00> : vector<2x8xf32>
    %715 = vector.multi_reduction <add>, %714, %cst_276 [2] : vector<2x8x8xf32> to vector<2x8xf32>
    %716 = vector.shape_cast %715 : vector<2x8xf32> to vector<2x8x1xf32>
    %717 = vector.broadcast %716 : vector<2x8x1xf32> to vector<2x8x8xf32>
    %718 = arith.divf %714, %717 : vector<2x8x8xf32>
    %719 = vector.extract_strided_slice %692 {offsets = [0, 0, 8], sizes = [2, 8, 8], strides = [1, 1, 1]} : vector<2x8x32xf32> to vector<2x8x8xf32>
    "tpu.trace_start"() <{level = 10 : i32, message = "bqk,bkd->bqd"}> : () -> ()
    %cst_277 = arith.constant dense<0.000000e+00> : vector<2x8x8xf32>
    %720 = tpu.matmul %718, %719, %cst_277 {dimension_numbers = #tpu.dot_dimension_numbers<[2], [1], [1], [2], [0, 0, 0, 1, 1, 2], [0], [0]>} : vector<2x8x8xf32>, vector<2x8x8xf32>, vector<2x8x8xf32> -> vector<2x8x8xf32>
    "tpu.trace_stop"() : () -> ()
    %721 = vector.extract_strided_slice %690 {offsets = [0, 0, 16], sizes = [2, 8, 8], strides = [1, 1, 1]} : vector<2x8x32xf32> to vector<2x8x8xf32>
    %722 = vector.extract_strided_slice %691 {offsets = [0, 0, 16], sizes = [2, 8, 8], strides = [1, 1, 1]} : vector<2x8x32xf32> to vector<2x8x8xf32>
    "tpu.trace_start"() <{level = 10 : i32, message = "bqd,bkd->bqk"}> : () -> ()
    %cst_278 = arith.constant dense<0.000000e+00> : vector<2x8x8xf32>
    %723 = tpu.matmul %721, %722, %cst_278 {dimension_numbers = #tpu.dot_dimension_numbers<[2], [2], [1], [1], [0, 0, 0, 1, 1, 1], [0], [0]>} : vector<2x8x8xf32>, vector<2x8x8xf32>, vector<2x8x8xf32> -> vector<2x8x8xf32>
    "tpu.trace_stop"() : () -> ()
    %cst_279 = arith.constant dense<0xFF800000> : vector<2x8xf32>
    %724 = vector.multi_reduction <maximumf>, %723, %cst_279 [2] : vector<2x8x8xf32> to vector<2x8xf32>
    %725 = vector.shape_cast %724 : vector<2x8xf32> to vector<2x8x1xf32>
    %726 = vector.broadcast %725 : vector<2x8x1xf32> to vector<2x8x8xf32>
    %727 = arith.subf %723, %726 : vector<2x8x8xf32>
    %728 = math.exp %727 : vector<2x8x8xf32>
    %cst_280 = arith.constant dense<0.000000e+00> : vector<2x8xf32>
    %729 = vector.multi_reduction <add>, %728, %cst_280 [2] : vector<2x8x8xf32> to vector<2x8xf32>
    %730 = vector.shape_cast %729 : vector<2x8xf32> to vector<2x8x1xf32>
    %731 = vector.broadcast %730 : vector<2x8x1xf32> to vector<2x8x8xf32>
    %732 = arith.divf %728, %731 : vector<2x8x8xf32>
    %733 = vector.extract_strided_slice %692 {offsets = [0, 0, 16], sizes = [2, 8, 8], strides = [1, 1, 1]} : vector<2x8x32xf32> to vector<2x8x8xf32>
    "tpu.trace_start"() <{level = 10 : i32, message = "bqk,bkd->bqd"}> : () -> ()
    %cst_281 = arith.constant dense<0.000000e+00> : vector<2x8x8xf32>
    %734 = tpu.matmul %732, %733, %cst_281 {dimension_numbers = #tpu.dot_dimension_numbers<[2], [1], [1], [2], [0, 0, 0, 1, 1, 2], [0], [0]>} : vector<2x8x8xf32>, vector<2x8x8xf32>, vector<2x8x8xf32> -> vector<2x8x8xf32>
    "tpu.trace_stop"() : () -> ()
    %735 = vector.extract_strided_slice %690 {offsets = [0, 0, 24], sizes = [2, 8, 8], strides = [1, 1, 1]} : vector<2x8x32xf32> to vector<2x8x8xf32>
    %736 = vector.extract_strided_slice %691 {offsets = [0, 0, 24], sizes = [2, 8, 8], strides = [1, 1, 1]} : vector<2x8x32xf32> to vector<2x8x8xf32>
    "tpu.trace_start"() <{level = 10 : i32, message = "bqd,bkd->bqk"}> : () -> ()
    %cst_282 = arith.constant dense<0.000000e+00> : vector<2x8x8xf32>
    %737 = tpu.matmul %735, %736, %cst_282 {dimension_numbers = #tpu.dot_dimension_numbers<[2], [2], [1], [1], [0, 0, 0, 1, 1, 1], [0], [0]>} : vector<2x8x8xf32>, vector<2x8x8xf32>, vector<2x8x8xf32> -> vector<2x8x8xf32>
    "tpu.trace_stop"() : () -> ()
    %cst_283 = arith.constant dense<0xFF800000> : vector<2x8xf32>
    %738 = vector.multi_reduction <maximumf>, %737, %cst_283 [2] : vector<2x8x8xf32> to vector<2x8xf32>
    %739 = vector.shape_cast %738 : vector<2x8xf32> to vector<2x8x1xf32>
    %740 = vector.broadcast %739 : vector<2x8x1xf32> to vector<2x8x8xf32>
    %741 = arith.subf %737, %740 : vector<2x8x8xf32>
    %742 = math.exp %741 : vector<2x8x8xf32>
    %cst_284 = arith.constant dense<0.000000e+00> : vector<2x8xf32>
    %743 = vector.multi_reduction <add>, %742, %cst_284 [2] : vector<2x8x8xf32> to vector<2x8xf32>
    %744 = vector.shape_cast %743 : vector<2x8xf32> to vector<2x8x1xf32>
    %745 = vector.broadcast %744 : vector<2x8x1xf32> to vector<2x8x8xf32>
    %746 = arith.divf %742, %745 : vector<2x8x8xf32>
    %747 = vector.extract_strided_slice %692 {offsets = [0, 0, 24], sizes = [2, 8, 8], strides = [1, 1, 1]} : vector<2x8x32xf32> to vector<2x8x8xf32>
    "tpu.trace_start"() <{level = 10 : i32, message = "bqk,bkd->bqd"}> : () -> ()
    %cst_285 = arith.constant dense<0.000000e+00> : vector<2x8x8xf32>
    %748 = tpu.matmul %746, %747, %cst_285 {dimension_numbers = #tpu.dot_dimension_numbers<[2], [1], [1], [2], [0, 0, 0, 1, 1, 2], [0], [0]>} : vector<2x8x8xf32>, vector<2x8x8xf32>, vector<2x8x8xf32> -> vector<2x8x8xf32>
    "tpu.trace_stop"() : () -> ()
    %749 = tpu.concatenate %706, %720, %734, %748 in 2 : vector<2x8x8xf32>, vector<2x8x8xf32>, vector<2x8x8xf32>, vector<2x8x8xf32> -> vector<2x8x32xf32>
    %750 = vector.shape_cast %749 : vector<2x8x32xf32> to vector<16x32xf32>
    %751 = arith.truncf %750 : vector<16x32xf32> to vector<16x32xbf16>
    %c0_286 = arith.constant 0 : index
    %c1664 = arith.constant 1664 : index
    %752 = vector.load %arg6[%c0_286, %c1664] : memref<32x1920xbf16, #tpu.memory_space<vmem>>, vector<32x32xbf16>
    %cst_287 = arith.constant dense<0.000000e+00> : vector<16x32xf32>
    %753 = tpu.matmul %751, %752, %cst_287 {dimension_numbers = #tpu.dot_dimension_numbers<[1], [0], [0], [1], [0, 0, 1, 1], [], []>} : vector<16x32xbf16>, vector<32x32xbf16>, vector<16x32xf32> -> vector<16x32xf32>
    %c35 = arith.constant 35 : index
    %c0_288 = arith.constant 0 : index
    %754 = vector.load %arg7[%c35, %c0_288] : memref<41x128xf32, #tpu.memory_space<vmem>>, vector<1x32xf32>
    %755 = vector.broadcast %754 : vector<1x32xf32> to vector<16x32xf32>
    %756 = arith.addf %753, %755 : vector<16x32xf32>
    %757 = arith.addf %676, %756 : vector<16x32xf32>
    %cst_289 = arith.constant dense<0.000000e+00> : vector<16xf32>
    %758 = vector.multi_reduction <add>, %757, %cst_289 [1] : vector<16x32xf32> to vector<16xf32>
    %759 = vector.shape_cast %758 : vector<16xf32> to vector<16x1xf32>
    %cst_290 = arith.constant 3.200000e+01 : f32
    %760 = vector.broadcast %cst_290 : f32 to vector<16x1xf32>
    %761 = arith.divf %759, %760 : vector<16x1xf32>
    %762 = vector.broadcast %761 : vector<16x1xf32> to vector<16x32xf32>
    %763 = arith.subf %757, %762 : vector<16x32xf32>
    %764 = arith.mulf %763, %763 : vector<16x32xf32>
    %cst_291 = arith.constant dense<0.000000e+00> : vector<16xf32>
    %765 = vector.multi_reduction <add>, %764, %cst_291 [1] : vector<16x32xf32> to vector<16xf32>
    %766 = vector.shape_cast %765 : vector<16xf32> to vector<16x1xf32>
    %cst_292 = arith.constant 3.200000e+01 : f32
    %767 = vector.broadcast %cst_292 : f32 to vector<16x1xf32>
    %768 = arith.divf %766, %767 : vector<16x1xf32>
    %cst_293 = arith.constant 9.99999974E-6 : f32
    %769 = vector.broadcast %cst_293 : f32 to vector<16x1xf32>
    %770 = arith.addf %768, %769 : vector<16x1xf32>
    %771 = math.rsqrt %770 : vector<16x1xf32>
    %772 = vector.broadcast %771 : vector<16x1xf32> to vector<16x32xf32>
    %773 = arith.mulf %763, %772 : vector<16x32xf32>
    %c36 = arith.constant 36 : index
    %c0_294 = arith.constant 0 : index
    %774 = vector.load %arg7[%c36, %c0_294] : memref<41x128xf32, #tpu.memory_space<vmem>>, vector<1x32xf32>
    %775 = vector.broadcast %774 : vector<1x32xf32> to vector<16x32xf32>
    %776 = arith.mulf %773, %775 : vector<16x32xf32>
    %c37 = arith.constant 37 : index
    %c0_295 = arith.constant 0 : index
    %777 = vector.load %arg7[%c37, %c0_295] : memref<41x128xf32, #tpu.memory_space<vmem>>, vector<1x32xf32>
    %778 = vector.broadcast %777 : vector<1x32xf32> to vector<16x32xf32>
    %779 = arith.addf %776, %778 : vector<16x32xf32>
    %c3_i32_296 = arith.constant 3 : i32
    %c1_i32_297 = arith.constant 1 : i32
    %c1_i32_298 = arith.constant 1 : i32
    %c0_i32_299 = arith.constant 0 : i32
    %c0_i32_300 = arith.constant 0 : i32
    %780 = tpu.memref_slice %arg9[%c3_i32_296, %c0_i32_299, %c0_i32_300] : memref<4x32x4096xbf16, #tpu.memory_space<any>> -> memref<1x32x4096xbf16, #tpu.memory_space<any>>
    %781 = tpu.memref_squeeze %780 : memref<1x32x4096xbf16, #tpu.memory_space<any>> -> memref<32x4096xbf16, #tpu.memory_space<any>>
    %c0_i32_301 = arith.constant 0 : i32
    %c0_i32_302 = arith.constant 0 : i32
    %782 = tpu.memref_slice %arg11[%c1_i32_297, %c0_i32_301, %c0_i32_302] : memref<2x32x4096xbf16, #tpu.memory_space<vmem>> -> memref<1x32x4096xbf16, #tpu.memory_space<vmem>>
    %783 = tpu.memref_squeeze %782 : memref<1x32x4096xbf16, #tpu.memory_space<vmem>> -> memref<32x4096xbf16, #tpu.memory_space<vmem>>
    %784 = tpu.memref_slice %arg12[%c1_i32_298] : memref<2x!tpu.dma_semaphore, #tpu.memory_space<semaphore_mem>> -> memref<1x!tpu.dma_semaphore, #tpu.memory_space<semaphore_mem>>
    %785 = tpu.memref_squeeze %784 : memref<1x!tpu.dma_semaphore, #tpu.memory_space<semaphore_mem>> -> memref<!tpu.dma_semaphore, #tpu.memory_space<semaphore_mem>>
    tpu.wait_dma2 semaphore(%785 : memref<!tpu.dma_semaphore, #tpu.memory_space<semaphore_mem>>) src(%781 : memref<32x4096xbf16, #tpu.memory_space<any>>) dst(%783 : memref<32x4096xbf16, #tpu.memory_space<vmem>>)
    %c1_303 = arith.constant 1 : index
    %c0_304 = arith.constant 0 : index
    %c0_305 = arith.constant 0 : index
    %786 = vector.load %arg11[%c1_303, %c0_304, %c0_305] : memref<2x32x4096xbf16, #tpu.memory_space<vmem>>, vector<1x32x2048xbf16>
    %787 = vector.shape_cast %786 : vector<1x32x2048xbf16> to vector<32x2048xbf16>
    %c1_306 = arith.constant 1 : index
    %c0_307 = arith.constant 0 : index
    %c2048_308 = arith.constant 2048 : index
    %788 = vector.load %arg11[%c1_306, %c0_307, %c2048_308] : memref<2x32x4096xbf16, #tpu.memory_space<vmem>>, vector<1x32x2048xbf16>
    %789 = vector.shape_cast %788 : vector<1x32x2048xbf16> to vector<32x2048xbf16>
    %790 = arith.truncf %779 : vector<16x32xf32> to vector<16x32xbf16>
    %cst_309 = arith.constant dense<0.000000e+00> : vector<16x2048xf32>
    %791 = tpu.matmul %790, %787, %cst_309 {dimension_numbers = #tpu.dot_dimension_numbers<[1], [0], [0], [1], [0, 0, 1, 1], [], []>} : vector<16x32xbf16>, vector<32x2048xbf16>, vector<16x2048xf32> -> vector<16x2048xf32>
    %c3_310 = arith.constant 3 : index
    %c0_311 = arith.constant 0 : index
    %792 = vector.load %arg8[%c3_310, %c0_311] : memref<4x2048xf32, #tpu.memory_space<vmem>>, vector<1x2048xf32>
    %793 = vector.broadcast %792 : vector<1x2048xf32> to vector<16x2048xf32>
    %794 = arith.addf %791, %793 : vector<16x2048xf32>
    %cst_312 = arith.constant 0.000000e+00 : f32
    %795 = vector.broadcast %cst_312 : f32 to vector<16x2048xf32>
    %796 = arith.maximumf %794, %795 : vector<16x2048xf32>
    %797 = arith.truncf %796 : vector<16x2048xf32> to vector<16x2048xbf16>
    %cst_313 = arith.constant dense<0.000000e+00> : vector<16x32xf32>
    %798 = tpu.matmul %797, %789, %cst_313 {dimension_numbers = #tpu.dot_dimension_numbers<[1], [1], [0], [0], [0, 0, 1, 0], [], []>} : vector<16x2048xbf16>, vector<32x2048xbf16>, vector<16x32xf32> -> vector<16x32xf32>
    %c38 = arith.constant 38 : index
    %c0_314 = arith.constant 0 : index
    %799 = vector.load %arg7[%c38, %c0_314] : memref<41x128xf32, #tpu.memory_space<vmem>>, vector<1x32xf32>
    %800 = vector.broadcast %799 : vector<1x32xf32> to vector<16x32xf32>
    %801 = arith.addf %798, %800 : vector<16x32xf32>
    %802 = arith.addf %779, %801 : vector<16x32xf32>
    %cst_315 = arith.constant dense<0.000000e+00> : vector<16xf32>
    %803 = vector.multi_reduction <add>, %802, %cst_315 [1] : vector<16x32xf32> to vector<16xf32>
    %804 = vector.shape_cast %803 : vector<16xf32> to vector<16x1xf32>
    %cst_316 = arith.constant 3.200000e+01 : f32
    %805 = vector.broadcast %cst_316 : f32 to vector<16x1xf32>
    %806 = arith.divf %804, %805 : vector<16x1xf32>
    %807 = vector.broadcast %806 : vector<16x1xf32> to vector<16x32xf32>
    %808 = arith.subf %802, %807 : vector<16x32xf32>
    %809 = arith.mulf %808, %808 : vector<16x32xf32>
    %cst_317 = arith.constant dense<0.000000e+00> : vector<16xf32>
    %810 = vector.multi_reduction <add>, %809, %cst_317 [1] : vector<16x32xf32> to vector<16xf32>
    %811 = vector.shape_cast %810 : vector<16xf32> to vector<16x1xf32>
    %cst_318 = arith.constant 3.200000e+01 : f32
    %812 = vector.broadcast %cst_318 : f32 to vector<16x1xf32>
    %813 = arith.divf %811, %812 : vector<16x1xf32>
    %cst_319 = arith.constant 9.99999974E-6 : f32
    %814 = vector.broadcast %cst_319 : f32 to vector<16x1xf32>
    %815 = arith.addf %813, %814 : vector<16x1xf32>
    %816 = math.rsqrt %815 : vector<16x1xf32>
    %817 = vector.broadcast %816 : vector<16x1xf32> to vector<16x32xf32>
    %818 = arith.mulf %808, %817 : vector<16x32xf32>
    %c39 = arith.constant 39 : index
    %c0_320 = arith.constant 0 : index
    %819 = vector.load %arg7[%c39, %c0_320] : memref<41x128xf32, #tpu.memory_space<vmem>>, vector<1x32xf32>
    %820 = vector.broadcast %819 : vector<1x32xf32> to vector<16x32xf32>
    %821 = arith.mulf %818, %820 : vector<16x32xf32>
    %c40 = arith.constant 40 : index
    %c0_321 = arith.constant 0 : index
    %822 = vector.load %arg7[%c40, %c0_321] : memref<41x128xf32, #tpu.memory_space<vmem>>, vector<1x32xf32>
    %823 = vector.broadcast %822 : vector<1x32xf32> to vector<16x32xf32>
    %824 = arith.addf %821, %823 : vector<16x32xf32>
    %825 = arith.truncf %824 : vector<16x32xf32> to vector<16x32xbf16>
    %c0_322 = arith.constant 0 : index
    %c1792 = arith.constant 1792 : index
    %826 = vector.load %arg6[%c0_322, %c1792] : memref<32x1920xbf16, #tpu.memory_space<vmem>>, vector<32x128xbf16>
    %cst_323 = arith.constant dense<0.000000e+00> : vector<16x128xf32>
    %827 = tpu.matmul %825, %826, %cst_323 {dimension_numbers = #tpu.dot_dimension_numbers<[1], [0], [0], [1], [0, 0, 1, 1], [], []>} : vector<16x32xbf16>, vector<32x128xbf16>, vector<16x128xf32> -> vector<16x128xf32>
    %c2_324 = arith.constant 2 : index
    %c0_325 = arith.constant 0 : index
    %828 = vector.load %arg7[%c2_324, %c0_325] : memref<41x128xf32, #tpu.memory_space<vmem>>, vector<1x128xf32>
    %829 = vector.broadcast %828 : vector<1x128xf32> to vector<16x128xf32>
    %830 = arith.addf %827, %829 : vector<16x128xf32>
    %c0_326 = arith.constant 0 : index
    %c0_327 = arith.constant 0 : index
    %831 = vector.load %arg10[%c0_326, %c0_327] : memref<16x128xf32, #tpu.memory_space<vmem>>, vector<16x128xf32>
    tpu.vector_store %arg10[%c0_326, %c0_327], %830 {strides = array<i32>} : memref<16x128xf32, #tpu.memory_space<vmem>>, vector<16x128xf32>,
    return
  }
  func.func @transform_0(%arg0: i32) -> (i32, i32) {
    %c0_i32 = arith.constant 0 : i32
    %c0_i32_0 = arith.constant 0 : i32
    %c0_i32_1 = arith.constant 0 : i32
    return %c0_i32, %c0_i32_0 : i32, i32
  }
  func.func @transform_1(%arg0: i32) -> (i32, i32) {
    %c0_i32 = arith.constant 0 : i32
    %c0_i32_0 = arith.constant 0 : i32
    %c0_i32_1 = arith.constant 0 : i32
    return %c0_i32, %c0_i32_0 : i32, i32
  }
  func.func @transform_2(%arg0: i32) -> (i32, i32) {
    %c0_i32 = arith.constant 0 : i32
    %c0_i32_0 = arith.constant 0 : i32
    %c0_i32_1 = arith.constant 0 : i32
    return %c0_i32, %c0_i32_0 : i32, i32
  }
  func.func @transform_3(%arg0: i32) -> (i32, i32) {
    %c0_i32 = arith.constant 0 : i32
    %c0_i32_0 = arith.constant 0 : i32
    %c0_i32_1 = arith.constant 0 : i32
    return %c0_i32, %c0_i32_0 : i32, i32
  }
  func.func @transform_4(%arg0: i32) -> (i32, i32) {
    %c0_i32 = arith.constant 0 : i32
    %c0_i32_0 = arith.constant 0 : i32
    %c0_i32_1 = arith.constant 0 : i32
    return %c0_i32, %c0_i32_0 : i32, i32
  }
  func.func @transform_5(%arg0: i32) -> (i32, i32) {
    %c0_i32 = arith.constant 0 : i32
    %c0_i32_0 = arith.constant 0 : i32
    %c0_i32_1 = arith.constant 0 : i32
    return %c0_i32, %c0_i32_0 : i32, i32
  }
  func.func @transform_6(%arg0: i32) -> (i32, i32) {
    %c0_i32 = arith.constant 0 : i32
    %c0_i32_0 = arith.constant 0 : i32
    %c0_i32_1 = arith.constant 0 : i32
    return %c0_i32, %c0_i32_0 : i32, i32
  }
  func.func @transform_7(%arg0: i32) -> (i32, i32) {
    %c0_i32 = arith.constant 0 : i32
    %c0_i32_0 = arith.constant 0 : i32
    %c0_i32_1 = arith.constant 0 : i32
    return %c0_i32, %c0_i32_0 : i32, i32
  }
  func.func @transform_9(%arg0: i32) -> (i32, i32) {
    %c0_i32 = arith.constant 0 : i32
    %c0_i32_0 = arith.constant 0 : i32
    %c0_i32_1 = arith.constant 0 : i32
    return %c0_i32, %c0_i32_0 : i32, i32
  }
}

</mosaic_0001>

<bundles_post_ra>
// kernel: transformer_forward.1
= control target key start
LH: loop header
LB: loop body
LE: loop exit
PB: predicated region body
PF: predicated region fallthrough
CT: control target
= control target key end

     0   :  { %14 = vsyncpa [#allocation5], 0  ;;  %s14911_s30 = smov [#allocation4]   ;;  %s16697_s0 = inlined_call_operand.vmem [shape: f32[16,16], index: 0, kind: input, shape index: {}]   ;;  %s16698_s1 = inlined_call_operand.vmem [shape: f32[16,16], index: 1, kind: input, shape index: {}]   ;;  %s16699_s2 = inlined_call_operand.vmem [shape: f32[16,32], index: 2, kind: input, shape index: {}, may-alias: {2,3}]   ;;  %s16700_s3 = inlined_call_operand.vmem [shape: f32[16,32], index: 3, kind: input, shape index: {}, may-alias: {2,3}]   ;;  %s16701_s4 = inlined_call_operand.vmem [shape: bf16[32,32], index: 4, kind: input, shape index: {}]   ;;  %s16702_s5 = inlined_call_operand.hbm [shape: bf16[32,1920], index: 5, kind: input, shape index: {}]   ;;  %s16703_s6 = inlined_call_operand.vmem [shape: f32[41,128], index: 6, kind: input, shape index: {}]   ;;  %s16704_s7 = inlined_call_operand.vmem [shape: f32[4,2048], index: 7, kind: input, shape index: {}]   ;;  %s16705_s8 = inlined_call_operand.hbm [shape: bf16[4,32,4096], index: 8, kind: input, shape index: {}]   ;;  %s16706_s9 = inlined_call_operand.vmem [shape: f32[16,128], index: 9, kind: output, shape index: {}]  }
   0x1   :  { %s30_s10 = sshll.u32 %s14911_s30, 4  ;;  %s14879_s13 = scalar_lea.hbm %s16702_s5, 3840  ;;  %s31_s10 = int_to_ptr.vmem [resolvable:$true] %s30_s10 }
   0x2   :  { %p14880_p0 = scmp.ne.s32.totalorder %s16702_s5, %s14879_s13  ;;  %p14883_p1 = scmp.lt.u32.totalorder %s14879_s13, %s16702_s5 }
   0x4   :  { %p14885_p2 = pnand %p14883_p1, %p14880_p0 }
   0x6   :  { %14888 = shalt.err (!%p14885_p2)
}
   0x7   :  { %s14889_s18 = scalar_lea.vmem %s31_s10, 3840  ;;  %p14894_p4 = scmp.lt.s32.totalorder %s31_s10, %s31_s10 }
   0x8   :  { %p14890_p3 = scmp.ne.s32.totalorder %s31_s10, %s14889_s18  ;;  %p14895_p5 = scmp.lt.s32.totalorder %s14889_s18, %s14889_s18 }
   0xa   :  { %p14896_p6 = por %p14895_p5, %p14894_p4 }
   0xc   :  { %p14897_p7 = pnand %p14896_p6, %p14890_p3 }
   0xe   :  { %14900 = shalt.err (!%p14897_p7)
}
   0xf   :  { %s14912_s19 = smov 960   ;;  %s14913_s20 = smov 60  }
  0x10   :  { %36 = dma.hbm_to_vmem [thread:$0]  %s16702_s5, 3840, %s31_s10, [#allocation5], %s14912_s19, %s14912_s19, %s14913_s20  }
  0x11   :  { %14901 = dma.done.wait [#allocation5], 3840  }
  0x12   :  { %14902 = vsyncadd [#allocation5], 4294963456  ;;  %s49_s23 = sld [smem:[#allocation0]]   ;;  %s14914_s24 = smov 4096   ;;  %v14915_v0 = vmov 0.0   ;;  %vm14916_vm0 = vmmov 0  }
  0x13   :  { %61 = sst [smem:[#allocation7]] %s14914_s24  ;;  %13879 = vmatprep.subr.bf16.mxu0 %v14915_v0  ;;  %13881 = vmatprep.mubr.msk.bf16.mxu0 %vm14916_vm0, %v14915_v0  ;;  %s14917_s5 = smov 32   ;;  %vm96_vm1 = vcmask 130048   ;;  %vm204_vm2 = vcmask 261120   ;;  %vm252_vm3 = vcmask 64512   ;;  %vm1596_vm4 = vcmask 195584  }
  0x14   :  { %63 = sst [smem:[#allocation7 + $0x1]] %s14914_s24  ;;  %13885 = vmatprep.subr.bf16.mxu1 %v14915_v0  ;;  %13889 = vmatprep.mubr.msk.bf16.mxu1 %vm14916_vm0, %v14915_v0  ;;  %s14918_s25 = smov 64  }
  0x15   :  { %65 = sst [smem:[#allocation7 + $0x2]] %s14917_s5  ;;  %s16719_s26 = smov 128  }
  0x16   :  { %67 = sst [smem:[#allocation7 + $0x3]] %s14918_s25  ;;  %s16718_s27 = smov 2  }
  0x17   :  { %69 = sst [smem:[#allocation7 + $0x4]] %s16719_s26  ;;  %s16717_s29 = smov 2048  }
  0x18   :  { %71 = sst [smem:[#allocation7 + $0x5]] %s16718_s27  ;;  %s13355_s28 = sshll.u32 %s49_s23, 26 }
  0x19   :  { %73 = sst [smem:[#allocation7 + $0x6]] %s16717_s29  ;;  %s15020_s30 = sadd.s32 134217728, %s13355_s28 }
  0x1a   :  { %75 = sst [smem:[#allocation7 + $0x7]] %s14918_s25  ;;  %s16716_s10 = smov 4  }
  0x1b   :  { %77 = sst [smem:[#allocation7 + $0x8]] %s16716_s10  ;;  %s14923_s11 = smov [#allocation2]  }
  0x1c   :  { %s15024_s12 = sshll.u32 %s14923_s11, 4  ;;  %s14924_s13 = smov [#allocation3]   ;;  %s58_s12 = int_to_ptr.vmem [resolvable:$true] %s15024_s12 }
  0x1d   :  { %s14925_s14 = smov [#allocation6]   ;;  %s145_s19 = scalar_lea.hbm %s16705_s8, 8192 }
  0x1e   :  { %79 = dma.general %s16705_s8, 8192, %s58_s12, %s14924_s13, %s14925_s14, [#allocation7], %s15020_s30, 0  }
  0x1f   :  { %163 = sst [smem:[#allocation9]] %s14914_s24  ;;  %s14926_s20 = smov [#allocation2 + $0x200]   ;;  %v14540_v1 = vld [vmem:[%s16701_s4] sm:$0xff]   ;;  %v83_v3 = vld [vmem:[%s16697_s0 + $0x8] sm:$0xff] }
  0x20   :  { %165 = sst [smem:[#allocation9 + $0x1]] %s14914_s24  ;;  %s15041_s21 = sshll.u32 %s14926_s20, 4  ;;  %v82_v2 = vld [vmem:[%s16697_s0] sm:$0xff]  ;;  %13880 = vmatpush3.bf16.msra.mxu0 %v14540_v1  ;;  %v142_v7 = vld [vmem:[%s16699_s2 + $0x8] sm:$0xff]  ;;  %s16709_s21 = int_to_ptr.vmem [resolvable:$true] %s15041_s21 }
  0x21   :  { %167 = sst [smem:[#allocation9 + $0x2]] %s14917_s5  ;;  %v13357_v4 = vld [vmem:[%s16703_s6] ss:$0 sm:$0xff]  ;;  %v84_v5 = vpack.c.bf16 %v83_v3, %v82_v2  ;;  %s16707_s28 = smov [#allocation3 + $0x1]   ;;  %13893 = vmatprep.subr.mxu0 %v14915_v0 }
  0x22   :  { %169 = sst [smem:[#allocation9 + $0x3]] %s14918_s25  ;;  %v141_v6 = vld [vmem:[%s16699_s2] sm:$0xff]  ;;  %s14928_s11 = smov [#allocation8]  }
  0x23   :  { %16724 = sst [smem:[#allocation19_spill]] %s15041_s21  ;;  %13882 = vmatmul.mubr.msk.bf16.vlgmr.msra.gmra.mrb[0].mxu0 %vm96_vm1, %v84_v5  ;;  %s14930_s14 = smov 88  }
  0x24   :  { %171 = sst [smem:[#allocation9 + $0x4]] %s16719_s26  ;;  %13895 = vmatprep.mubr.msk.f32.mxu0 %vm14916_vm0, %v14915_v0  ;;  %s14931_s15 = smov 120  }
  0x25   :  { %173 = sst [smem:[#allocation9 + $0x5]] %s16718_s27  ;;  %s14932_s16 = smov 56  }
  0x26   :  { %175 = sst [smem:[#allocation9 + $0x6]] %s16717_s29  ;;  %s14933_s17 = smov 80  }
  0x27   :  { %177 = sst [smem:[#allocation9 + $0x7]] %s14918_s25  ;;  %s14934_s18 = smov 112  }
  0x28   :  { %179 = sst [smem:[#allocation9 + $0x8]] %s16716_s10  ;;  %s14935_s20 = smov 48  }
  0x29   :  { %181 = dma.general %s145_s19, 8192, %s16709_s21, %s16707_s28, %s14928_s11, [#allocation9], %s15020_s30, 0  }
  0x2a   :  { %v14541_v8 = vld [vmem:[#allocation4] ss:$60 sps:$4 sm:$0xff]   ;;  %v14542_v9 = vld [vmem:[#allocation4 + $0x78] ss:$60 sps:$4 sm:$0xff]   ;;  %s14929_s19 = smov 96   ;;  %s14936_s22 = smov 72  }
  0x2b   :  { %13886 = vmatpush3.bf16.msra.mxu1 %v14541_v8  ;;  %v13362_v19 = vld [vmem:[%s16703_s6 + $0x3] ss:$0 sm:$0xff]  ;;  %s16722_s23 = smov 104   ;;  %s16720_s11 = smov 40  }
  0x2c   :  { %13887 = vmatprep.subr.bf16.mxu1 %v14915_v0  ;;  %s16714_s0 = smov 8   ;;  %s16712_s2 = smov 16  }
  0x2d   :  { %s16710_s28 = smov 24  }
  0x2f   :  { %13888 = vmatpush3.bf16.msra.mxu1 %v14542_v9 }
  0x30   :  { %13903 = vmatprep.subr.mxu1 %v14915_v0 }
  0xf6   :  { %v134_v10 = vpop.f32.mrb[0].mxu0 }
  0xf7   :  { %v135_v11 = vadd.f32 %v13357_v4, %v134_v10  ;;  %v13883_v12 = vpop.f32.mrb[1].mxu0 }
  0xf8   :  { %v137_v13 = vpop.f32.mrb[2].mxu0 }
  0xf9   :  { %v138_v14 = vadd.f32 %v13357_v4, %v137_v13  ;;  %v13884_v15 = vpop.f32.mrb[3].mxu0  ;;  %v15077_v16 = vadd.f32 %v141_v6, %v135_v11 }
  0xfb   :  { %v15079_v17 = vadd.f32 %v142_v7, %v138_v14 }
  0xfd   :  { %v182_v18 = vpack.c.bf16 %v15079_v17, %v15077_v16 }
  0xff   :  { %13890 = vmatmul.mubr.msk.bf16.vlgmr.msra.gmra.mrb[0].mxu1 %vm204_vm2, %v182_v18 }
 0x100   :  { %13905 = vmatprep.mubr.msk.f32.mxu1 %vm14916_vm0, %v14915_v0 }
 0x1d2   :  { %v242_v20 = vpop.f32.mrb[0].mxu1 }
 0x1d3   :  { %v15089_v21 = vadd.f32 %v13362_v19, %v242_v20  ;;  %v13891_v22 = vpop.f32.mrb[1].mxu1 }
 0x1d4   :  { %v245_v23 = vpop.f32.mrb[2].mxu1 }
 0x1d5   :  { %250 = vrot.lane.b32.xlu0 %v15089_v21, %s14929_s19  ;;  %v13892_v24 = vpop.f32.mrb[3].mxu1  ;;  %v15093_v25 = vadd.f32 %v13362_v19, %v245_v23 }
 0x1d9   :  { %328 = vrot.lane.b32.xlu0 %v15093_v25, %s14929_s19 }
 0x247   :  { %v251_v26 = vpop.permute.xlu0 %250 }
 0x248   :  { %13894 = vmatpush3.xpose.msk.msra.mxu0 %vm252_vm3, %v251_v26 }
 0x249   :  { %13898 = vmatprep.subr.mxu0 %v14915_v0 }
 0x24b   :  { %13896 = vmatmul.mubr.msk.f32.vlgmr.msra.gmra.mrb[4].mxu0 %vm252_vm3, %v15089_v21  ;;  %v329_v27 = vpop.permute.xlu0 %328 }
 0x24c   :  { %13899 = vmatpush3.xpose.msk.msra.mxu0 %vm252_vm3, %v329_v27  ;;  %13900 = vmatprep.mubr.msk.f32.mxu0 %vm14916_vm0, %v14915_v0 }
 0x24d   :  { %13908 = vmatprep.subr.mxu0 %v14915_v0 }
 0x24f   :  { %13901 = vmatmul.mubr.msk.f32.vlgmr.msra.gmra.mrb[6].mxu0 %vm252_vm3, %v15093_v25 }
 0x250   :  { %13910 = vmatprep.mubr.msk.f32.mxu0 %vm14916_vm0, %v14915_v0 }
 0x31e   :  { %v323_v28 = vpop.f32.mrb[4].mxu0 }
 0x31f   :  { %v13897_v29 = vpop.f32.mrb[5].mxu0  ;;  %v404_v30 = vsel %vm252_vm3, %v323_v28, -inf }
 0x320   :  { %405 = vmax.xlane.f32.xlu1 %v404_v30 }
 0x322   :  { %v400_v31 = vpop.f32.mrb[6].mxu0 }
 0x323   :  { %v13902_v32 = vpop.f32.mrb[7].mxu0  ;;  %v407_v33 = vsel %vm252_vm3, %v400_v31, -inf }
 0x324   :  { %408 = vmax.xlane.f32.xlu1 %v407_v33 }
 0x335   :  { %426 = vrot.lane.b32.xlu1 %v15089_v21, %s14918_s25 }
 0x339   :  { %502 = vrot.lane.b32.xlu1 %v15093_v25, %s14918_s25 }
 0x33d   :  { %580 = vrot.lane.b32.xlu1 %v15089_v21, %s14930_s14 }
 0x341   :  { %658 = vrot.lane.b32.xlu1 %v15093_v25, %s14930_s14 }
 0x3ad   :  { %v406_v34 = vpop.xlane.xlu1 %405 }
 0x3ae   :  { %v410_v35 = vsub.f32 %v323_v28, %v406_v34 }
 0x3b0   :  { %v412_v36 = vmul.f32 1.442695, %v410_v35 }
 0x3b1   :  { %v409_v37 = vpop.xlane.xlu1 %408 }
 0x3b2   :  { %14545 = vpow2.f32 %v412_v36  ;;  %v411_v38 = vsub.f32 %v400_v31, %v409_v37 }
 0x3b4   :  { %v414_v39 = vmul.f32 1.442695, %v411_v38 }
 0x3b5   :  { %v427_v40 = vpop.permute.xlu1 %426 }
 0x3b6   :  { %14547 = vpow2.f32 %v414_v39  ;;  %13904 = vmatpush3.msra.mxu1 %v427_v40 }
 0x3b7   :  { %13913 = vmatprep.subr.mxu1 %v14915_v0 }
 0x3b9   :  { %v503_v41 = vpop.permute.xlu1 %502 }
 0x3ba   :  { %13909 = vmatpush3.msra.mxu0 %v503_v41 }
 0x3bb   :  { %13918 = vmatprep.subr.mxu0 %v14915_v0 }
 0x3bc   :  { %v14546_v42 = vpop.eup %14545 }
 0x3bd   :  { %v416_v43 = vsel %vm252_vm3, %v14546_v42, 0.0  ;;  %v581_v46 = vpop.permute.xlu1 %580 }
 0x3be   :  { %417 = vadd.xlane.f32.xlu0 %v416_v43 }
 0x3c0   :  { %v14548_v44 = vpop.eup %14547 }
 0x3c1   :  { %v419_v45 = vsel %vm252_vm3, %v14548_v44, 0.0  ;;  %v659_v47 = vpop.permute.xlu1 %658 }
 0x3c2   :  { %420 = vadd.xlane.f32.xlu1 %v419_v45 }
 0x3d3   :  { %656 = vrot.lane.b32.xlu1 %v15093_v25, %s14931_s15 }
 0x3d4   :  { %578 = vrot.lane.b32.xlu0 %v15089_v21, %s14931_s15 }
 0x44b   :  { %v418_v48 = vpop.xlane.xlu0 %417 }
 0x44c   :  { %14549 = vrcp.f32 %v418_v48 }
 0x44f   :  { %v421_v49 = vpop.xlane.xlu1 %420  ;;  %v579_v54 = vpop.permute.xlu0 %578 }
 0x450   :  { %14551 = vrcp.f32 %v421_v49 }
 0x453   :  { %v657_v55 = vpop.permute.xlu1 %656 }
 0x456   :  { %v14550_v50 = vpop.eup %14549 }
 0x457   :  { %v423_v51 = vmul.f32 %v14550_v50, %v14546_v42 }
 0x459   :  { %13906 = vmatmul.mubr.msk.f32.vlgmr.msra.gmra.mrb[4].mxu1 %vm252_vm3, %v423_v51 }
 0x45a   :  { %v14552_v52 = vpop.eup %14551  ;;  %13914 = vmatpush3.xpose.msk.msra.mxu1 %vm252_vm3, %v581_v46  ;;  %13915 = vmatprep.mubr.msk.f32.mxu1 %vm14916_vm0, %v14915_v0 }
 0x45b   :  { %v425_v53 = vmul.f32 %v14552_v52, %v14548_v44  ;;  %13923 = vmatprep.subr.mxu1 %v14915_v0 }
 0x45d   :  { %13911 = vmatmul.mubr.msk.f32.vlgmr.msra.gmra.mrb[8].mxu0 %vm252_vm3, %v425_v53  ;;  %13916 = vmatmul.mubr.msk.f32.vlgmr.msra.gmra.mrb[6].mxu1 %vm252_vm3, %v579_v54 }
 0x45e   :  { %13919 = vmatpush3.xpose.msk.msra.mxu0 %vm252_vm3, %v659_v47  ;;  %13920 = vmatprep.mubr.msk.f32.mxu0 %vm14916_vm0, %v14915_v0 }
 0x45f   :  { %13928 = vmatprep.subr.mxu0 %v14915_v0  ;;  %13925 = vmatprep.mubr.msk.f32.mxu1 %vm14916_vm0, %v14915_v0 }
 0x461   :  { %13921 = vmatmul.mubr.msk.f32.vlgmr.msra.gmra.mrb[10].mxu0 %vm252_vm3, %v657_v55 }
 0x462   :  { %13930 = vmatprep.mubr.msk.f32.mxu0 %vm14916_vm0, %v14915_v0 }
 0x52c   :  { %v15143_v56 = vpop.f32.mrb[4].mxu1 }
 0x52d   :  { %v13907_v57 = vpop.f32.mrb[5].mxu1 }
 0x530   :  { %v15145_v58 = vpop.f32.mrb[8].mxu0  ;;  %v652_v59 = vpop.f32.mrb[6].mxu1 }
 0x531   :  { %v13912_v60 = vpop.f32.mrb[9].mxu0  ;;  %v13917_v61 = vpop.f32.mrb[7].mxu1  ;;  %v734_v62 = vsel %vm252_vm3, %v652_v59, -inf }
 0x532   :  { %735 = vmax.xlane.f32.xlu1 %v734_v62 }
 0x534   :  { %v730_v63 = vpop.f32.mrb[10].mxu0 }
 0x535   :  { %v13922_v1 = vpop.f32.mrb[11].mxu0  ;;  %v737_v2 = vsel %vm252_vm3, %v730_v63, -inf }
 0x536   :  { %738 = vmax.xlane.f32.xlu0 %v737_v2 }
 0x543   :  { %756 = vrot.lane.b32.xlu1 %v15089_v21, %s14932_s16 }
 0x547   :  { %910 = vrot.lane.b32.xlu1 %v15089_v21, %s14933_s17 }
 0x54b   :  { %988 = vrot.lane.b32.xlu1 %v15093_v25, %s14933_s17 }
 0x54c   :  { %832 = vrot.lane.b32.xlu0 %v15093_v25, %s14932_s16 }
 0x550   :  { %908 = vrot.lane.b32.xlu0 %v15089_v21, %s14934_s18 }
 0x5bf   :  { %v736_v3 = vpop.xlane.xlu1 %735 }
 0x5c0   :  { %v740_v4 = vsub.f32 %v652_v59, %v736_v3 }
 0x5c2   :  { %v742_v5 = vmul.f32 1.442695, %v740_v4 }
 0x5c3   :  { %v757_v6 = vpop.permute.xlu1 %756  ;;  %v739_v7 = vpop.xlane.xlu0 %738 }
 0x5c4   :  { %14553 = vpow2.f32 %v742_v5  ;;  %v741_v8 = vsub.f32 %v730_v63, %v739_v7  ;;  %13924 = vmatpush3.msra.mxu1 %v757_v6 }
 0x5c5   :  { %13933 = vmatprep.subr.mxu1 %v14915_v0 }
 0x5c6   :  { %v744_v9 = vmul.f32 1.442695, %v741_v8 }
 0x5c7   :  { %v833_v10 = vpop.permute.xlu0 %832  ;;  %v911_v15 = vpop.permute.xlu1 %910 }
 0x5c8   :  { %14555 = vpow2.f32 %v744_v9  ;;  %13929 = vmatpush3.msra.mxu0 %v833_v10 }
 0x5c9   :  { %13938 = vmatprep.subr.mxu0 %v14915_v0 }
 0x5cb   :  { %v989_v18 = vpop.permute.xlu1 %988  ;;  %v909_v27 = vpop.permute.xlu0 %908 }
 0x5ce   :  { %v14554_v11 = vpop.eup %14553 }
 0x5cf   :  { %v746_v12 = vsel %vm252_vm3, %v14554_v11, 0.0 }
 0x5d0   :  { %747 = vadd.xlane.f32.xlu1 %v746_v12 }
 0x5d2   :  { %v14556_v13 = vpop.eup %14555 }
 0x5d3   :  { %v749_v14 = vsel %vm252_vm3, %v14556_v13, 0.0 }
 0x5d4   :  { %750 = vadd.xlane.f32.xlu1 %v749_v14 }
 0x5e5   :  { %986 = vrot.lane.b32.xlu1 %v15093_v25, %s14934_s18 }
 0x65d   :  { %v748_v19 = vpop.xlane.xlu1 %747 }
 0x65e   :  { %14557 = vrcp.f32 %v748_v19 }
 0x661   :  { %v751_v20 = vpop.xlane.xlu1 %750 }
 0x662   :  { %14559 = vrcp.f32 %v751_v20 }
 0x665   :  { %v987_v28 = vpop.permute.xlu1 %986 }
 0x668   :  { %v14558_v22 = vpop.eup %14557 }
 0x669   :  { %v753_v23 = vmul.f32 %v14558_v22, %v14554_v11 }
 0x66b   :  { %13926 = vmatmul.mubr.msk.f32.vlgmr.msra.gmra.mrb[8].mxu1 %vm252_vm3, %v753_v23 }
 0x66c   :  { %v14560_v24 = vpop.eup %14559  ;;  %13934 = vmatpush3.xpose.msk.msra.mxu1 %vm252_vm3, %v911_v15  ;;  %13935 = vmatprep.mubr.msk.f32.mxu1 %vm14916_vm0, %v14915_v0 }
 0x66d   :  { %v755_v26 = vmul.f32 %v14560_v24, %v14556_v13  ;;  %13943 = vmatprep.subr.mxu1 %v14915_v0 }
 0x66f   :  { %13931 = vmatmul.mubr.msk.f32.vlgmr.msra.gmra.mrb[12].mxu0 %vm252_vm3, %v755_v26  ;;  %13936 = vmatmul.mubr.msk.f32.vlgmr.msra.gmra.mrb[10].mxu1 %vm252_vm3, %v909_v27 }
 0x670   :  { %13939 = vmatpush3.xpose.msk.msra.mxu0 %vm252_vm3, %v989_v18  ;;  %13940 = vmatprep.mubr.msk.f32.mxu0 %vm14916_vm0, %v14915_v0 }
 0x671   :  { %13948 = vmatprep.subr.mxu0 %v14915_v0  ;;  %13945 = vmatprep.mubr.msk.f32.mxu1 %vm14916_vm0, %v14915_v0 }
 0x673   :  { %13941 = vmatmul.mubr.msk.f32.vlgmr.msra.gmra.mrb[14].mxu0 %vm252_vm3, %v987_v28 }
 0x674   :  { %13950 = vmatprep.mubr.msk.f32.mxu0 %vm14916_vm0, %v14915_v0 }
 0x73e   :  { %v15181_v29 = vpop.f32.mrb[8].mxu1 }
 0x73f   :  { %v13927_v30 = vpop.f32.mrb[9].mxu1 }
 0x742   :  { %v15183_v31 = vpop.f32.mrb[12].mxu0  ;;  %v982_v32 = vpop.f32.mrb[10].mxu1 }
 0x743   :  { %v14525_v33 = vpack.i.bf16 %v15183_v31, %v15181_v29  ;;  %v13932_v34 = vpop.f32.mrb[13].mxu0  ;;  %v13937_v35 = vpop.f32.mrb[11].mxu1  ;;  %v1064_v36 = vsel %vm252_vm3, %v982_v32, -inf }
 0x744   :  { %1065 = vmax.xlane.f32.xlu0 %v1064_v36 }
 0x746   :  { %v1060_v37 = vpop.f32.mrb[14].mxu0 }
 0x747   :  { %v13942_v38 = vpop.f32.mrb[15].mxu0  ;;  %v1067_v39 = vsel %vm252_vm3, %v1060_v37, -inf }
 0x748   :  { %1068 = vmax.xlane.f32.xlu1 %v1067_v39 }
 0x759   :  { %1086 = vrot.lane.b32.xlu1 %v15089_v21, %s14935_s20 }
 0x75a   :  { %1162 = vrot.lane.b32.xlu0 %v15093_v25, %s14935_s20 }
 0x75d   :  { %1240 = vrot.lane.b32.xlu1 %v15089_v21, %s14936_s22 }
 0x761   :  { %1318 = vrot.lane.b32.xlu1 %v15093_v25, %s14936_s22 }
 0x765   :  { %1316 = vrot.lane.b32.xlu1 %v15093_v25, %s16722_s23 }
 0x7d1   :  { %v1066_v40 = vpop.xlane.xlu0 %1065 }
 0x7d2   :  { %v1070_v41 = vsub.f32 %v982_v32, %v1066_v40 }
 0x7d4   :  { %v1072_v42 = vmul.f32 1.442695, %v1070_v41 }
 0x7d5   :  { %v1163_v43 = vpop.permute.xlu0 %1162  ;;  %v1069_v44 = vpop.xlane.xlu1 %1068 }
 0x7d6   :  { %14561 = vpow2.f32 %v1072_v42  ;;  %v1071_v45 = vsub.f32 %v1060_v37, %v1069_v44  ;;  %13949 = vmatpush3.msra.mxu0 %v1163_v43 }
 0x7d7   :  { %13958 = vmatprep.subr.mxu0 %v14915_v0 }
 0x7d8   :  { %v1074_v46 = vmul.f32 1.442695, %v1071_v45 }
 0x7d9   :  { %v1087_v47 = vpop.permute.xlu1 %1086 }
 0x7da   :  { %14563 = vpow2.f32 %v1074_v46  ;;  %13944 = vmatpush3.msra.mxu1 %v1087_v47 }
 0x7db   :  { %13953 = vmatprep.subr.mxu1 %v14915_v0 }
 0x7dd   :  { %v1241_v54 = vpop.permute.xlu1 %1240 }
 0x7e0   :  { %v14562_v48 = vpop.eup %14561 }
 0x7e1   :  { %v1076_v49 = vsel %vm252_vm3, %v14562_v48, 0.0  ;;  %v1319_v60 = vpop.permute.xlu1 %1318 }
 0x7e2   :  { %1077 = vadd.xlane.f32.xlu0 %v1076_v49 }
 0x7e4   :  { %v14564_v50 = vpop.eup %14563 }
 0x7e5   :  { %v1079_v51 = vsel %vm252_vm3, %v14564_v50, 0.0  ;;  %v1317_v63 = vpop.permute.xlu1 %1316 }
 0x7e6   :  { %1080 = vadd.xlane.f32.xlu0 %v1079_v51 }
 0x7fc   :  { %1238 = vrot.lane.b32.xlu0 %v15089_v21, %s16722_s23 }
 0x86f   :  { %v1078_v52 = vpop.xlane.xlu0 %1077 }
 0x870   :  { %14565 = vrcp.f32 %v1078_v52 }
 0x873   :  { %v1081_v53 = vpop.xlane.xlu0 %1080 }
 0x874   :  { %14567 = vrcp.f32 %v1081_v53 }
 0x877   :  { %v1239_v62 = vpop.permute.xlu0 %1238 }
 0x87a   :  { %v14566_v55 = vpop.eup %14565 }
 0x87b   :  { %v1083_v57 = vmul.f32 %v14566_v55, %v14562_v48 }
 0x87d   :  { %13946 = vmatmul.mubr.msk.f32.vlgmr.msra.gmra.mrb[12].mxu1 %vm252_vm3, %v1083_v57 }
 0x87e   :  { %v14568_v59 = vpop.eup %14567  ;;  %13954 = vmatpush3.xpose.msk.msra.mxu1 %vm252_vm3, %v1241_v54  ;;  %13955 = vmatprep.mubr.msk.f32.mxu1 %vm14916_vm0, %v14915_v0 }
 0x87f   :  { %v1085_v61 = vmul.f32 %v14568_v59, %v14564_v50  ;;  %13963 = vmatprep.subr.mxu1 %v14915_v0 }
 0x881   :  { %13951 = vmatmul.mubr.msk.f32.vlgmr.msra.gmra.mrb[16].mxu0 %vm252_vm3, %v1085_v61  ;;  %13956 = vmatmul.mubr.msk.f32.vlgmr.msra.gmra.mrb[14].mxu1 %vm252_vm3, %v1239_v62 }
 0x882   :  { %13959 = vmatpush3.xpose.msk.msra.mxu0 %vm252_vm3, %v1319_v60  ;;  %13960 = vmatprep.mubr.msk.f32.mxu0 %vm14916_vm0, %v14915_v0 }
 0x883   :  { %13968 = vmatprep.subr.mxu0 %v14915_v0  ;;  %13965 = vmatprep.mubr.msk.f32.mxu1 %vm14916_vm0, %v14915_v0 }
 0x885   :  { %13961 = vmatmul.mubr.msk.f32.vlgmr.msra.gmra.mrb[18].mxu0 %vm252_vm3, %v1317_v63 }
 0x886   :  { %13970 = vmatprep.mubr.msk.f32.mxu0 %vm14916_vm0, %v14915_v0 }
 0x950   :  { %v1158_v1 = vpop.f32.mrb[12].mxu1 }
 0x951   :  { %v13947_v2 = vpop.f32.mrb[13].mxu1 }
 0x954   :  { %v1234_v3 = vpop.f32.mrb[16].mxu0  ;;  %v1312_v4 = vpop.f32.mrb[14].mxu1 }
 0x955   :  { %v14530_v5 = vpack.i.bf16 %v1234_v3, %v1158_v1  ;;  %v13952_v6 = vpop.f32.mrb[17].mxu0  ;;  %v13957_v7 = vpop.f32.mrb[15].mxu1  ;;  %v1394_v8 = vsel %vm252_vm3, %v1312_v4, -inf }
 0x956   :  { %1395 = vmax.xlane.f32.xlu0 %v1394_v8 }
 0x958   :  { %v1390_v9 = vpop.f32.mrb[18].mxu0 }
 0x959   :  { %v13962_v10 = vpop.f32.mrb[19].mxu0  ;;  %v1397_v11 = vsel %vm252_vm3, %v1390_v9, -inf }
 0x95a   :  { %1398 = vmax.xlane.f32.xlu1 %v1397_v11 }
 0x96b   :  { %1416 = vrot.lane.b32.xlu1 %v15089_v21, %s16720_s11 }
 0x96f   :  { %14526 = vrot.lane.b32.xlu1 %v14525_v33, %s16714_s0  ;;  %v14543_v33 = vld [vmem:[#allocation4 + $0x4] ss:$60 sps:$4 sm:$0xff]  }
 0x973   :  { %14531 = vrot.lane.b32.xlu1 %v14530_v5, %s16712_s2 }
 0x9e3   :  { %v1396_v12 = vpop.xlane.xlu0 %1395 }
 0x9e4   :  { %v1400_v13 = vsub.f32 %v1312_v4, %v1396_v12 }
 0x9e6   :  { %v1402_v14 = vmul.f32 1.442695, %v1400_v13 }
 0x9e7   :  { %v1399_v15 = vpop.xlane.xlu1 %1398 }
 0x9e8   :  { %14569 = vpow2.f32 %v1402_v14  ;;  %v1401_v18 = vsub.f32 %v1390_v9, %v1399_v15 }
 0x9ea   :  { %v1404_v19 = vmul.f32 1.442695, %v1401_v18 }
 0x9eb   :  { %v1417_v20 = vpop.permute.xlu1 %1416 }
 0x9ec   :  { %14571 = vpow2.f32 %v1404_v19  ;;  %13964 = vmatpush3.msra.mxu1 %v1417_v20  ;;  %v13394_v20 = vld [vmem:[%s16703_s6 + $0x5] ss:$0 sm:$0xff] }
 0x9ed   :  { %13973 = vmatprep.subr.bf16.mxu1 %v14915_v0 }
 0x9ef   :  { %v14527_v39 = vpop.permute.xlu1 %14526 }
 0x9f0   :  { %v14529_v41 = vunpack.i.h.bf16 %v14527_v39  ;;  %v14528_v42 = vunpack.i.l.bf16 %v14527_v39 }
 0x9f2   :  { %v14570_v21 = vpop.eup %14569  ;;  %v1593_v46 = vsel %vm252_vm3, %v15145_v58, %v14529_v41  ;;  %v1592_v47 = vsel %vm252_vm3, %v15143_v56, %v14528_v42  ;;  %v13390_v58 = vld [vmem:[%s16703_s6 + $0x4] ss:$0 sm:$0xff] }
 0x9f3   :  { %v1406_v22 = vsel %vm252_vm3, %v14570_v21, 0.0  ;;  %v14532_v40 = vpop.permute.xlu1 %14531 }
 0x9f4   :  { %1407 = vadd.xlane.f32.xlu0 %v1406_v22  ;;  %v14534_v43 = vunpack.i.h.bf16 %v14532_v40  ;;  %v14533_v44 = vunpack.i.l.bf16 %v14532_v40 }
 0x9f6   :  { %v14572_v23 = vpop.eup %14571  ;;  %v1594_v50 = vsel %vm96_vm1, %v1592_v47, %v14533_v44  ;;  %v1595_v51 = vsel %vm96_vm1, %v1593_v46, %v14534_v43 }
 0x9f7   :  { %v1409_v24 = vsel %vm252_vm3, %v14572_v23, 0.0 }
 0x9f8   :  { %1410 = vadd.xlane.f32.xlu0 %v1409_v24 }
 0xa0e   :  { %1492 = vrot.lane.b32.xlu0 %v15093_v25, %s16720_s11  ;;  %v14544_v25 = vld [vmem:[#allocation4 + $0x7c] ss:$60 sps:$4 sm:$0xff]  }
 0xa81   :  { %v1408_v26 = vpop.xlane.xlu0 %1407 }
 0xa82   :  { %14573 = vrcp.f32 %v1408_v26 }
 0xa85   :  { %v1411_v27 = vpop.xlane.xlu0 %1410 }
 0xa86   :  { %14575 = vrcp.f32 %v1411_v27 }
 0xa89   :  { %v1493_v28 = vpop.permute.xlu0 %1492 }
 0xa8a   :  { %13969 = vmatpush3.msra.mxu0 %v1493_v28 }
 0xa8c   :  { %v14574_v29 = vpop.eup %14573 }
 0xa8d   :  { %v1413_v30 = vmul.f32 %v14574_v29, %v14570_v21 }
 0xa8f   :  { %13966 = vmatmul.mubr.msk.f32.vlgmr.msra.gmra.mrb[16].mxu1 %vm252_vm3, %v1413_v30 }
 0xa90   :  { %v14576_v31 = vpop.eup %14575  ;;  %13977 = vmatprep.mubr.msk.bf16.mxu1 %vm14916_vm0, %v14915_v0  ;;  %13974 = vmatpush3.bf16.msra.mxu1 %v14543_v33 }
 0xa91   :  { %v1415_v32 = vmul.f32 %v14576_v31, %v14572_v23  ;;  %13975 = vmatprep.subr.bf16.mxu1 %v14915_v0  ;;  %v13395_v23 = vld [vmem:[%s16703_s6 + $0x6] ss:$0 sm:$0xff] }
 0xa93   :  { %13971 = vmatmul.mubr.msk.f32.vlgmr.msra.gmra.mrb[20].mxu0 %vm252_vm3, %v1415_v32 }
 0xa94   :  { %13976 = vmatpush3.bf16.msra.mxu1 %v14544_v25 }
 0xb62   :  { %v1488_v34 = vpop.f32.mrb[16].mxu1 }
 0xb63   :  { %v13967_v35 = vpop.f32.mrb[17].mxu1 }
 0xb66   :  { %v1564_v36 = vpop.f32.mrb[20].mxu0 }
 0xb67   :  { %v14535_v37 = vpack.i.bf16 %v1564_v36, %v1488_v34  ;;  %v13972_v38 = vpop.f32.mrb[21].mxu0 }
 0xb69   :  { %14536 = vrot.lane.b32.xlu0 %v14535_v37, %s16710_s28 }
 0xbdb   :  { %v14537_v45 = vpop.permute.xlu0 %14536 }
 0xbdc   :  { %v14539_v48 = vunpack.i.h.bf16 %v14537_v45  ;;  %v14538_v49 = vunpack.i.l.bf16 %v14537_v45 }
 0xbde   :  { %v1598_v52 = vsel %vm1596_vm4, %v1595_v51, %v14539_v48  ;;  %v1597_v53 = vsel %vm1596_vm4, %v1594_v50, %v14538_v49 }
 0xbdf   :  { %v1599_v54 = vpack.c.bf16 %v1598_v52, %v1597_v53 }
 0xbe1   :  { %13978 = vmatmul.mubr.msk.bf16.vlgmr.msra.gmra.mrb[20].mxu1 %vm204_vm2, %v1599_v54 }
 0xcb4   :  { %v1658_v55 = vpop.f32.mrb[20].mxu1 }
 0xcb5   :  { %v1659_v57 = vadd.f32 %v13390_v58, %v1658_v55  ;;  %v13979_v56 = vpop.f32.mrb[21].mxu1 }
 0xcb6   :  { %v1661_v59 = vpop.f32.mrb[22].mxu1 }
 0xcb7   :  { %v1662_v60 = vadd.f32 %v13390_v58, %v1661_v59  ;;  %v13980_v61 = vpop.f32.mrb[23].mxu1  ;;  %v1665_v62 = vadd.f32 %v1659_v57, %v15077_v16 }
 0xcb9   :  { %v1667_v63 = vsel %vm204_vm2, %v1665_v62, 0.0  ;;  %v1666_v1 = vadd.f32 %v1662_v60, %v15079_v17 }
 0xcba   :  { %1668 = vadd.xlane.f32.xlu1 %v1667_v63 }
 0xcbb   :  { %v1670_v2 = vsel %vm204_vm2, %v1666_v1, 0.0 }
 0xcbc   :  { %1671 = vadd.xlane.f32.xlu0 %v1670_v2 }
 0xd47   :  { %v1669_v3 = vpop.xlane.xlu1 %1668 }
 0xd48   :  { %v1674_v4 = vmul.f32 0.03125, %v1669_v3 }
 0xd49   :  { %v1672_v5 = vpop.xlane.xlu0 %1671 }
 0xd4a   :  { %v1676_v6 = vsub.f32 %v1665_v62, %v1674_v4  ;;  %v1675_v7 = vmul.f32 0.03125, %v1672_v5 }
 0xd4c   :  { %v1677_v8 = vsub.f32 %v1666_v1, %v1675_v7  ;;  %v1678_v9 = vmul.f32 %v1676_v6, %v1676_v6 }
 0xd4e   :  { %v1680_v10 = vsel %vm204_vm2, %v1678_v9, 0.0  ;;  %v1679_v11 = vmul.f32 %v1677_v8, %v1677_v8 }
 0xd4f   :  { %1681 = vadd.xlane.f32.xlu0 %v1680_v10 }
 0xd50   :  { %v1683_v16 = vsel %vm204_vm2, %v1679_v11, 0.0 }
 0xd51   :  { %1684 = vadd.xlane.f32.xlu1 %v1683_v16 }
 0xddc   :  { %v1682_v12 = vpop.xlane.xlu0 %1681 }
 0xddd   :  { %v1686_v17 = vmul.f32 0.03125, %v1682_v12 }
 0xdde   :  { %v1685_v13 = vpop.xlane.xlu1 %1684 }
 0xddf   :  { %v1688_v14 = vadd.f32 1e-05, %v1686_v17  ;;  %v1687_v15 = vmul.f32 0.03125, %v1685_v13 }
 0xde1   :  { %14577 = vrsqrt.f32 %v1688_v14  ;;  %v1689_v18 = vadd.f32 1e-05, %v1687_v15 }
 0xde3   :  { %14579 = vrsqrt.f32 %v1689_v18 }
 0xdeb   :  { %v14578_v19 = vpop.eup %14577 }
 0xdec   :  { %v1692_v21 = vmul.f32 %v14578_v19, %v1676_v6 }
 0xded   :  { %v14580_v22 = vpop.eup %14579 }
 0xdee   :  { %v1699_v24 = vmul.f32 %v13394_v20, %v1692_v21  ;;  %v1693_v26 = vmul.f32 %v14580_v22, %v1677_v8 }
 0xdf0   :  { %v15265_v27 = vadd.f32 %v13395_v23, %v1699_v24  ;;  %v1700_v28 = vmul.f32 %v13394_v20, %v1693_v26 }
 0xdf2   :  { %v15267_v29 = vadd.f32 %v13395_v23, %v1700_v28 }
 0xdf3   :  { %14903 = dma.done.wait [#allocation3], 8192 }
 0xdf4   :  { %14904 = vsyncadd [#allocation3], 4294959104  ;;  %2648 = sst [smem:[#allocation11]] %s14914_s24  ;;  %v14942_v30 = vmov 0   ;;  %v1713_v31 = vld [vmem:[#allocation2 + $0x8] sm:$0xff]  ;;  %v1715_v32 = vld [vmem:[#allocation2 + $0x18] sm:$0xff]  ;;  %v15282_v40 = vpack.c.bf16 %v15267_v29, %v15265_v27  ;;  %v1782_v10 = vlaneseq }
 0xdf5   :  { %1897 = vmatprep.mubr.bf16.mxu0 %v14942_v30  ;;  %1940 = vmatprep.mubr.bf16.mxu1 %v14942_v30  ;;  %2650 = sst [smem:[#allocation11 + $0x1]] %s14914_s24  ;;  %v1712_v33 = vld [vmem:[#allocation2] sm:$0xff]  ;;  %v1714_v25 = vld [vmem:[#allocation2 + $0x10] sm:$0xff]  ;;  %v1729_v34 = vld [vmem:[#allocation2 + $0x108] sm:$0xff] }
 0xdf6   :  { %2652 = sst [smem:[#allocation11 + $0x2]] %s14917_s5  ;;  %1865 = vmatprep.subr.bf16.mxu0 %v1713_v31  ;;  %1908 = vmatprep.subr.bf16.mxu1 %v1715_v32  ;;  %v1731_v35 = vld [vmem:[#allocation2 + $0x118] sm:$0xff]  ;;  %v1728_v36 = vld [vmem:[#allocation2 + $0x100] sm:$0xff]  ;;  %v1730_v37 = vld [vmem:[#allocation2 + $0x110] sm:$0xff]  ;;  %v1783_v11 = vshrl.u32 %v1782_v10, 7 }
 0xdf7   :  { %2654 = sst [smem:[#allocation11 + $0x3]] %s14918_s25  ;;  %1866 = vmatpush1.bf16.msra.mxu0 %v1712_v33  ;;  %1909 = vmatpush1.bf16.msra.mxu1 %v1714_v25  ;;  %v1717_v38 = vld [vmem:[#allocation2 + $0x28] sm:$0xff]  ;;  %v1719_v39 = vld [vmem:[#allocation2 + $0x38] sm:$0xff]  ;;  %v1716_v41 = vld [vmem:[#allocation2 + $0x20] sm:$0xff] }
 0xdf8   :  { %2656 = sst [smem:[#allocation11 + $0x4]] %s16719_s26  ;;  %1867 = vmatprep.subr.bf16.mxu0 %v1729_v34  ;;  %1910 = vmatprep.subr.bf16.mxu1 %v1731_v35  ;;  %v1718_v42 = vld [vmem:[#allocation2 + $0x30] sm:$0xff]  ;;  %v1733_v43 = vld [vmem:[#allocation2 + $0x128] sm:$0xff]  ;;  %v1735_v44 = vld [vmem:[#allocation2 + $0x138] sm:$0xff]  ;;  %v15306_v16 = vsub.s32 0, %v1783_v11  ;;  %v15308_v12 = vsub.s32 2, %v1783_v11 }
 0xdf9   :  { %2658 = sst [smem:[#allocation11 + $0x5]] %s16718_s27  ;;  %v1732_v45 = vld [vmem:[#allocation2 + $0x120] sm:$0xff]  ;;  %v1734_v46 = vld [vmem:[#allocation2 + $0x130] sm:$0xff]  ;;  %v1721_v47 = vld [vmem:[#allocation2 + $0x48] sm:$0xff]  ;;  %v15313_v13 = vsub.s32 1, %v1783_v11  ;;  %v15315_v14 = vsub.s32 3, %v1783_v11 }
 0xdfa   :  { %2660 = sst [smem:[#allocation11 + $0x6]] %s16717_s29  ;;  %v1723_v48 = vld [vmem:[#allocation2 + $0x58] sm:$0xff]  ;;  %v1720_v49 = vld [vmem:[#allocation2 + $0x40] sm:$0xff]  ;;  %v1722_v50 = vld [vmem:[#allocation2 + $0x50] sm:$0xff]  ;;  %v15321_v21 = vsub.s32 4, %v1783_v11  ;;  %v15323_v24 = vsub.s32 5, %v1783_v11 }
 0xdfb   :  { %2662 = sst [smem:[#allocation11 + $0x7]] %s14918_s25  ;;  %1868 = vmatpush1.bf16.msra.mxu0 %v1728_v36  ;;  %1911 = vmatpush1.bf16.msra.mxu1 %v1730_v37  ;;  %v1737_v51 = vld [vmem:[#allocation2 + $0x148] sm:$0xff]  ;;  %v1739_v52 = vld [vmem:[#allocation2 + $0x158] sm:$0xff]  ;;  %v1736_v53 = vld [vmem:[#allocation2 + $0x140] sm:$0xff]  ;;  %v15325_v33 = vsub.s32 6, %v1783_v11  ;;  %v15327_v37 = vsub.s32 7, %v1783_v11 }
 0xdfc   :  { %2664 = sst [smem:[#allocation11 + $0x8]] %s16716_s10  ;;  %1951 = vmatprep.subr.bf16.mxu0 %v1717_v38  ;;  %1994 = vmatprep.subr.bf16.mxu1 %v1719_v39  ;;  %v1738_v54 = vld [vmem:[#allocation2 + $0x150] sm:$0xff]  ;;  %v1725_v58 = vld [vmem:[#allocation2 + $0x68] sm:$0xff]  ;;  %v1727_v55 = vld [vmem:[#allocation2 + $0x78] sm:$0xff]  ;;  %s2632_s27 = scalar_lea.hbm %s16705_s8, 16384 }
 0xdfd   :  { %v1724_v57 = vld [vmem:[#allocation2 + $0x60] sm:$0xff]  ;;  %v1726_v56 = vld [vmem:[#allocation2 + $0x70] sm:$0xff]  ;;  %v1741_v59 = vld [vmem:[#allocation2 + $0x168] sm:$0xff]  ;;  %s14943_s26 = smov [#allocation10]   ;;  %s16725_s29 = smov 8  }
 0xdfe   :  { %13397 = vmatmul.mubr.msk.bf16.vlgmr.msra.gmra.mrb[24].mxu0 %vm204_vm2, %v15282_v40  ;;  %13398 = vmatmul.mubr.msk.bf16.vlgmr.msra.gmra.mrb[24].mxu1 %vm204_vm2, %v15282_v40  ;;  %v1743_v60 = vld [vmem:[#allocation2 + $0x178] sm:$0xff]  ;;  %v1740_v61 = vld [vmem:[#allocation2 + $0x160] sm:$0xff]  ;;  %v1742_v62 = vld [vmem:[#allocation2 + $0x170] sm:$0xff]  ;;  %s16726_s10 = smov 16  }
 0xdff   :  { %1952 = vmatpush1.bf16.msra.mxu0 %v1716_v41  ;;  %1995 = vmatpush1.bf16.msra.mxu1 %v1718_v42  ;;  %v1745_v63 = vld [vmem:[#allocation2 + $0x88] sm:$0xff]  ;;  %v1747_v1 = vld [vmem:[#allocation2 + $0x98] sm:$0xff]  ;;  %v1744_v2 = vld [vmem:[#allocation2 + $0x80] sm:$0xff] }
 0xe00   :  { %1953 = vmatprep.subr.bf16.mxu0 %v1733_v43  ;;  %1996 = vmatprep.subr.bf16.mxu1 %v1735_v44  ;;  %v1746_v3 = vld [vmem:[#allocation2 + $0x90] sm:$0xff]  ;;  %v1761_v4 = vld [vmem:[#allocation2 + $0x188] sm:$0xff]  ;;  %v1763_v5 = vld [vmem:[#allocation2 + $0x198] sm:$0xff] }
 0xe01   :  { %1983 = vmatprep.mubr.bf16.mxu0 %v14942_v30  ;;  %2026 = vmatprep.mubr.bf16.mxu1 %v14942_v30  ;;  %v1760_v6 = vld [vmem:[#allocation2 + $0x180] sm:$0xff]  ;;  %v1762_v7 = vld [vmem:[#allocation2 + $0x190] sm:$0xff]  ;;  %v1749_v8 = vld [vmem:[#allocation2 + $0xa8] sm:$0xff] }
 0xe02   :  { %v1751_v9 = vld [vmem:[#allocation2 + $0xb8] sm:$0xff] }
 0xe03   :  { %1954 = vmatpush1.bf16.msra.mxu0 %v1732_v45  ;;  %1997 = vmatpush1.bf16.msra.mxu1 %v1734_v46  ;;  %v1777_v17 = vld [vmem:[%s16704_s7] ss:$4 sm:$0xff] }
 0xe04   :  { %2037 = vmatprep.subr.bf16.mxu0 %v1721_v47  ;;  %2080 = vmatprep.subr.bf16.mxu1 %v1723_v48  ;;  %v1785_v15 = vrot.slane %v1777_v17, %v15306_v16  ;;  %v1793_v18 = vrot.slane %v1777_v17, %v15308_v12  ;;  %v1789_v19 = vrot.slane %v1777_v17, %v15313_v13  ;;  %v1767_v10 = vld [vmem:[#allocation2 + $0x1b8] sm:$0xff] }
 0xe05   :  { %v1797_v20 = vrot.slane %v1777_v17, %v15315_v14  ;;  %v1801_v43 = vrot.slane %v1777_v17, %v15321_v21  ;;  %v1805_v47 = vrot.slane %v1777_v17, %v15323_v24  ;;  %v15336_v11 = vld [vmem:[%s16704_s7 + $0x20] ss:$4 sm:$0xff] }
 0xe06   :  { %13399 = vmatmul.mubr.msk.bf16.vlgmr.msra.gmra.mrb[28].mxu0 %vm204_vm2, %v15282_v40  ;;  %13400 = vmatmul.mubr.msk.bf16.vlgmr.msra.gmra.mrb[28].mxu1 %vm204_vm2, %v15282_v40 }
 0xe07   :  { %2038 = vmatpush1.bf16.msra.mxu0 %v1720_v49  ;;  %2081 = vmatpush1.bf16.msra.mxu1 %v1722_v50 }
 0xe08   :  { %2039 = vmatprep.subr.bf16.mxu0 %v1737_v51  ;;  %2082 = vmatprep.subr.bf16.mxu1 %v1739_v52  ;;  %v1809_v51 = vrot.slane %v1777_v17, %v15325_v33 }
 0xe09   :  { %2069 = vmatprep.mubr.bf16.mxu0 %v14942_v30  ;;  %2112 = vmatprep.mubr.bf16.mxu1 %v14942_v30 }
 0xe0b   :  { %2040 = vmatpush1.bf16.msra.mxu0 %v1736_v53  ;;  %2083 = vmatpush1.bf16.msra.mxu1 %v1738_v54 }
 0xe0c   :  { %2123 = vmatprep.subr.bf16.mxu0 %v1725_v58  ;;  %2166 = vmatprep.subr.bf16.mxu1 %v1727_v55  ;;  %v1813_v58 = vrot.slane %v1777_v17, %v15327_v37 }
 0xe0e   :  { %13401 = vmatmul.mubr.msk.bf16.vlgmr.msra.gmra.mrb[32].mxu0 %vm204_vm2, %v15282_v40  ;;  %13402 = vmatmul.mubr.msk.bf16.vlgmr.msra.gmra.mrb[32].mxu1 %vm204_vm2, %v15282_v40 }
 0xe0f   :  { %2124 = vmatpush1.bf16.msra.mxu0 %v1724_v57  ;;  %2167 = vmatpush1.bf16.msra.mxu1 %v1726_v56 }
 0xe10   :  { %2125 = vmatprep.subr.bf16.mxu0 %v1741_v59  ;;  %2168 = vmatprep.subr.bf16.mxu1 %v1743_v60 }
 0xe11   :  { %2155 = vmatprep.mubr.bf16.mxu0 %v14942_v30  ;;  %2198 = vmatprep.mubr.bf16.mxu1 %v14942_v30 }
 0xe13   :  { %2126 = vmatpush1.bf16.msra.mxu0 %v1740_v61  ;;  %2169 = vmatpush1.bf16.msra.mxu1 %v1742_v62  ;;  %v1748_v62 = vld [vmem:[#allocation2 + $0xa0] sm:$0xff] }
 0xe14   :  { %2262 = vmatprep.subr.bf16.mxu0 %v1745_v63  ;;  %2303 = vmatprep.subr.bf16.mxu1 %v1747_v1  ;;  %v1750_v63 = vld [vmem:[#allocation2 + $0xb0] sm:$0xff] }
 0xe16   :  { %13403 = vmatmul.mubr.msk.bf16.vlgmr.msra.gmra.mrb[36].mxu0 %vm204_vm2, %v15282_v40  ;;  %13404 = vmatmul.mubr.msk.bf16.vlgmr.msra.gmra.mrb[36].mxu1 %vm204_vm2, %v15282_v40 }
 0xe1c   :  { %2263 = vmatpush1.bf16.xpose.msra.mxu0 %v1744_v2  ;;  %2304 = vmatpush1.bf16.xpose.msra.mxu1 %v1746_v3 }
 0xe1d   :  { %2264 = vmatprep.subr.bf16.mxu0 %v1761_v4  ;;  %2305 = vmatprep.subr.bf16.mxu1 %v1763_v5 }
 0xe24   :  { %2265 = vmatpush1.bf16.xpose.msra.mxu0 %v1760_v6  ;;  %2306 = vmatpush1.bf16.xpose.msra.mxu1 %v1762_v7 }
 0xe25   :  { %2344 = vmatprep.subr.bf16.mxu0 %v1749_v8  ;;  %2385 = vmatprep.subr.bf16.mxu1 %v1751_v9  ;;  %v1765_v9 = vld [vmem:[#allocation2 + $0x1a8] sm:$0xff] }
 0xed1   :  { %v1899_v22 = vpop.f32.mrb[24].mxu0  ;;  %v1942_v23 = vpop.f32.mrb[24].mxu1 }
 0xed2   :  { %v1900_v26 = vadd.f32 %v1899_v22, %v1785_v15  ;;  %v1943_v28 = vadd.f32 %v1942_v23, %v1793_v18  ;;  %v1901_v31 = vpop.f32.mrb[25].mxu0  ;;  %v1944_v32 = vpop.f32.mrb[25].mxu1 }
 0xed3   :  { %v1902_v25 = vadd.f32 %v1901_v31, %v1789_v19  ;;  %v1945_v34 = vadd.f32 %v1944_v32, %v1797_v20  ;;  %v1903_v35 = vpop.f32.mrb[26].mxu0  ;;  %v1946_v36 = vpop.f32.mrb[26].mxu1 }
 0xed4   :  { %v2211_v38 = vmax.f32 %v1943_v28, 0.0  ;;  %v1904_v39 = vadd.f32 %v1903_v35, %v1785_v15  ;;  %v1947_v40 = vadd.f32 %v1946_v36, %v1793_v18  ;;  %v1905_v41 = vpop.f32.mrb[27].mxu0  ;;  %v1948_v42 = vpop.f32.mrb[27].mxu1  ;;  %v2209_v48 = vmax.f32 %v1900_v26, 0.0 }
 0xed5   :  { %v2212_v44 = vmax.f32 %v1945_v34, 0.0  ;;  %v1906_v45 = vadd.f32 %v1905_v41, %v1789_v19  ;;  %v1949_v46 = vadd.f32 %v1948_v42, %v1797_v20  ;;  %v2210_v52 = vmax.f32 %v1902_v25, 0.0 }
 0xed6   :  { %v2225_v49 = vmax.f32 %v1904_v39, 0.0  ;;  %v2227_v50 = vmax.f32 %v1947_v40, 0.0  ;;  %v1817_v34 = vrot.slane %v15336_v11, %v15306_v16  ;;  %v1825_v35 = vrot.slane %v15336_v11, %v15308_v12 }
 0xed7   :  { %v2226_v53 = vmax.f32 %v1906_v45, 0.0  ;;  %v2228_v54 = vmax.f32 %v1949_v46, 0.0  ;;  %v1821_v39 = vrot.slane %v15336_v11, %v15313_v13  ;;  %v1829_v40 = vrot.slane %v15336_v11, %v15315_v14 }
 0xed8   :  { %v2241_v55 = vpack.c.bf16 %v2225_v49, %v2209_v48  ;;  %v2243_v57 = vpack.c.bf16 %v2227_v50, %v2211_v38  ;;  %v1766_v48 = vld [vmem:[#allocation2 + $0x1b0] sm:$0xff] }
 0xed9   :  { %v2242_v56 = vpack.c.bf16 %v2226_v53, %v2210_v52  ;;  %v2244_v59 = vpack.c.bf16 %v2228_v54, %v2212_v44  ;;  %v1985_v60 = vpop.f32.mrb[28].mxu0  ;;  %v2028_v61 = vpop.f32.mrb[28].mxu1  ;;  %v1753_v53 = vld [vmem:[#allocation2 + $0xc8] sm:$0xff]  ;;  %v1755_v54 = vld [vmem:[#allocation2 + $0xd8] sm:$0xff] }
 0xeda   :  { %v1986_v1 = vadd.f32 %v1985_v60, %v1801_v43  ;;  %v1987_v2 = vpop.f32.mrb[29].mxu0  ;;  %v2029_v3 = vadd.f32 %v2028_v61, %v1809_v51  ;;  %v2030_v4 = vpop.f32.mrb[29].mxu1 }
 0xedb   :  { %2294 = vmatprep.mubr.bf16.mxu0 %v2242_v56  ;;  %2335 = vmatprep.mubr.bf16.mxu1 %v2244_v59  ;;  %v1988_v5 = vadd.f32 %v1987_v2, %v1805_v47  ;;  %v1989_v6 = vpop.f32.mrb[30].mxu0  ;;  %v2031_v7 = vadd.f32 %v2030_v4, %v1813_v58  ;;  %v2032_v8 = vpop.f32.mrb[30].mxu1 }
 0xedc   :  { %2295 = vmatmul.mubr.bf16.vlgmr.msra.gmra.mrb[40].mxu0 %v2241_v55  ;;  %2336 = vmatmul.mubr.bf16.vlgmr.msra.gmra.mrb[40].mxu1 %v2243_v57  ;;  %v2213_v17 = vmax.f32 %v1986_v1, 0.0  ;;  %v1990_v15 = vadd.f32 %v1989_v6, %v1801_v43  ;;  %v2215_v18 = vmax.f32 %v2029_v3, 0.0  ;;  %v1991_v19 = vpop.f32.mrb[31].mxu0  ;;  %v2033_v20 = vadd.f32 %v2032_v8, %v1809_v51  ;;  %v2034_v22 = vpop.f32.mrb[31].mxu1 }
 0xedd   :  { %2345 = vmatpush1.bf16.xpose.msra.mxu0 %v1748_v62  ;;  %2386 = vmatpush1.bf16.xpose.msra.mxu1 %v1750_v63  ;;  %v2214_v23 = vmax.f32 %v1988_v5, 0.0  ;;  %v1992_v26 = vadd.f32 %v1991_v19, %v1805_v47  ;;  %v2216_v28 = vmax.f32 %v2031_v7, 0.0  ;;  %v2035_v31 = vadd.f32 %v2034_v22, %v1813_v58  ;;  %v1764_v47 = vld [vmem:[#allocation2 + $0x1a0] sm:$0xff] }
 0xede   :  { %v2229_v32 = vmax.f32 %v1990_v15, 0.0  ;;  %v2231_v25 = vmax.f32 %v2033_v20, 0.0  ;;  %2346 = vmatprep.subr.bf16.mxu0 %v1765_v9  ;;  %2387 = vmatprep.subr.bf16.mxu1 %v1767_v10  ;;  %v1833_v8 = vrot.slane %v15336_v11, %v15321_v21  ;;  %v1841_v9 = vrot.slane %v15336_v11, %v15325_v33 }
 0xedf   :  { %v2230_v36 = vmax.f32 %v1992_v26, 0.0  ;;  %v2232_v38 = vmax.f32 %v2035_v31, 0.0  ;;  %v1837_v15 = vrot.slane %v15336_v11, %v15323_v24  ;;  %v1752_v31 = vld [vmem:[#allocation2 + $0xc0] sm:$0xff] }
 0xee0   :  { %v2245_v41 = vpack.c.bf16 %v2229_v32, %v2213_v17  ;;  %v2247_v42 = vpack.c.bf16 %v2231_v25, %v2215_v18  ;;  %v1845_v18 = vrot.slane %v15336_v11, %v15327_v37  ;;  %v1754_v32 = vld [vmem:[#allocation2 + $0xd0] sm:$0xff] }
 0xee1   :  { %v2246_v43 = vpack.c.bf16 %v2230_v36, %v2214_v23  ;;  %v2248_v44 = vpack.c.bf16 %v2232_v38, %v2216_v28  ;;  %v2071_v45 = vpop.f32.mrb[32].mxu0  ;;  %v2114_v46 = vpop.f32.mrb[32].mxu1  ;;  %v1769_v38 = vld [vmem:[#allocation2 + $0x1c8] sm:$0xff] }
 0xee2   :  { %v2072_v49 = vadd.f32 %v2071_v45, %v1817_v34  ;;  %v2073_v50 = vpop.f32.mrb[33].mxu0  ;;  %v2115_v51 = vadd.f32 %v2114_v46, %v1825_v35  ;;  %v2116_v52 = vpop.f32.mrb[33].mxu1 }
 0xee3   :  { %2376 = vmatprep.mubr.bf16.mxu0 %v2246_v43  ;;  %2417 = vmatprep.mubr.bf16.mxu1 %v2248_v44  ;;  %v2074_v58 = vadd.f32 %v2073_v50, %v1821_v39  ;;  %v2075_v55 = vpop.f32.mrb[34].mxu0  ;;  %v2117_v57 = vadd.f32 %v2116_v52, %v1829_v40  ;;  %v2118_v56 = vpop.f32.mrb[34].mxu1 }
 0xee4   :  { %v2217_v59 = vmax.f32 %v2072_v49, 0.0  ;;  %v2076_v60 = vadd.f32 %v2075_v55, %v1817_v34  ;;  %v2219_v61 = vmax.f32 %v2115_v51, 0.0  ;;  %v2077_v62 = vpop.f32.mrb[35].mxu0  ;;  %v2119_v63 = vadd.f32 %v2118_v56, %v1825_v35  ;;  %v2120_v1 = vpop.f32.mrb[35].mxu1 }
 0xee5   :  { %2347 = vmatpush1.bf16.xpose.msra.mxu0 %v1764_v47  ;;  %2388 = vmatpush1.bf16.xpose.msra.mxu1 %v1766_v48  ;;  %v2218_v2 = vmax.f32 %v2074_v58, 0.0  ;;  %v2078_v3 = vadd.f32 %v2077_v62, %v1821_v39  ;;  %v2220_v4 = vmax.f32 %v2117_v57, 0.0  ;;  %v2121_v5 = vadd.f32 %v2120_v1, %v1829_v40  ;;  %v1771_v39 = vld [vmem:[#allocation2 + $0x1d8] sm:$0xff]  ;;  %v1770_v62 = vld [vmem:[#allocation2 + $0x1d0] sm:$0xff] }
 0xee6   :  { %2426 = vmatprep.subr.bf16.mxu0 %v1753_v53  ;;  %2467 = vmatprep.subr.bf16.mxu1 %v1755_v54  ;;  %v2233_v6 = vmax.f32 %v2076_v60, 0.0  ;;  %v2235_v7 = vmax.f32 %v2119_v63, 0.0  ;;  %v1757_v63 = vld [vmem:[#allocation2 + $0xe8] sm:$0xff]  ;;  %v1759_v1 = vld [vmem:[#allocation2 + $0xf8] sm:$0xff] }
 0xee7   :  { %v2234_v10 = vmax.f32 %v2078_v3, 0.0  ;;  %v2236_v17 = vmax.f32 %v2121_v5, 0.0  ;;  %v1758_v3 = vld [vmem:[#allocation2 + $0xf0] sm:$0xff]  ;;  %v1775_v5 = vld [vmem:[#allocation2 + $0x1f8] sm:$0xff] }
 0xee8   :  { %v2249_v19 = vpack.c.bf16 %v2233_v6, %v2217_v59  ;;  %v2251_v20 = vpack.c.bf16 %v2235_v7, %v2219_v61  ;;  %v1768_v61 = vld [vmem:[#allocation2 + $0x1c0] sm:$0xff]  ;;  %v1774_v7 = vld [vmem:[#allocation2 + $0x1f0] sm:$0xff] }
 0xee9   :  { %v2250_v22 = vpack.c.bf16 %v2234_v10, %v2218_v2  ;;  %v2252_v23 = vpack.c.bf16 %v2236_v17, %v2220_v4  ;;  %v2157_v26 = vpop.f32.mrb[36].mxu0  ;;  %v2200_v28 = vpop.f32.mrb[36].mxu1  ;;  %v1756_v2 = vld [vmem:[#allocation2 + $0xe0] sm:$0xff]  ;;  %v1773_v4 = vld [vmem:[#allocation2 + $0x1e8] sm:$0xff] }
 0xeea   :  { %v2158_v25 = vadd.f32 %v2157_v26, %v1833_v8  ;;  %v2159_v34 = vpop.f32.mrb[37].mxu0  ;;  %v2201_v35 = vadd.f32 %v2200_v28, %v1841_v9  ;;  %v2202_v36 = vpop.f32.mrb[37].mxu1  ;;  %v1772_v6 = vld [vmem:[#allocation2 + $0x1e0] sm:$0xff] }
 0xeeb   :  { %v2160_v40 = vadd.f32 %v2159_v34, %v1837_v15  ;;  %v2161_v43 = vpop.f32.mrb[38].mxu0  ;;  %v2203_v44 = vadd.f32 %v2202_v36, %v1845_v18  ;;  %v2204_v45 = vpop.f32.mrb[38].mxu1 }
 0xeec   :  { %2377 = vmatmul.mubr.bf16.vlgmr.msra.gmra.mrb[44].mxu0 %v2245_v41  ;;  %2418 = vmatmul.mubr.bf16.vlgmr.msra.gmra.mrb[44].mxu1 %v2247_v42  ;;  %v2221_v11 = vmax.f32 %v2158_v25, 0.0  ;;  %v2162_v46 = vadd.f32 %v2161_v43, %v1833_v8  ;;  %v2223_v47 = vmax.f32 %v2201_v35, 0.0  ;;  %v2163_v48 = vpop.f32.mrb[39].mxu0  ;;  %v2205_v49 = vadd.f32 %v2204_v45, %v1841_v9  ;;  %v2206_v50 = vpop.f32.mrb[39].mxu1  ;;  %v13405_v8 = vld [vmem:[%s16703_s6 + $0x7] ss:$0 sm:$0xff] }
 0xeed   :  { %2427 = vmatpush1.bf16.xpose.msra.mxu0 %v1752_v31  ;;  %2468 = vmatpush1.bf16.xpose.msra.mxu1 %v1754_v32  ;;  %v2222_v51 = vmax.f32 %v2160_v40, 0.0  ;;  %v2164_v52 = vadd.f32 %v2163_v48, %v1837_v15  ;;  %v2224_v53 = vmax.f32 %v2203_v44, 0.0  ;;  %v2207_v54 = vadd.f32 %v2206_v50, %v1845_v18 }
 0xeee   :  { %2428 = vmatprep.subr.bf16.mxu0 %v1769_v38  ;;  %2469 = vmatprep.subr.bf16.mxu1 %v1771_v39  ;;  %v2237_v58 = vmax.f32 %v2162_v46, 0.0  ;;  %v2239_v55 = vmax.f32 %v2205_v49, 0.0 }
 0xeef   :  { %2458 = vmatprep.mubr.bf16.mxu0 %v2250_v22  ;;  %2499 = vmatprep.mubr.bf16.mxu1 %v2252_v23  ;;  %v2238_v41 = vmax.f32 %v2164_v52, 0.0  ;;  %v2240_v42 = vmax.f32 %v2207_v54, 0.0 }
 0xef0   :  { %v2253_v57 = vpack.c.bf16 %v2237_v58, %v2221_v11  ;;  %v2255_v56 = vpack.c.bf16 %v2239_v55, %v2223_v47 }
 0xef1   :  { %v2254_v59 = vpack.c.bf16 %v2238_v41, %v2222_v51  ;;  %v2256_v60 = vpack.c.bf16 %v2240_v42, %v2224_v53 }
 0xef5   :  { %2429 = vmatpush1.bf16.xpose.msra.mxu0 %v1768_v61  ;;  %2470 = vmatpush1.bf16.xpose.msra.mxu1 %v1770_v62 }
 0xef6   :  { %2508 = vmatprep.subr.bf16.mxu0 %v1757_v63  ;;  %2549 = vmatprep.subr.bf16.mxu1 %v1759_v1 }
 0xefc   :  { %2459 = vmatmul.mubr.bf16.vlgmr.msra.gmra.mrb[48].mxu0 %v2249_v19  ;;  %2500 = vmatmul.mubr.bf16.vlgmr.msra.gmra.mrb[48].mxu1 %v2251_v20 }
 0xefd   :  { %2509 = vmatpush1.bf16.xpose.msra.mxu0 %v1756_v2  ;;  %2550 = vmatpush1.bf16.xpose.msra.mxu1 %v1758_v3 }
 0xefe   :  { %2510 = vmatprep.subr.bf16.mxu0 %v1773_v4  ;;  %2551 = vmatprep.subr.bf16.mxu1 %v1775_v5 }
 0xeff   :  { %2540 = vmatprep.mubr.bf16.mxu0 %v2254_v59  ;;  %2581 = vmatprep.mubr.bf16.mxu1 %v2256_v60 }
 0xf05   :  { %2511 = vmatpush1.bf16.xpose.msra.mxu0 %v1772_v6  ;;  %2552 = vmatpush1.bf16.xpose.msra.mxu1 %v1774_v7 }
 0xf06   :  { %13981 = vmatprep.subr.bf16.mxu0 %v14915_v0  ;;  %13989 = vmatprep.subr.mxu1 %v14915_v0 }
 0xf0c   :  { %2541 = vmatmul.mubr.bf16.vlgmr.msra.gmra.mrb[52].mxu0 %v2253_v57  ;;  %2582 = vmatmul.mubr.bf16.vlgmr.msra.gmra.mrb[52].mxu1 %v2255_v56 }
 0xf0d   :  { %13985 = vmatprep.mubr.msk.bf16.mxu0 %vm14916_vm0, %v14915_v0  ;;  %13991 = vmatprep.mubr.msk.f32.mxu1 %vm14916_vm0, %v14915_v0 }
 0xfaf   :  { %v2296_v9 = vpop.f32.mrb[40].mxu0  ;;  %v2337_v10 = vpop.f32.mrb[40].mxu1 }
 0xfb0   :  { %v2297_v17 = vadd.f32 %v13405_v8, %v2296_v9  ;;  %v2298_v15 = vpop.f32.mrb[41].mxu0  ;;  %v2339_v18 = vpop.f32.mrb[41].mxu1 }
 0xfb1   :  { %v2299_v19 = vpop.f32.mrb[42].mxu0  ;;  %v2340_v20 = vpop.f32.mrb[42].mxu1 }
 0xfb2   :  { %v2338_v22 = vadd.f32 %v2337_v10, %v2297_v17  ;;  %v2300_v23 = vadd.f32 %v13405_v8, %v2299_v19  ;;  %v2301_v26 = vpop.f32.mrb[43].mxu0  ;;  %v2342_v28 = vpop.f32.mrb[43].mxu1 }
 0xfb3   :  { %v13407_v26 = vld [vmem:[%s16703_s6 + $0x9] ss:$0 sm:$0xff] }
 0xfb4   :  { %v2341_v31 = vadd.f32 %v2340_v20, %v2300_v23  ;;  %v13406_v23 = vld [vmem:[%s16703_s6 + $0x8] ss:$0 sm:$0xff] }
 0xfb5   :  { %2666 = dma.general %s2632_s27, 8192, %s58_s12, %s14924_s13, %s14943_s26, [#allocation11], %s15020_s30, 0  }
 0xfb6   :  { %v14596_v28 = vld [vmem:[#allocation4 + $0x8] ss:$60 sps:$4 sm:$0xff]   ;;  %s16727_s12 = smov 24  }
 0xfb7   :  { %13982 = vmatpush3.bf16.msra.mxu0 %v14596_v28 }
 0xfb8   :  { %13983 = vmatprep.subr.bf16.mxu0 %v14915_v0 }
 0xfbf   :  { %v2378_v32 = vpop.f32.mrb[44].mxu0  ;;  %v2419_v25 = vpop.f32.mrb[44].mxu1 }
 0xfc0   :  { %v2379_v34 = vadd.f32 %v2378_v32, %v2338_v22  ;;  %v2380_v35 = vpop.f32.mrb[45].mxu0  ;;  %v2421_v36 = vpop.f32.mrb[45].mxu1 }
 0xfc1   :  { %v2381_v38 = vpop.f32.mrb[46].mxu0  ;;  %v2422_v39 = vpop.f32.mrb[46].mxu1 }
 0xfc2   :  { %v2420_v40 = vadd.f32 %v2419_v25, %v2379_v34  ;;  %v2382_v43 = vadd.f32 %v2381_v38, %v2341_v31  ;;  %v2383_v44 = vpop.f32.mrb[47].mxu0  ;;  %v2424_v45 = vpop.f32.mrb[47].mxu1  ;;  %v14597_v31 = vld [vmem:[#allocation4 + $0x80] ss:$60 sps:$4 sm:$0xff]  }
 0xfc3   :  { %13984 = vmatpush3.bf16.msra.mxu0 %v14597_v31 }
 0xfc4   :  { %v2423_v11 = vadd.f32 %v2422_v39, %v2382_v43  ;;  %13994 = vmatprep.subr.mxu0 %v14915_v0 }
 0xfcf   :  { %v2460_v46 = vpop.f32.mrb[48].mxu0  ;;  %v2501_v47 = vpop.f32.mrb[48].mxu1 }
 0xfd0   :  { %v2461_v48 = vadd.f32 %v2460_v46, %v2420_v40  ;;  %v2462_v49 = vpop.f32.mrb[49].mxu0  ;;  %v2503_v50 = vpop.f32.mrb[49].mxu1 }
 0xfd1   :  { %v2463_v51 = vpop.f32.mrb[50].mxu0  ;;  %v2504_v52 = vpop.f32.mrb[50].mxu1  ;;  %v13410_v49 = vld [vmem:[%s16703_s6 + $0xa] ss:$0 sm:$0xff] }
 0xfd2   :  { %v2502_v53 = vadd.f32 %v2501_v47, %v2461_v48  ;;  %v2464_v54 = vadd.f32 %v2463_v51, %v2423_v11  ;;  %v2465_v58 = vpop.f32.mrb[51].mxu0  ;;  %v2506_v55 = vpop.f32.mrb[51].mxu1 }
 0xfd4   :  { %v2505_v41 = vadd.f32 %v2504_v52, %v2464_v54 }
 0xfdf   :  { %v2542_v42 = vpop.f32.mrb[52].mxu0  ;;  %v2583_v57 = vpop.f32.mrb[52].mxu1 }
 0xfe0   :  { %v2543_v56 = vadd.f32 %v2542_v42, %v2502_v53  ;;  %v2544_v59 = vpop.f32.mrb[53].mxu0  ;;  %v2585_v60 = vpop.f32.mrb[53].mxu1 }
 0xfe1   :  { %v2545_v61 = vpop.f32.mrb[54].mxu0  ;;  %v2586_v62 = vpop.f32.mrb[54].mxu1 }
 0xfe2   :  { %v2584_v63 = vadd.f32 %v2583_v57, %v2543_v56  ;;  %v2546_v1 = vadd.f32 %v2545_v61, %v2505_v41  ;;  %v2547_v2 = vpop.f32.mrb[55].mxu0  ;;  %v2588_v3 = vpop.f32.mrb[55].mxu1 }
 0xfe4   :  { %v2590_v4 = vadd.f32 %v2584_v63, %v15265_v27  ;;  %v2587_v5 = vadd.f32 %v2586_v62, %v2546_v1 }
 0xfe6   :  { %v2591_v6 = vadd.f32 %v2587_v5, %v15267_v29  ;;  %v2592_v7 = vsel %vm204_vm2, %v2590_v4, 0.0 }
 0xfe7   :  { %2593 = vadd.xlane.f32.xlu0 %v2592_v7 }
 0xfe8   :  { %v2595_v8 = vsel %vm204_vm2, %v2591_v6, 0.0 }
 0xfeb   :  { %2596 = vadd.xlane.f32.xlu0 %v2595_v8 }
0x1074   :  { %v2594_v9 = vpop.xlane.xlu0 %2593 }
0x1075   :  { %v2598_v10 = vmul.f32 0.03125, %v2594_v9 }
0x1077   :  { %v2600_v17 = vsub.f32 %v2590_v4, %v2598_v10 }
0x1078   :  { %v2597_v15 = vpop.xlane.xlu0 %2596 }
0x1079   :  { %v2599_v18 = vmul.f32 0.03125, %v2597_v15  ;;  %v2602_v19 = vmul.f32 %v2600_v17, %v2600_v17 }
0x107b   :  { %v2601_v20 = vsub.f32 %v2591_v6, %v2599_v18  ;;  %v2604_v27 = vsel %vm204_vm2, %v2602_v19, 0.0 }
0x107c   :  { %2605 = vadd.xlane.f32.xlu1 %v2604_v27 }
0x107d   :  { %v2603_v22 = vmul.f32 %v2601_v20, %v2601_v20 }
0x107f   :  { %v2607_v29 = vsel %vm204_vm2, %v2603_v22, 0.0 }
0x1080   :  { %2608 = vadd.xlane.f32.xlu1 %v2607_v29 }
0x1109   :  { %v2606_v32 = vpop.xlane.xlu1 %2605 }
0x110a   :  { %v2610_v25 = vmul.f32 0.03125, %v2606_v32 }
0x110c   :  { %v2612_v34 = vadd.f32 1e-05, %v2610_v25 }
0x110d   :  { %v2609_v35 = vpop.xlane.xlu1 %2608 }
0x110e   :  { %14600 = vrsqrt.f32 %v2612_v34  ;;  %v2611_v36 = vmul.f32 0.03125, %v2609_v35 }
0x1110   :  { %v2613_v38 = vadd.f32 1e-05, %v2611_v36 }
0x1112   :  { %14602 = vrsqrt.f32 %v2613_v38 }
0x1118   :  { %v14601_v39 = vpop.eup %14600 }
0x1119   :  { %v2616_v40 = vmul.f32 %v14601_v39, %v2600_v17 }
0x111b   :  { %v2623_v45 = vmul.f32 %v13406_v23, %v2616_v40 }
0x111c   :  { %v14603_v43 = vpop.eup %14602 }
0x111d   :  { %v2617_v44 = vmul.f32 %v14603_v43, %v2601_v20  ;;  %v15384_v46 = vadd.f32 %v13407_v26, %v2623_v45 }
0x111f   :  { %v2624_v11 = vmul.f32 %v13406_v23, %v2617_v44 }
0x1121   :  { %v15386_v47 = vadd.f32 %v13407_v26, %v2624_v11 }
0x1123   :  { %v2667_v48 = vpack.c.bf16 %v15386_v47, %v15384_v46 }
0x1125   :  { %13986 = vmatmul.mubr.msk.bf16.vlgmr.msra.gmra.mrb[56].mxu0 %vm204_vm2, %v2667_v48 }
0x1126   :  { %13996 = vmatprep.mubr.msk.f32.mxu0 %vm14916_vm0, %v14915_v0 }
0x11f8   :  { %v2726_v50 = vpop.f32.mrb[56].mxu0 }
0x11f9   :  { %v15396_v51 = vadd.f32 %v13410_v49, %v2726_v50  ;;  %v13987_v52 = vpop.f32.mrb[57].mxu0 }
0x11fa   :  { %v2729_v53 = vpop.f32.mrb[58].mxu0 }
0x11fb   :  { %v15398_v54 = vadd.f32 %v13410_v49, %v2729_v53  ;;  %2734 = vrot.lane.b32.xlu0 %v15396_v51, %s14929_s19  ;;  %v13988_v58 = vpop.f32.mrb[59].mxu0 }
0x11fd   :  { %2811 = vrot.lane.b32.xlu1 %v15398_v54, %s14929_s19 }
0x126d   :  { %v2735_v55 = vpop.permute.xlu0 %2734 }
0x126e   :  { %13990 = vmatpush3.xpose.msk.msra.mxu1 %vm252_vm3, %v2735_v55 }
0x126f   :  { %v2812_v41 = vpop.permute.xlu1 %2811  ;;  %13999 = vmatprep.subr.mxu1 %v14915_v0 }
0x1270   :  { %13995 = vmatpush3.xpose.msk.msra.mxu0 %vm252_vm3, %v2812_v41 }
0x1271   :  { %13992 = vmatmul.mubr.msk.f32.vlgmr.msra.gmra.mrb[18].mxu1 %vm252_vm3, %v15396_v51  ;;  %14004 = vmatprep.subr.mxu0 %v14915_v0 }
0x1272   :  { %14001 = vmatprep.mubr.msk.f32.mxu1 %vm14916_vm0, %v14915_v0 }
0x1273   :  { %13997 = vmatmul.mubr.msk.f32.vlgmr.msra.gmra.mrb[22].mxu0 %vm252_vm3, %v15398_v54 }
0x1274   :  { %14006 = vmatprep.mubr.msk.f32.mxu0 %vm14916_vm0, %v14915_v0 }
0x1344   :  { %v2806_v42 = vpop.f32.mrb[18].mxu1 }
0x1345   :  { %v13993_v57 = vpop.f32.mrb[19].mxu1  ;;  %v2887_v56 = vsel %vm252_vm3, %v2806_v42, -inf }
0x1346   :  { %2888 = vmax.xlane.f32.xlu1 %v2887_v56  ;;  %v2883_v59 = vpop.f32.mrb[22].mxu0 }
0x1347   :  { %v13998_v60 = vpop.f32.mrb[23].mxu0  ;;  %v2890_v61 = vsel %vm252_vm3, %v2883_v59, -inf }
0x1348   :  { %2891 = vmax.xlane.f32.xlu0 %v2890_v61 }
0x1357   :  { %2985 = vrot.lane.b32.xlu1 %v15398_v54, %s14918_s25 }
0x135b   :  { %3063 = vrot.lane.b32.xlu1 %v15396_v51, %s14930_s14 }
0x135e   :  { %2909 = vrot.lane.b32.xlu0 %v15396_v51, %s14918_s25 }
0x135f   :  { %3141 = vrot.lane.b32.xlu1 %v15398_v54, %s14930_s14 }
0x13d3   :  { %v2889_v62 = vpop.xlane.xlu1 %2888 }
0x13d4   :  { %v2893_v63 = vsub.f32 %v2806_v42, %v2889_v62 }
0x13d5   :  { %v2892_v1 = vpop.xlane.xlu0 %2891 }
0x13d6   :  { %v2895_v2 = vmul.f32 1.442695, %v2893_v63  ;;  %v2894_v3 = vsub.f32 %v2883_v59, %v2892_v1 }
0x13d7   :  { %v2986_v4 = vpop.permute.xlu1 %2985 }
0x13d8   :  { %14604 = vpow2.f32 %v2895_v2  ;;  %v2897_v5 = vmul.f32 1.442695, %v2894_v3  ;;  %14005 = vmatpush3.msra.mxu0 %v2986_v4 }
0x13d9   :  { %v2910_v6 = vpop.permute.xlu0 %2909  ;;  %14014 = vmatprep.subr.mxu0 %v14915_v0 }
0x13da   :  { %14606 = vpow2.f32 %v2897_v5  ;;  %14000 = vmatpush3.msra.mxu1 %v2910_v6 }
0x13db   :  { %14009 = vmatprep.subr.mxu1 %v14915_v0  ;;  %v3064_v17 = vpop.permute.xlu1 %3063 }
0x13df   :  { %v3142_v15 = vpop.permute.xlu1 %3141 }
0x13e2   :  { %v14605_v7 = vpop.eup %14604 }
0x13e3   :  { %v2899_v8 = vsel %vm252_vm3, %v14605_v7, 0.0 }
0x13e4   :  { %v14607_v9 = vpop.eup %14606  ;;  %2900 = vadd.xlane.f32.xlu0 %v2899_v8 }
0x13e5   :  { %v2902_v10 = vsel %vm252_vm3, %v14607_v9, 0.0 }
0x13e6   :  { %2903 = vadd.xlane.f32.xlu1 %v2902_v10 }
0x13f7   :  { %3139 = vrot.lane.b32.xlu1 %v15398_v54, %s14931_s15 }
0x13fa   :  { %3061 = vrot.lane.b32.xlu0 %v15396_v51, %s14931_s15 }
0x1471   :  { %v2901_v18 = vpop.xlane.xlu0 %2900 }
0x1472   :  { %14608 = vrcp.f32 %v2901_v18 }
0x1473   :  { %v2904_v19 = vpop.xlane.xlu1 %2903 }
0x1474   :  { %14610 = vrcp.f32 %v2904_v19 }
0x1475   :  { %v3062_v23 = vpop.permute.xlu0 %3061 }
0x1477   :  { %v3140_v26 = vpop.permute.xlu1 %3139 }
0x147c   :  { %v14609_v20 = vpop.eup %14608 }
0x147d   :  { %v2906_v27 = vmul.f32 %v14609_v20, %v14605_v7 }
0x147e   :  { %v14611_v22 = vpop.eup %14610 }
0x147f   :  { %14002 = vmatmul.mubr.msk.f32.vlgmr.msra.gmra.mrb[56].mxu1 %vm252_vm3, %v2906_v27  ;;  %v2908_v29 = vmul.f32 %v14611_v22, %v14607_v9 }
0x1480   :  { %14010 = vmatpush3.xpose.msk.msra.mxu1 %vm252_vm3, %v3064_v17  ;;  %14011 = vmatprep.mubr.msk.f32.mxu1 %vm14916_vm0, %v14915_v0 }
0x1481   :  { %14007 = vmatmul.mubr.msk.f32.vlgmr.msra.gmra.mrb[60].mxu0 %vm252_vm3, %v2908_v29  ;;  %14019 = vmatprep.subr.mxu1 %v14915_v0 }
0x1482   :  { %14015 = vmatpush3.xpose.msk.msra.mxu0 %vm252_vm3, %v3142_v15  ;;  %14016 = vmatprep.mubr.msk.f32.mxu0 %vm14916_vm0, %v14915_v0 }
0x1483   :  { %14012 = vmatmul.mubr.msk.f32.vlgmr.msra.gmra.mrb[58].mxu1 %vm252_vm3, %v3062_v23  ;;  %14024 = vmatprep.subr.mxu0 %v14915_v0 }
0x1484   :  { %14021 = vmatprep.mubr.msk.f32.mxu1 %vm14916_vm0, %v14915_v0 }
0x1485   :  { %14017 = vmatmul.mubr.msk.f32.vlgmr.msra.gmra.mrb[62].mxu0 %vm252_vm3, %v3140_v26 }
0x1486   :  { %14026 = vmatprep.mubr.msk.f32.mxu0 %vm14916_vm0, %v14915_v0 }
0x1552   :  { %v15450_v28 = vpop.f32.mrb[56].mxu1 }
0x1553   :  { %v14003_v31 = vpop.f32.mrb[57].mxu1 }
0x1554   :  { %v15452_v32 = vpop.f32.mrb[60].mxu0 }
0x1555   :  { %v14008_v25 = vpop.f32.mrb[61].mxu0 }
0x1556   :  { %v3135_v34 = vpop.f32.mrb[58].mxu1 }
0x1557   :  { %v14013_v35 = vpop.f32.mrb[59].mxu1  ;;  %v3217_v36 = vsel %vm252_vm3, %v3135_v34, -inf }
0x1558   :  { %3218 = vmax.xlane.f32.xlu0 %v3217_v36  ;;  %v3213_v38 = vpop.f32.mrb[62].mxu0 }
0x1559   :  { %v14018_v39 = vpop.f32.mrb[63].mxu0  ;;  %v3220_v40 = vsel %vm252_vm3, %v3213_v38, -inf }
0x155a   :  { %3221 = vmax.xlane.f32.xlu1 %v3220_v40 }
0x156b   :  { %3315 = vrot.lane.b32.xlu1 %v15398_v54, %s14932_s16 }
0x156e   :  { %3239 = vrot.lane.b32.xlu0 %v15396_v51, %s14932_s16 }
0x156f   :  { %3393 = vrot.lane.b32.xlu1 %v15396_v51, %s14933_s17 }
0x1573   :  { %3471 = vrot.lane.b32.xlu1 %v15398_v54, %s14933_s17 }
0x1577   :  { %3469 = vrot.lane.b32.xlu1 %v15398_v54, %s14934_s18 }
0x15e5   :  { %v3219_v43 = vpop.xlane.xlu0 %3218 }
0x15e6   :  { %v3223_v44 = vsub.f32 %v3135_v34, %v3219_v43 }
0x15e7   :  { %v3222_v45 = vpop.xlane.xlu1 %3221 }
0x15e8   :  { %v3225_v11 = vmul.f32 1.442695, %v3223_v44  ;;  %v3224_v48 = vsub.f32 %v3213_v38, %v3222_v45 }
0x15e9   :  { %v3240_v49 = vpop.permute.xlu0 %3239 }
0x15ea   :  { %14612 = vpow2.f32 %v3225_v11  ;;  %v3227_v50 = vmul.f32 1.442695, %v3224_v48  ;;  %14020 = vmatpush3.msra.mxu1 %v3240_v49 }
0x15eb   :  { %v3316_v52 = vpop.permute.xlu1 %3315  ;;  %14029 = vmatprep.subr.mxu1 %v14915_v0 }
0x15ec   :  { %14614 = vpow2.f32 %v3227_v50  ;;  %14025 = vmatpush3.msra.mxu0 %v3316_v52 }
0x15ed   :  { %14034 = vmatprep.subr.mxu0 %v14915_v0 }
0x15ef   :  { %v3394_v56 = vpop.permute.xlu1 %3393 }
0x15f3   :  { %v3472_v62 = vpop.permute.xlu1 %3471 }
0x15f4   :  { %v14613_v53 = vpop.eup %14612 }
0x15f5   :  { %v3229_v58 = vsel %vm252_vm3, %v14613_v53, 0.0 }
0x15f6   :  { %v14615_v55 = vpop.eup %14614  ;;  %3230 = vadd.xlane.f32.xlu0 %v3229_v58 }
0x15f7   :  { %v3232_v41 = vsel %vm252_vm3, %v14615_v55, 0.0  ;;  %v3470_v2 = vpop.permute.xlu1 %3469 }
0x15fa   :  { %3233 = vadd.xlane.f32.xlu0 %v3232_v41 }
0x1610   :  { %3391 = vrot.lane.b32.xlu0 %v15396_v51, %s14934_s18 }
0x1683   :  { %v3231_v42 = vpop.xlane.xlu0 %3230 }
0x1684   :  { %14616 = vrcp.f32 %v3231_v42 }
0x1687   :  { %v3234_v57 = vpop.xlane.xlu0 %3233 }
0x1688   :  { %14618 = vrcp.f32 %v3234_v57 }
0x168b   :  { %v3392_v1 = vpop.permute.xlu0 %3391 }
0x168e   :  { %v14617_v59 = vpop.eup %14616 }
0x168f   :  { %v3236_v60 = vmul.f32 %v14617_v59, %v14613_v53 }
0x1691   :  { %14022 = vmatmul.mubr.msk.f32.vlgmr.msra.gmra.mrb[60].mxu1 %vm252_vm3, %v3236_v60 }
0x1692   :  { %v14619_v61 = vpop.eup %14618  ;;  %14030 = vmatpush3.xpose.msk.msra.mxu1 %vm252_vm3, %v3394_v56  ;;  %14031 = vmatprep.mubr.msk.f32.mxu1 %vm14916_vm0, %v14915_v0 }
0x1693   :  { %v3238_v63 = vmul.f32 %v14619_v61, %v14615_v55  ;;  %14039 = vmatprep.subr.mxu1 %v14915_v0 }
0x1695   :  { %14027 = vmatmul.mubr.msk.f32.vlgmr.msra.gmra.mrb[64].mxu0 %vm252_vm3, %v3238_v63  ;;  %14032 = vmatmul.mubr.msk.f32.vlgmr.msra.gmra.mrb[62].mxu1 %vm252_vm3, %v3392_v1 }
0x1696   :  { %14035 = vmatpush3.xpose.msk.msra.mxu0 %vm252_vm3, %v3472_v62  ;;  %14036 = vmatprep.mubr.msk.f32.mxu0 %vm14916_vm0, %v14915_v0 }
0x1697   :  { %14044 = vmatprep.subr.mxu0 %v14915_v0  ;;  %14041 = vmatprep.mubr.msk.f32.mxu1 %vm14916_vm0, %v14915_v0 }
0x1699   :  { %14037 = vmatmul.mubr.msk.f32.vlgmr.msra.gmra.mrb[66].mxu0 %vm252_vm3, %v3470_v2 }
0x169a   :  { %14046 = vmatprep.mubr.msk.f32.mxu0 %vm14916_vm0, %v14915_v0 }
0x1764   :  { %v15488_v3 = vpop.f32.mrb[60].mxu1 }
0x1765   :  { %v14023_v4 = vpop.f32.mrb[61].mxu1 }
0x1768   :  { %v15490_v5 = vpop.f32.mrb[64].mxu0  ;;  %v3465_v6 = vpop.f32.mrb[62].mxu1 }
0x1769   :  { %v14581_v7 = vpack.i.bf16 %v15490_v5, %v15488_v3  ;;  %v14028_v8 = vpop.f32.mrb[65].mxu0  ;;  %v14033_v9 = vpop.f32.mrb[63].mxu1  ;;  %v3547_v10 = vsel %vm252_vm3, %v3465_v6, -inf }
0x176a   :  { %3548 = vmax.xlane.f32.xlu0 %v3547_v10 }
0x176c   :  { %v3543_v17 = vpop.f32.mrb[66].mxu0 }
0x176d   :  { %v14038_v15 = vpop.f32.mrb[67].mxu0  ;;  %v3550_v18 = vsel %vm252_vm3, %v3543_v17, -inf }
0x176e   :  { %3551 = vmax.xlane.f32.xlu1 %v3550_v18 }
0x177f   :  { %3645 = vrot.lane.b32.xlu1 %v15398_v54, %s14935_s20 }
0x1780   :  { %3569 = vrot.lane.b32.xlu0 %v15396_v51, %s14935_s20 }
0x1783   :  { %3723 = vrot.lane.b32.xlu1 %v15396_v51, %s14936_s22 }
0x1787   :  { %3801 = vrot.lane.b32.xlu1 %v15398_v54, %s14936_s22 }
0x178b   :  { %3799 = vrot.lane.b32.xlu1 %v15398_v54, %s16722_s23 }
0x17f7   :  { %v3549_v19 = vpop.xlane.xlu0 %3548 }
0x17f8   :  { %v3553_v20 = vsub.f32 %v3465_v6, %v3549_v19 }
0x17fa   :  { %v3555_v27 = vmul.f32 1.442695, %v3553_v20 }
0x17fb   :  { %v3570_v22 = vpop.permute.xlu0 %3569  ;;  %v3552_v29 = vpop.xlane.xlu1 %3551 }
0x17fc   :  { %14620 = vpow2.f32 %v3555_v27  ;;  %v3554_v23 = vsub.f32 %v3543_v17, %v3552_v29  ;;  %14040 = vmatpush3.msra.mxu1 %v3570_v22  ;;  %v14599_v27 = vld [vmem:[#allocation4 + $0x84] ss:$60 sps:$4 sm:$0xff]  }
0x17fd   :  { %14049 = vmatprep.subr.mxu1 %v14915_v0 }
0x17fe   :  { %v3557_v26 = vmul.f32 1.442695, %v3554_v23 }
0x17ff   :  { %v3646_v31 = vpop.permute.xlu1 %3645 }
0x1800   :  { %14622 = vpow2.f32 %v3557_v26  ;;  %14045 = vmatpush3.msra.mxu0 %v3646_v31 }
0x1801   :  { %14054 = vmatprep.subr.mxu0 %v14915_v0 }
0x1803   :  { %v3724_v40 = vpop.permute.xlu1 %3723 }
0x1806   :  { %v14621_v25 = vpop.eup %14620 }
0x1807   :  { %v3559_v34 = vsel %vm252_vm3, %v14621_v25, 0.0  ;;  %v3802_v11 = vpop.permute.xlu1 %3801 }
0x1808   :  { %3560 = vadd.xlane.f32.xlu0 %v3559_v34 }
0x180a   :  { %v14623_v35 = vpop.eup %14622 }
0x180b   :  { %v3562_v36 = vsel %vm252_vm3, %v14623_v35, 0.0  ;;  %v3800_v50 = vpop.permute.xlu1 %3799 }
0x180c   :  { %3563 = vadd.xlane.f32.xlu0 %v3562_v36 }
0x1822   :  { %3721 = vrot.lane.b32.xlu0 %v15396_v51, %s16722_s23 }
0x1895   :  { %v3561_v38 = vpop.xlane.xlu0 %3560 }
0x1896   :  { %14624 = vrcp.f32 %v3561_v38 }
0x1899   :  { %v3564_v39 = vpop.xlane.xlu0 %3563 }
0x189a   :  { %14626 = vrcp.f32 %v3564_v39 }
0x189d   :  { %v3722_v49 = vpop.permute.xlu0 %3721 }
0x18a0   :  { %v14625_v43 = vpop.eup %14624 }
0x18a1   :  { %v3566_v44 = vmul.f32 %v14625_v43, %v14621_v25 }
0x18a3   :  { %14042 = vmatmul.mubr.msk.f32.vlgmr.msra.gmra.mrb[64].mxu1 %vm252_vm3, %v3566_v44 }
0x18a4   :  { %v14627_v45 = vpop.eup %14626  ;;  %14050 = vmatpush3.xpose.msk.msra.mxu1 %vm252_vm3, %v3724_v40  ;;  %14051 = vmatprep.mubr.msk.f32.mxu1 %vm14916_vm0, %v14915_v0 }
0x18a5   :  { %v3568_v48 = vmul.f32 %v14627_v45, %v14623_v35  ;;  %14059 = vmatprep.subr.mxu1 %v14915_v0 }
0x18a7   :  { %14047 = vmatmul.mubr.msk.f32.vlgmr.msra.gmra.mrb[68].mxu0 %vm252_vm3, %v3568_v48  ;;  %14052 = vmatmul.mubr.msk.f32.vlgmr.msra.gmra.mrb[66].mxu1 %vm252_vm3, %v3722_v49 }
0x18a8   :  { %14055 = vmatpush3.xpose.msk.msra.mxu0 %vm252_vm3, %v3802_v11  ;;  %14056 = vmatprep.mubr.msk.f32.mxu0 %vm14916_vm0, %v14915_v0 }
0x18a9   :  { %14064 = vmatprep.subr.mxu0 %v14915_v0  ;;  %14061 = vmatprep.mubr.msk.f32.mxu1 %vm14916_vm0, %v14915_v0 }
0x18ab   :  { %14057 = vmatmul.mubr.msk.f32.vlgmr.msra.gmra.mrb[70].mxu0 %vm252_vm3, %v3800_v50 }
0x18ac   :  { %14066 = vmatprep.mubr.msk.f32.mxu0 %vm14916_vm0, %v14915_v0 }
0x1976   :  { %v3641_v52 = vpop.f32.mrb[64].mxu1 }
0x1977   :  { %v14043_v53 = vpop.f32.mrb[65].mxu1 }
0x197a   :  { %v3717_v58 = vpop.f32.mrb[68].mxu0  ;;  %v3795_v55 = vpop.f32.mrb[66].mxu1 }
0x197b   :  { %v14586_v41 = vpack.i.bf16 %v3717_v58, %v3641_v52  ;;  %v14048_v42 = vpop.f32.mrb[69].mxu0  ;;  %v14053_v57 = vpop.f32.mrb[67].mxu1  ;;  %v3877_v56 = vsel %vm252_vm3, %v3795_v55, -inf }
0x197c   :  { %3878 = vmax.xlane.f32.xlu0 %v3877_v56 }
0x197e   :  { %v3873_v59 = vpop.f32.mrb[70].mxu0 }
0x197f   :  { %v14058_v60 = vpop.f32.mrb[71].mxu0  ;;  %v3880_v61 = vsel %vm252_vm3, %v3873_v59, -inf }
0x1980   :  { %3881 = vmax.xlane.f32.xlu1 %v3880_v61 }
0x1991   :  { %3975 = vrot.lane.b32.xlu1 %v15398_v54, %s16720_s11 }
0x1995   :  { %14582 = vrot.lane.b32.xlu1 %v14581_v7, %s16725_s29 }
0x1999   :  { %14587 = vrot.lane.b32.xlu1 %v14586_v41, %s16726_s10 }
0x1a09   :  { %v3879_v62 = vpop.xlane.xlu0 %3878 }
0x1a0a   :  { %v3883_v63 = vsub.f32 %v3795_v55, %v3879_v62 }
0x1a0c   :  { %v3885_v1 = vmul.f32 1.442695, %v3883_v63 }
0x1a0d   :  { %v3882_v2 = vpop.xlane.xlu1 %3881 }
0x1a0e   :  { %14628 = vpow2.f32 %v3885_v1  ;;  %v3884_v4 = vsub.f32 %v3873_v59, %v3882_v2 }
0x1a10   :  { %v3887_v6 = vmul.f32 1.442695, %v3884_v4 }
0x1a11   :  { %v3976_v8 = vpop.permute.xlu1 %3975 }
0x1a12   :  { %14630 = vpow2.f32 %v3887_v6  ;;  %14065 = vmatpush3.msra.mxu0 %v3976_v8 }
0x1a15   :  { %v14583_v25 = vpop.permute.xlu1 %14582 }
0x1a16   :  { %v14585_v35 = vunpack.i.h.bf16 %v14583_v25  ;;  %v14584_v36 = vunpack.i.l.bf16 %v14583_v25 }
0x1a18   :  { %v14629_v9 = vpop.eup %14628  ;;  %v4076_v43 = vsel %vm252_vm3, %v15452_v32, %v14585_v35  ;;  %v4075_v44 = vsel %vm252_vm3, %v15450_v28, %v14584_v36  ;;  %v13438_v32 = vld [vmem:[%s16703_s6 + $0xb] ss:$0 sm:$0xff] }
0x1a19   :  { %v3889_v54 = vsel %vm252_vm3, %v14629_v9, 0.0  ;;  %v14588_v34 = vpop.permute.xlu1 %14587 }
0x1a1a   :  { %3890 = vadd.xlane.f32.xlu0 %v3889_v54  ;;  %v14590_v38 = vunpack.i.h.bf16 %v14588_v34  ;;  %v14589_v39 = vunpack.i.l.bf16 %v14588_v34 }
0x1a1c   :  { %v14631_v10 = vpop.eup %14630  ;;  %v4077_v48 = vsel %vm96_vm1, %v4075_v44, %v14589_v39  ;;  %v4078_v49 = vsel %vm96_vm1, %v4076_v43, %v14590_v38 }
0x1a1d   :  { %v3892_v3 = vsel %vm252_vm3, %v14631_v10, 0.0 }
0x1a1e   :  { %3893 = vadd.xlane.f32.xlu0 %v3892_v3 }
0x1a34   :  { %3899 = vrot.lane.b32.xlu0 %v15396_v51, %s16720_s11  ;;  %v14598_v51 = vld [vmem:[#allocation4 + $0xc] ss:$60 sps:$4 sm:$0xff]  }
0x1aa7   :  { %v3891_v5 = vpop.xlane.xlu0 %3890 }
0x1aa8   :  { %14632 = vrcp.f32 %v3891_v5 }
0x1aab   :  { %v3894_v7 = vpop.xlane.xlu0 %3893 }
0x1aac   :  { %14634 = vrcp.f32 %v3894_v7 }
0x1aaf   :  { %v3900_v17 = vpop.permute.xlu0 %3899 }
0x1ab0   :  { %14060 = vmatpush3.msra.mxu1 %v3900_v17 }
0x1ab1   :  { %14069 = vmatprep.subr.bf16.mxu1 %v14915_v0 }
0x1ab2   :  { %v14633_v15 = vpop.eup %14632 }
0x1ab3   :  { %v3896_v18 = vmul.f32 %v14633_v15, %v14629_v9 }
0x1ab5   :  { %14062 = vmatmul.mubr.msk.f32.vlgmr.msra.gmra.mrb[68].mxu1 %vm252_vm3, %v3896_v18  ;;  %v13442_v18 = vld [vmem:[%s16703_s6 + $0xc] ss:$0 sm:$0xff] }
0x1ab6   :  { %v14635_v19 = vpop.eup %14634  ;;  %14073 = vmatprep.mubr.msk.bf16.mxu1 %vm14916_vm0, %v14915_v0  ;;  %14070 = vmatpush3.bf16.msra.mxu1 %v14598_v51 }
0x1ab7   :  { %v3898_v20 = vmul.f32 %v14635_v19, %v14631_v10  ;;  %14071 = vmatprep.subr.bf16.mxu1 %v14915_v0 }
0x1ab9   :  { %14067 = vmatmul.mubr.msk.f32.vlgmr.msra.gmra.mrb[72].mxu0 %vm252_vm3, %v3898_v20  ;;  %v13443_v20 = vld [vmem:[%s16703_s6 + $0xd] ss:$0 sm:$0xff] }
0x1aba   :  { %14072 = vmatpush3.bf16.msra.mxu1 %v14599_v27 }
0x1b88   :  { %v3971_v22 = vpop.f32.mrb[68].mxu1 }
0x1b89   :  { %v14063_v29 = vpop.f32.mrb[69].mxu1 }
0x1b8c   :  { %v4047_v23 = vpop.f32.mrb[72].mxu0 }
0x1b8d   :  { %v14591_v26 = vpack.i.bf16 %v4047_v23, %v3971_v22  ;;  %v14068_v31 = vpop.f32.mrb[73].mxu0 }
0x1b8f   :  { %14592 = vrot.lane.b32.xlu0 %v14591_v26, %s16727_s12 }
0x1c01   :  { %v14593_v40 = vpop.permute.xlu0 %14592 }
0x1c02   :  { %v14595_v45 = vunpack.i.h.bf16 %v14593_v40  ;;  %v14594_v11 = vunpack.i.l.bf16 %v14593_v40 }
0x1c04   :  { %v4080_v50 = vsel %vm1596_vm4, %v4078_v49, %v14595_v45  ;;  %v4079_v52 = vsel %vm1596_vm4, %v4077_v48, %v14594_v11 }
0x1c05   :  { %v4081_v53 = vpack.c.bf16 %v4080_v50, %v4079_v52 }
0x1c07   :  { %14074 = vmatmul.mubr.msk.bf16.vlgmr.msra.gmra.mrb[72].mxu1 %vm204_vm2, %v4081_v53 }
0x1cda   :  { %v4140_v58 = vpop.f32.mrb[72].mxu1 }
0x1cdb   :  { %v4141_v55 = vadd.f32 %v13438_v32, %v4140_v58  ;;  %v14075_v28 = vpop.f32.mrb[73].mxu1 }
0x1cdc   :  { %v4143_v41 = vpop.f32.mrb[74].mxu1 }
0x1cdd   :  { %v4144_v42 = vadd.f32 %v13438_v32, %v4143_v41  ;;  %v14076_v57 = vpop.f32.mrb[75].mxu1  ;;  %v4147_v56 = vadd.f32 %v4141_v55, %v15384_v46 }
0x1cdf   :  { %v4149_v59 = vsel %vm204_vm2, %v4147_v56, 0.0  ;;  %v4148_v60 = vadd.f32 %v4144_v42, %v15386_v47 }
0x1ce0   :  { %4150 = vadd.xlane.f32.xlu1 %v4149_v59 }
0x1ce1   :  { %v4152_v61 = vsel %vm204_vm2, %v4148_v60, 0.0 }
0x1ce2   :  { %4153 = vadd.xlane.f32.xlu0 %v4152_v61 }
0x1d6d   :  { %v4151_v62 = vpop.xlane.xlu1 %4150 }
0x1d6e   :  { %v4155_v63 = vmul.f32 0.03125, %v4151_v62 }
0x1d6f   :  { %v4154_v1 = vpop.xlane.xlu0 %4153 }
0x1d70   :  { %v4157_v2 = vsub.f32 %v4147_v56, %v4155_v63  ;;  %v4156_v4 = vmul.f32 0.03125, %v4154_v1 }
0x1d72   :  { %v4158_v6 = vsub.f32 %v4148_v60, %v4156_v4  ;;  %v4159_v8 = vmul.f32 %v4157_v2, %v4157_v2 }
0x1d74   :  { %v4161_v9 = vsel %vm204_vm2, %v4159_v8, 0.0  ;;  %v4160_v54 = vmul.f32 %v4158_v6, %v4158_v6 }
0x1d75   :  { %4162 = vadd.xlane.f32.xlu0 %v4161_v9 }
0x1d76   :  { %v4164_v46 = vsel %vm204_vm2, %v4160_v54, 0.0 }
0x1d79   :  { %4165 = vadd.xlane.f32.xlu0 %v4164_v46 }
0x1e02   :  { %v4163_v10 = vpop.xlane.xlu0 %4162 }
0x1e03   :  { %v4167_v47 = vmul.f32 0.03125, %v4163_v10 }
0x1e05   :  { %v4169_v3 = vadd.f32 1e-05, %v4167_v47 }
0x1e06   :  { %v4166_v5 = vpop.xlane.xlu0 %4165 }
0x1e07   :  { %14636 = vrsqrt.f32 %v4169_v3  ;;  %v4168_v7 = vmul.f32 0.03125, %v4166_v5 }
0x1e09   :  { %v4170_v17 = vadd.f32 1e-05, %v4168_v7 }
0x1e0b   :  { %14638 = vrsqrt.f32 %v4170_v17 }
0x1e11   :  { %v14637_v15 = vpop.eup %14636 }
0x1e12   :  { %v4173_v19 = vmul.f32 %v14637_v15, %v4157_v2 }
0x1e14   :  { %v4180_v51 = vmul.f32 %v13442_v18, %v4173_v19 }
0x1e15   :  { %v14639_v27 = vpop.eup %14638 }
0x1e16   :  { %v15572_v22 = vadd.f32 %v13443_v20, %v4180_v51  ;;  %v4174_v29 = vmul.f32 %v14639_v27, %v4158_v6 }
0x1e18   :  { %v4181_v23 = vmul.f32 %v13442_v18, %v4174_v29 }
0x1e1a   :  { %v15574_v26 = vadd.f32 %v13443_v20, %v4181_v23 }
0x1e1b   :  { %14905 = dma.done.wait [#allocation3 + $0x1], 8192 }
0x1e1c   :  { %14906 = vsyncadd [#allocation3 + $0x1], 4294959104  ;;  %4377 = vmatprep.mubr.bf16.mxu0 %v14942_v30  ;;  %4420 = vmatprep.mubr.bf16.mxu1 %v14942_v30  ;;  %5193 = sst [smem:[#allocation13]] %s14914_s24  ;;  %s16728_s27 = smov 128   ;;  %v4192_v31 = vld [vmem:[#allocation2 + $0x208] sm:$0xff]  ;;  %v4191_v25 = vld [vmem:[#allocation2 + $0x200] sm:$0xff]  ;;  %v15589_v45 = vpack.c.bf16 %v15574_v26, %v15572_v22 }
0x1e1d   :  { %5195 = sst [smem:[#allocation13 + $0x1]] %s14914_s24  ;;  %s16729_s13 = smov 2   ;;  %v4194_v34 = vld [vmem:[#allocation2 + $0x218] sm:$0xff]  ;;  %4345 = vmatprep.subr.bf16.mxu0 %v4192_v31  ;;  %v4193_v35 = vld [vmem:[#allocation2 + $0x210] sm:$0xff]  ;;  %v4208_v36 = vld [vmem:[#allocation2 + $0x308] sm:$0xff] }
0x1e1e   :  { %5197 = sst [smem:[#allocation13 + $0x2]] %s14917_s5  ;;  %s16730_s21 = smov 2048   ;;  %4388 = vmatprep.subr.bf16.mxu1 %v4194_v34  ;;  %4346 = vmatpush1.bf16.msra.mxu0 %v4191_v25  ;;  %v4210_v38 = vld [vmem:[#allocation2 + $0x318] sm:$0xff]  ;;  %v4207_v39 = vld [vmem:[#allocation2 + $0x300] sm:$0xff]  ;;  %v4209_v40 = vld [vmem:[#allocation2 + $0x310] sm:$0xff] }
0x1e1f   :  { %5199 = sst [smem:[#allocation13 + $0x3]] %s14918_s25  ;;  %s16731_s24 = smov 4   ;;  %4389 = vmatpush1.bf16.msra.mxu1 %v4193_v35  ;;  %4347 = vmatprep.subr.bf16.mxu0 %v4208_v36  ;;  %v4196_v43 = vld [vmem:[#allocation2 + $0x228] sm:$0xff]  ;;  %v4198_v44 = vld [vmem:[#allocation2 + $0x238] sm:$0xff]  ;;  %v4195_v11 = vld [vmem:[#allocation2 + $0x220] sm:$0xff] }
0x1e20   :  { %5201 = sst [smem:[#allocation13 + $0x4]] %s16728_s27  ;;  %4390 = vmatprep.subr.bf16.mxu1 %v4210_v38  ;;  %v4197_v48 = vld [vmem:[#allocation2 + $0x230] sm:$0xff]  ;;  %v4212_v49 = vld [vmem:[#allocation2 + $0x328] sm:$0xff]  ;;  %v4214_v50 = vld [vmem:[#allocation2 + $0x338] sm:$0xff]  ;;  %s14944_s27 = smov [#allocation12]  }
0x1e21   :  { %5203 = sst [smem:[#allocation13 + $0x5]] %s16729_s13  ;;  %v4211_v52 = vld [vmem:[#allocation2 + $0x320] sm:$0xff]  ;;  %v4213_v53 = vld [vmem:[#allocation2 + $0x330] sm:$0xff]  ;;  %v4200_v32 = vld [vmem:[#allocation2 + $0x248] sm:$0xff]  ;;  %s16733_s11 = smov [#allocation3 + $0x1]  }
0x1e22   :  { %5205 = sst [smem:[#allocation13 + $0x6]] %s16730_s21  ;;  %4348 = vmatpush1.bf16.msra.mxu0 %v4207_v39  ;;  %v4202_v58 = vld [vmem:[#allocation2 + $0x258] sm:$0xff]  ;;  %v4199_v55 = vld [vmem:[#allocation2 + $0x240] sm:$0xff]  ;;  %v4201_v28 = vld [vmem:[#allocation2 + $0x250] sm:$0xff] }
0x1e23   :  { %5207 = sst [smem:[#allocation13 + $0x7]] %s14918_s25  ;;  %4391 = vmatpush1.bf16.msra.mxu1 %v4209_v40  ;;  %4431 = vmatprep.subr.bf16.mxu0 %v4196_v43  ;;  %v4216_v41 = vld [vmem:[#allocation2 + $0x348] sm:$0xff]  ;;  %v4218_v42 = vld [vmem:[#allocation2 + $0x358] sm:$0xff]  ;;  %v4215_v57 = vld [vmem:[#allocation2 + $0x340] sm:$0xff] }
0x1e24   :  { %5209 = sst [smem:[#allocation13 + $0x8]] %s16731_s24  ;;  %4474 = vmatprep.subr.bf16.mxu1 %v4198_v44  ;;  %v4217_v56 = vld [vmem:[#allocation2 + $0x350] sm:$0xff]  ;;  %v4204_v59 = vld [vmem:[#allocation2 + $0x268] sm:$0xff]  ;;  %v4206_v60 = vld [vmem:[#allocation2 + $0x278] sm:$0xff]  ;;  %s16732_s24 = sld [smem:[#allocation19_spill]] }
0x1e25   :  { %13446 = vmatmul.mubr.msk.bf16.vlgmr.msra.gmra.mrb[76].mxu0 %vm204_vm2, %v15589_v45  ;;  %v4203_v61 = vld [vmem:[#allocation2 + $0x260] sm:$0xff]  ;;  %v4205_v62 = vld [vmem:[#allocation2 + $0x270] sm:$0xff]  ;;  %v4220_v63 = vld [vmem:[#allocation2 + $0x368] sm:$0xff] }
0x1e26   :  { %13447 = vmatmul.mubr.msk.bf16.vlgmr.msra.gmra.mrb[76].mxu1 %vm204_vm2, %v15589_v45  ;;  %4432 = vmatpush1.bf16.msra.mxu0 %v4195_v11  ;;  %v4222_v1 = vld [vmem:[#allocation2 + $0x378] sm:$0xff]  ;;  %v4219_v2 = vld [vmem:[#allocation2 + $0x360] sm:$0xff]  ;;  %v4221_v4 = vld [vmem:[#allocation2 + $0x370] sm:$0xff] }
0x1e27   :  { %4475 = vmatpush1.bf16.msra.mxu1 %v4197_v48  ;;  %4433 = vmatprep.subr.bf16.mxu0 %v4212_v49  ;;  %v4224_v6 = vld [vmem:[#allocation2 + $0x288] sm:$0xff]  ;;  %v4226_v8 = vld [vmem:[#allocation2 + $0x298] sm:$0xff]  ;;  %v4223_v9 = vld [vmem:[#allocation2 + $0x280] sm:$0xff] }
0x1e28   :  { %4463 = vmatprep.mubr.bf16.mxu0 %v14942_v30  ;;  %4476 = vmatprep.subr.bf16.mxu1 %v4214_v50  ;;  %v4225_v54 = vld [vmem:[#allocation2 + $0x290] sm:$0xff]  ;;  %v4240_v46 = vld [vmem:[#allocation2 + $0x388] sm:$0xff]  ;;  %v4239_v10 = vld [vmem:[#allocation2 + $0x380] sm:$0xff] }
0x1e29   :  { %4506 = vmatprep.mubr.bf16.mxu1 %v14942_v30  ;;  %v4242_v47 = vld [vmem:[#allocation2 + $0x398] sm:$0xff]  ;;  %v4241_v3 = vld [vmem:[#allocation2 + $0x390] sm:$0xff]  ;;  %v4228_v5 = vld [vmem:[#allocation2 + $0x2a8] sm:$0xff] }
0x1e2a   :  { %4434 = vmatpush1.bf16.msra.mxu0 %v4211_v52  ;;  %v4230_v7 = vld [vmem:[#allocation2 + $0x2b8] sm:$0xff]  ;;  %s16734_s23 = int_to_ptr.vmem [resolvable:$true] %s16732_s24 }
0x1e2b   :  { %4477 = vmatpush1.bf16.msra.mxu1 %v4213_v53  ;;  %4517 = vmatprep.subr.bf16.mxu0 %v4200_v32  ;;  %v13444_v17 = vld [vmem:[%s16704_s7 + $0x1] ss:$4 sm:$0xff] }
0x1e2c   :  { %4560 = vmatprep.subr.bf16.mxu1 %v4202_v58  ;;  %v4265_v15 = vrot.slane %v13444_v17, %v15306_v16  ;;  %v4273_v18 = vrot.slane %v13444_v17, %v15308_v12  ;;  %v4269_v19 = vrot.slane %v13444_v17, %v15313_v13  ;;  %v4277_v20 = vrot.slane %v13444_v17, %v15315_v14 }
0x1e2d   :  { %13448 = vmatmul.mubr.msk.bf16.vlgmr.msra.gmra.mrb[80].mxu0 %vm204_vm2, %v15589_v45  ;;  %v4281_v11 = vrot.slane %v13444_v17, %v15321_v21  ;;  %v4285_v52 = vrot.slane %v13444_v17, %v15323_v24 }
0x1e2e   :  { %13449 = vmatmul.mubr.msk.bf16.vlgmr.msra.gmra.mrb[80].mxu1 %vm204_vm2, %v15589_v45  ;;  %4518 = vmatpush1.bf16.msra.mxu0 %v4199_v55  ;;  %v4289_v55 = vrot.slane %v13444_v17, %v15325_v33 }
0x1e2f   :  { %4561 = vmatpush1.bf16.msra.mxu1 %v4201_v28  ;;  %4519 = vmatprep.subr.bf16.mxu0 %v4216_v41 }
0x1e30   :  { %4549 = vmatprep.mubr.bf16.mxu0 %v14942_v30  ;;  %4562 = vmatprep.subr.bf16.mxu1 %v4218_v42 }
0x1e31   :  { %4592 = vmatprep.mubr.bf16.mxu1 %v14942_v30 }
0x1e32   :  { %4520 = vmatpush1.bf16.msra.mxu0 %v4215_v57  ;;  %v4293_v57 = vrot.slane %v13444_v17, %v15327_v37 }
0x1e33   :  { %4563 = vmatpush1.bf16.msra.mxu1 %v4217_v56  ;;  %4603 = vmatprep.subr.bf16.mxu0 %v4204_v59 }
0x1e34   :  { %4646 = vmatprep.subr.bf16.mxu1 %v4206_v60 }
0x1e35   :  { %13450 = vmatmul.mubr.msk.bf16.vlgmr.msra.gmra.mrb[84].mxu0 %vm204_vm2, %v15589_v45 }
0x1e36   :  { %13451 = vmatmul.mubr.msk.bf16.vlgmr.msra.gmra.mrb[84].mxu1 %vm204_vm2, %v15589_v45  ;;  %4604 = vmatpush1.bf16.msra.mxu0 %v4203_v61 }
0x1e37   :  { %4647 = vmatpush1.bf16.msra.mxu1 %v4205_v62  ;;  %4605 = vmatprep.subr.bf16.mxu0 %v4220_v63 }
0x1e38   :  { %4635 = vmatprep.mubr.bf16.mxu0 %v14942_v30  ;;  %4648 = vmatprep.subr.bf16.mxu1 %v4222_v1  ;;  %v4227_v1 = vld [vmem:[#allocation2 + $0x2a0] sm:$0xff] }
0x1e39   :  { %4678 = vmatprep.mubr.bf16.mxu1 %v14942_v30 }
0x1e3a   :  { %4606 = vmatpush1.bf16.msra.mxu0 %v4219_v2 }
0x1e3b   :  { %4649 = vmatpush1.bf16.msra.mxu1 %v4221_v4  ;;  %4742 = vmatprep.subr.bf16.mxu0 %v4224_v6  ;;  %v4229_v4 = vld [vmem:[#allocation2 + $0x2b0] sm:$0xff] }
0x1e3c   :  { %4783 = vmatprep.subr.bf16.mxu1 %v4226_v8 }
0x1e3d   :  { %13452 = vmatmul.mubr.msk.bf16.vlgmr.msra.gmra.mrb[88].mxu0 %vm204_vm2, %v15589_v45 }
0x1e3e   :  { %13453 = vmatmul.mubr.msk.bf16.vlgmr.msra.gmra.mrb[88].mxu1 %vm204_vm2, %v15589_v45 }
0x1e43   :  { %4743 = vmatpush1.bf16.xpose.msra.mxu0 %v4223_v9 }
0x1e44   :  { %4784 = vmatpush1.bf16.xpose.msra.mxu1 %v4225_v54  ;;  %4744 = vmatprep.subr.bf16.mxu0 %v4240_v46 }
0x1e45   :  { %4785 = vmatprep.subr.bf16.mxu1 %v4242_v47  ;;  %v4244_v47 = vld [vmem:[#allocation2 + $0x3a8] sm:$0xff] }
0x1e4b   :  { %4745 = vmatpush1.bf16.xpose.msra.mxu0 %v4239_v10 }
0x1e4c   :  { %4786 = vmatpush1.bf16.xpose.msra.mxu1 %v4241_v3  ;;  %4824 = vmatprep.subr.bf16.mxu0 %v4228_v5  ;;  %v4246_v5 = vld [vmem:[#allocation2 + $0x3b8] sm:$0xff] }
0x1e4d   :  { %4865 = vmatprep.subr.bf16.mxu1 %v4230_v7  ;;  %v15627_v7 = vld [vmem:[%s16704_s7 + $0x21] ss:$4 sm:$0xff] }
0x1ef8   :  { %v4379_v51 = vpop.f32.mrb[76].mxu0 }
0x1ef9   :  { %v4422_v27 = vpop.f32.mrb[76].mxu1  ;;  %v4380_v29 = vadd.f32 %v4379_v51, %v4265_v15  ;;  %v4381_v23 = vpop.f32.mrb[77].mxu0 }
0x1efa   :  { %v4423_v31 = vadd.f32 %v4422_v27, %v4273_v18  ;;  %v4424_v25 = vpop.f32.mrb[77].mxu1  ;;  %v4382_v34 = vadd.f32 %v4381_v23, %v4269_v19  ;;  %v4383_v35 = vpop.f32.mrb[78].mxu0 }
0x1efb   :  { %v4425_v36 = vadd.f32 %v4424_v25, %v4277_v20  ;;  %v4426_v38 = vpop.f32.mrb[78].mxu1  ;;  %v4384_v39 = vadd.f32 %v4383_v35, %v4265_v15  ;;  %v4385_v43 = vpop.f32.mrb[79].mxu0  ;;  %v4689_v53 = vmax.f32 %v4380_v29, 0.0  ;;  %v4297_v35 = vrot.slane %v15627_v7, %v15306_v16 }
0x1efc   :  { %v4691_v40 = vmax.f32 %v4423_v31, 0.0  ;;  %v4427_v44 = vadd.f32 %v4426_v38, %v4273_v18  ;;  %v4428_v45 = vpop.f32.mrb[79].mxu1  ;;  %v4386_v48 = vadd.f32 %v4385_v43, %v4269_v19  ;;  %v4690_v28 = vmax.f32 %v4382_v34, 0.0 }
0x1efd   :  { %v4692_v49 = vmax.f32 %v4425_v36, 0.0  ;;  %v4429_v50 = vadd.f32 %v4428_v45, %v4277_v20  ;;  %v4705_v32 = vmax.f32 %v4384_v39, 0.0  ;;  %v4305_v36 = vrot.slane %v15627_v7, %v15308_v12 }
0x1efe   :  { %v4707_v58 = vmax.f32 %v4427_v44, 0.0  ;;  %v4706_v41 = vmax.f32 %v4386_v48, 0.0  ;;  %v4309_v43 = vrot.slane %v15627_v7, %v15315_v14 }
0x1eff   :  { %v4708_v42 = vmax.f32 %v4429_v50, 0.0  ;;  %v4721_v56 = vpack.c.bf16 %v4705_v32, %v4689_v53  ;;  %v4245_v53 = vld [vmem:[#allocation2 + $0x3b0] sm:$0xff] }
0x1f00   :  { %v4723_v59 = vpack.c.bf16 %v4707_v58, %v4691_v40  ;;  %v4722_v60 = vpack.c.bf16 %v4706_v41, %v4690_v28  ;;  %v4465_v62 = vpop.f32.mrb[80].mxu0  ;;  %v4301_v40 = vrot.slane %v15627_v7, %v15313_v13  ;;  %v4232_v41 = vld [vmem:[#allocation2 + $0x2c8] sm:$0xff] }
0x1f01   :  { %v4724_v61 = vpack.c.bf16 %v4708_v42, %v4692_v49  ;;  %v4508_v63 = vpop.f32.mrb[80].mxu1  ;;  %v4466_v2 = vadd.f32 %v4465_v62, %v4281_v11  ;;  %v4467_v6 = vpop.f32.mrb[81].mxu0  ;;  %v4234_v42 = vld [vmem:[#allocation2 + $0x2d8] sm:$0xff] }
0x1f02   :  { %v4509_v8 = vadd.f32 %v4508_v63, %v4289_v55  ;;  %v4510_v9 = vpop.f32.mrb[81].mxu1  ;;  %4774 = vmatprep.mubr.bf16.mxu0 %v4722_v60  ;;  %v4468_v54 = vadd.f32 %v4467_v6, %v4285_v52  ;;  %v4469_v46 = vpop.f32.mrb[82].mxu0 }
0x1f03   :  { %4815 = vmatprep.mubr.bf16.mxu1 %v4724_v61  ;;  %v4511_v10 = vadd.f32 %v4510_v9, %v4293_v57  ;;  %v4512_v3 = vpop.f32.mrb[82].mxu1  ;;  %4775 = vmatmul.mubr.bf16.vlgmr.msra.gmra.mrb[92].mxu0 %v4721_v56  ;;  %v4693_v17 = vmax.f32 %v4466_v2, 0.0  ;;  %v4470_v15 = vadd.f32 %v4469_v46, %v4281_v11  ;;  %v4471_v18 = vpop.f32.mrb[83].mxu0 }
0x1f04   :  { %4816 = vmatmul.mubr.bf16.vlgmr.msra.gmra.mrb[92].mxu1 %v4723_v59  ;;  %v4695_v19 = vmax.f32 %v4509_v8, 0.0  ;;  %v4513_v20 = vadd.f32 %v4512_v3, %v4289_v55  ;;  %v4514_v51 = vpop.f32.mrb[83].mxu1  ;;  %4825 = vmatpush1.bf16.xpose.msra.mxu0 %v4227_v1  ;;  %v4694_v27 = vmax.f32 %v4468_v54, 0.0  ;;  %v4472_v29 = vadd.f32 %v4471_v18, %v4285_v52  ;;  %v4243_v52 = vld [vmem:[#allocation2 + $0x3a0] sm:$0xff] }
0x1f05   :  { %4866 = vmatpush1.bf16.xpose.msra.mxu1 %v4229_v4  ;;  %v4696_v23 = vmax.f32 %v4511_v10, 0.0  ;;  %v4515_v31 = vadd.f32 %v4514_v51, %v4293_v57  ;;  %v4709_v25 = vmax.f32 %v4470_v15, 0.0  ;;  %4826 = vmatprep.subr.bf16.mxu0 %v4244_v47  ;;  %v4313_v47 = vrot.slane %v15627_v7, %v15321_v21 }
0x1f06   :  { %v4711_v34 = vmax.f32 %v4513_v20, 0.0  ;;  %4867 = vmatprep.subr.bf16.mxu1 %v4246_v5  ;;  %v4710_v38 = vmax.f32 %v4472_v29, 0.0  ;;  %v4321_v3 = vrot.slane %v15627_v7, %v15325_v33  ;;  %v4317_v15 = vrot.slane %v15627_v7, %v15323_v24 }
0x1f07   :  { %v4712_v39 = vmax.f32 %v4515_v31, 0.0  ;;  %v4725_v44 = vpack.c.bf16 %v4709_v25, %v4693_v17  ;;  %v4325_v18 = vrot.slane %v15627_v7, %v15327_v37  ;;  %v4231_v31 = vld [vmem:[#allocation2 + $0x2c0] sm:$0xff]  ;;  %v4233_v25 = vld [vmem:[#allocation2 + $0x2d0] sm:$0xff] }
0x1f08   :  { %v4727_v45 = vpack.c.bf16 %v4711_v34, %v4695_v19  ;;  %v4726_v11 = vpack.c.bf16 %v4710_v38, %v4694_v27  ;;  %v4551_v49 = vpop.f32.mrb[84].mxu0 }
0x1f09   :  { %v4728_v48 = vpack.c.bf16 %v4712_v39, %v4696_v23  ;;  %v4594_v50 = vpop.f32.mrb[84].mxu1  ;;  %v4552_v32 = vadd.f32 %v4551_v49, %v4297_v35  ;;  %v4553_v58 = vpop.f32.mrb[85].mxu0  ;;  %v4248_v39 = vld [vmem:[#allocation2 + $0x3c8] sm:$0xff] }
0x1f0a   :  { %v4595_v55 = vadd.f32 %v4594_v50, %v4305_v36  ;;  %v4596_v28 = vpop.f32.mrb[85].mxu1  ;;  %4856 = vmatprep.mubr.bf16.mxu0 %v4726_v11  ;;  %v4554_v57 = vadd.f32 %v4553_v58, %v4301_v40  ;;  %v4555_v56 = vpop.f32.mrb[86].mxu0 }
0x1f0b   :  { %4897 = vmatprep.mubr.bf16.mxu1 %v4728_v48  ;;  %v4597_v59 = vadd.f32 %v4596_v28, %v4309_v43  ;;  %v4598_v60 = vpop.f32.mrb[86].mxu1  ;;  %v4697_v61 = vmax.f32 %v4552_v32, 0.0  ;;  %v4556_v62 = vadd.f32 %v4555_v56, %v4297_v35  ;;  %v4557_v63 = vpop.f32.mrb[87].mxu0 }
0x1f0c   :  { %v4699_v1 = vmax.f32 %v4595_v55, 0.0  ;;  %v4599_v2 = vadd.f32 %v4598_v60, %v4305_v36  ;;  %v4600_v4 = vpop.f32.mrb[87].mxu1  ;;  %4827 = vmatpush1.bf16.xpose.msra.mxu0 %v4243_v52  ;;  %v4698_v6 = vmax.f32 %v4554_v57, 0.0  ;;  %v4558_v8 = vadd.f32 %v4557_v63, %v4301_v40  ;;  %v4250_v40 = vld [vmem:[#allocation2 + $0x3d8] sm:$0xff]  ;;  %v4247_v63 = vld [vmem:[#allocation2 + $0x3c0] sm:$0xff] }
0x1f0d   :  { %4868 = vmatpush1.bf16.xpose.msra.mxu1 %v4245_v53  ;;  %v4700_v9 = vmax.f32 %v4597_v59, 0.0  ;;  %v4601_v54 = vadd.f32 %v4600_v4, %v4309_v43  ;;  %4906 = vmatprep.subr.bf16.mxu0 %v4232_v41  ;;  %v4713_v46 = vmax.f32 %v4556_v62, 0.0  ;;  %v4238_v4 = vld [vmem:[#allocation2 + $0x2f8] sm:$0xff] }
0x1f0e   :  { %4947 = vmatprep.subr.bf16.mxu1 %v4234_v42  ;;  %v4715_v10 = vmax.f32 %v4599_v2, 0.0  ;;  %v4714_v5 = vmax.f32 %v4558_v8, 0.0  ;;  %v4236_v2 = vld [vmem:[#allocation2 + $0x2e8] sm:$0xff]  ;;  %v4237_v8 = vld [vmem:[#allocation2 + $0x2f0] sm:$0xff] }
0x1f0f   :  { %v4716_v17 = vmax.f32 %v4601_v54, 0.0  ;;  %v4729_v19 = vpack.c.bf16 %v4713_v46, %v4697_v61  ;;  %v4254_v54 = vld [vmem:[#allocation2 + $0x3f8] sm:$0xff]  ;;  %v4251_v46 = vld [vmem:[#allocation2 + $0x3e0] sm:$0xff] }
0x1f10   :  { %v4731_v20 = vpack.c.bf16 %v4715_v10, %v4699_v1  ;;  %v4730_v51 = vpack.c.bf16 %v4714_v5, %v4698_v6  ;;  %v4637_v29 = vpop.f32.mrb[88].mxu0  ;;  %v4249_v1 = vld [vmem:[#allocation2 + $0x3d0] sm:$0xff]  ;;  %v4235_v6 = vld [vmem:[#allocation2 + $0x2e0] sm:$0xff]  ;;  %v5116_v5 = vld [vmem:[%s16698_s1 + $0x8] sm:$0xff] }
0x1f11   :  { %v4732_v27 = vpack.c.bf16 %v4716_v17, %v4700_v9  ;;  %v4680_v23 = vpop.f32.mrb[88].mxu1  ;;  %v4638_v34 = vadd.f32 %v4637_v29, %v4313_v47  ;;  %v4639_v35 = vpop.f32.mrb[89].mxu0  ;;  %v4252_v9 = vld [vmem:[#allocation2 + $0x3e8] sm:$0xff]  ;;  %v4253_v10 = vld [vmem:[#allocation2 + $0x3f0] sm:$0xff] }
0x1f12   :  { %v4681_v36 = vadd.f32 %v4680_v23, %v4321_v3  ;;  %v4682_v38 = vpop.f32.mrb[89].mxu1  ;;  %v4640_v43 = vadd.f32 %v4639_v35, %v4317_v15  ;;  %v4641_v11 = vpop.f32.mrb[90].mxu0 }
0x1f13   :  { %v4683_v48 = vadd.f32 %v4682_v38, %v4325_v18  ;;  %v4684_v49 = vpop.f32.mrb[90].mxu1  ;;  %4857 = vmatmul.mubr.bf16.vlgmr.msra.gmra.mrb[96].mxu0 %v4725_v44  ;;  %v4701_v7 = vmax.f32 %v4638_v34, 0.0  ;;  %v4642_v50 = vadd.f32 %v4641_v11, %v4313_v47  ;;  %v4643_v52 = vpop.f32.mrb[91].mxu0  ;;  %v14670_v47 = vld [vmem:[%s16701_s4 + $0x8] sm:$0xff]  }
0x1f14   :  { %4898 = vmatmul.mubr.bf16.vlgmr.msra.gmra.mrb[96].mxu1 %v4727_v45  ;;  %v4703_v53 = vmax.f32 %v4681_v36, 0.0  ;;  %v4685_v32 = vadd.f32 %v4684_v49, %v4321_v3  ;;  %v4686_v58 = vpop.f32.mrb[91].mxu1  ;;  %4907 = vmatpush1.bf16.xpose.msra.mxu0 %v4231_v31  ;;  %v4702_v55 = vmax.f32 %v4640_v43, 0.0  ;;  %v4644_v28 = vadd.f32 %v4643_v52, %v4317_v15  ;;  %v5115_v3 = vld [vmem:[%s16698_s1] sm:$0xff]  ;;  %v15667_v15 = vld [vmem:[%s16703_s6 + $0xf] ss:$0 sm:$0xff] }
0x1f15   :  { %4948 = vmatpush1.bf16.xpose.msra.mxu1 %v4233_v25  ;;  %v4704_v41 = vmax.f32 %v4683_v48, 0.0  ;;  %v4687_v42 = vadd.f32 %v4686_v58, %v4325_v18  ;;  %4908 = vmatprep.subr.bf16.mxu0 %v4248_v39  ;;  %v4717_v57 = vmax.f32 %v4642_v50, 0.0  ;;  %v5117_v17 = vpack.c.bf16 %v5116_v5, %v5115_v3  ;;  %v15672_v18 = vld [vmem:[%s16703_s6 + $0x10] ss:$0 sm:$0xff]  ;;  %s5177_s1 = scalar_lea.hbm %s16705_s8, 24576 }
0x1f16   :  { %4949 = vmatprep.subr.bf16.mxu1 %v4250_v40  ;;  %v4719_v56 = vmax.f32 %v4685_v32, 0.0  ;;  %4938 = vmatprep.mubr.bf16.mxu0 %v4730_v51  ;;  %v4718_v44 = vmax.f32 %v4644_v28, 0.0  ;;  %v15685_v51 = vld [vmem:[%s16700_s3] sm:$0xff] }
0x1f17   :  { %4979 = vmatprep.mubr.bf16.mxu1 %v4732_v27  ;;  %v4720_v45 = vmax.f32 %v4687_v42, 0.0  ;;  %v4733_v59 = vpack.c.bf16 %v4717_v57, %v4701_v7  ;;  %v15690_v27 = vld [vmem:[%s16700_s3 + $0x8] sm:$0xff] }
0x1f18   :  { %v4735_v60 = vpack.c.bf16 %v4719_v56, %v4703_v53  ;;  %v4734_v61 = vpack.c.bf16 %v4718_v44, %v4702_v55 }
0x1f19   :  { %v4736_v62 = vpack.c.bf16 %v4720_v45, %v4704_v41 }
0x1f1c   :  { %4909 = vmatpush1.bf16.xpose.msra.mxu0 %v4247_v63 }
0x1f1d   :  { %4950 = vmatpush1.bf16.xpose.msra.mxu1 %v4249_v1  ;;  %4988 = vmatprep.subr.bf16.mxu0 %v4236_v2 }
0x1f1e   :  { %5029 = vmatprep.subr.bf16.mxu1 %v4238_v4 }
0x1f23   :  { %4939 = vmatmul.mubr.bf16.vlgmr.msra.gmra.mrb[100].mxu0 %v4729_v19  ;;  %v15677_v19 = vld [vmem:[%s16703_s6 + $0x1] ss:$0 sm:$0xff] }
0x1f24   :  { %4980 = vmatmul.mubr.bf16.vlgmr.msra.gmra.mrb[100].mxu1 %v4731_v20  ;;  %4989 = vmatpush1.bf16.xpose.msra.mxu0 %v4235_v6  ;;  %v13454_v20 = vld [vmem:[%s16703_s6 + $0xe] ss:$0 sm:$0xff] }
0x1f25   :  { %5030 = vmatpush1.bf16.xpose.msra.mxu1 %v4237_v8  ;;  %4990 = vmatprep.subr.bf16.mxu0 %v4252_v9  ;;  %5211 = dma.general %s5177_s1, 8192, %s16734_s23, %s16733_s11, %s14944_s27, [#allocation13], %s15020_s30, 0  }
0x1f26   :  { %5031 = vmatprep.subr.bf16.mxu1 %v4254_v54  ;;  %5020 = vmatprep.mubr.bf16.mxu0 %v4734_v61  ;;  %v14671_v29 = vld [vmem:[#allocation4 + $0x10] ss:$60 sps:$4 sm:$0xff]   ;;  %v14672_v23 = vld [vmem:[#allocation4 + $0x88] ss:$60 sps:$4 sm:$0xff]   ;;  %s16735_s30 = smov 104   ;;  %s16736_s23 = smov 40  }
0x1f27   :  { %5061 = vmatprep.mubr.bf16.mxu1 %v4736_v62 }
0x1f2c   :  { %4991 = vmatpush1.bf16.xpose.msra.mxu0 %v4251_v46 }
0x1f2d   :  { %5032 = vmatpush1.bf16.xpose.msra.mxu1 %v4253_v10  ;;  %14077 = vmatprep.subr.bf16.mxu0 %v14915_v0 }
0x1f2e   :  { %14083 = vmatprep.subr.bf16.mxu1 %v14915_v0 }
0x1f33   :  { %5021 = vmatmul.mubr.bf16.vlgmr.msra.gmra.mrb[104].mxu0 %v4733_v59 }
0x1f34   :  { %5062 = vmatmul.mubr.bf16.vlgmr.msra.gmra.mrb[104].mxu1 %v4735_v60  ;;  %14078 = vmatpush3.bf16.msra.mxu0 %v14670_v47 }
0x1f35   :  { %14079 = vmatprep.mubr.msk.bf16.mxu0 %vm14916_vm0, %v14915_v0  ;;  %14087 = vmatprep.mubr.msk.bf16.mxu1 %vm14916_vm0, %v14915_v0 }
0x1f36   :  { %14091 = vmatprep.subr.mxu0 %v14915_v0  ;;  %14084 = vmatpush3.bf16.msra.mxu1 %v14671_v29 }
0x1f37   :  { %14085 = vmatprep.subr.bf16.mxu1 %v14915_v0 }
0x1f3a   :  { %14086 = vmatpush3.bf16.msra.mxu1 %v14672_v23 }
0x1f3b   :  { %14080 = vmatmul.mubr.msk.bf16.vlgmr.msra.gmra.mrb[108].mxu0 %vm96_vm1, %v5117_v17  ;;  %14101 = vmatprep.subr.mxu1 %v14915_v0 }
0x1f3c   :  { %14093 = vmatprep.mubr.msk.f32.mxu0 %vm14916_vm0, %v14915_v0 }
0x1fd6   :  { %v4776_v31 = vpop.f32.mrb[92].mxu0 }
0x1fd7   :  { %v4817_v25 = vpop.f32.mrb[92].mxu1  ;;  %v4777_v34 = vadd.f32 %v13454_v20, %v4776_v31  ;;  %v4778_v35 = vpop.f32.mrb[93].mxu0 }
0x1fd8   :  { %v4819_v36 = vpop.f32.mrb[93].mxu1  ;;  %v4779_v38 = vpop.f32.mrb[94].mxu0 }
0x1fd9   :  { %v4820_v39 = vpop.f32.mrb[94].mxu1  ;;  %v4780_v40 = vadd.f32 %v13454_v20, %v4779_v38  ;;  %v4818_v43 = vadd.f32 %v4817_v25, %v4777_v34  ;;  %v4781_v11 = vpop.f32.mrb[95].mxu0 }
0x1fda   :  { %v4822_v48 = vpop.f32.mrb[95].mxu1 }
0x1fdb   :  { %v4821_v49 = vadd.f32 %v4820_v39, %v4780_v40  ;;  %v13462_v48 = vld [vmem:[%s16703_s6 + $0x11] ss:$0 sm:$0xff] }
0x1fe6   :  { %v4858_v7 = vpop.f32.mrb[96].mxu0 }
0x1fe7   :  { %v4899_v50 = vpop.f32.mrb[96].mxu1  ;;  %v4859_v52 = vadd.f32 %v4858_v7, %v4818_v43  ;;  %v4860_v53 = vpop.f32.mrb[97].mxu0 }
0x1fe8   :  { %v4901_v32 = vpop.f32.mrb[97].mxu1  ;;  %v4861_v58 = vpop.f32.mrb[98].mxu0 }
0x1fe9   :  { %v4902_v55 = vpop.f32.mrb[98].mxu1  ;;  %v4862_v28 = vadd.f32 %v4861_v58, %v4821_v49  ;;  %v4900_v41 = vadd.f32 %v4899_v50, %v4859_v52  ;;  %v4863_v42 = vpop.f32.mrb[99].mxu0 }
0x1fea   :  { %v4904_v57 = vpop.f32.mrb[99].mxu1 }
0x1feb   :  { %v4903_v56 = vadd.f32 %v4902_v55, %v4862_v28 }
0x1ff6   :  { %v4940_v44 = vpop.f32.mrb[100].mxu0 }
0x1ff7   :  { %v4981_v45 = vpop.f32.mrb[100].mxu1  ;;  %v4941_v59 = vadd.f32 %v4940_v44, %v4900_v41  ;;  %v4942_v60 = vpop.f32.mrb[101].mxu0 }
0x1ff8   :  { %v4983_v61 = vpop.f32.mrb[101].mxu1  ;;  %v4943_v62 = vpop.f32.mrb[102].mxu0 }
0x1ff9   :  { %v4984_v63 = vpop.f32.mrb[102].mxu1  ;;  %v4944_v1 = vadd.f32 %v4943_v62, %v4903_v56  ;;  %v4982_v2 = vadd.f32 %v4981_v45, %v4941_v59  ;;  %v4945_v4 = vpop.f32.mrb[103].mxu0 }
0x1ffa   :  { %v4986_v6 = vpop.f32.mrb[103].mxu1 }
0x1ffb   :  { %v4985_v8 = vadd.f32 %v4984_v63, %v4944_v1 }
0x2006   :  { %v5022_v9 = vpop.f32.mrb[104].mxu0 }
0x2007   :  { %v5063_v54 = vpop.f32.mrb[104].mxu1  ;;  %v5023_v46 = vadd.f32 %v5022_v9, %v4982_v2  ;;  %v5024_v10 = vpop.f32.mrb[105].mxu0 }
0x2008   :  { %v5065_v47 = vpop.f32.mrb[105].mxu1  ;;  %v5025_v3 = vpop.f32.mrb[106].mxu0 }
0x2009   :  { %v5066_v5 = vpop.f32.mrb[106].mxu1  ;;  %v5026_v17 = vadd.f32 %v5025_v3, %v4985_v8  ;;  %v15701_v20 = vadd.f32 %v5063_v54, %v5023_v46  ;;  %v5027_v29 = vpop.f32.mrb[107].mxu0 }
0x200a   :  { %v5068_v23 = vpop.f32.mrb[107].mxu1 }
0x200b   :  { %v15703_v31 = vadd.f32 %v5066_v5, %v5026_v17 }
0x200e   :  { %v5166_v25 = vpop.f32.mrb[108].mxu0 }
0x200f   :  { %v5167_v34 = vadd.f32 %v15677_v19, %v5166_v25  ;;  %v14081_v35 = vpop.f32.mrb[109].mxu0 }
0x2010   :  { %v5169_v36 = vpop.f32.mrb[110].mxu0 }
0x2011   :  { %v5170_v38 = vadd.f32 %v15677_v19, %v5169_v36  ;;  %v14082_v39 = vpop.f32.mrb[111].mxu0  ;;  %v15708_v40 = vadd.f32 %v15685_v51, %v5167_v34 }
0x2013   :  { %v15711_v43 = vadd.f32 %v15690_v27, %v5170_v38 }
0x2015   :  { %v5212_v11 = vpack.c.bf16 %v15711_v43, %v15708_v40 }
0x2017   :  { %14088 = vmatmul.mubr.msk.bf16.vlgmr.msra.gmra.mrb[108].mxu1 %vm204_vm2, %v5212_v11 }
0x2018   :  { %14103 = vmatprep.mubr.msk.f32.mxu1 %vm14916_vm0, %v14915_v0 }
0x20ea   :  { %v5271_v19 = vpop.f32.mrb[108].mxu1 }
0x20eb   :  { %v15721_v49 = vadd.f32 %v13462_v48, %v5271_v19  ;;  %v14089_v51 = vpop.f32.mrb[109].mxu1 }
0x20ec   :  { %v5274_v7 = vpop.f32.mrb[110].mxu1 }
0x20ed   :  { %5279 = vrot.lane.b32.xlu0 %v15721_v49, %s14929_s19  ;;  %v14090_v27 = vpop.f32.mrb[111].mxu1  ;;  %v15725_v50 = vadd.f32 %v13462_v48, %v5274_v7 }
0x20f1   :  { %5356 = vrot.lane.b32.xlu0 %v15725_v50, %s14929_s19 }
0x215f   :  { %v5280_v52 = vpop.permute.xlu0 %5279 }
0x2160   :  { %14092 = vmatpush3.xpose.msk.msra.mxu0 %vm252_vm3, %v5280_v52 }
0x2161   :  { %14096 = vmatprep.subr.mxu0 %v14915_v0 }
0x2163   :  { %14094 = vmatmul.mubr.msk.f32.vlgmr.msra.gmra.mrb[74].mxu0 %vm252_vm3, %v15721_v49  ;;  %v5357_v53 = vpop.permute.xlu0 %5356 }
0x2164   :  { %14097 = vmatpush3.xpose.msk.msra.mxu0 %vm252_vm3, %v5357_v53  ;;  %14098 = vmatprep.mubr.msk.f32.mxu0 %vm14916_vm0, %v14915_v0 }
0x2165   :  { %14106 = vmatprep.subr.mxu0 %v14915_v0 }
0x2167   :  { %14099 = vmatmul.mubr.msk.f32.vlgmr.msra.gmra.mrb[112].mxu0 %vm252_vm3, %v15725_v50 }
0x2168   :  { %14108 = vmatprep.mubr.msk.f32.mxu0 %vm14916_vm0, %v14915_v0 }
0x2236   :  { %v5351_v32 = vpop.f32.mrb[74].mxu0 }
0x2237   :  { %v14095_v58 = vpop.f32.mrb[75].mxu0  ;;  %v5432_v55 = vsel %vm252_vm3, %v5351_v32, -inf }
0x2238   :  { %5433 = vmax.xlane.f32.xlu1 %v5432_v55 }
0x223a   :  { %v5428_v28 = vpop.f32.mrb[112].mxu0 }
0x223b   :  { %v14100_v41 = vpop.f32.mrb[113].mxu0  ;;  %v5435_v42 = vsel %vm252_vm3, %v5428_v28, -inf }
0x223c   :  { %5436 = vmax.xlane.f32.xlu1 %v5435_v42 }
0x224d   :  { %5454 = vrot.lane.b32.xlu1 %v15721_v49, %s14918_s25 }
0x2251   :  { %5530 = vrot.lane.b32.xlu1 %v15725_v50, %s14918_s25 }
0x2255   :  { %5608 = vrot.lane.b32.xlu1 %v15721_v49, %s14930_s14 }
0x2259   :  { %5686 = vrot.lane.b32.xlu1 %v15725_v50, %s14930_s14 }
0x22c5   :  { %v5434_v57 = vpop.xlane.xlu1 %5433 }
0x22c6   :  { %v5438_v56 = vsub.f32 %v5351_v32, %v5434_v57 }
0x22c8   :  { %v5440_v44 = vmul.f32 1.442695, %v5438_v56 }
0x22c9   :  { %v5437_v45 = vpop.xlane.xlu1 %5436 }
0x22ca   :  { %14681 = vpow2.f32 %v5440_v44  ;;  %v5439_v59 = vsub.f32 %v5428_v28, %v5437_v45 }
0x22cc   :  { %v5442_v60 = vmul.f32 1.442695, %v5439_v59 }
0x22cd   :  { %v5455_v61 = vpop.permute.xlu1 %5454 }
0x22ce   :  { %14683 = vpow2.f32 %v5442_v60  ;;  %14102 = vmatpush3.msra.mxu1 %v5455_v61 }
0x22cf   :  { %14111 = vmatprep.subr.mxu1 %v14915_v0 }
0x22d1   :  { %v5531_v62 = vpop.permute.xlu1 %5530 }
0x22d2   :  { %14107 = vmatpush3.msra.mxu0 %v5531_v62 }
0x22d3   :  { %14116 = vmatprep.subr.mxu0 %v14915_v0 }
0x22d4   :  { %v14682_v63 = vpop.eup %14681 }
0x22d5   :  { %v5444_v1 = vsel %vm252_vm3, %v14682_v63, 0.0  ;;  %v5609_v6 = vpop.permute.xlu1 %5608 }
0x22d6   :  { %5445 = vadd.xlane.f32.xlu0 %v5444_v1 }
0x22d8   :  { %v14684_v2 = vpop.eup %14683 }
0x22d9   :  { %v5447_v4 = vsel %vm252_vm3, %v14684_v2, 0.0  ;;  %v5687_v8 = vpop.permute.xlu1 %5686 }
0x22da   :  { %5448 = vadd.xlane.f32.xlu1 %v5447_v4 }
0x22eb   :  { %5684 = vrot.lane.b32.xlu1 %v15725_v50, %s14931_s15 }
0x22ec   :  { %5606 = vrot.lane.b32.xlu0 %v15721_v49, %s14931_s15 }
0x2363   :  { %v5446_v9 = vpop.xlane.xlu0 %5445 }
0x2364   :  { %14685 = vrcp.f32 %v5446_v9 }
0x2367   :  { %v5449_v54 = vpop.xlane.xlu1 %5448  ;;  %v5607_v5 = vpop.permute.xlu0 %5606 }
0x2368   :  { %14687 = vrcp.f32 %v5449_v54 }
0x236b   :  { %v5685_v17 = vpop.permute.xlu1 %5684 }
0x236e   :  { %v14686_v46 = vpop.eup %14685 }
0x236f   :  { %v5451_v10 = vmul.f32 %v14686_v46, %v14682_v63 }
0x2371   :  { %14104 = vmatmul.mubr.msk.f32.vlgmr.msra.gmra.mrb[70].mxu1 %vm252_vm3, %v5451_v10 }
0x2372   :  { %v14688_v47 = vpop.eup %14687  ;;  %14112 = vmatpush3.xpose.msk.msra.mxu1 %vm252_vm3, %v5609_v6  ;;  %14113 = vmatprep.mubr.msk.f32.mxu1 %vm14916_vm0, %v14915_v0 }
0x2373   :  { %v5453_v3 = vmul.f32 %v14688_v47, %v14684_v2  ;;  %14121 = vmatprep.subr.mxu1 %v14915_v0 }
0x2375   :  { %14109 = vmatmul.mubr.msk.f32.vlgmr.msra.gmra.mrb[114].mxu0 %vm252_vm3, %v5453_v3  ;;  %14114 = vmatmul.mubr.msk.f32.vlgmr.msra.gmra.mrb[112].mxu1 %vm252_vm3, %v5607_v5 }
0x2376   :  { %14117 = vmatpush3.xpose.msk.msra.mxu0 %vm252_vm3, %v5687_v8  ;;  %14118 = vmatprep.mubr.msk.f32.mxu0 %vm14916_vm0, %v14915_v0 }
0x2377   :  { %14126 = vmatprep.subr.mxu0 %v14915_v0  ;;  %14123 = vmatprep.mubr.msk.f32.mxu1 %vm14916_vm0, %v14915_v0 }
0x2379   :  { %14119 = vmatmul.mubr.msk.f32.vlgmr.msra.gmra.mrb[116].mxu0 %vm252_vm3, %v5685_v17 }
0x237a   :  { %14128 = vmatprep.mubr.msk.f32.mxu0 %vm14916_vm0, %v14915_v0 }
0x2444   :  { %v15775_v29 = vpop.f32.mrb[70].mxu1 }
0x2445   :  { %v14105_v23 = vpop.f32.mrb[71].mxu1 }
0x2448   :  { %v15777_v25 = vpop.f32.mrb[114].mxu0  ;;  %v5680_v34 = vpop.f32.mrb[112].mxu1 }
0x2449   :  { %v14110_v35 = vpop.f32.mrb[115].mxu0  ;;  %v14115_v36 = vpop.f32.mrb[113].mxu1  ;;  %v5762_v38 = vsel %vm252_vm3, %v5680_v34, -inf }
0x244a   :  { %5763 = vmax.xlane.f32.xlu1 %v5762_v38 }
0x244c   :  { %v5758_v39 = vpop.f32.mrb[116].mxu0 }
0x244d   :  { %v14120_v11 = vpop.f32.mrb[117].mxu0  ;;  %v5765_v48 = vsel %vm252_vm3, %v5758_v39, -inf }
0x244e   :  { %5766 = vmax.xlane.f32.xlu0 %v5765_v48 }
0x245b   :  { %5784 = vrot.lane.b32.xlu1 %v15721_v49, %s14932_s16 }
0x245f   :  { %5938 = vrot.lane.b32.xlu1 %v15721_v49, %s14933_s17 }
0x2463   :  { %6016 = vrot.lane.b32.xlu1 %v15725_v50, %s14933_s17 }
0x2464   :  { %5860 = vrot.lane.b32.xlu0 %v15725_v50, %s14932_s16 }
0x2468   :  { %5936 = vrot.lane.b32.xlu0 %v15721_v49, %s14934_s18 }
0x24d7   :  { %v5764_v19 = vpop.xlane.xlu1 %5763 }
0x24d8   :  { %v5768_v51 = vsub.f32 %v5680_v34, %v5764_v19 }
0x24da   :  { %v5770_v7 = vmul.f32 1.442695, %v5768_v51 }
0x24db   :  { %v5785_v27 = vpop.permute.xlu1 %5784  ;;  %v5767_v52 = vpop.xlane.xlu0 %5766 }
0x24dc   :  { %14689 = vpow2.f32 %v5770_v7  ;;  %v5769_v53 = vsub.f32 %v5758_v39, %v5767_v52  ;;  %14122 = vmatpush3.msra.mxu1 %v5785_v27 }
0x24dd   :  { %14131 = vmatprep.subr.mxu1 %v14915_v0 }
0x24de   :  { %v5772_v32 = vmul.f32 1.442695, %v5769_v53 }
0x24df   :  { %v5861_v58 = vpop.permute.xlu0 %5860  ;;  %v5939_v57 = vpop.permute.xlu1 %5938 }
0x24e0   :  { %14691 = vpow2.f32 %v5772_v32  ;;  %14127 = vmatpush3.msra.mxu0 %v5861_v58 }
0x24e1   :  { %14136 = vmatprep.subr.mxu0 %v14915_v0 }
0x24e3   :  { %v6017_v56 = vpop.permute.xlu1 %6016  ;;  %v5937_v63 = vpop.permute.xlu0 %5936 }
0x24e6   :  { %v14690_v55 = vpop.eup %14689 }
0x24e7   :  { %v5774_v28 = vsel %vm252_vm3, %v14690_v55, 0.0 }
0x24e8   :  { %5775 = vadd.xlane.f32.xlu1 %v5774_v28 }
0x24ea   :  { %v14692_v41 = vpop.eup %14691 }
0x24eb   :  { %v5777_v42 = vsel %vm252_vm3, %v14692_v41, 0.0 }
0x24ec   :  { %5778 = vadd.xlane.f32.xlu1 %v5777_v42 }
0x24fd   :  { %6014 = vrot.lane.b32.xlu1 %v15725_v50, %s14934_s18 }
0x2575   :  { %v5776_v44 = vpop.xlane.xlu1 %5775 }
0x2576   :  { %14693 = vrcp.f32 %v5776_v44 }
0x2579   :  { %v5779_v45 = vpop.xlane.xlu1 %5778 }
0x257a   :  { %14695 = vrcp.f32 %v5779_v45 }
0x257d   :  { %v6015_v1 = vpop.permute.xlu1 %6014 }
0x2580   :  { %v14694_v59 = vpop.eup %14693 }
0x2581   :  { %v5781_v60 = vmul.f32 %v14694_v59, %v14690_v55 }
0x2583   :  { %14124 = vmatmul.mubr.msk.f32.vlgmr.msra.gmra.mrb[114].mxu1 %vm252_vm3, %v5781_v60 }
0x2584   :  { %v14696_v61 = vpop.eup %14695  ;;  %14132 = vmatpush3.xpose.msk.msra.mxu1 %vm252_vm3, %v5939_v57  ;;  %14133 = vmatprep.mubr.msk.f32.mxu1 %vm14916_vm0, %v14915_v0 }
0x2585   :  { %v5783_v62 = vmul.f32 %v14696_v61, %v14692_v41  ;;  %14141 = vmatprep.subr.mxu1 %v14915_v0 }
0x2587   :  { %14129 = vmatmul.mubr.msk.f32.vlgmr.msra.gmra.mrb[118].mxu0 %vm252_vm3, %v5783_v62  ;;  %14134 = vmatmul.mubr.msk.f32.vlgmr.msra.gmra.mrb[116].mxu1 %vm252_vm3, %v5937_v63 }
0x2588   :  { %14137 = vmatpush3.xpose.msk.msra.mxu0 %vm252_vm3, %v6017_v56  ;;  %14138 = vmatprep.mubr.msk.f32.mxu0 %vm14916_vm0, %v14915_v0 }
0x2589   :  { %14146 = vmatprep.subr.mxu0 %v14915_v0  ;;  %14143 = vmatprep.mubr.msk.f32.mxu1 %vm14916_vm0, %v14915_v0 }
0x258b   :  { %14139 = vmatmul.mubr.msk.f32.vlgmr.msra.gmra.mrb[120].mxu0 %vm252_vm3, %v6015_v1 }
0x258c   :  { %14148 = vmatprep.mubr.msk.f32.mxu0 %vm14916_vm0, %v14915_v0 }
0x2656   :  { %v15813_v2 = vpop.f32.mrb[114].mxu1 }
0x2657   :  { %v14125_v4 = vpop.f32.mrb[115].mxu1 }
0x265a   :  { %v15815_v6 = vpop.f32.mrb[118].mxu0  ;;  %v6010_v8 = vpop.f32.mrb[116].mxu1 }
0x265b   :  { %v14640_v9 = vpack.i.bf16 %v15815_v6, %v15813_v2  ;;  %v14130_v54 = vpop.f32.mrb[119].mxu0  ;;  %v14135_v46 = vpop.f32.mrb[117].mxu1  ;;  %v6092_v10 = vsel %vm252_vm3, %v6010_v8, -inf }
0x265c   :  { %6093 = vmax.xlane.f32.xlu0 %v6092_v10  ;;  %v15864_v54 = vadd.f32 %v15701_v20, %v15572_v22 }
0x265e   :  { %v6088_v47 = vpop.f32.mrb[120].mxu0  ;;  %v5072_v46 = vsel %vm204_vm2, %v15864_v54, 0.0 }
0x265f   :  { %v14140_v3 = vpop.f32.mrb[121].mxu0  ;;  %v6095_v5 = vsel %vm252_vm3, %v6088_v47, -inf }
0x2660   :  { %6096 = vmax.xlane.f32.xlu1 %v6095_v5 }
0x2671   :  { %6114 = vrot.lane.b32.xlu1 %v15721_v49, %s14935_s20 }
0x2672   :  { %6190 = vrot.lane.b32.xlu0 %v15725_v50, %s14935_s20 }
0x2675   :  { %6268 = vrot.lane.b32.xlu1 %v15721_v49, %s14936_s22 }
0x2679   :  { %6346 = vrot.lane.b32.xlu1 %v15725_v50, %s14936_s22 }
0x267d   :  { %6344 = vrot.lane.b32.xlu1 %v15725_v50, %s16735_s30 }
0x26e9   :  { %v6094_v17 = vpop.xlane.xlu0 %6093 }
0x26ea   :  { %v6098_v23 = vsub.f32 %v6010_v8, %v6094_v17 }
0x26ec   :  { %v6100_v34 = vmul.f32 1.442695, %v6098_v23 }
0x26ed   :  { %v6191_v35 = vpop.permute.xlu0 %6190  ;;  %v6097_v36 = vpop.xlane.xlu1 %6096 }
0x26ee   :  { %14697 = vpow2.f32 %v6100_v34  ;;  %v6099_v38 = vsub.f32 %v6088_v47, %v6097_v36  ;;  %14147 = vmatpush3.msra.mxu0 %v6191_v35 }
0x26ef   :  { %14156 = vmatprep.subr.mxu0 %v14915_v0 }
0x26f0   :  { %v6102_v39 = vmul.f32 1.442695, %v6099_v38 }
0x26f1   :  { %v6115_v11 = vpop.permute.xlu1 %6114 }
0x26f2   :  { %14699 = vpow2.f32 %v6102_v39  ;;  %14142 = vmatpush3.msra.mxu1 %v6115_v11 }
0x26f3   :  { %14151 = vmatprep.subr.mxu1 %v14915_v0 }
0x26f5   :  { %v6269_v53 = vpop.permute.xlu1 %6268 }
0x26f8   :  { %v14698_v48 = vpop.eup %14697 }
0x26f9   :  { %v6104_v19 = vsel %vm252_vm3, %v14698_v48, 0.0  ;;  %v6347_v28 = vpop.permute.xlu1 %6346 }
0x26fa   :  { %6105 = vadd.xlane.f32.xlu0 %v6104_v19 }
0x26fc   :  { %v14700_v51 = vpop.eup %14699 }
0x26fd   :  { %v6107_v7 = vsel %vm252_vm3, %v14700_v51, 0.0  ;;  %v6345_v57 = vpop.permute.xlu1 %6344 }
0x26fe   :  { %6108 = vadd.xlane.f32.xlu0 %v6107_v7 }
0x2714   :  { %6266 = vrot.lane.b32.xlu0 %v15721_v49, %s16735_s30 }
0x2787   :  { %v6106_v27 = vpop.xlane.xlu0 %6105 }
0x2788   :  { %14701 = vrcp.f32 %v6106_v27 }
0x278b   :  { %v6109_v52 = vpop.xlane.xlu0 %6108 }
0x278c   :  { %14703 = vrcp.f32 %v6109_v52 }
0x278f   :  { %v6267_v42 = vpop.permute.xlu0 %6266 }
0x2792   :  { %v14702_v32 = vpop.eup %14701 }
0x2793   :  { %v6111_v58 = vmul.f32 %v14702_v32, %v14698_v48  ;;  %v14674_v48 = vld [vmem:[#allocation4 + $0x8c] ss:$60 sps:$4 sm:$0xff]  }
0x2795   :  { %14144 = vmatmul.mubr.msk.f32.vlgmr.msra.gmra.mrb[118].mxu1 %vm252_vm3, %v6111_v58 }
0x2796   :  { %v14704_v55 = vpop.eup %14703  ;;  %14152 = vmatpush3.xpose.msk.msra.mxu1 %vm252_vm3, %v6269_v53  ;;  %14153 = vmatprep.mubr.msk.f32.mxu1 %vm14916_vm0, %v14915_v0  ;;  %v5071_v53 = vadd.f32 %v15703_v31, %v15574_v26 }
0x2797   :  { %v6113_v41 = vmul.f32 %v14704_v55, %v14700_v51  ;;  %14161 = vmatprep.subr.mxu1 %v14915_v0 }
0x2798   :  { %v5075_v32 = vsel %vm204_vm2, %v5071_v53, 0.0 }
0x2799   :  { %14149 = vmatmul.mubr.msk.f32.vlgmr.msra.gmra.mrb[122].mxu0 %vm252_vm3, %v6113_v41  ;;  %14154 = vmatmul.mubr.msk.f32.vlgmr.msra.gmra.mrb[120].mxu1 %vm252_vm3, %v6267_v42 }
0x279a   :  { %14157 = vmatpush3.xpose.msk.msra.mxu0 %vm252_vm3, %v6347_v28  ;;  %14158 = vmatprep.mubr.msk.f32.mxu0 %vm14916_vm0, %v14915_v0 }
0x279b   :  { %14166 = vmatprep.subr.mxu0 %v14915_v0  ;;  %14163 = vmatprep.mubr.msk.f32.mxu1 %vm14916_vm0, %v14915_v0 }
0x279d   :  { %14159 = vmatmul.mubr.msk.f32.vlgmr.msra.gmra.mrb[124].mxu0 %vm252_vm3, %v6345_v57 }
0x279e   :  { %14168 = vmatprep.mubr.msk.f32.mxu0 %vm14916_vm0, %v14915_v0 }
0x2868   :  { %v6186_v56 = vpop.f32.mrb[118].mxu1 }
0x2869   :  { %v14145_v44 = vpop.f32.mrb[119].mxu1 }
0x286c   :  { %v6262_v45 = vpop.f32.mrb[122].mxu0  ;;  %v6340_v59 = vpop.f32.mrb[120].mxu1 }
0x286d   :  { %v14645_v60 = vpack.i.bf16 %v6262_v45, %v6186_v56  ;;  %v14150_v61 = vpop.f32.mrb[123].mxu0  ;;  %v14155_v62 = vpop.f32.mrb[121].mxu1  ;;  %v6422_v63 = vsel %vm252_vm3, %v6340_v59, -inf }
0x286e   :  { %6423 = vmax.xlane.f32.xlu0 %v6422_v63 }
0x2870   :  { %v6418_v1 = vpop.f32.mrb[124].mxu0 }
0x2871   :  { %v14160_v4 = vpop.f32.mrb[125].mxu0  ;;  %v6425_v8 = vsel %vm252_vm3, %v6418_v1, -inf }
0x2872   :  { %6426 = vmax.xlane.f32.xlu1 %v6425_v8 }
0x2883   :  { %6444 = vrot.lane.b32.xlu1 %v15721_v49, %s16736_s23 }
0x2887   :  { %14641 = vrot.lane.b32.xlu1 %v14640_v9, %s16725_s29 }
0x288b   :  { %14646 = vrot.lane.b32.xlu1 %v14645_v60, %s16726_s10 }
0x28af   :  { %5073 = vadd.xlane.f32.xlu1 %v5072_v46 }
0x28fb   :  { %v6424_v10 = vpop.xlane.xlu0 %6423 }
0x28fc   :  { %v6428_v47 = vsub.f32 %v6340_v59, %v6424_v10 }
0x28fe   :  { %v6430_v3 = vmul.f32 1.442695, %v6428_v47 }
0x28ff   :  { %v6427_v5 = vpop.xlane.xlu1 %6426 }
0x2900   :  { %14705 = vpow2.f32 %v6430_v3  ;;  %v6429_v49 = vsub.f32 %v6418_v1, %v6427_v5 }
0x2902   :  { %v6432_v17 = vmul.f32 1.442695, %v6429_v49 }
0x2903   :  { %v6445_v23 = vpop.permute.xlu1 %6444 }
0x2904   :  { %14707 = vpow2.f32 %v6432_v17  ;;  %14162 = vmatpush3.msra.mxu1 %v6445_v23 }
0x2905   :  { %14171 = vmatprep.subr.bf16.mxu1 %v14915_v0 }
0x2907   :  { %v14642_v58 = vpop.permute.xlu1 %14641 }
0x2908   :  { %v14644_v28 = vunpack.i.h.bf16 %v14642_v58  ;;  %v14643_v41 = vunpack.i.l.bf16 %v14642_v58 }
0x290a   :  { %v14706_v2 = vpop.eup %14705  ;;  %v6621_v44 = vsel %vm252_vm3, %v15777_v25, %v14644_v28  ;;  %v6620_v45 = vsel %vm252_vm3, %v15775_v29, %v14643_v41  ;;  %v13490_v29 = vld [vmem:[%s16703_s6 + $0x12] ss:$0 sm:$0xff] }
0x290b   :  { %v6434_v22 = vsel %vm252_vm3, %v14706_v2, 0.0  ;;  %v14647_v55 = vpop.permute.xlu1 %14646 }
0x290c   :  { %6435 = vadd.xlane.f32.xlu0 %v6434_v22  ;;  %v14649_v42 = vunpack.i.h.bf16 %v14647_v55  ;;  %v14648_v57 = vunpack.i.l.bf16 %v14647_v55 }
0x290e   :  { %v14708_v20 = vpop.eup %14707  ;;  %v6622_v26 = vsel %vm96_vm1, %v6620_v45, %v14648_v57  ;;  %v6623_v31 = vsel %vm96_vm1, %v6621_v44, %v14649_v42 }
0x290f   :  { %v6437_v6 = vsel %vm252_vm3, %v14708_v20, 0.0 }
0x2910   :  { %6438 = vadd.xlane.f32.xlu0 %v6437_v6 }
0x2926   :  { %6520 = vrot.lane.b32.xlu0 %v15725_v50, %s16736_s23  ;;  %v14673_v50 = vld [vmem:[#allocation4 + $0x14] ss:$60 sps:$4 sm:$0xff]  }
0x293c   :  { %v5074_v25 = vpop.xlane.xlu1 %5073 }
0x293d   :  { %v5078_v4 = vmul.f32 0.03125, %v5074_v25 }
0x293f   :  { %v5080_v10 = vsub.f32 %v15864_v54, %v5078_v4 }
0x2941   :  { %v5082_v6 = vmul.f32 %v5080_v10, %v5080_v10 }
0x2943   :  { %v5084_v54 = vsel %vm204_vm2, %v5082_v6, 0.0 }
0x2999   :  { %v6436_v9 = vpop.xlane.xlu0 %6435 }
0x299a   :  { %14709 = vrcp.f32 %v6436_v9 }
0x299d   :  { %v6439_v34 = vpop.xlane.xlu0 %6438 }
0x299e   :  { %14711 = vrcp.f32 %v6439_v34 }
0x29a1   :  { %v6521_v35 = vpop.permute.xlu0 %6520 }
0x29a2   :  { %14167 = vmatpush3.msra.mxu0 %v6521_v35 }
0x29a3   :  { %14179 = vmatprep.subr.bf16.mxu0 %v14915_v0 }
0x29a4   :  { %v14710_v36 = vpop.eup %14709 }
0x29a5   :  { %v6441_v38 = vmul.f32 %v14710_v36, %v14706_v2  ;;  %v14675_v36 = vld [vmem:[#allocation4 + $0x1c] ss:$60 sps:$4 sm:$0xff]  }
0x29a7   :  { %14164 = vmatmul.mubr.msk.f32.vlgmr.msra.gmra.mrb[122].mxu1 %vm252_vm3, %v6441_v38  ;;  %v14676_v38 = vld [vmem:[#allocation4 + $0x94] ss:$60 sps:$4 sm:$0xff]  }
0x29a8   :  { %v14712_v39 = vpop.eup %14711  ;;  %14175 = vmatprep.mubr.msk.bf16.mxu1 %vm14916_vm0, %v14915_v0  ;;  %14172 = vmatpush3.bf16.msra.mxu1 %v14673_v50 }
0x29a9   :  { %v6443_v11 = vmul.f32 %v14712_v39, %v14708_v20  ;;  %14173 = vmatprep.subr.bf16.mxu1 %v14915_v0 }
0x29ab   :  { %14169 = vmatmul.mubr.msk.f32.vlgmr.msra.gmra.mrb[126].mxu0 %vm252_vm3, %v6443_v11 }
0x29ac   :  { %14183 = vmatprep.mubr.msk.bf16.mxu0 %vm14916_vm0, %v14915_v0  ;;  %14174 = vmatpush3.bf16.msra.mxu1 %v14674_v48 }
0x29ad   :  { %14187 = vmatprep.subr.bf16.mxu1 %v14915_v0 }
0x2a7a   :  { %v6516_v19 = vpop.f32.mrb[122].mxu1 }
0x2a7b   :  { %v14165_v51 = vpop.f32.mrb[123].mxu1 }
0x2a7e   :  { %v6592_v7 = vpop.f32.mrb[126].mxu0 }
0x2a7f   :  { %v14650_v27 = vpack.i.bf16 %v6592_v7, %v6516_v19  ;;  %v14170_v52 = vpop.f32.mrb[127].mxu0 }
0x2a81   :  { %14651 = vrot.lane.b32.xlu0 %v14650_v27, %s16727_s12 }
0x2aa0   :  { %5076 = vadd.xlane.f32.xlu0 %v5075_v32 }
0x2af3   :  { %v14652_v56 = vpop.permute.xlu0 %14651 }
0x2af4   :  { %v14654_v59 = vunpack.i.h.bf16 %v14652_v56  ;;  %v14653_v60 = vunpack.i.l.bf16 %v14652_v56 }
0x2af6   :  { %v6625_v61 = vsel %vm1596_vm4, %v6623_v31, %v14654_v59  ;;  %v6624_v62 = vsel %vm1596_vm4, %v6622_v26, %v14653_v60  ;;  %v14677_v31 = vld [vmem:[#allocation4 + $0x18] ss:$60 sps:$4 sm:$0xff]  }
0x2af7   :  { %v6626_v63 = vpack.c.bf16 %v6625_v61, %v6624_v62  ;;  %14180 = vmatpush3.bf16.msra.mxu0 %v14677_v31  ;;  %v14678_v61 = vld [vmem:[#allocation4 + $0x90] ss:$60 sps:$4 sm:$0xff]  }
0x2af8   :  { %14181 = vmatprep.subr.bf16.mxu0 %v14915_v0 }
0x2af9   :  { %14176 = vmatmul.mubr.msk.bf16.vlgmr.msra.gmra.mrb[124].mxu1 %vm204_vm2, %v6626_v63 }
0x2afa   :  { %14191 = vmatprep.mubr.msk.bf16.mxu1 %vm14916_vm0, %v14915_v0  ;;  %14188 = vmatpush3.bf16.msra.mxu1 %v14675_v36 }
0x2afb   :  { %14189 = vmatprep.subr.bf16.mxu1 %v14915_v0  ;;  %14182 = vmatpush3.bf16.msra.mxu0 %v14678_v61 }
0x2afc   :  { %14195 = vmatprep.subr.mxu0 %v14915_v0 }
0x2afe   :  { %14190 = vmatpush3.bf16.msra.mxu1 %v14676_v38 }
0x2aff   :  { %14205 = vmatprep.subr.mxu1 %v14915_v0 }
0x2b2d   :  { %v5077_v1 = vpop.xlane.xlu0 %5076 }
0x2b2e   :  { %v5079_v8 = vmul.f32 0.03125, %v5077_v1 }
0x2b30   :  { %v5081_v49 = vsub.f32 %v5071_v53, %v5079_v8 }
0x2b32   :  { %v5083_v34 = vmul.f32 %v5081_v49, %v5081_v49 }
0x2b34   :  { %v5087_v35 = vsel %vm204_vm2, %v5083_v34, 0.0 }
0x2bcc   :  { %v6685_v46 = vpop.f32.mrb[124].mxu1 }
0x2bcd   :  { %v6686_v47 = vadd.f32 %v13490_v29, %v6685_v46  ;;  %v14177_v3 = vpop.f32.mrb[125].mxu1 }
0x2bce   :  { %v6688_v5 = vpop.f32.mrb[126].mxu1  ;;  %v13495_v3 = vld [vmem:[%s16703_s6 + $0x14] ss:$0 sm:$0xff] }
0x2bcf   :  { %v6689_v17 = vadd.f32 %v13490_v29, %v6688_v5  ;;  %v14178_v23 = vpop.f32.mrb[127].mxu1  ;;  %v6692_v2 = vadd.f32 %v6686_v47, %v15708_v40  ;;  %v13494_v29 = vld [vmem:[%s16703_s6 + $0x13] ss:$0 sm:$0xff] }
0x2bd1   :  { %v6694_v22 = vsel %vm204_vm2, %v6692_v2, 0.0  ;;  %v6693_v20 = vadd.f32 %v6689_v17, %v15711_v43 }
0x2bd2   :  { %6695 = vadd.xlane.f32.xlu0 %v6694_v22 }
0x2bd3   :  { %v6697_v9 = vsel %vm204_vm2, %v6693_v20, 0.0 }
0x2bd4   :  { %6698 = vadd.xlane.f32.xlu1 %v6697_v9 }
0x2bd6   :  { %5085 = vadd.xlane.f32.xlu0 %v5084_v54 }
0x2bd8   :  { %5088 = vadd.xlane.f32.xlu1 %v5087_v35  ;;  %v13496_v35 = vld [vmem:[%s16703_s6 + $0x15] ss:$0 sm:$0xff] }
0x2c5f   :  { %v6696_v40 = vpop.xlane.xlu0 %6695 }
0x2c60   :  { %v6700_v43 = vmul.f32 0.03125, %v6696_v40 }
0x2c61   :  { %v6699_v39 = vpop.xlane.xlu1 %6698 }
0x2c62   :  { %v6702_v11 = vsub.f32 %v6692_v2, %v6700_v43  ;;  %v6701_v50 = vmul.f32 0.03125, %v6699_v39  ;;  %v13500_v2 = vld [vmem:[%s16703_s6 + $0x16] ss:$0 sm:$0xff] }
0x2c63   :  { %v5086_v48 = vpop.xlane.xlu0 %5085 }
0x2c64   :  { %v6703_v19 = vsub.f32 %v6693_v20, %v6701_v50  ;;  %v5090_v51 = vmul.f32 0.03125, %v5086_v48  ;;  %v6704_v7 = vmul.f32 %v6702_v11, %v6702_v11 }
0x2c65   :  { %v5089_v27 = vpop.xlane.xlu1 %5088 }
0x2c66   :  { %v5092_v52 = vadd.f32 1e-05, %v5090_v51  ;;  %v5091_v53 = vmul.f32 0.03125, %v5089_v27  ;;  %v6706_v32 = vsel %vm204_vm2, %v6704_v7, 0.0  ;;  %v6705_v58 = vmul.f32 %v6703_v19, %v6703_v19 }
0x2c67   :  { %6707 = vadd.xlane.f32.xlu0 %v6706_v32 }
0x2c68   :  { %14713 = vrsqrt.f32 %v5092_v52  ;;  %v5093_v55 = vadd.f32 1e-05, %v5091_v53  ;;  %v6709_v28 = vsel %vm204_vm2, %v6705_v58, 0.0 }
0x2c69   :  { %6710 = vadd.xlane.f32.xlu1 %v6709_v28 }
0x2c6a   :  { %14715 = vrsqrt.f32 %v5093_v55 }
0x2c72   :  { %v14714_v41 = vpop.eup %14713 }
0x2c73   :  { %v5096_v42 = vmul.f32 %v14714_v41, %v5080_v10 }
0x2c74   :  { %v14716_v57 = vpop.eup %14715 }
0x2c75   :  { %v5097_v56 = vmul.f32 %v14716_v57, %v5081_v49  ;;  %v5103_v44 = vmul.f32 %v15667_v15, %v5096_v42 }
0x2c77   :  { %v5104_v45 = vmul.f32 %v15667_v15, %v5097_v56  ;;  %v5110_v59 = vadd.f32 %v15672_v18, %v5103_v44 }
0x2c79   :  { %v5111_v60 = vadd.f32 %v15672_v18, %v5104_v45 }
0x2c7b   :  { %v15915_v26 = vpack.c.bf16 %v5111_v60, %v5110_v59 }
0x2c7d   :  { %14192 = vmatmul.mubr.msk.bf16.vlgmr.msra.gmra.mrb[128].mxu1 %vm204_vm2, %v15915_v26 }
0x2c7e   :  { %14207 = vmatprep.mubr.msk.f32.mxu1 %vm14916_vm0, %v14915_v0 }
0x2cf4   :  { %v6708_v15 = vpop.xlane.xlu0 %6707 }
0x2cf5   :  { %v6712_v62 = vmul.f32 0.03125, %v6708_v15 }
0x2cf6   :  { %v6711_v63 = vpop.xlane.xlu1 %6710 }
0x2cf7   :  { %v6714_v18 = vadd.f32 1e-05, %v6712_v62  ;;  %v6713_v25 = vmul.f32 0.03125, %v6711_v63 }
0x2cf9   :  { %14717 = vrsqrt.f32 %v6714_v18  ;;  %v6715_v1 = vadd.f32 1e-05, %v6713_v25 }
0x2cfb   :  { %14719 = vrsqrt.f32 %v6715_v1 }
0x2d03   :  { %v14718_v4 = vpop.eup %14717 }
0x2d04   :  { %v6718_v8 = vmul.f32 %v14718_v4, %v6702_v11 }
0x2d05   :  { %v14720_v46 = vpop.eup %14719 }
0x2d06   :  { %v6719_v10 = vmul.f32 %v14720_v46, %v6703_v19  ;;  %v6725_v47 = vmul.f32 %v13494_v29, %v6718_v8 }
0x2d08   :  { %v6726_v5 = vmul.f32 %v13494_v29, %v6719_v10  ;;  %v15929_v49 = vadd.f32 %v13495_v3, %v6725_v47 }
0x2d0a   :  { %v15931_v17 = vadd.f32 %v13495_v3, %v6726_v5 }
0x2d0c   :  { %v6734_v23 = vpack.c.bf16 %v15931_v17, %v15929_v49 }
0x2d0e   :  { %14184 = vmatmul.mubr.msk.bf16.vlgmr.msra.gmra.mrb[128].mxu0 %vm204_vm2, %v6734_v23 }
0x2d0f   :  { %14197 = vmatprep.mubr.msk.f32.mxu0 %vm14916_vm0, %v14915_v0 }
0x2d50   :  { %v6858_v22 = vpop.f32.mrb[128].mxu1 }
0x2d51   :  { %v15941_v20 = vadd.f32 %v13500_v2, %v6858_v22  ;;  %v14193_v6 = vpop.f32.mrb[129].mxu1 }
0x2d52   :  { %v6861_v9 = vpop.f32.mrb[130].mxu1 }
0x2d53   :  { %v15943_v34 = vadd.f32 %v13500_v2, %v6861_v9  ;;  %v14194_v54 = vpop.f32.mrb[131].mxu1  ;;  %14196 = vmatpush3.xpose.msk.msra.mxu0 %vm252_vm3, %v15941_v20 }
0x2d54   :  { %14200 = vmatprep.subr.mxu0 %v14915_v0 }
0x2de1   :  { %v6793_v36 = vpop.f32.mrb[128].mxu0 }
0x2de2   :  { %v15951_v38 = vadd.f32 %v13496_v35, %v6793_v36  ;;  %v14185_v40 = vpop.f32.mrb[129].mxu0 }
0x2de3   :  { %v6796_v43 = vpop.f32.mrb[130].mxu0 }
0x2de4   :  { %v14186_v39 = vpop.f32.mrb[131].mxu0  ;;  %14198 = vmatmul.mubr.msk.f32.vlgmr.msra.gmra.mrb[132].mxu0 %vm252_vm3, %v15951_v38  ;;  %v15959_v11 = vadd.f32 %v13496_v35, %v6796_v43 }
0x2de5   :  { %14201 = vmatpush3.xpose.msk.msra.mxu0 %vm252_vm3, %v15943_v34  ;;  %14202 = vmatprep.mubr.msk.f32.mxu0 %vm14916_vm0, %v14915_v0 }
0x2de6   :  { %14210 = vmatprep.subr.mxu0 %v14915_v0 }
0x2de8   :  { %14203 = vmatmul.mubr.msk.f32.vlgmr.msra.gmra.mrb[134].mxu0 %vm252_vm3, %v15959_v11 }
0x2de9   :  { %14212 = vmatprep.mubr.msk.f32.mxu0 %vm14916_vm0, %v14915_v0 }
0x2eb7   :  { %v6937_v50 = vpop.f32.mrb[132].mxu0 }
0x2eb8   :  { %v14199_v48 = vpop.f32.mrb[133].mxu0  ;;  %v7017_v19 = vsel %vm252_vm3, %v6937_v50, -inf }
0x2eb9   :  { %7018 = vmax.xlane.f32.xlu0 %v7017_v19 }
0x2ebb   :  { %v7013_v51 = vpop.f32.mrb[134].mxu0 }
0x2ebc   :  { %v14204_v7 = vpop.f32.mrb[135].mxu0  ;;  %v7020_v27 = vsel %vm252_vm3, %v7013_v51, -inf }
0x2ebd   :  { %7021 = vmax.xlane.f32.xlu1 %v7020_v27 }
0x2ece   :  { %7115 = vrot.lane.b32.xlu1 %v15943_v34, %s14929_s19 }
0x2ecf   :  { %7039 = vrot.lane.b32.xlu0 %v15941_v20, %s14929_s19 }
0x2ed2   :  { %7193 = vrot.lane.b32.xlu1 %v15941_v20, %s14931_s15 }
0x2ed3   :  { %7271 = vrot.lane.b32.xlu0 %v15943_v34, %s14931_s15 }
0x2f46   :  { %v7019_v52 = vpop.xlane.xlu0 %7018 }
0x2f47   :  { %v7023_v53 = vsub.f32 %v6937_v50, %v7019_v52 }
0x2f49   :  { %v7025_v32 = vmul.f32 1.442695, %v7023_v53 }
0x2f4a   :  { %v7040_v58 = vpop.permute.xlu0 %7039  ;;  %v7022_v55 = vpop.xlane.xlu1 %7021 }
0x2f4b   :  { %14721 = vpow2.f32 %v7025_v32  ;;  %v7024_v28 = vsub.f32 %v7013_v51, %v7022_v55  ;;  %14206 = vmatpush3.msra.mxu1 %v7040_v58 }
0x2f4c   :  { %14215 = vmatprep.subr.mxu1 %v14915_v0 }
0x2f4d   :  { %v7027_v41 = vmul.f32 1.442695, %v7024_v28 }
0x2f4e   :  { %v7116_v42 = vpop.permute.xlu1 %7115  ;;  %v7272_v59 = vpop.permute.xlu0 %7271 }
0x2f4f   :  { %14723 = vpow2.f32 %v7027_v41  ;;  %14211 = vmatpush3.msra.mxu0 %v7116_v42 }
0x2f50   :  { %14220 = vmatprep.subr.mxu0 %v14915_v0 }
0x2f52   :  { %v7194_v60 = vpop.permute.xlu1 %7193 }
0x2f55   :  { %v14722_v57 = vpop.eup %14721 }
0x2f56   :  { %v7029_v56 = vsel %vm252_vm3, %v14722_v57, 0.0 }
0x2f57   :  { %7030 = vadd.xlane.f32.xlu0 %v7029_v56 }
0x2f59   :  { %v14724_v44 = vpop.eup %14723 }
0x2f5a   :  { %v7032_v45 = vsel %vm252_vm3, %v14724_v44, 0.0 }
0x2f5b   :  { %7033 = vadd.xlane.f32.xlu1 %v7032_v45 }
0x2f6c   :  { %7191 = vrot.lane.b32.xlu1 %v15951_v38, %s14931_s15 }
0x2f6d   :  { %7269 = vrot.lane.b32.xlu0 %v15959_v11, %s14931_s15 }
0x2fe4   :  { %v7031_v31 = vpop.xlane.xlu0 %7030 }
0x2fe5   :  { %14725 = vrcp.f32 %v7031_v31 }
0x2fe8   :  { %v7034_v61 = vpop.xlane.xlu1 %7033  ;;  %v7270_v1 = vpop.permute.xlu0 %7269 }
0x2fe9   :  { %14727 = vrcp.f32 %v7034_v61 }
0x2fec   :  { %v7192_v25 = vpop.permute.xlu1 %7191 }
0x2fef   :  { %v14726_v15 = vpop.eup %14725 }
0x2ff0   :  { %v7036_v62 = vmul.f32 %v14726_v15, %v14722_v57 }
0x2ff2   :  { %14208 = vmatmul.mubr.msk.f32.vlgmr.msra.gmra.mrb[132].mxu1 %vm252_vm3, %v7036_v62 }
0x2ff3   :  { %v14728_v63 = vpop.eup %14727  ;;  %14216 = vmatpush3.xpose.msk.msra.mxu1 %vm252_vm3, %v7194_v60  ;;  %14217 = vmatprep.mubr.msk.f32.mxu1 %vm14916_vm0, %v14915_v0 }
0x2ff4   :  { %v7038_v18 = vmul.f32 %v14728_v63, %v14724_v44  ;;  %14225 = vmatprep.subr.mxu1 %v14915_v0 }
0x2ff6   :  { %14213 = vmatmul.mubr.msk.f32.vlgmr.msra.gmra.mrb[136].mxu0 %vm252_vm3, %v7038_v18  ;;  %14218 = vmatmul.mubr.msk.f32.vlgmr.msra.gmra.mrb[134].mxu1 %vm252_vm3, %v7192_v25 }
0x2ff7   :  { %14221 = vmatpush3.xpose.msk.msra.mxu0 %vm252_vm3, %v7272_v59  ;;  %14222 = vmatprep.mubr.msk.f32.mxu0 %vm14916_vm0, %v14915_v0 }
0x2ff8   :  { %14230 = vmatprep.subr.mxu0 %v14915_v0  ;;  %14227 = vmatprep.mubr.msk.f32.mxu1 %vm14916_vm0, %v14915_v0 }
0x2ffa   :  { %14223 = vmatmul.mubr.msk.f32.vlgmr.msra.gmra.mrb[138].mxu0 %vm252_vm3, %v7270_v1 }
0x2ffb   :  { %14232 = vmatprep.mubr.msk.f32.mxu0 %vm14916_vm0, %v14915_v0 }
0x30c5   :  { %v16000_v4 = vpop.f32.mrb[132].mxu1 }
0x30c6   :  { %v14209_v29 = vpop.f32.mrb[133].mxu1 }
0x30c9   :  { %v16002_v8 = vpop.f32.mrb[136].mxu0  ;;  %v7265_v46 = vpop.f32.mrb[134].mxu1 }
0x30ca   :  { %v14214_v10 = vpop.f32.mrb[137].mxu0  ;;  %v14219_v47 = vpop.f32.mrb[135].mxu1  ;;  %v7347_v3 = vsel %vm252_vm3, %v7265_v46, -inf }
0x30cb   :  { %7348 = vmax.xlane.f32.xlu1 %v7347_v3 }
0x30cd   :  { %v7343_v5 = vpop.f32.mrb[138].mxu0 }
0x30ce   :  { %v14224_v23 = vpop.f32.mrb[139].mxu0  ;;  %v7350_v2 = vsel %vm252_vm3, %v7343_v5, -inf }
0x30cf   :  { %7351 = vmax.xlane.f32.xlu0 %v7350_v2 }
0x30dc   :  { %7445 = vrot.lane.b32.xlu1 %v15943_v34, %s14930_s14 }
0x30e0   :  { %7523 = vrot.lane.b32.xlu1 %v15941_v20, %s14934_s18 }
0x30e5   :  { %7369 = vrot.lane.b32.xlu0 %v15941_v20, %s14930_s14 }
0x30e9   :  { %7601 = vrot.lane.b32.xlu0 %v15943_v34, %s14934_s18 }
0x3158   :  { %v7349_v22 = vpop.xlane.xlu1 %7348 }
0x3159   :  { %v7353_v6 = vsub.f32 %v7265_v46, %v7349_v22 }
0x315b   :  { %v7355_v9 = vmul.f32 1.442695, %v7353_v6 }
0x315c   :  { %v7446_v54 = vpop.permute.xlu1 %7445  ;;  %v7352_v35 = vpop.xlane.xlu0 %7351 }
0x315d   :  { %14729 = vpow2.f32 %v7355_v9  ;;  %v7354_v36 = vsub.f32 %v7343_v5, %v7352_v35  ;;  %14231 = vmatpush3.msra.mxu0 %v7446_v54 }
0x315e   :  { %14240 = vmatprep.subr.mxu0 %v14915_v0 }
0x315f   :  { %v7357_v40 = vmul.f32 1.442695, %v7354_v36 }
0x3160   :  { %v7370_v43 = vpop.permute.xlu0 %7369  ;;  %v7524_v7 = vpop.permute.xlu1 %7523 }
0x3161   :  { %14731 = vpow2.f32 %v7357_v40  ;;  %14226 = vmatpush3.msra.mxu1 %v7370_v43 }
0x3162   :  { %14235 = vmatprep.subr.mxu1 %v14915_v0 }
0x3164   :  { %v7602_v51 = vpop.permute.xlu0 %7601 }
0x3167   :  { %v14730_v39 = vpop.eup %14729 }
0x3168   :  { %v7359_v50 = vsel %vm252_vm3, %v14730_v39, 0.0 }
0x3169   :  { %7360 = vadd.xlane.f32.xlu0 %v7359_v50 }
0x316b   :  { %v14732_v48 = vpop.eup %14731 }
0x316c   :  { %v7362_v19 = vsel %vm252_vm3, %v14732_v48, 0.0 }
0x316d   :  { %7363 = vadd.xlane.f32.xlu1 %v7362_v19 }
0x317e   :  { %7521 = vrot.lane.b32.xlu1 %v15951_v38, %s14934_s18 }
0x317f   :  { %7599 = vrot.lane.b32.xlu0 %v15959_v11, %s14934_s18 }
0x31f6   :  { %v7361_v27 = vpop.xlane.xlu0 %7360 }
0x31f7   :  { %14733 = vrcp.f32 %v7361_v27 }
0x31fa   :  { %v7364_v52 = vpop.xlane.xlu1 %7363  ;;  %v7600_v41 = vpop.permute.xlu0 %7599 }
0x31fb   :  { %14735 = vrcp.f32 %v7364_v52 }
0x31fe   :  { %v7522_v28 = vpop.permute.xlu1 %7521 }
0x3201   :  { %v14734_v53 = vpop.eup %14733 }
0x3202   :  { %v7366_v32 = vmul.f32 %v14734_v53, %v14730_v39 }
0x3204   :  { %14228 = vmatmul.mubr.msk.f32.vlgmr.msra.gmra.mrb[136].mxu1 %vm252_vm3, %v7366_v32 }
0x3205   :  { %v14736_v58 = vpop.eup %14735  ;;  %14236 = vmatpush3.xpose.msk.msra.mxu1 %vm252_vm3, %v7524_v7  ;;  %14237 = vmatprep.mubr.msk.f32.mxu1 %vm14916_vm0, %v14915_v0 }
0x3206   :  { %v7368_v55 = vmul.f32 %v14736_v58, %v14732_v48  ;;  %14245 = vmatprep.subr.mxu1 %v14915_v0 }
0x3208   :  { %14233 = vmatmul.mubr.msk.f32.vlgmr.msra.gmra.mrb[140].mxu0 %vm252_vm3, %v7368_v55  ;;  %14238 = vmatmul.mubr.msk.f32.vlgmr.msra.gmra.mrb[138].mxu1 %vm252_vm3, %v7522_v28 }
0x3209   :  { %14241 = vmatpush3.xpose.msk.msra.mxu0 %vm252_vm3, %v7602_v51  ;;  %14242 = vmatprep.mubr.msk.f32.mxu0 %vm14916_vm0, %v14915_v0 }
0x320a   :  { %14250 = vmatprep.subr.mxu0 %v14915_v0  ;;  %14247 = vmatprep.mubr.msk.f32.mxu1 %vm14916_vm0, %v14915_v0 }
0x320c   :  { %14243 = vmatmul.mubr.msk.f32.vlgmr.msra.gmra.mrb[142].mxu0 %vm252_vm3, %v7600_v41 }
0x320d   :  { %14252 = vmatprep.mubr.msk.f32.mxu0 %vm14916_vm0, %v14915_v0 }
0x32d7   :  { %v16038_v42 = vpop.f32.mrb[136].mxu1 }
0x32d8   :  { %v14229_v57 = vpop.f32.mrb[137].mxu1 }
0x32db   :  { %v16040_v56 = vpop.f32.mrb[140].mxu0  ;;  %v7595_v44 = vpop.f32.mrb[138].mxu1 }
0x32dc   :  { %v14655_v45 = vpack.i.bf16 %v16040_v56, %v16038_v42  ;;  %v14234_v59 = vpop.f32.mrb[141].mxu0  ;;  %v14239_v60 = vpop.f32.mrb[139].mxu1  ;;  %v7677_v31 = vsel %vm252_vm3, %v7595_v44, -inf  ;;  %v14679_v56 = vld [vmem:[#allocation4 + $0x20] ss:$60 sps:$4 sm:$0xff]  }
0x32dd   :  { %7678 = vmax.xlane.f32.xlu1 %v7677_v31 }
0x32df   :  { %v7673_v61 = vpop.f32.mrb[142].mxu0 }
0x32e0   :  { %v14244_v15 = vpop.f32.mrb[143].mxu0  ;;  %v7680_v62 = vsel %vm252_vm3, %v7673_v61, -inf }
0x32e1   :  { %7681 = vmax.xlane.f32.xlu0 %v7680_v62 }
0x32ee   :  { %7775 = vrot.lane.b32.xlu1 %v15943_v34, %s14933_s17 }
0x32f2   :  { %7853 = vrot.lane.b32.xlu1 %v15941_v20, %s16735_s30 }
0x32f7   :  { %7699 = vrot.lane.b32.xlu0 %v15941_v20, %s14933_s17 }
0x32fb   :  { %7931 = vrot.lane.b32.xlu0 %v15943_v34, %s16735_s30 }
0x336a   :  { %v7679_v63 = vpop.xlane.xlu1 %7678 }
0x336b   :  { %v7683_v18 = vsub.f32 %v7595_v44, %v7679_v63 }
0x336d   :  { %v7685_v25 = vmul.f32 1.442695, %v7683_v18 }
0x336e   :  { %v7776_v1 = vpop.permute.xlu1 %7775  ;;  %v7682_v29 = vpop.xlane.xlu0 %7681 }
0x336f   :  { %14737 = vpow2.f32 %v7685_v25  ;;  %v7684_v46 = vsub.f32 %v7673_v61, %v7682_v29  ;;  %14251 = vmatpush3.msra.mxu0 %v7776_v1 }
0x3370   :  { %14260 = vmatprep.subr.mxu0 %v14915_v0 }
0x3371   :  { %v7687_v10 = vmul.f32 1.442695, %v7684_v46 }
0x3372   :  { %v7700_v47 = vpop.permute.xlu0 %7699  ;;  %v7854_v6 = vpop.permute.xlu1 %7853 }
0x3373   :  { %14739 = vpow2.f32 %v7687_v10  ;;  %14246 = vmatpush3.msra.mxu1 %v7700_v47 }
0x3374   :  { %14255 = vmatprep.subr.mxu1 %v14915_v0 }
0x3376   :  { %v7932_v22 = vpop.permute.xlu0 %7931 }
0x3379   :  { %v14738_v3 = vpop.eup %14737 }
0x337a   :  { %v7689_v5 = vsel %vm252_vm3, %v14738_v3, 0.0 }
0x337b   :  { %7690 = vadd.xlane.f32.xlu0 %v7689_v5 }
0x337d   :  { %v14740_v23 = vpop.eup %14739 }
0x337e   :  { %v7692_v2 = vsel %vm252_vm3, %v14740_v23, 0.0 }
0x337f   :  { %7693 = vadd.xlane.f32.xlu1 %v7692_v2 }
0x3390   :  { %7851 = vrot.lane.b32.xlu1 %v15951_v38, %s16735_s30 }
0x3391   :  { %7929 = vrot.lane.b32.xlu0 %v15959_v11, %s16735_s30 }
0x3408   :  { %v7691_v9 = vpop.xlane.xlu0 %7690 }
0x3409   :  { %14741 = vrcp.f32 %v7691_v9 }
0x340c   :  { %v7694_v54 = vpop.xlane.xlu1 %7693  ;;  %v7930_v43 = vpop.permute.xlu0 %7929 }
0x340d   :  { %14743 = vrcp.f32 %v7694_v54 }
0x3410   :  { %v7852_v11 = vpop.permute.xlu1 %7851 }
0x3413   :  { %v14742_v35 = vpop.eup %14741 }
0x3414   :  { %v7696_v36 = vmul.f32 %v14742_v35, %v14738_v3 }
0x3416   :  { %14248 = vmatmul.mubr.msk.f32.vlgmr.msra.gmra.mrb[140].mxu1 %vm252_vm3, %v7696_v36 }
0x3417   :  { %v14744_v40 = vpop.eup %14743  ;;  %14256 = vmatpush3.xpose.msk.msra.mxu1 %vm252_vm3, %v7854_v6  ;;  %14257 = vmatprep.mubr.msk.f32.mxu1 %vm14916_vm0, %v14915_v0 }
0x3418   :  { %v7698_v38 = vmul.f32 %v14744_v40, %v14740_v23  ;;  %14265 = vmatprep.subr.mxu1 %v14915_v0 }
0x341a   :  { %14253 = vmatmul.mubr.msk.f32.vlgmr.msra.gmra.mrb[144].mxu0 %vm252_vm3, %v7698_v38  ;;  %14258 = vmatmul.mubr.msk.f32.vlgmr.msra.gmra.mrb[142].mxu1 %vm252_vm3, %v7852_v11 }
0x341b   :  { %14261 = vmatpush3.xpose.msk.msra.mxu0 %vm252_vm3, %v7932_v22  ;;  %14262 = vmatprep.mubr.msk.f32.mxu0 %vm14916_vm0, %v14915_v0 }
0x341c   :  { %14270 = vmatprep.subr.mxu0 %v14915_v0  ;;  %14267 = vmatprep.mubr.msk.f32.mxu1 %vm14916_vm0, %v14915_v0 }
0x341e   :  { %14263 = vmatmul.mubr.msk.f32.vlgmr.msra.gmra.mrb[146].mxu0 %vm252_vm3, %v7930_v43 }
0x341f   :  { %14272 = vmatprep.mubr.msk.f32.mxu0 %vm14916_vm0, %v14915_v0 }
0x34e9   :  { %v7771_v39 = vpop.f32.mrb[140].mxu1 }
0x34ea   :  { %v14249_v50 = vpop.f32.mrb[141].mxu1 }
0x34ed   :  { %v7847_v48 = vpop.f32.mrb[144].mxu0  ;;  %v7925_v19 = vpop.f32.mrb[142].mxu1 }
0x34ee   :  { %v14660_v51 = vpack.i.bf16 %v7847_v48, %v7771_v39  ;;  %v14254_v7 = vpop.f32.mrb[145].mxu0  ;;  %v14259_v27 = vpop.f32.mrb[143].mxu1  ;;  %v8007_v52 = vsel %vm252_vm3, %v7925_v19, -inf }
0x34ef   :  { %8008 = vmax.xlane.f32.xlu1 %v8007_v52 }
0x34f1   :  { %v8003_v53 = vpop.f32.mrb[146].mxu0 }
0x34f2   :  { %v14264_v32 = vpop.f32.mrb[147].mxu0  ;;  %v8010_v58 = vsel %vm252_vm3, %v8003_v53, -inf }
0x34f3   :  { %8011 = vmax.xlane.f32.xlu0 %v8010_v58 }
0x357c   :  { %v8009_v55 = vpop.xlane.xlu1 %8008 }
0x357d   :  { %v8013_v28 = vsub.f32 %v7925_v19, %v8009_v55 }
0x357f   :  { %v8015_v41 = vmul.f32 1.442695, %v8013_v28 }
0x3580   :  { %v8012_v57 = vpop.xlane.xlu0 %8011 }
0x3581   :  { %14745 = vpow2.f32 %v8015_v41  ;;  %v8014_v44 = vsub.f32 %v8003_v53, %v8012_v57 }
0x3583   :  { %v8017_v59 = vmul.f32 1.442695, %v8014_v44 }
0x3585   :  { %14747 = vpow2.f32 %v8017_v59 }
0x358b   :  { %v14746_v60 = vpop.eup %14745 }
0x358c   :  { %v8019_v31 = vsel %vm252_vm3, %v14746_v60, 0.0 }
0x358d   :  { %8020 = vadd.xlane.f32.xlu0 %v8019_v31 }
0x358f   :  { %v14748_v61 = vpop.eup %14747 }
0x3590   :  { %v8022_v15 = vsel %vm252_vm3, %v14748_v61, 0.0 }
0x3591   :  { %8023 = vadd.xlane.f32.xlu1 %v8022_v15 }
0x35a2   :  { %8105 = vrot.lane.b32.xlu1 %v15943_v34, %s14936_s22 }
0x35a3   :  { %8029 = vrot.lane.b32.xlu0 %v15941_v20, %s14936_s22 }
0x35a6   :  { %14656 = vrot.lane.b32.xlu1 %v14655_v45, %s16725_s29  ;;  %v14680_v45 = vld [vmem:[#allocation4 + $0x98] ss:$60 sps:$4 sm:$0xff]  }
0x35a7   :  { %14661 = vrot.lane.b32.xlu0 %v14660_v51, %s16726_s10 }
0x361a   :  { %v8021_v62 = vpop.xlane.xlu0 %8020 }
0x361b   :  { %14749 = vrcp.f32 %v8021_v62 }
0x361e   :  { %v8024_v63 = vpop.xlane.xlu1 %8023  ;;  %v8030_v18 = vpop.permute.xlu0 %8029 }
0x361f   :  { %14751 = vrcp.f32 %v8024_v63  ;;  %14266 = vmatpush3.msra.mxu1 %v8030_v18 }
0x3620   :  { %14275 = vmatprep.subr.bf16.mxu1 %v14915_v0 }
0x3622   :  { %v8106_v25 = vpop.permute.xlu1 %8105  ;;  %v14662_v22 = vpop.permute.xlu0 %14661 }
0x3623   :  { %14271 = vmatpush3.msra.mxu0 %v8106_v25  ;;  %v14664_v54 = vunpack.i.h.bf16 %v14662_v22  ;;  %v14663_v35 = vunpack.i.l.bf16 %v14662_v22 }
0x3625   :  { %v14750_v34 = vpop.eup %14749 }
0x3626   :  { %v8026_v1 = vmul.f32 %v14750_v34, %v14746_v60  ;;  %v14657_v5 = vpop.permute.xlu1 %14656 }
0x3627   :  { %v14659_v23 = vunpack.i.h.bf16 %v14657_v5  ;;  %v14658_v2 = vunpack.i.l.bf16 %v14657_v5 }
0x3628   :  { %14268 = vmatmul.mubr.msk.f32.vlgmr.msra.gmra.mrb[144].mxu1 %vm252_vm3, %v8026_v1 }
0x3629   :  { %v14752_v20 = vpop.eup %14751  ;;  %14279 = vmatprep.mubr.msk.bf16.mxu1 %vm14916_vm0, %v14915_v0  ;;  %14276 = vmatpush3.bf16.msra.mxu1 %v14679_v56  ;;  %v8206_v6 = vsel %vm252_vm3, %v16002_v8, %v14659_v23  ;;  %v8205_v9 = vsel %vm252_vm3, %v16000_v4, %v14658_v2  ;;  %v13528_v4 = vld [vmem:[%s16703_s6 + $0x17] ss:$0 sm:$0xff]  ;;  %v13533_v56 = vld [vmem:[%s16703_s6 + $0x19] ss:$0 sm:$0xff] }
0x362a   :  { %v8028_v42 = vmul.f32 %v14752_v20, %v14748_v61  ;;  %14277 = vmatprep.subr.bf16.mxu1 %v14915_v0  ;;  %v8207_v11 = vsel %vm96_vm1, %v8205_v9, %v14663_v35  ;;  %v8208_v43 = vsel %vm96_vm1, %v8206_v6, %v14664_v54  ;;  %v13532_v20 = vld [vmem:[%s16703_s6 + $0x18] ss:$0 sm:$0xff] }
0x362c   :  { %14273 = vmatmul.mubr.msk.f32.vlgmr.msra.gmra.mrb[148].mxu0 %vm252_vm3, %v8028_v42 }
0x362d   :  { %14278 = vmatpush3.bf16.msra.mxu1 %v14680_v45 }
0x36fb   :  { %v8101_v29 = vpop.f32.mrb[144].mxu1 }
0x36fc   :  { %v14269_v46 = vpop.f32.mrb[145].mxu1 }
0x36ff   :  { %v8177_v10 = vpop.f32.mrb[148].mxu0 }
0x3700   :  { %v14665_v47 = vpack.i.bf16 %v8177_v10, %v8101_v29  ;;  %v14274_v3 = vpop.f32.mrb[149].mxu0 }
0x3702   :  { %14666 = vrot.lane.b32.xlu1 %v14665_v47, %s16727_s12 }
0x3774   :  { %v14667_v36 = vpop.permute.xlu1 %14666 }
0x3775   :  { %v14669_v40 = vunpack.i.h.bf16 %v14667_v36  ;;  %v14668_v38 = vunpack.i.l.bf16 %v14667_v36 }
0x3777   :  { %v8210_v39 = vsel %vm1596_vm4, %v8208_v43, %v14669_v40  ;;  %v8209_v50 = vsel %vm1596_vm4, %v8207_v11, %v14668_v38 }
0x3778   :  { %v8211_v48 = vpack.c.bf16 %v8210_v39, %v8209_v50 }
0x377a   :  { %14280 = vmatmul.mubr.msk.bf16.vlgmr.msra.gmra.mrb[148].mxu1 %vm204_vm2, %v8211_v48 }
0x384d   :  { %v8270_v8 = vpop.f32.mrb[148].mxu1 }
0x384e   :  { %v8271_v19 = vadd.f32 %v13528_v4, %v8270_v8  ;;  %v14281_v51 = vpop.f32.mrb[149].mxu1 }
0x384f   :  { %v8273_v7 = vpop.f32.mrb[150].mxu1 }
0x3850   :  { %v8274_v27 = vadd.f32 %v13528_v4, %v8273_v7  ;;  %v14282_v52 = vpop.f32.mrb[151].mxu1  ;;  %v8277_v53 = vadd.f32 %v8271_v19, %v15929_v49 }
0x3852   :  { %v8279_v32 = vsel %vm204_vm2, %v8277_v53, 0.0  ;;  %v8278_v58 = vadd.f32 %v8274_v27, %v15931_v17 }
0x3853   :  { %8280 = vadd.xlane.f32.xlu0 %v8279_v32 }
0x3854   :  { %v8282_v55 = vsel %vm204_vm2, %v8278_v58, 0.0 }
0x3855   :  { %8283 = vadd.xlane.f32.xlu1 %v8282_v55 }
0x38e0   :  { %v8281_v28 = vpop.xlane.xlu0 %8280 }
0x38e1   :  { %v8285_v41 = vmul.f32 0.03125, %v8281_v28 }
0x38e2   :  { %v8284_v57 = vpop.xlane.xlu1 %8283 }
0x38e3   :  { %v8287_v44 = vsub.f32 %v8277_v53, %v8285_v41  ;;  %v8286_v59 = vmul.f32 0.03125, %v8284_v57 }
0x38e5   :  { %v8288_v60 = vsub.f32 %v8278_v58, %v8286_v59  ;;  %v8289_v31 = vmul.f32 %v8287_v44, %v8287_v44 }
0x38e7   :  { %v8291_v61 = vsel %vm204_vm2, %v8289_v31, 0.0  ;;  %v8290_v15 = vmul.f32 %v8288_v60, %v8288_v60 }
0x38e8   :  { %8292 = vadd.xlane.f32.xlu0 %v8291_v61 }
0x38e9   :  { %v8294_v49 = vsel %vm204_vm2, %v8290_v15, 0.0 }
0x38ec   :  { %8295 = vadd.xlane.f32.xlu0 %v8294_v49 }
0x3975   :  { %v8293_v62 = vpop.xlane.xlu0 %8292 }
0x3976   :  { %v8297_v17 = vmul.f32 0.03125, %v8293_v62 }
0x3978   :  { %v8299_v63 = vadd.f32 1e-05, %v8297_v17 }
0x3979   :  { %v8296_v18 = vpop.xlane.xlu0 %8295 }
0x397a   :  { %14753 = vrsqrt.f32 %v8299_v63  ;;  %v8298_v25 = vmul.f32 0.03125, %v8296_v18 }
0x397c   :  { %v8300_v34 = vadd.f32 1e-05, %v8298_v25 }
0x397e   :  { %14755 = vrsqrt.f32 %v8300_v34 }
0x3984   :  { %v14754_v1 = vpop.eup %14753 }
0x3985   :  { %v8303_v42 = vmul.f32 %v14754_v1, %v8287_v44 }
0x3987   :  { %v8310_v45 = vmul.f32 %v13532_v20, %v8303_v42 }
0x3988   :  { %v14756_v29 = vpop.eup %14755 }
0x3989   :  { %v16122_v46 = vadd.f32 %v13533_v56, %v8310_v45  ;;  %v8304_v10 = vmul.f32 %v14756_v29, %v8288_v60 }
0x398b   :  { %v8311_v47 = vmul.f32 %v13532_v20, %v8304_v10 }
0x398d   :  { %v16124_v3 = vadd.f32 %v13533_v56, %v8311_v47 }
0x398e   :  { %14907 = dma.done.wait [#allocation3], 8192 }
0x398f   :  { %14908 = vsyncadd [#allocation3], 4294959104  ;;  %8507 = vmatprep.mubr.bf16.mxu0 %v14942_v30  ;;  %8550 = vmatprep.mubr.bf16.mxu1 %v14942_v30  ;;  %v8322_v5 = vld [vmem:[#allocation2 + $0x8] sm:$0xff]  ;;  %v8324_v23 = vld [vmem:[#allocation2 + $0x18] sm:$0xff]  ;;  %v16130_v38 = vpack.c.bf16 %v16124_v3, %v16122_v46 }
0x3990   :  { %v8321_v2 = vld [vmem:[#allocation2] sm:$0xff]  ;;  %8475 = vmatprep.subr.bf16.mxu0 %v8322_v5  ;;  %8518 = vmatprep.subr.bf16.mxu1 %v8324_v23  ;;  %v8323_v22 = vld [vmem:[#allocation2 + $0x10] sm:$0xff]  ;;  %v8338_v6 = vld [vmem:[#allocation2 + $0x108] sm:$0xff] }
0x3991   :  { %v8340_v9 = vld [vmem:[#allocation2 + $0x118] sm:$0xff]  ;;  %8476 = vmatpush1.bf16.msra.mxu0 %v8321_v2  ;;  %8519 = vmatpush1.bf16.msra.mxu1 %v8323_v22  ;;  %v8337_v54 = vld [vmem:[#allocation2 + $0x100] sm:$0xff]  ;;  %v8339_v35 = vld [vmem:[#allocation2 + $0x110] sm:$0xff] }
0x3992   :  { %8477 = vmatprep.subr.bf16.mxu0 %v8338_v6  ;;  %8520 = vmatprep.subr.bf16.mxu1 %v8340_v9  ;;  %v8326_v36 = vld [vmem:[#allocation2 + $0x28] sm:$0xff]  ;;  %v8328_v40 = vld [vmem:[#allocation2 + $0x38] sm:$0xff]  ;;  %v8325_v11 = vld [vmem:[#allocation2 + $0x20] sm:$0xff] }
0x3993   :  { %v8327_v43 = vld [vmem:[#allocation2 + $0x30] sm:$0xff]  ;;  %v8342_v39 = vld [vmem:[#allocation2 + $0x128] sm:$0xff]  ;;  %v8344_v50 = vld [vmem:[#allocation2 + $0x138] sm:$0xff] }
0x3994   :  { %v8341_v48 = vld [vmem:[#allocation2 + $0x120] sm:$0xff]  ;;  %v8343_v4 = vld [vmem:[#allocation2 + $0x130] sm:$0xff]  ;;  %v8330_v8 = vld [vmem:[#allocation2 + $0x48] sm:$0xff] }
0x3995   :  { %8478 = vmatpush1.bf16.msra.mxu0 %v8337_v54  ;;  %8521 = vmatpush1.bf16.msra.mxu1 %v8339_v35  ;;  %v8332_v19 = vld [vmem:[#allocation2 + $0x58] sm:$0xff]  ;;  %v8329_v51 = vld [vmem:[#allocation2 + $0x40] sm:$0xff]  ;;  %v8331_v7 = vld [vmem:[#allocation2 + $0x50] sm:$0xff] }
0x3996   :  { %8561 = vmatprep.subr.bf16.mxu0 %v8326_v36  ;;  %8604 = vmatprep.subr.bf16.mxu1 %v8328_v40  ;;  %v8346_v27 = vld [vmem:[#allocation2 + $0x148] sm:$0xff]  ;;  %v8348_v52 = vld [vmem:[#allocation2 + $0x158] sm:$0xff]  ;;  %v8345_v53 = vld [vmem:[#allocation2 + $0x140] sm:$0xff] }
0x3997   :  { %v8347_v32 = vld [vmem:[#allocation2 + $0x150] sm:$0xff]  ;;  %v8334_v58 = vld [vmem:[#allocation2 + $0x68] sm:$0xff]  ;;  %v8336_v55 = vld [vmem:[#allocation2 + $0x78] sm:$0xff] }
0x3998   :  { %13536 = vmatmul.mubr.msk.bf16.vlgmr.msra.gmra.mrb[152].mxu0 %vm204_vm2, %v16130_v38  ;;  %13537 = vmatmul.mubr.msk.bf16.vlgmr.msra.gmra.mrb[152].mxu1 %vm204_vm2, %v16130_v38  ;;  %v8333_v28 = vld [vmem:[#allocation2 + $0x60] sm:$0xff]  ;;  %v8335_v41 = vld [vmem:[#allocation2 + $0x70] sm:$0xff]  ;;  %v8350_v57 = vld [vmem:[#allocation2 + $0x168] sm:$0xff] }
0x3999   :  { %8562 = vmatpush1.bf16.msra.mxu0 %v8325_v11  ;;  %8605 = vmatpush1.bf16.msra.mxu1 %v8327_v43  ;;  %v8352_v44 = vld [vmem:[#allocation2 + $0x178] sm:$0xff]  ;;  %v8349_v59 = vld [vmem:[#allocation2 + $0x160] sm:$0xff]  ;;  %v8351_v60 = vld [vmem:[#allocation2 + $0x170] sm:$0xff] }
0x399a   :  { %8563 = vmatprep.subr.bf16.mxu0 %v8342_v39  ;;  %8606 = vmatprep.subr.bf16.mxu1 %v8344_v50  ;;  %v8354_v31 = vld [vmem:[#allocation2 + $0x88] sm:$0xff]  ;;  %v8356_v61 = vld [vmem:[#allocation2 + $0x98] sm:$0xff]  ;;  %v8353_v15 = vld [vmem:[#allocation2 + $0x80] sm:$0xff] }
0x399b   :  { %8593 = vmatprep.mubr.bf16.mxu0 %v14942_v30  ;;  %8636 = vmatprep.mubr.bf16.mxu1 %v14942_v30  ;;  %v8355_v49 = vld [vmem:[#allocation2 + $0x90] sm:$0xff]  ;;  %v8370_v62 = vld [vmem:[#allocation2 + $0x188] sm:$0xff]  ;;  %v8372_v17 = vld [vmem:[#allocation2 + $0x198] sm:$0xff] }
0x399c   :  { %v8369_v63 = vld [vmem:[#allocation2 + $0x180] sm:$0xff]  ;;  %v8371_v18 = vld [vmem:[#allocation2 + $0x190] sm:$0xff]  ;;  %v8358_v25 = vld [vmem:[#allocation2 + $0xa8] sm:$0xff] }
0x399d   :  { %8564 = vmatpush1.bf16.msra.mxu0 %v8341_v48  ;;  %8607 = vmatpush1.bf16.msra.mxu1 %v8343_v4  ;;  %v8360_v34 = vld [vmem:[#allocation2 + $0xb8] sm:$0xff] }
0x399e   :  { %8647 = vmatprep.subr.bf16.mxu0 %v8330_v8  ;;  %8690 = vmatprep.subr.bf16.mxu1 %v8332_v19  ;;  %v13534_v1 = vld [vmem:[%s16704_s7 + $0x2] ss:$4 sm:$0xff] }
0x399f   :  { %v8395_v20 = vrot.slane %v13534_v1, %v15306_v16  ;;  %v8403_v42 = vrot.slane %v13534_v1, %v15308_v12  ;;  %v8399_v56 = vrot.slane %v13534_v1, %v15313_v13  ;;  %v8407_v45 = vrot.slane %v13534_v1, %v15315_v14 }
0x39a0   :  { %13538 = vmatmul.mubr.msk.bf16.vlgmr.msra.gmra.mrb[156].mxu0 %vm204_vm2, %v16130_v38  ;;  %13539 = vmatmul.mubr.msk.bf16.vlgmr.msra.gmra.mrb[156].mxu1 %vm204_vm2, %v16130_v38  ;;  %v8411_v43 = vrot.slane %v13534_v1, %v15321_v21  ;;  %v8415_v4 = vrot.slane %v13534_v1, %v15323_v24 }
0x39a1   :  { %8648 = vmatpush1.bf16.msra.mxu0 %v8329_v51  ;;  %8691 = vmatpush1.bf16.msra.mxu1 %v8331_v7  ;;  %v8419_v7 = vrot.slane %v13534_v1, %v15325_v33 }
0x39a2   :  { %8649 = vmatprep.subr.bf16.mxu0 %v8346_v27  ;;  %8692 = vmatprep.subr.bf16.mxu1 %v8348_v52 }
0x39a3   :  { %8679 = vmatprep.mubr.bf16.mxu0 %v14942_v30  ;;  %8722 = vmatprep.mubr.bf16.mxu1 %v14942_v30 }
0x39a5   :  { %8650 = vmatpush1.bf16.msra.mxu0 %v8345_v53  ;;  %8693 = vmatpush1.bf16.msra.mxu1 %v8347_v32  ;;  %v8423_v32 = vrot.slane %v13534_v1, %v15327_v37  ;;  %v16168_v1 = vld [vmem:[%s16704_s7 + $0x22] ss:$4 sm:$0xff] }
0x39a6   :  { %8733 = vmatprep.subr.bf16.mxu0 %v8334_v58  ;;  %8776 = vmatprep.subr.bf16.mxu1 %v8336_v55 }
0x39a8   :  { %13540 = vmatmul.mubr.msk.bf16.vlgmr.msra.gmra.mrb[160].mxu0 %vm204_vm2, %v16130_v38  ;;  %13541 = vmatmul.mubr.msk.bf16.vlgmr.msra.gmra.mrb[160].mxu1 %vm204_vm2, %v16130_v38 }
0x39a9   :  { %8734 = vmatpush1.bf16.msra.mxu0 %v8333_v28  ;;  %8777 = vmatpush1.bf16.msra.mxu1 %v8335_v41 }
0x39aa   :  { %8735 = vmatprep.subr.bf16.mxu0 %v8350_v57  ;;  %8778 = vmatprep.subr.bf16.mxu1 %v8352_v44 }
0x39ab   :  { %8765 = vmatprep.mubr.bf16.mxu0 %v14942_v30  ;;  %8808 = vmatprep.mubr.bf16.mxu1 %v14942_v30 }
0x39ad   :  { %8736 = vmatpush1.bf16.msra.mxu0 %v8349_v59  ;;  %8779 = vmatpush1.bf16.msra.mxu1 %v8351_v60  ;;  %v8357_v59 = vld [vmem:[#allocation2 + $0xa0] sm:$0xff]  ;;  %v8359_v60 = vld [vmem:[#allocation2 + $0xb0] sm:$0xff] }
0x39ae   :  { %8872 = vmatprep.subr.bf16.mxu0 %v8354_v31  ;;  %8913 = vmatprep.subr.bf16.mxu1 %v8356_v61 }
0x39b0   :  { %13542 = vmatmul.mubr.msk.bf16.vlgmr.msra.gmra.mrb[164].mxu0 %vm204_vm2, %v16130_v38  ;;  %13543 = vmatmul.mubr.msk.bf16.vlgmr.msra.gmra.mrb[164].mxu1 %vm204_vm2, %v16130_v38 }
0x39b6   :  { %8873 = vmatpush1.bf16.xpose.msra.mxu0 %v8353_v15  ;;  %8914 = vmatpush1.bf16.xpose.msra.mxu1 %v8355_v49 }
0x39b7   :  { %8874 = vmatprep.subr.bf16.mxu0 %v8370_v62  ;;  %8915 = vmatprep.subr.bf16.mxu1 %v8372_v17 }
0x39be   :  { %8875 = vmatpush1.bf16.xpose.msra.mxu0 %v8369_v63  ;;  %8916 = vmatpush1.bf16.xpose.msra.mxu1 %v8371_v18 }
0x39bf   :  { %8954 = vmatprep.subr.bf16.mxu0 %v8358_v25  ;;  %8995 = vmatprep.subr.bf16.mxu1 %v8360_v34  ;;  %v8374_v25 = vld [vmem:[#allocation2 + $0x1a8] sm:$0xff]  ;;  %v8376_v34 = vld [vmem:[#allocation2 + $0x1b8] sm:$0xff] }
0x3a6b   :  { %v8509_v29 = vpop.f32.mrb[152].mxu0  ;;  %v8552_v10 = vpop.f32.mrb[152].mxu1 }
0x3a6c   :  { %v8510_v47 = vadd.f32 %v8509_v29, %v8395_v20  ;;  %v8553_v5 = vadd.f32 %v8552_v10, %v8403_v42  ;;  %v8511_v23 = vpop.f32.mrb[153].mxu0  ;;  %v8554_v2 = vpop.f32.mrb[153].mxu1 }
0x3a6d   :  { %v8512_v22 = vadd.f32 %v8511_v23, %v8399_v56  ;;  %v8555_v6 = vadd.f32 %v8554_v2, %v8407_v45  ;;  %v8513_v9 = vpop.f32.mrb[154].mxu0  ;;  %v8556_v54 = vpop.f32.mrb[154].mxu1 }
0x3a6e   :  { %v8821_v35 = vmax.f32 %v8553_v5, 0.0  ;;  %v8514_v36 = vadd.f32 %v8513_v9, %v8395_v20  ;;  %v8557_v40 = vadd.f32 %v8556_v54, %v8403_v42  ;;  %v8515_v38 = vpop.f32.mrb[155].mxu0  ;;  %v8558_v11 = vpop.f32.mrb[155].mxu1  ;;  %v8819_v8 = vmax.f32 %v8510_v47, 0.0 }
0x3a6f   :  { %v8822_v39 = vmax.f32 %v8555_v6, 0.0  ;;  %v8516_v50 = vadd.f32 %v8515_v38, %v8399_v56  ;;  %v8559_v48 = vadd.f32 %v8558_v11, %v8407_v45  ;;  %v8820_v27 = vmax.f32 %v8512_v22, 0.0 }
0x3a70   :  { %v8835_v19 = vmax.f32 %v8514_v36, 0.0  ;;  %v8837_v51 = vmax.f32 %v8557_v40, 0.0  ;;  %v8427_v9 = vrot.slane %v16168_v1, %v15306_v16  ;;  %v8435_v54 = vrot.slane %v16168_v1, %v15308_v12 }
0x3a71   :  { %v8836_v52 = vmax.f32 %v8516_v50, 0.0  ;;  %v8838_v53 = vmax.f32 %v8559_v48, 0.0  ;;  %v8431_v40 = vrot.slane %v16168_v1, %v15313_v13  ;;  %v8439_v38 = vrot.slane %v16168_v1, %v15315_v14 }
0x3a72   :  { %v8851_v58 = vpack.c.bf16 %v8835_v19, %v8819_v8  ;;  %v8853_v55 = vpack.c.bf16 %v8837_v51, %v8821_v35  ;;  %v8373_v8 = vld [vmem:[#allocation2 + $0x1a0] sm:$0xff]  ;;  %v8375_v19 = vld [vmem:[#allocation2 + $0x1b0] sm:$0xff] }
0x3a73   :  { %v8852_v28 = vpack.c.bf16 %v8836_v52, %v8820_v27  ;;  %v8854_v41 = vpack.c.bf16 %v8838_v53, %v8822_v39  ;;  %v8595_v57 = vpop.f32.mrb[156].mxu0  ;;  %v8638_v44 = vpop.f32.mrb[156].mxu1  ;;  %v8362_v53 = vld [vmem:[#allocation2 + $0xc8] sm:$0xff] }
0x3a74   :  { %v8596_v31 = vadd.f32 %v8595_v57, %v8411_v43  ;;  %v8597_v61 = vpop.f32.mrb[157].mxu0  ;;  %v8639_v15 = vadd.f32 %v8638_v44, %v8419_v7  ;;  %v8640_v49 = vpop.f32.mrb[157].mxu1 }
0x3a75   :  { %8904 = vmatprep.mubr.bf16.mxu0 %v8852_v28  ;;  %8945 = vmatprep.mubr.bf16.mxu1 %v8854_v41  ;;  %v8598_v62 = vadd.f32 %v8597_v61, %v8415_v4  ;;  %v8599_v17 = vpop.f32.mrb[158].mxu0  ;;  %v8641_v63 = vadd.f32 %v8640_v49, %v8423_v32  ;;  %v8642_v18 = vpop.f32.mrb[158].mxu1 }
0x3a76   :  { %8905 = vmatmul.mubr.bf16.vlgmr.msra.gmra.mrb[168].mxu0 %v8851_v58  ;;  %8946 = vmatmul.mubr.bf16.vlgmr.msra.gmra.mrb[168].mxu1 %v8853_v55  ;;  %v8823_v20 = vmax.f32 %v8596_v31, 0.0  ;;  %v8600_v42 = vadd.f32 %v8599_v17, %v8411_v43  ;;  %v8825_v56 = vmax.f32 %v8639_v15, 0.0  ;;  %v8601_v45 = vpop.f32.mrb[159].mxu0  ;;  %v8643_v29 = vadd.f32 %v8642_v18, %v8419_v7  ;;  %v8644_v10 = vpop.f32.mrb[159].mxu1 }
0x3a77   :  { %8955 = vmatpush1.bf16.xpose.msra.mxu0 %v8357_v59  ;;  %8996 = vmatpush1.bf16.xpose.msra.mxu1 %v8359_v60  ;;  %v8824_v47 = vmax.f32 %v8598_v62, 0.0  ;;  %v8602_v5 = vadd.f32 %v8601_v45, %v8415_v4  ;;  %v8826_v23 = vmax.f32 %v8641_v63, 0.0  ;;  %v8645_v2 = vadd.f32 %v8644_v10, %v8423_v32  ;;  %v8364_v32 = vld [vmem:[#allocation2 + $0xd8] sm:$0xff] }
0x3a78   :  { %v8839_v22 = vmax.f32 %v8600_v42, 0.0  ;;  %v8841_v6 = vmax.f32 %v8643_v29, 0.0  ;;  %8956 = vmatprep.subr.bf16.mxu0 %v8374_v25  ;;  %8997 = vmatprep.subr.bf16.mxu1 %v8376_v34  ;;  %v8443_v25 = vrot.slane %v16168_v1, %v15321_v21  ;;  %v8451_v34 = vrot.slane %v16168_v1, %v15325_v33 }
0x3a79   :  { %v8840_v35 = vmax.f32 %v8602_v5, 0.0  ;;  %v8842_v36 = vmax.f32 %v8645_v2, 0.0  ;;  %v8455_v45 = vrot.slane %v16168_v1, %v15327_v37 }
0x3a7a   :  { %v8855_v11 = vpack.c.bf16 %v8839_v22, %v8823_v20  ;;  %v8857_v43 = vpack.c.bf16 %v8841_v6, %v8825_v56  ;;  %v8447_v56 = vrot.slane %v16168_v1, %v15323_v24  ;;  %v8361_v22 = vld [vmem:[#allocation2 + $0xc0] sm:$0xff]  ;;  %v8363_v6 = vld [vmem:[#allocation2 + $0xd0] sm:$0xff] }
0x3a7b   :  { %v8856_v39 = vpack.c.bf16 %v8840_v35, %v8824_v47  ;;  %v8858_v50 = vpack.c.bf16 %v8842_v36, %v8826_v23  ;;  %v8681_v48 = vpop.f32.mrb[160].mxu0  ;;  %v8724_v4 = vpop.f32.mrb[160].mxu1 }
0x3a7c   :  { %v8682_v51 = vadd.f32 %v8681_v48, %v8427_v9  ;;  %v8683_v7 = vpop.f32.mrb[161].mxu0  ;;  %v8725_v27 = vadd.f32 %v8724_v4, %v8435_v54  ;;  %v8726_v52 = vpop.f32.mrb[161].mxu1 }
0x3a7d   :  { %8986 = vmatprep.mubr.bf16.mxu0 %v8856_v39  ;;  %9027 = vmatprep.mubr.bf16.mxu1 %v8858_v50  ;;  %v8684_v58 = vadd.f32 %v8683_v7, %v8431_v40  ;;  %v8685_v55 = vpop.f32.mrb[162].mxu0  ;;  %v8727_v28 = vadd.f32 %v8726_v52, %v8439_v38  ;;  %v8728_v41 = vpop.f32.mrb[162].mxu1 }
0x3a7e   :  { %v8827_v57 = vmax.f32 %v8682_v51, 0.0  ;;  %v8686_v44 = vadd.f32 %v8685_v55, %v8427_v9  ;;  %v8829_v59 = vmax.f32 %v8725_v27, 0.0  ;;  %v8687_v60 = vpop.f32.mrb[163].mxu0  ;;  %v8729_v31 = vadd.f32 %v8728_v41, %v8435_v54  ;;  %v8730_v61 = vpop.f32.mrb[163].mxu1 }
0x3a7f   :  { %8957 = vmatpush1.bf16.xpose.msra.mxu0 %v8373_v8  ;;  %8998 = vmatpush1.bf16.xpose.msra.mxu1 %v8375_v19  ;;  %v8828_v15 = vmax.f32 %v8684_v58, 0.0  ;;  %v8688_v49 = vadd.f32 %v8687_v60, %v8431_v40  ;;  %v8830_v62 = vmax.f32 %v8727_v28, 0.0  ;;  %v8731_v17 = vadd.f32 %v8730_v61, %v8439_v38  ;;  %v8378_v40 = vld [vmem:[#allocation2 + $0x1c8] sm:$0xff]  ;;  %v8380_v38 = vld [vmem:[#allocation2 + $0x1d8] sm:$0xff]  ;;  %v8377_v60 = vld [vmem:[#allocation2 + $0x1c0] sm:$0xff] }
0x3a80   :  { %9036 = vmatprep.subr.bf16.mxu0 %v8362_v53  ;;  %9077 = vmatprep.subr.bf16.mxu1 %v8364_v32  ;;  %v8843_v63 = vmax.f32 %v8686_v44, 0.0  ;;  %v8845_v18 = vmax.f32 %v8729_v31, 0.0  ;;  %v8379_v31 = vld [vmem:[#allocation2 + $0x1d0] sm:$0xff]  ;;  %v8366_v61 = vld [vmem:[#allocation2 + $0xe8] sm:$0xff] }
0x3a81   :  { %v8844_v20 = vmax.f32 %v8688_v49, 0.0  ;;  %v8846_v42 = vmax.f32 %v8731_v17, 0.0  ;;  %v8365_v49 = vld [vmem:[#allocation2 + $0xe0] sm:$0xff]  ;;  %v8382_v17 = vld [vmem:[#allocation2 + $0x1e8] sm:$0xff] }
0x3a82   :  { %v8859_v29 = vpack.c.bf16 %v8843_v63, %v8827_v57  ;;  %v8861_v10 = vpack.c.bf16 %v8845_v18, %v8829_v59  ;;  %v8384_v63 = vld [vmem:[#allocation2 + $0x1f8] sm:$0xff]  ;;  %v8381_v18 = vld [vmem:[#allocation2 + $0x1e0] sm:$0xff] }
0x3a83   :  { %v8860_v47 = vpack.c.bf16 %v8844_v20, %v8828_v15  ;;  %v8862_v5 = vpack.c.bf16 %v8846_v42, %v8830_v62  ;;  %v8767_v23 = vpop.f32.mrb[164].mxu0  ;;  %v8810_v2 = vpop.f32.mrb[164].mxu1  ;;  %v8368_v15 = vld [vmem:[#allocation2 + $0xf8] sm:$0xff]  ;;  %v8367_v62 = vld [vmem:[#allocation2 + $0xf0] sm:$0xff] }
0x3a84   :  { %v8768_v9 = vadd.f32 %v8767_v23, %v8443_v25  ;;  %v8769_v54 = vpop.f32.mrb[165].mxu0  ;;  %v8811_v35 = vadd.f32 %v8810_v2, %v8451_v34  ;;  %v8812_v36 = vpop.f32.mrb[165].mxu1 }
0x3a85   :  { %v8770_v39 = vadd.f32 %v8769_v54, %v8447_v56  ;;  %v8771_v50 = vpop.f32.mrb[166].mxu0  ;;  %v8813_v48 = vadd.f32 %v8812_v36, %v8455_v45  ;;  %v8814_v4 = vpop.f32.mrb[166].mxu1 }
0x3a86   :  { %8987 = vmatmul.mubr.bf16.vlgmr.msra.gmra.mrb[172].mxu0 %v8855_v11  ;;  %9028 = vmatmul.mubr.bf16.vlgmr.msra.gmra.mrb[172].mxu1 %v8857_v43  ;;  %v8831_v1 = vmax.f32 %v8768_v9, 0.0  ;;  %v8772_v8 = vadd.f32 %v8771_v50, %v8443_v25  ;;  %v8833_v19 = vmax.f32 %v8811_v35, 0.0  ;;  %v8773_v51 = vpop.f32.mrb[167].mxu0  ;;  %v8815_v7 = vadd.f32 %v8814_v4, %v8451_v34  ;;  %v8816_v27 = vpop.f32.mrb[167].mxu1  ;;  %v8383_v25 = vld [vmem:[#allocation2 + $0x1f0] sm:$0xff] }
0x3a87   :  { %9037 = vmatpush1.bf16.xpose.msra.mxu0 %v8361_v22  ;;  %9078 = vmatpush1.bf16.xpose.msra.mxu1 %v8363_v6  ;;  %v8832_v52 = vmax.f32 %v8770_v39, 0.0  ;;  %v8774_v53 = vadd.f32 %v8773_v51, %v8447_v56  ;;  %v8834_v32 = vmax.f32 %v8813_v48, 0.0  ;;  %v8817_v58 = vadd.f32 %v8816_v27, %v8455_v45  ;;  %v13544_v34 = vld [vmem:[%s16703_s6 + $0x1a] ss:$0 sm:$0xff] }
0x3a88   :  { %9038 = vmatprep.subr.bf16.mxu0 %v8378_v40  ;;  %9079 = vmatprep.subr.bf16.mxu1 %v8380_v38  ;;  %v8847_v55 = vmax.f32 %v8772_v8, 0.0  ;;  %v8849_v28 = vmax.f32 %v8815_v7, 0.0 }
0x3a89   :  { %9068 = vmatprep.mubr.bf16.mxu0 %v8860_v47  ;;  %9109 = vmatprep.mubr.bf16.mxu1 %v8862_v5  ;;  %v8848_v11 = vmax.f32 %v8774_v53, 0.0  ;;  %v8850_v43 = vmax.f32 %v8817_v58, 0.0 }
0x3a8a   :  { %v8863_v41 = vpack.c.bf16 %v8847_v55, %v8831_v1  ;;  %v8865_v57 = vpack.c.bf16 %v8849_v28, %v8833_v19 }
0x3a8b   :  { %v8864_v44 = vpack.c.bf16 %v8848_v11, %v8832_v52  ;;  %v8866_v59 = vpack.c.bf16 %v8850_v43, %v8834_v32 }
0x3a8f   :  { %9039 = vmatpush1.bf16.xpose.msra.mxu0 %v8377_v60  ;;  %9080 = vmatpush1.bf16.xpose.msra.mxu1 %v8379_v31 }
0x3a90   :  { %9118 = vmatprep.subr.bf16.mxu0 %v8366_v61  ;;  %9159 = vmatprep.subr.bf16.mxu1 %v8368_v15 }
0x3a96   :  { %9069 = vmatmul.mubr.bf16.vlgmr.msra.gmra.mrb[176].mxu0 %v8859_v29  ;;  %9110 = vmatmul.mubr.bf16.vlgmr.msra.gmra.mrb[176].mxu1 %v8861_v10 }
0x3a97   :  { %9119 = vmatpush1.bf16.xpose.msra.mxu0 %v8365_v49  ;;  %9160 = vmatpush1.bf16.xpose.msra.mxu1 %v8367_v62 }
0x3a98   :  { %9120 = vmatprep.subr.bf16.mxu0 %v8382_v17  ;;  %9161 = vmatprep.subr.bf16.mxu1 %v8384_v63 }
0x3a99   :  { %9150 = vmatprep.mubr.bf16.mxu0 %v8864_v44  ;;  %9191 = vmatprep.mubr.bf16.mxu1 %v8866_v59 }
0x3a9f   :  { %9121 = vmatpush1.bf16.xpose.msra.mxu0 %v8381_v18  ;;  %9162 = vmatpush1.bf16.xpose.msra.mxu1 %v8383_v25 }
0x3aa0   :  { %14283 = vmatprep.subr.bf16.mxu0 %v14915_v0  ;;  %14291 = vmatprep.subr.mxu1 %v14915_v0 }
0x3aa6   :  { %9151 = vmatmul.mubr.bf16.vlgmr.msra.gmra.mrb[180].mxu0 %v8863_v41  ;;  %9192 = vmatmul.mubr.bf16.vlgmr.msra.gmra.mrb[180].mxu1 %v8865_v57 }
0x3aa7   :  { %14287 = vmatprep.mubr.msk.bf16.mxu0 %vm14916_vm0, %v14915_v0  ;;  %14293 = vmatprep.mubr.msk.f32.mxu1 %vm14916_vm0, %v14915_v0 }
0x3b49   :  { %v8906_v20 = vpop.f32.mrb[168].mxu0  ;;  %v8947_v42 = vpop.f32.mrb[168].mxu1 }
0x3b4a   :  { %v8907_v56 = vadd.f32 %v13544_v34, %v8906_v20  ;;  %v8908_v45 = vpop.f32.mrb[169].mxu0  ;;  %v8949_v29 = vpop.f32.mrb[169].mxu1 }
0x3b4b   :  { %v8909_v10 = vpop.f32.mrb[170].mxu0  ;;  %v8950_v47 = vpop.f32.mrb[170].mxu1 }
0x3b4c   :  { %v8948_v5 = vadd.f32 %v8947_v42, %v8907_v56  ;;  %v8910_v23 = vadd.f32 %v13544_v34, %v8909_v10  ;;  %v8911_v2 = vpop.f32.mrb[171].mxu0  ;;  %v8952_v22 = vpop.f32.mrb[171].mxu1 }
0x3b4d   :  { %v14788_v22 = vld [vmem:[#allocation4 + $0x9c] ss:$60 sps:$4 sm:$0xff]  }
0x3b4e   :  { %v8951_v6 = vadd.f32 %v8950_v47, %v8910_v23 }
0x3b59   :  { %v8988_v9 = vpop.f32.mrb[172].mxu0  ;;  %v9029_v54 = vpop.f32.mrb[172].mxu1 }
0x3b5a   :  { %v8989_v35 = vadd.f32 %v8988_v9, %v8948_v5  ;;  %v8990_v36 = vpop.f32.mrb[173].mxu0  ;;  %v9031_v40 = vpop.f32.mrb[173].mxu1 }
0x3b5b   :  { %v8991_v38 = vpop.f32.mrb[174].mxu0  ;;  %v9032_v39 = vpop.f32.mrb[174].mxu1 }
0x3b5c   :  { %v9030_v50 = vadd.f32 %v9029_v54, %v8989_v35  ;;  %v8992_v48 = vadd.f32 %v8991_v38, %v8951_v6  ;;  %v8993_v4 = vpop.f32.mrb[175].mxu0  ;;  %v9034_v1 = vpop.f32.mrb[175].mxu1 }
0x3b5e   :  { %v9033_v8 = vadd.f32 %v9032_v39, %v8992_v48 }
0x3b69   :  { %v9070_v19 = vpop.f32.mrb[176].mxu0  ;;  %v9111_v51 = vpop.f32.mrb[176].mxu1 }
0x3b6a   :  { %v9071_v7 = vadd.f32 %v9070_v19, %v9030_v50  ;;  %v9072_v27 = vpop.f32.mrb[177].mxu0  ;;  %v9113_v52 = vpop.f32.mrb[177].mxu1  ;;  %v13545_v50 = vld [vmem:[%s16703_s6 + $0x1b] ss:$0 sm:$0xff] }
0x3b6b   :  { %v9073_v53 = vpop.f32.mrb[178].mxu0  ;;  %v9114_v32 = vpop.f32.mrb[178].mxu1  ;;  %v13547_v52 = vld [vmem:[%s16703_s6 + $0x1d] ss:$0 sm:$0xff] }
0x3b6c   :  { %v9112_v58 = vadd.f32 %v9111_v51, %v9071_v7  ;;  %v9074_v55 = vadd.f32 %v9073_v53, %v9033_v8  ;;  %v9075_v28 = vpop.f32.mrb[179].mxu0  ;;  %v9116_v11 = vpop.f32.mrb[179].mxu1  ;;  %v13546_v8 = vld [vmem:[%s16703_s6 + $0x1c] ss:$0 sm:$0xff] }
0x3b6e   :  { %v9115_v43 = vadd.f32 %v9114_v32, %v9074_v55 }
0x3b79   :  { %v9152_v41 = vpop.f32.mrb[180].mxu0  ;;  %v9193_v57 = vpop.f32.mrb[180].mxu1 }
0x3b7a   :  { %v9153_v44 = vadd.f32 %v9152_v41, %v9112_v58  ;;  %v9154_v59 = vpop.f32.mrb[181].mxu0  ;;  %v9195_v60 = vpop.f32.mrb[181].mxu1 }
0x3b7b   :  { %v9155_v31 = vpop.f32.mrb[182].mxu0  ;;  %v9196_v61 = vpop.f32.mrb[182].mxu1 }
0x3b7c   :  { %v9194_v15 = vadd.f32 %v9193_v57, %v9153_v44  ;;  %v9156_v49 = vadd.f32 %v9155_v31, %v9115_v43  ;;  %v9157_v62 = vpop.f32.mrb[183].mxu0  ;;  %v9198_v17 = vpop.f32.mrb[183].mxu1 }
0x3b7e   :  { %v9200_v63 = vadd.f32 %v9194_v15, %v16122_v46  ;;  %v9197_v18 = vadd.f32 %v9196_v61, %v9156_v49 }
0x3b80   :  { %v9201_v25 = vadd.f32 %v9197_v18, %v16124_v3  ;;  %v9202_v34 = vsel %vm204_vm2, %v9200_v63, 0.0  ;;  %v14787_v3 = vld [vmem:[#allocation4 + $0x24] ss:$60 sps:$4 sm:$0xff]  }
0x3b81   :  { %9203 = vadd.xlane.f32.xlu0 %v9202_v34  ;;  %14284 = vmatpush3.bf16.msra.mxu0 %v14787_v3 }
0x3b82   :  { %v9205_v20 = vsel %vm204_vm2, %v9201_v25, 0.0  ;;  %14285 = vmatprep.subr.bf16.mxu0 %v14915_v0 }
0x3b85   :  { %9206 = vadd.xlane.f32.xlu0 %v9205_v20  ;;  %14286 = vmatpush3.bf16.msra.mxu0 %v14788_v22 }
0x3b86   :  { %14296 = vmatprep.subr.mxu0 %v14915_v0 }
0x3c0e   :  { %v9204_v42 = vpop.xlane.xlu0 %9203 }
0x3c0f   :  { %v9208_v56 = vmul.f32 0.03125, %v9204_v42 }
0x3c11   :  { %v9210_v45 = vsub.f32 %v9200_v63, %v9208_v56 }
0x3c12   :  { %v9207_v29 = vpop.xlane.xlu0 %9206 }
0x3c13   :  { %v9209_v10 = vmul.f32 0.03125, %v9207_v29  ;;  %v9212_v47 = vmul.f32 %v9210_v45, %v9210_v45 }
0x3c15   :  { %v9211_v5 = vsub.f32 %v9201_v25, %v9209_v10  ;;  %v9214_v23 = vsel %vm204_vm2, %v9212_v47, 0.0 }
0x3c16   :  { %9215 = vadd.xlane.f32.xlu1 %v9214_v23 }
0x3c17   :  { %v9213_v46 = vmul.f32 %v9211_v5, %v9211_v5 }
0x3c19   :  { %v9217_v2 = vsel %vm204_vm2, %v9213_v46, 0.0 }
0x3c1a   :  { %9218 = vadd.xlane.f32.xlu1 %v9217_v2 }
0x3ca3   :  { %v9216_v6 = vpop.xlane.xlu1 %9215 }
0x3ca4   :  { %v9220_v9 = vmul.f32 0.03125, %v9216_v6 }
0x3ca6   :  { %v9222_v54 = vadd.f32 1e-05, %v9220_v9 }
0x3ca7   :  { %v9219_v35 = vpop.xlane.xlu1 %9218 }
0x3ca8   :  { %14797 = vrsqrt.f32 %v9222_v54  ;;  %v9221_v36 = vmul.f32 0.03125, %v9219_v35 }
0x3caa   :  { %v9223_v40 = vadd.f32 1e-05, %v9221_v36 }
0x3cac   :  { %14799 = vrsqrt.f32 %v9223_v40 }
0x3cb2   :  { %v14798_v38 = vpop.eup %14797 }
0x3cb3   :  { %v9226_v39 = vmul.f32 %v14798_v38, %v9210_v45 }
0x3cb5   :  { %v9233_v1 = vmul.f32 %v13545_v50, %v9226_v39 }
0x3cb6   :  { %v14800_v48 = vpop.eup %14799 }
0x3cb7   :  { %v9227_v4 = vmul.f32 %v14800_v48, %v9211_v5  ;;  %v16209_v51 = vadd.f32 %v13546_v8, %v9233_v1 }
0x3cb9   :  { %v9234_v19 = vmul.f32 %v13545_v50, %v9227_v4 }
0x3cbb   :  { %v16211_v7 = vadd.f32 %v13546_v8, %v9234_v19 }
0x3cbd   :  { %v9242_v27 = vpack.c.bf16 %v16211_v7, %v16209_v51 }
0x3cbf   :  { %14288 = vmatmul.mubr.msk.bf16.vlgmr.msra.gmra.mrb[184].mxu0 %vm204_vm2, %v9242_v27 }
0x3cc0   :  { %14298 = vmatprep.mubr.msk.f32.mxu0 %vm14916_vm0, %v14915_v0 }
0x3d92   :  { %v9301_v53 = vpop.f32.mrb[184].mxu0 }
0x3d93   :  { %v16221_v32 = vadd.f32 %v13547_v52, %v9301_v53  ;;  %v14289_v58 = vpop.f32.mrb[185].mxu0 }
0x3d94   :  { %v9304_v55 = vpop.f32.mrb[186].mxu0 }
0x3d95   :  { %v16223_v28 = vadd.f32 %v13547_v52, %v9304_v55  ;;  %9309 = vrot.lane.b32.xlu0 %v16221_v32, %s14929_s19  ;;  %v14290_v11 = vpop.f32.mrb[187].mxu0 }
0x3d97   :  { %9386 = vrot.lane.b32.xlu1 %v16223_v28, %s14929_s19 }
0x3e07   :  { %v9310_v43 = vpop.permute.xlu0 %9309 }
0x3e08   :  { %14292 = vmatpush3.xpose.msk.msra.mxu1 %vm252_vm3, %v9310_v43 }
0x3e09   :  { %v9387_v41 = vpop.permute.xlu1 %9386  ;;  %14301 = vmatprep.subr.mxu1 %v14915_v0 }
0x3e0a   :  { %14297 = vmatpush3.xpose.msk.msra.mxu0 %vm252_vm3, %v9387_v41 }
0x3e0b   :  { %14294 = vmatmul.mubr.msk.f32.vlgmr.msra.gmra.mrb[146].mxu1 %vm252_vm3, %v16221_v32  ;;  %14306 = vmatprep.subr.mxu0 %v14915_v0 }
0x3e0c   :  { %14303 = vmatprep.mubr.msk.f32.mxu1 %vm14916_vm0, %v14915_v0 }
0x3e0d   :  { %14299 = vmatmul.mubr.msk.f32.vlgmr.msra.gmra.mrb[150].mxu0 %vm252_vm3, %v16223_v28 }
0x3e0e   :  { %14308 = vmatprep.mubr.msk.f32.mxu0 %vm14916_vm0, %v14915_v0 }
0x3ede   :  { %v9381_v57 = vpop.f32.mrb[146].mxu1 }
0x3edf   :  { %v14295_v44 = vpop.f32.mrb[147].mxu1  ;;  %v9462_v59 = vsel %vm252_vm3, %v9381_v57, -inf }
0x3ee0   :  { %9463 = vmax.xlane.f32.xlu1 %v9462_v59  ;;  %v9458_v60 = vpop.f32.mrb[150].mxu0 }
0x3ee1   :  { %v14300_v31 = vpop.f32.mrb[151].mxu0  ;;  %v9465_v61 = vsel %vm252_vm3, %v9458_v60, -inf }
0x3ee2   :  { %9466 = vmax.xlane.f32.xlu0 %v9465_v61 }
0x3ef1   :  { %9560 = vrot.lane.b32.xlu1 %v16223_v28, %s14918_s25 }
0x3ef5   :  { %9638 = vrot.lane.b32.xlu1 %v16221_v32, %s14930_s14 }
0x3ef8   :  { %9484 = vrot.lane.b32.xlu0 %v16221_v32, %s14918_s25 }
0x3ef9   :  { %9716 = vrot.lane.b32.xlu1 %v16223_v28, %s14930_s14 }
0x3f6d   :  { %v9464_v15 = vpop.xlane.xlu1 %9463 }
0x3f6e   :  { %v9468_v49 = vsub.f32 %v9381_v57, %v9464_v15 }
0x3f6f   :  { %v9467_v62 = vpop.xlane.xlu0 %9466 }
0x3f70   :  { %v9470_v17 = vmul.f32 1.442695, %v9468_v49  ;;  %v9469_v63 = vsub.f32 %v9458_v60, %v9467_v62 }
0x3f71   :  { %v9561_v18 = vpop.permute.xlu1 %9560 }
0x3f72   :  { %14801 = vpow2.f32 %v9470_v17  ;;  %v9472_v25 = vmul.f32 1.442695, %v9469_v63  ;;  %14307 = vmatpush3.msra.mxu0 %v9561_v18 }
0x3f73   :  { %v9485_v34 = vpop.permute.xlu0 %9484  ;;  %14316 = vmatprep.subr.mxu0 %v14915_v0 }
0x3f74   :  { %14803 = vpow2.f32 %v9472_v25  ;;  %14302 = vmatpush3.msra.mxu1 %v9485_v34 }
0x3f75   :  { %14311 = vmatprep.subr.mxu1 %v14915_v0  ;;  %v9639_v29 = vpop.permute.xlu1 %9638 }
0x3f79   :  { %v9717_v10 = vpop.permute.xlu1 %9716 }
0x3f7c   :  { %v14802_v20 = vpop.eup %14801 }
0x3f7d   :  { %v9474_v42 = vsel %vm252_vm3, %v14802_v20, 0.0 }
0x3f7e   :  { %v14804_v56 = vpop.eup %14803  ;;  %9475 = vadd.xlane.f32.xlu0 %v9474_v42 }
0x3f7f   :  { %v9477_v45 = vsel %vm252_vm3, %v14804_v56, 0.0 }
0x3f80   :  { %9478 = vadd.xlane.f32.xlu1 %v9477_v45 }
0x3f91   :  { %9714 = vrot.lane.b32.xlu1 %v16223_v28, %s14931_s15 }
0x3f94   :  { %9636 = vrot.lane.b32.xlu0 %v16221_v32, %s14931_s15 }
0x400b   :  { %v9476_v47 = vpop.xlane.xlu0 %9475 }
0x400c   :  { %14805 = vrcp.f32 %v9476_v47 }
0x400d   :  { %v9479_v5 = vpop.xlane.xlu1 %9478 }
0x400e   :  { %14807 = vrcp.f32 %v9479_v5 }
0x400f   :  { %v9637_v22 = vpop.permute.xlu0 %9636 }
0x4011   :  { %v9715_v6 = vpop.permute.xlu1 %9714 }
0x4016   :  { %v14806_v23 = vpop.eup %14805 }
0x4017   :  { %v9481_v46 = vmul.f32 %v14806_v23, %v14802_v20 }
0x4018   :  { %v14808_v2 = vpop.eup %14807 }
0x4019   :  { %14304 = vmatmul.mubr.msk.f32.vlgmr.msra.gmra.mrb[184].mxu1 %vm252_vm3, %v9481_v46  ;;  %v9483_v3 = vmul.f32 %v14808_v2, %v14804_v56 }
0x401a   :  { %14312 = vmatpush3.xpose.msk.msra.mxu1 %vm252_vm3, %v9639_v29  ;;  %14313 = vmatprep.mubr.msk.f32.mxu1 %vm14916_vm0, %v14915_v0 }
0x401b   :  { %14309 = vmatmul.mubr.msk.f32.vlgmr.msra.gmra.mrb[188].mxu0 %vm252_vm3, %v9483_v3  ;;  %14321 = vmatprep.subr.mxu1 %v14915_v0 }
0x401c   :  { %14317 = vmatpush3.xpose.msk.msra.mxu0 %vm252_vm3, %v9717_v10  ;;  %14318 = vmatprep.mubr.msk.f32.mxu0 %vm14916_vm0, %v14915_v0 }
0x401d   :  { %14314 = vmatmul.mubr.msk.f32.vlgmr.msra.gmra.mrb[186].mxu1 %vm252_vm3, %v9637_v22  ;;  %14326 = vmatprep.subr.mxu0 %v14915_v0 }
0x401e   :  { %14323 = vmatprep.mubr.msk.f32.mxu1 %vm14916_vm0, %v14915_v0 }
0x401f   :  { %14319 = vmatmul.mubr.msk.f32.vlgmr.msra.gmra.mrb[190].mxu0 %vm252_vm3, %v9715_v6 }
0x4020   :  { %14328 = vmatprep.mubr.msk.f32.mxu0 %vm14916_vm0, %v14915_v0 }
0x40ec   :  { %v16275_v9 = vpop.f32.mrb[184].mxu1 }
0x40ed   :  { %v14305_v54 = vpop.f32.mrb[185].mxu1 }
0x40ee   :  { %v16277_v35 = vpop.f32.mrb[188].mxu0 }
0x40ef   :  { %v14310_v36 = vpop.f32.mrb[189].mxu0 }
0x40f0   :  { %v9710_v40 = vpop.f32.mrb[186].mxu1 }
0x40f1   :  { %v14315_v38 = vpop.f32.mrb[187].mxu1  ;;  %v9792_v39 = vsel %vm252_vm3, %v9710_v40, -inf }
0x40f2   :  { %9793 = vmax.xlane.f32.xlu0 %v9792_v39  ;;  %v9788_v50 = vpop.f32.mrb[190].mxu0 }
0x40f3   :  { %v14320_v48 = vpop.f32.mrb[191].mxu0  ;;  %v9795_v4 = vsel %vm252_vm3, %v9788_v50, -inf }
0x40f4   :  { %9796 = vmax.xlane.f32.xlu1 %v9795_v4 }
0x4105   :  { %9890 = vrot.lane.b32.xlu1 %v16223_v28, %s14932_s16 }
0x4108   :  { %9814 = vrot.lane.b32.xlu0 %v16221_v32, %s14932_s16 }
0x4109   :  { %9968 = vrot.lane.b32.xlu1 %v16221_v32, %s14933_s17 }
0x410d   :  { %10046 = vrot.lane.b32.xlu1 %v16223_v28, %s14933_s17 }
0x4111   :  { %10044 = vrot.lane.b32.xlu1 %v16223_v28, %s14934_s18 }
0x417f   :  { %v9794_v1 = vpop.xlane.xlu0 %9793 }
0x4180   :  { %v9798_v8 = vsub.f32 %v9710_v40, %v9794_v1 }
0x4181   :  { %v9797_v19 = vpop.xlane.xlu1 %9796 }
0x4182   :  { %v9800_v27 = vmul.f32 1.442695, %v9798_v8  ;;  %v9799_v52 = vsub.f32 %v9788_v50, %v9797_v19 }
0x4183   :  { %v9815_v53 = vpop.permute.xlu0 %9814 }
0x4184   :  { %14809 = vpow2.f32 %v9800_v27  ;;  %v9802_v58 = vmul.f32 1.442695, %v9799_v52  ;;  %14322 = vmatpush3.msra.mxu1 %v9815_v53 }
0x4185   :  { %v9891_v55 = vpop.permute.xlu1 %9890  ;;  %14331 = vmatprep.subr.mxu1 %v14915_v0 }
0x4186   :  { %14811 = vpow2.f32 %v9802_v58  ;;  %14327 = vmatpush3.msra.mxu0 %v9891_v55 }
0x4187   :  { %14336 = vmatprep.subr.mxu0 %v14915_v0 }
0x4189   :  { %v9969_v60 = vpop.permute.xlu1 %9968 }
0x418d   :  { %v10047_v49 = vpop.permute.xlu1 %10046 }
0x418e   :  { %v14810_v11 = vpop.eup %14809 }
0x418f   :  { %v9804_v43 = vsel %vm252_vm3, %v14810_v11, 0.0 }
0x4190   :  { %v14812_v41 = vpop.eup %14811  ;;  %9805 = vadd.xlane.f32.xlu0 %v9804_v43 }
0x4191   :  { %v9807_v57 = vsel %vm252_vm3, %v14812_v41, 0.0  ;;  %v10045_v63 = vpop.permute.xlu1 %10044 }
0x4194   :  { %9808 = vadd.xlane.f32.xlu0 %v9807_v57 }
0x41aa   :  { %9966 = vrot.lane.b32.xlu0 %v16221_v32, %s14934_s18 }
0x421d   :  { %v9806_v44 = vpop.xlane.xlu0 %9805 }
0x421e   :  { %14813 = vrcp.f32 %v9806_v44 }
0x4221   :  { %v9809_v59 = vpop.xlane.xlu0 %9808 }
0x4222   :  { %14815 = vrcp.f32 %v9809_v59 }
0x4225   :  { %v9967_v17 = vpop.permute.xlu0 %9966 }
0x4228   :  { %v14814_v31 = vpop.eup %14813 }
0x4229   :  { %v9811_v61 = vmul.f32 %v14814_v31, %v14810_v11 }
0x422b   :  { %14324 = vmatmul.mubr.msk.f32.vlgmr.msra.gmra.mrb[188].mxu1 %vm252_vm3, %v9811_v61 }
0x422c   :  { %v14816_v15 = vpop.eup %14815  ;;  %14332 = vmatpush3.xpose.msk.msra.mxu1 %vm252_vm3, %v9969_v60  ;;  %14333 = vmatprep.mubr.msk.f32.mxu1 %vm14916_vm0, %v14915_v0 }
0x422d   :  { %v9813_v62 = vmul.f32 %v14816_v15, %v14812_v41  ;;  %14341 = vmatprep.subr.mxu1 %v14915_v0 }
0x422f   :  { %14329 = vmatmul.mubr.msk.f32.vlgmr.msra.gmra.mrb[192].mxu0 %vm252_vm3, %v9813_v62  ;;  %14334 = vmatmul.mubr.msk.f32.vlgmr.msra.gmra.mrb[190].mxu1 %vm252_vm3, %v9967_v17 }
0x4230   :  { %14337 = vmatpush3.xpose.msk.msra.mxu0 %vm252_vm3, %v10047_v49  ;;  %14338 = vmatprep.mubr.msk.f32.mxu0 %vm14916_vm0, %v14915_v0 }
0x4231   :  { %14346 = vmatprep.subr.mxu0 %v14915_v0  ;;  %14343 = vmatprep.mubr.msk.f32.mxu1 %vm14916_vm0, %v14915_v0 }
0x4233   :  { %14339 = vmatmul.mubr.msk.f32.vlgmr.msra.gmra.mrb[194].mxu0 %vm252_vm3, %v10045_v63 }
0x4234   :  { %14348 = vmatprep.mubr.msk.f32.mxu0 %vm14916_vm0, %v14915_v0 }
0x42fe   :  { %v16313_v18 = vpop.f32.mrb[188].mxu1 }
0x42ff   :  { %v14325_v25 = vpop.f32.mrb[189].mxu1 }
0x4302   :  { %v16315_v34 = vpop.f32.mrb[192].mxu0  ;;  %v10040_v20 = vpop.f32.mrb[190].mxu1 }
0x4303   :  { %v14757_v42 = vpack.i.bf16 %v16315_v34, %v16313_v18  ;;  %v14330_v56 = vpop.f32.mrb[193].mxu0  ;;  %v14335_v45 = vpop.f32.mrb[191].mxu1  ;;  %v10122_v29 = vsel %vm252_vm3, %v10040_v20, -inf }
0x4304   :  { %10123 = vmax.xlane.f32.xlu0 %v10122_v29 }
0x4306   :  { %v10118_v10 = vpop.f32.mrb[194].mxu0 }
0x4307   :  { %v14340_v47 = vpop.f32.mrb[195].mxu0  ;;  %v10125_v5 = vsel %vm252_vm3, %v10118_v10, -inf }
0x4308   :  { %10126 = vmax.xlane.f32.xlu1 %v10125_v5 }
0x4319   :  { %10220 = vrot.lane.b32.xlu1 %v16223_v28, %s14935_s20 }
0x431a   :  { %10144 = vrot.lane.b32.xlu0 %v16221_v32, %s14935_s20 }
0x431d   :  { %10298 = vrot.lane.b32.xlu1 %v16221_v32, %s14936_s22 }
0x4321   :  { %10376 = vrot.lane.b32.xlu1 %v16223_v28, %s14936_s22 }
0x4325   :  { %10374 = vrot.lane.b32.xlu1 %v16223_v28, %s16735_s30 }
0x4391   :  { %v10124_v23 = vpop.xlane.xlu0 %10123 }
0x4392   :  { %v10128_v46 = vsub.f32 %v10040_v20, %v10124_v23 }
0x4394   :  { %v10130_v2 = vmul.f32 1.442695, %v10128_v46 }
0x4395   :  { %v10145_v3 = vpop.permute.xlu0 %10144  ;;  %v10127_v22 = vpop.xlane.xlu1 %10126 }
0x4396   :  { %14817 = vpow2.f32 %v10130_v2  ;;  %v10129_v6 = vsub.f32 %v10118_v10, %v10127_v22  ;;  %14342 = vmatpush3.msra.mxu1 %v10145_v3  ;;  %v14790_v3 = vld [vmem:[#allocation4 + $0xa0] ss:$60 sps:$4 sm:$0xff]  }
0x4397   :  { %14351 = vmatprep.subr.mxu1 %v14915_v0 }
0x4398   :  { %v10132_v54 = vmul.f32 1.442695, %v10129_v6 }
0x4399   :  { %v10221_v36 = vpop.permute.xlu1 %10220 }
0x439a   :  { %14819 = vpow2.f32 %v10132_v54  ;;  %14347 = vmatpush3.msra.mxu0 %v10221_v36 }
0x439b   :  { %14356 = vmatprep.subr.mxu0 %v14915_v0 }
0x439d   :  { %v10299_v1 = vpop.permute.xlu1 %10298 }
0x43a0   :  { %v14818_v40 = vpop.eup %14817 }
0x43a1   :  { %v10134_v38 = vsel %vm252_vm3, %v14818_v40, 0.0  ;;  %v10377_v52 = vpop.permute.xlu1 %10376 }
0x43a2   :  { %10135 = vadd.xlane.f32.xlu0 %v10134_v38 }
0x43a4   :  { %v14820_v39 = vpop.eup %14819 }
0x43a5   :  { %v10137_v50 = vsel %vm252_vm3, %v14820_v39, 0.0  ;;  %v10375_v55 = vpop.permute.xlu1 %10374 }
0x43a6   :  { %10138 = vadd.xlane.f32.xlu0 %v10137_v50 }
0x43bc   :  { %10296 = vrot.lane.b32.xlu0 %v16221_v32, %s16735_s30 }
0x442f   :  { %v10136_v48 = vpop.xlane.xlu0 %10135 }
0x4430   :  { %14821 = vrcp.f32 %v10136_v48 }
0x4433   :  { %v10139_v4 = vpop.xlane.xlu0 %10138 }
0x4434   :  { %14823 = vrcp.f32 %v10139_v4 }
0x4437   :  { %v10297_v58 = vpop.permute.xlu0 %10296 }
0x443a   :  { %v14822_v8 = vpop.eup %14821 }
0x443b   :  { %v10141_v19 = vmul.f32 %v14822_v8, %v14818_v40 }
0x443d   :  { %14344 = vmatmul.mubr.msk.f32.vlgmr.msra.gmra.mrb[192].mxu1 %vm252_vm3, %v10141_v19 }
0x443e   :  { %v14824_v27 = vpop.eup %14823  ;;  %14352 = vmatpush3.xpose.msk.msra.mxu1 %vm252_vm3, %v10299_v1  ;;  %14353 = vmatprep.mubr.msk.f32.mxu1 %vm14916_vm0, %v14915_v0 }
0x443f   :  { %v10143_v53 = vmul.f32 %v14824_v27, %v14820_v39  ;;  %14361 = vmatprep.subr.mxu1 %v14915_v0 }
0x4441   :  { %14349 = vmatmul.mubr.msk.f32.vlgmr.msra.gmra.mrb[196].mxu0 %vm252_vm3, %v10143_v53  ;;  %14354 = vmatmul.mubr.msk.f32.vlgmr.msra.gmra.mrb[194].mxu1 %vm252_vm3, %v10297_v58 }
0x4442   :  { %14357 = vmatpush3.xpose.msk.msra.mxu0 %vm252_vm3, %v10377_v52  ;;  %14358 = vmatprep.mubr.msk.f32.mxu0 %vm14916_vm0, %v14915_v0 }
0x4443   :  { %14366 = vmatprep.subr.mxu0 %v14915_v0  ;;  %14363 = vmatprep.mubr.msk.f32.mxu1 %vm14916_vm0, %v14915_v0 }
0x4445   :  { %14359 = vmatmul.mubr.msk.f32.vlgmr.msra.gmra.mrb[198].mxu0 %vm252_vm3, %v10375_v55 }
0x4446   :  { %14368 = vmatprep.mubr.msk.f32.mxu0 %vm14916_vm0, %v14915_v0 }
0x4510   :  { %v10216_v11 = vpop.f32.mrb[192].mxu1 }
0x4511   :  { %v14345_v43 = vpop.f32.mrb[193].mxu1 }
0x4514   :  { %v10292_v41 = vpop.f32.mrb[196].mxu0  ;;  %v10370_v57 = vpop.f32.mrb[194].mxu1 }
0x4515   :  { %v14762_v44 = vpack.i.bf16 %v10292_v41, %v10216_v11  ;;  %v14350_v59 = vpop.f32.mrb[197].mxu0  ;;  %v14355_v60 = vpop.f32.mrb[195].mxu1  ;;  %v10452_v31 = vsel %vm252_vm3, %v10370_v57, -inf }
0x4516   :  { %10453 = vmax.xlane.f32.xlu0 %v10452_v31 }
0x4518   :  { %v10448_v61 = vpop.f32.mrb[198].mxu0 }
0x4519   :  { %v14360_v15 = vpop.f32.mrb[199].mxu0  ;;  %v10455_v49 = vsel %vm252_vm3, %v10448_v61, -inf }
0x451a   :  { %10456 = vmax.xlane.f32.xlu1 %v10455_v49 }
0x452b   :  { %10550 = vrot.lane.b32.xlu1 %v16223_v28, %s16736_s23 }
0x452f   :  { %14758 = vrot.lane.b32.xlu1 %v14757_v42, %s16725_s29 }
0x4533   :  { %14763 = vrot.lane.b32.xlu1 %v14762_v44, %s16726_s10 }
0x45a3   :  { %v10454_v62 = vpop.xlane.xlu0 %10453 }
0x45a4   :  { %v10458_v17 = vsub.f32 %v10370_v57, %v10454_v62 }
0x45a6   :  { %v10460_v63 = vmul.f32 1.442695, %v10458_v17 }
0x45a7   :  { %v10457_v25 = vpop.xlane.xlu1 %10456 }
0x45a8   :  { %14825 = vpow2.f32 %v10460_v63  ;;  %v10459_v20 = vsub.f32 %v10448_v61, %v10457_v25 }
0x45aa   :  { %v10462_v56 = vmul.f32 1.442695, %v10459_v20 }
0x45ab   :  { %v10551_v45 = vpop.permute.xlu1 %10550 }
0x45ac   :  { %14827 = vpow2.f32 %v10462_v56  ;;  %14367 = vmatpush3.msra.mxu0 %v10551_v45 }
0x45ad   :  { %14379 = vmatprep.subr.bf16.mxu0 %v14915_v0 }
0x45af   :  { %v14759_v38 = vpop.permute.xlu1 %14758 }
0x45b0   :  { %v14761_v50 = vunpack.i.h.bf16 %v14759_v38  ;;  %v14760_v48 = vunpack.i.l.bf16 %v14759_v38 }
0x45b2   :  { %v14826_v28 = vpop.eup %14825  ;;  %v10651_v19 = vsel %vm252_vm3, %v16277_v35, %v14761_v50  ;;  %v10650_v27 = vsel %vm252_vm3, %v16275_v9, %v14760_v48  ;;  %v13575_v9 = vld [vmem:[%s16703_s6 + $0x1e] ss:$0 sm:$0xff] }
0x45b3   :  { %v10464_v29 = vsel %vm252_vm3, %v14826_v28, 0.0  ;;  %v14764_v39 = vpop.permute.xlu1 %14763 }
0x45b4   :  { %10465 = vadd.xlane.f32.xlu0 %v10464_v29  ;;  %v14766_v4 = vunpack.i.h.bf16 %v14764_v39  ;;  %v14765_v1 = vunpack.i.l.bf16 %v14764_v39 }
0x45b6   :  { %v14828_v18 = vpop.eup %14827  ;;  %v10652_v58 = vsel %vm96_vm1, %v10650_v27, %v14765_v1  ;;  %v10653_v55 = vsel %vm96_vm1, %v10651_v19, %v14766_v4  ;;  %v13585_v4 = vld [vmem:[%s16703_s6 + $0x22] ss:$0 sm:$0xff] }
0x45b7   :  { %v10467_v34 = vsel %vm252_vm3, %v14828_v18, 0.0 }
0x45b8   :  { %10468 = vadd.xlane.f32.xlu0 %v10467_v34  ;;  %v14791_v34 = vld [vmem:[#allocation4 + $0x30] ss:$60 sps:$4 sm:$0xff]  }
0x45ce   :  { %10474 = vrot.lane.b32.xlu0 %v16221_v32, %s16736_s23  ;;  %v14789_v32 = vld [vmem:[#allocation4 + $0x28] ss:$60 sps:$4 sm:$0xff]  }
0x4641   :  { %v10466_v42 = vpop.xlane.xlu0 %10465 }
0x4642   :  { %14829 = vrcp.f32 %v10466_v42  ;;  %v14793_v42 = vld [vmem:[#allocation4 + $0x2c] ss:$60 sps:$4 sm:$0xff]  }
0x4645   :  { %v10469_v10 = vpop.xlane.xlu0 %10468 }
0x4646   :  { %14831 = vrcp.f32 %v10469_v10  ;;  %v14794_v10 = vld [vmem:[#allocation4 + $0xa4] ss:$60 sps:$4 sm:$0xff]  }
0x4649   :  { %v10475_v47 = vpop.permute.xlu0 %10474 }
0x464a   :  { %14362 = vmatpush3.msra.mxu1 %v10475_v47 }
0x464b   :  { %14371 = vmatprep.subr.bf16.mxu1 %v14915_v0 }
0x464c   :  { %v14830_v5 = vpop.eup %14829 }
0x464d   :  { %v10471_v23 = vmul.f32 %v14830_v5, %v14826_v28 }
0x464f   :  { %14364 = vmatmul.mubr.msk.f32.vlgmr.msra.gmra.mrb[196].mxu1 %vm252_vm3, %v10471_v23 }
0x4650   :  { %v14832_v46 = vpop.eup %14831  ;;  %14375 = vmatprep.mubr.msk.bf16.mxu1 %vm14916_vm0, %v14915_v0  ;;  %14372 = vmatpush3.bf16.msra.mxu1 %v14789_v32 }
0x4651   :  { %v10473_v2 = vmul.f32 %v14832_v46, %v14828_v18  ;;  %14373 = vmatprep.subr.bf16.mxu1 %v14915_v0 }
0x4653   :  { %14369 = vmatmul.mubr.msk.f32.vlgmr.msra.gmra.mrb[200].mxu0 %vm252_vm3, %v10473_v2 }
0x4654   :  { %14383 = vmatprep.mubr.msk.bf16.mxu0 %vm14916_vm0, %v14915_v0  ;;  %14374 = vmatpush3.bf16.msra.mxu1 %v14790_v3 }
0x4655   :  { %14387 = vmatprep.subr.bf16.mxu1 %v14915_v0  ;;  %14380 = vmatpush3.bf16.msra.mxu0 %v14793_v42 }
0x4656   :  { %14381 = vmatprep.subr.bf16.mxu0 %v14915_v0 }
0x4659   :  { %14382 = vmatpush3.bf16.msra.mxu0 %v14794_v10 }
0x465a   :  { %14395 = vmatprep.subr.mxu0 %v14915_v0 }
0x4722   :  { %v10546_v22 = vpop.f32.mrb[196].mxu1 }
0x4723   :  { %v14365_v6 = vpop.f32.mrb[197].mxu1 }
0x4726   :  { %v10622_v54 = vpop.f32.mrb[200].mxu0 }
0x4727   :  { %v14767_v36 = vpack.i.bf16 %v10622_v54, %v10546_v22  ;;  %v14370_v40 = vpop.f32.mrb[201].mxu0 }
0x4728   :  { %v13580_v40 = vld [vmem:[%s16703_s6 + $0x20] ss:$0 sm:$0xff] }
0x4729   :  { %14768 = vrot.lane.b32.xlu0 %v14767_v36, %s16727_s12 }
0x479b   :  { %v14769_v8 = vpop.permute.xlu0 %14768 }
0x479c   :  { %v14771_v52 = vunpack.i.h.bf16 %v14769_v8  ;;  %v14770_v53 = vunpack.i.l.bf16 %v14769_v8 }
0x479e   :  { %v10655_v11 = vsel %vm1596_vm4, %v10653_v55, %v14771_v52  ;;  %v10654_v43 = vsel %vm1596_vm4, %v10652_v58, %v14770_v53  ;;  %v13581_v58 = vld [vmem:[%s16703_s6 + $0x21] ss:$0 sm:$0xff] }
0x479f   :  { %v10656_v41 = vpack.c.bf16 %v10655_v11, %v10654_v43 }
0x47a1   :  { %14376 = vmatmul.mubr.msk.bf16.vlgmr.msra.gmra.mrb[200].mxu1 %vm204_vm2, %v10656_v41 }
0x47a2   :  { %14391 = vmatprep.mubr.msk.bf16.mxu1 %vm14916_vm0, %v14915_v0  ;;  %14388 = vmatpush3.bf16.msra.mxu1 %v14791_v34 }
0x47a3   :  { %14389 = vmatprep.subr.bf16.mxu1 %v14915_v0 }
0x4874   :  { %v10715_v35 = vpop.f32.mrb[200].mxu1 }
0x4875   :  { %v10716_v57 = vadd.f32 %v13575_v9, %v10715_v35  ;;  %v14377_v44 = vpop.f32.mrb[201].mxu1 }
0x4876   :  { %v10718_v59 = vpop.f32.mrb[202].mxu1 }
0x4877   :  { %v10719_v60 = vadd.f32 %v13575_v9, %v10718_v59  ;;  %v14378_v31 = vpop.f32.mrb[203].mxu1  ;;  %v10722_v61 = vadd.f32 %v10716_v57, %v16209_v51 }
0x4879   :  { %v10724_v15 = vsel %vm204_vm2, %v10722_v61, 0.0  ;;  %v10723_v49 = vadd.f32 %v10719_v60, %v16211_v7  ;;  %v14792_v7 = vld [vmem:[#allocation4 + $0xa8] ss:$60 sps:$4 sm:$0xff]  }
0x487a   :  { %10725 = vadd.xlane.f32.xlu1 %v10724_v15  ;;  %14390 = vmatpush3.bf16.msra.mxu1 %v14792_v7 }
0x487b   :  { %v10727_v62 = vsel %vm204_vm2, %v10723_v49, 0.0  ;;  %14405 = vmatprep.subr.mxu1 %v14915_v0 }
0x487c   :  { %10728 = vadd.xlane.f32.xlu0 %v10727_v62 }
0x487d   :  { %14392 = vmatmul.mubr.msk.bf16.vlgmr.msra.gmra.mrb[204].mxu1 %vm204_vm2, %v15915_v26  ;;  %v13579_v26 = vld [vmem:[%s16703_s6 + $0x1f] ss:$0 sm:$0xff] }
0x487e   :  { %14407 = vmatprep.mubr.msk.f32.mxu1 %vm14916_vm0, %v14915_v0 }
0x4907   :  { %v10726_v17 = vpop.xlane.xlu1 %10725 }
0x4908   :  { %v10730_v63 = vmul.f32 0.03125, %v10726_v17 }
0x4909   :  { %v10729_v25 = vpop.xlane.xlu0 %10728 }
0x490a   :  { %v10732_v20 = vsub.f32 %v10722_v61, %v10730_v63  ;;  %v10731_v56 = vmul.f32 0.03125, %v10729_v25 }
0x490c   :  { %v10733_v45 = vsub.f32 %v10723_v49, %v10731_v56  ;;  %v10734_v28 = vmul.f32 %v10732_v20, %v10732_v20 }
0x490e   :  { %v10736_v29 = vsel %vm204_vm2, %v10734_v28, 0.0  ;;  %v10735_v18 = vmul.f32 %v10733_v45, %v10733_v45 }
0x490f   :  { %10737 = vadd.xlane.f32.xlu0 %v10736_v29 }
0x4910   :  { %v10739_v51 = vsel %vm204_vm2, %v10735_v18, 0.0 }
0x4913   :  { %10740 = vadd.xlane.f32.xlu0 %v10739_v51 }
0x4950   :  { %v10885_v1 = vpop.f32.mrb[204].mxu1 }
0x4951   :  { %v16423_v8 = vadd.f32 %v13585_v4, %v10885_v1  ;;  %v14393_v19 = vpop.f32.mrb[205].mxu1 }
0x4952   :  { %v10888_v27 = vpop.f32.mrb[206].mxu1 }
0x4953   :  { %v16425_v52 = vadd.f32 %v13585_v4, %v10888_v27  ;;  %v14394_v53 = vpop.f32.mrb[207].mxu1 }
0x499c   :  { %v10738_v47 = vpop.xlane.xlu0 %10737 }
0x499d   :  { %v10742_v5 = vmul.f32 0.03125, %v10738_v47 }
0x499f   :  { %v10744_v23 = vadd.f32 1e-05, %v10742_v5 }
0x49a0   :  { %v10741_v46 = vpop.xlane.xlu0 %10740 }
0x49a1   :  { %14833 = vrsqrt.f32 %v10744_v23  ;;  %v10743_v2 = vmul.f32 0.03125, %v10741_v46 }
0x49a3   :  { %v10745_v32 = vadd.f32 1e-05, %v10743_v2 }
0x49a5   :  { %14835 = vrsqrt.f32 %v10745_v32 }
0x49ab   :  { %v14834_v3 = vpop.eup %14833 }
0x49ac   :  { %v10748_v22 = vmul.f32 %v14834_v3, %v10732_v20 }
0x49ae   :  { %v10755_v36 = vmul.f32 %v13579_v26, %v10748_v22 }
0x49af   :  { %v14836_v6 = vpop.eup %14835 }
0x49b0   :  { %v10749_v54 = vmul.f32 %v14836_v6, %v10733_v45  ;;  %v16411_v39 = vadd.f32 %v13580_v40, %v10755_v36 }
0x49b2   :  { %v10756_v38 = vmul.f32 %v13579_v26, %v10749_v54 }
0x49b4   :  { %v16413_v50 = vadd.f32 %v13580_v40, %v10756_v38 }
0x49b6   :  { %v10764_v48 = vpack.c.bf16 %v16413_v50, %v16411_v39 }
0x49b8   :  { %14384 = vmatmul.mubr.msk.bf16.vlgmr.msra.gmra.mrb[204].mxu0 %vm204_vm2, %v10764_v48 }
0x49b9   :  { %14397 = vmatprep.mubr.msk.f32.mxu0 %vm14916_vm0, %v14915_v0  ;;  %14396 = vmatpush3.xpose.msk.msra.mxu0 %vm252_vm3, %v16423_v8 }
0x49ba   :  { %14400 = vmatprep.subr.mxu0 %v14915_v0 }
0x4a8b   :  { %v10823_v55 = vpop.f32.mrb[204].mxu0 }
0x4a8c   :  { %v16433_v11 = vadd.f32 %v13581_v58, %v10823_v55  ;;  %v14385_v43 = vpop.f32.mrb[205].mxu0 }
0x4a8d   :  { %v10826_v41 = vpop.f32.mrb[206].mxu0 }
0x4a8e   :  { %v14386_v9 = vpop.f32.mrb[207].mxu0  ;;  %14398 = vmatmul.mubr.msk.f32.vlgmr.msra.gmra.mrb[202].mxu0 %vm252_vm3, %v16433_v11  ;;  %v16441_v35 = vadd.f32 %v13581_v58, %v10826_v41 }
0x4a8f   :  { %14401 = vmatpush3.xpose.msk.msra.mxu0 %vm252_vm3, %v16425_v52  ;;  %14402 = vmatprep.mubr.msk.f32.mxu0 %vm14916_vm0, %v14915_v0 }
0x4a90   :  { %14410 = vmatprep.subr.mxu0 %v14915_v0 }
0x4a92   :  { %14403 = vmatmul.mubr.msk.f32.vlgmr.msra.gmra.mrb[208].mxu0 %vm252_vm3, %v16441_v35 }
0x4a93   :  { %14412 = vmatprep.mubr.msk.f32.mxu0 %vm14916_vm0, %v14915_v0 }
0x4b61   :  { %v10964_v57 = vpop.f32.mrb[202].mxu0 }
0x4b62   :  { %v14399_v44 = vpop.f32.mrb[203].mxu0  ;;  %v11044_v59 = vsel %vm252_vm3, %v10964_v57, -inf }
0x4b63   :  { %11045 = vmax.xlane.f32.xlu1 %v11044_v59 }
0x4b65   :  { %v11040_v60 = vpop.f32.mrb[208].mxu0 }
0x4b66   :  { %v14404_v31 = vpop.f32.mrb[209].mxu0  ;;  %v11047_v61 = vsel %vm252_vm3, %v11040_v60, -inf }
0x4b67   :  { %11048 = vmax.xlane.f32.xlu0 %v11047_v61 }
0x4b74   :  { %11066 = vrot.lane.b32.xlu1 %v16423_v8, %s14929_s19 }
0x4b78   :  { %11220 = vrot.lane.b32.xlu1 %v16423_v8, %s14931_s15 }
0x4b7c   :  { %11298 = vrot.lane.b32.xlu1 %v16425_v52, %s14931_s15 }
0x4b7d   :  { %11142 = vrot.lane.b32.xlu0 %v16425_v52, %s14929_s19 }
0x4bf0   :  { %v11046_v15 = vpop.xlane.xlu1 %11045 }
0x4bf1   :  { %v11050_v49 = vsub.f32 %v10964_v57, %v11046_v15 }
0x4bf3   :  { %v11052_v62 = vmul.f32 1.442695, %v11050_v49 }
0x4bf4   :  { %v11067_v17 = vpop.permute.xlu1 %11066  ;;  %v11049_v63 = vpop.xlane.xlu0 %11048 }
0x4bf5   :  { %14837 = vpow2.f32 %v11052_v62  ;;  %v11051_v25 = vsub.f32 %v11040_v60, %v11049_v63  ;;  %14406 = vmatpush3.msra.mxu1 %v11067_v17 }
0x4bf6   :  { %14415 = vmatprep.subr.mxu1 %v14915_v0 }
0x4bf7   :  { %v11054_v20 = vmul.f32 1.442695, %v11051_v25 }
0x4bf8   :  { %v11143_v56 = vpop.permute.xlu0 %11142  ;;  %v11221_v51 = vpop.permute.xlu1 %11220 }
0x4bf9   :  { %14839 = vpow2.f32 %v11054_v20  ;;  %14411 = vmatpush3.msra.mxu0 %v11143_v56 }
0x4bfa   :  { %14420 = vmatprep.subr.mxu0 %v14915_v0 }
0x4bfc   :  { %v11299_v34 = vpop.permute.xlu1 %11298 }
0x4bff   :  { %v14838_v45 = vpop.eup %14837 }
0x4c00   :  { %v11056_v28 = vsel %vm252_vm3, %v14838_v45, 0.0 }
0x4c01   :  { %11057 = vadd.xlane.f32.xlu1 %v11056_v28 }
0x4c03   :  { %v14840_v29 = vpop.eup %14839 }
0x4c04   :  { %v11059_v18 = vsel %vm252_vm3, %v14840_v29, 0.0 }
0x4c05   :  { %11060 = vadd.xlane.f32.xlu0 %v11059_v18 }
0x4c12   :  { %11218 = vrot.lane.b32.xlu1 %v16433_v11, %s14931_s15 }
0x4c1b   :  { %11296 = vrot.lane.b32.xlu0 %v16441_v35, %s14931_s15 }
0x4c8e   :  { %v11058_v7 = vpop.xlane.xlu1 %11057 }
0x4c8f   :  { %14841 = vrcp.f32 %v11058_v7 }
0x4c92   :  { %v11061_v42 = vpop.xlane.xlu0 %11060  ;;  %v11219_v46 = vpop.permute.xlu1 %11218 }
0x4c93   :  { %14843 = vrcp.f32 %v11061_v42 }
0x4c96   :  { %v11297_v2 = vpop.permute.xlu0 %11296 }
0x4c99   :  { %v14842_v10 = vpop.eup %14841 }
0x4c9a   :  { %v11063_v47 = vmul.f32 %v14842_v10, %v14838_v45 }
0x4c9c   :  { %14408 = vmatmul.mubr.msk.f32.vlgmr.msra.gmra.mrb[198].mxu1 %vm252_vm3, %v11063_v47 }
0x4c9d   :  { %v14844_v5 = vpop.eup %14843  ;;  %14416 = vmatpush3.xpose.msk.msra.mxu1 %vm252_vm3, %v11221_v51  ;;  %14417 = vmatprep.mubr.msk.f32.mxu1 %vm14916_vm0, %v14915_v0 }
0x4c9e   :  { %v11065_v23 = vmul.f32 %v14844_v5, %v14840_v29  ;;  %14425 = vmatprep.subr.mxu1 %v14915_v0 }
0x4ca0   :  { %14413 = vmatmul.mubr.msk.f32.vlgmr.msra.gmra.mrb[210].mxu0 %vm252_vm3, %v11065_v23  ;;  %14418 = vmatmul.mubr.msk.f32.vlgmr.msra.gmra.mrb[208].mxu1 %vm252_vm3, %v11219_v46 }
0x4ca1   :  { %14421 = vmatpush3.xpose.msk.msra.mxu0 %vm252_vm3, %v11299_v34  ;;  %14422 = vmatprep.mubr.msk.f32.mxu0 %vm14916_vm0, %v14915_v0 }
0x4ca2   :  { %14430 = vmatprep.subr.mxu0 %v14915_v0  ;;  %14427 = vmatprep.mubr.msk.f32.mxu1 %vm14916_vm0, %v14915_v0 }
0x4ca4   :  { %14423 = vmatmul.mubr.msk.f32.vlgmr.msra.gmra.mrb[212].mxu0 %vm252_vm3, %v11297_v2 }
0x4ca5   :  { %14432 = vmatprep.mubr.msk.f32.mxu0 %vm14916_vm0, %v14915_v0 }
0x4d6f   :  { %v16482_v32 = vpop.f32.mrb[198].mxu1 }
0x4d70   :  { %v14409_v3 = vpop.f32.mrb[199].mxu1 }
0x4d73   :  { %v16484_v22 = vpop.f32.mrb[210].mxu0  ;;  %v11292_v26 = vpop.f32.mrb[208].mxu1 }
0x4d74   :  { %v14414_v6 = vpop.f32.mrb[211].mxu0  ;;  %v14419_v54 = vpop.f32.mrb[209].mxu1  ;;  %v11374_v36 = vsel %vm252_vm3, %v11292_v26, -inf }
0x4d75   :  { %11375 = vmax.xlane.f32.xlu1 %v11374_v36 }
0x4d77   :  { %v11370_v40 = vpop.f32.mrb[212].mxu0 }
0x4d78   :  { %v14424_v38 = vpop.f32.mrb[213].mxu0  ;;  %v11377_v48 = vsel %vm252_vm3, %v11370_v40, -inf }
0x4d79   :  { %11378 = vmax.xlane.f32.xlu0 %v11377_v48 }
0x4d86   :  { %11396 = vrot.lane.b32.xlu1 %v16423_v8, %s14930_s14 }
0x4d8a   :  { %11550 = vrot.lane.b32.xlu1 %v16423_v8, %s14934_s18 }
0x4d8e   :  { %11628 = vrot.lane.b32.xlu1 %v16425_v52, %s14934_s18 }
0x4d8f   :  { %11472 = vrot.lane.b32.xlu0 %v16425_v52, %s14930_s14 }
0x4d92   :  { %11548 = vrot.lane.b32.xlu1 %v16433_v11, %s14934_s18 }
0x4e02   :  { %v11376_v4 = vpop.xlane.xlu1 %11375 }
0x4e03   :  { %v11380_v1 = vsub.f32 %v11292_v26, %v11376_v4 }
0x4e05   :  { %v11382_v19 = vmul.f32 1.442695, %v11380_v1 }
0x4e06   :  { %v11397_v27 = vpop.permute.xlu1 %11396  ;;  %v11379_v53 = vpop.xlane.xlu0 %11378 }
0x4e07   :  { %14845 = vpow2.f32 %v11382_v19  ;;  %v11381_v58 = vsub.f32 %v11370_v40, %v11379_v53  ;;  %14426 = vmatpush3.msra.mxu1 %v11397_v27 }
0x4e08   :  { %14435 = vmatprep.subr.mxu1 %v14915_v0 }
0x4e09   :  { %v11384_v55 = vmul.f32 1.442695, %v11381_v58 }
0x4e0a   :  { %v11473_v43 = vpop.permute.xlu0 %11472  ;;  %v11551_v31 = vpop.permute.xlu1 %11550 }
0x4e0b   :  { %14847 = vpow2.f32 %v11384_v55  ;;  %14431 = vmatpush3.msra.mxu0 %v11473_v43 }
0x4e0c   :  { %14440 = vmatprep.subr.mxu0 %v14915_v0 }
0x4e0e   :  { %v11629_v15 = vpop.permute.xlu1 %11628 }
0x4e11   :  { %v14846_v41 = vpop.eup %14845 }
0x4e12   :  { %v11386_v9 = vsel %vm252_vm3, %v14846_v41, 0.0  ;;  %v11549_v63 = vpop.permute.xlu1 %11548 }
0x4e13   :  { %11387 = vadd.xlane.f32.xlu0 %v11386_v9 }
0x4e15   :  { %v14848_v57 = vpop.eup %14847 }
0x4e16   :  { %v11389_v44 = vsel %vm252_vm3, %v14848_v57, 0.0 }
0x4e17   :  { %11390 = vadd.xlane.f32.xlu0 %v11389_v44 }
0x4e2d   :  { %11626 = vrot.lane.b32.xlu0 %v16441_v35, %s14934_s18 }
0x4ea0   :  { %v11388_v59 = vpop.xlane.xlu0 %11387 }
0x4ea1   :  { %14849 = vrcp.f32 %v11388_v59 }
0x4ea4   :  { %v11391_v60 = vpop.xlane.xlu0 %11390 }
0x4ea5   :  { %14851 = vrcp.f32 %v11391_v60 }
0x4ea8   :  { %v11627_v25 = vpop.permute.xlu0 %11626 }
0x4eab   :  { %v14850_v61 = vpop.eup %14849 }
0x4eac   :  { %v11393_v49 = vmul.f32 %v14850_v61, %v14846_v41 }
0x4eae   :  { %14428 = vmatmul.mubr.msk.f32.vlgmr.msra.gmra.mrb[210].mxu1 %vm252_vm3, %v11393_v49 }
0x4eaf   :  { %v14852_v62 = vpop.eup %14851  ;;  %14436 = vmatpush3.xpose.msk.msra.mxu1 %vm252_vm3, %v11551_v31  ;;  %14437 = vmatprep.mubr.msk.f32.mxu1 %vm14916_vm0, %v14915_v0 }
0x4eb0   :  { %v11395_v17 = vmul.f32 %v14852_v62, %v14848_v57  ;;  %14445 = vmatprep.subr.mxu1 %v14915_v0 }
0x4eb2   :  { %14433 = vmatmul.mubr.msk.f32.vlgmr.msra.gmra.mrb[214].mxu0 %vm252_vm3, %v11395_v17  ;;  %14438 = vmatmul.mubr.msk.f32.vlgmr.msra.gmra.mrb[212].mxu1 %vm252_vm3, %v11549_v63 }
0x4eb3   :  { %14441 = vmatpush3.xpose.msk.msra.mxu0 %vm252_vm3, %v11629_v15  ;;  %14442 = vmatprep.mubr.msk.f32.mxu0 %vm14916_vm0, %v14915_v0 }
0x4eb4   :  { %14450 = vmatprep.subr.mxu0 %v14915_v0  ;;  %14447 = vmatprep.mubr.msk.f32.mxu1 %vm14916_vm0, %v14915_v0 }
0x4eb6   :  { %14443 = vmatmul.mubr.msk.f32.vlgmr.msra.gmra.mrb[216].mxu0 %vm252_vm3, %v11627_v25 }
0x4eb7   :  { %14452 = vmatprep.mubr.msk.f32.mxu0 %vm14916_vm0, %v14915_v0 }
0x4f81   :  { %v16520_v20 = vpop.f32.mrb[210].mxu1 }
0x4f82   :  { %v14429_v56 = vpop.f32.mrb[211].mxu1 }
0x4f85   :  { %v16522_v45 = vpop.f32.mrb[214].mxu0  ;;  %v11622_v28 = vpop.f32.mrb[212].mxu1 }
0x4f86   :  { %v14772_v29 = vpack.i.bf16 %v16522_v45, %v16520_v20  ;;  %v14434_v18 = vpop.f32.mrb[215].mxu0  ;;  %v14439_v51 = vpop.f32.mrb[213].mxu1  ;;  %v11704_v34 = vsel %vm252_vm3, %v11622_v28, -inf }
0x4f87   :  { %11705 = vmax.xlane.f32.xlu1 %v11704_v34 }
0x4f89   :  { %v11700_v7 = vpop.f32.mrb[216].mxu0 }
0x4f8a   :  { %v14444_v42 = vpop.f32.mrb[217].mxu0  ;;  %v11707_v10 = vsel %vm252_vm3, %v11700_v7, -inf }
0x4f8b   :  { %11708 = vmax.xlane.f32.xlu0 %v11707_v10 }
0x4f98   :  { %11726 = vrot.lane.b32.xlu1 %v16423_v8, %s14933_s17 }
0x4f9c   :  { %11880 = vrot.lane.b32.xlu1 %v16423_v8, %s16735_s30 }
0x4fa0   :  { %11958 = vrot.lane.b32.xlu1 %v16425_v52, %s16735_s30 }
0x4fa1   :  { %11802 = vrot.lane.b32.xlu0 %v16425_v52, %s14933_s17 }
0x4fa4   :  { %11878 = vrot.lane.b32.xlu1 %v16433_v11, %s16735_s30 }
0x5014   :  { %v11706_v47 = vpop.xlane.xlu1 %11705 }
0x5015   :  { %v11710_v5 = vsub.f32 %v11622_v28, %v11706_v47 }
0x5017   :  { %v11712_v23 = vmul.f32 1.442695, %v11710_v5 }
0x5018   :  { %v11727_v46 = vpop.permute.xlu1 %11726  ;;  %v11709_v2 = vpop.xlane.xlu0 %11708 }
0x5019   :  { %14853 = vpow2.f32 %v11712_v23  ;;  %v11711_v3 = vsub.f32 %v11700_v7, %v11709_v2  ;;  %14446 = vmatpush3.msra.mxu1 %v11727_v46  ;;  %v14795_v23 = vld [vmem:[#allocation4 + $0x34] ss:$60 sps:$4 sm:$0xff]  }
0x501a   :  { %14455 = vmatprep.subr.mxu1 %v14915_v0 }
0x501b   :  { %v11714_v26 = vmul.f32 1.442695, %v11711_v3 }
0x501c   :  { %v11803_v6 = vpop.permute.xlu0 %11802  ;;  %v11881_v4 = vpop.permute.xlu1 %11880 }
0x501d   :  { %14855 = vpow2.f32 %v11714_v26  ;;  %14451 = vmatpush3.msra.mxu0 %v11803_v6 }
0x501e   :  { %14460 = vmatprep.subr.mxu0 %v14915_v0 }
0x5020   :  { %v11959_v19 = vpop.permute.xlu1 %11958 }
0x5023   :  { %v14854_v54 = vpop.eup %14853 }
0x5024   :  { %v11716_v36 = vsel %vm252_vm3, %v14854_v54, 0.0 }
0x5025   :  { %11717 = vadd.xlane.f32.xlu0 %v11716_v36 }
0x5027   :  { %v14856_v11 = vpop.eup %14855 }
0x5028   :  { %v11719_v40 = vsel %vm252_vm3, %v14856_v11, 0.0 }
0x5029   :  { %11720 = vadd.xlane.f32.xlu0 %v11719_v40 }
0x503f   :  { %11956 = vrot.lane.b32.xlu0 %v16441_v35, %s16735_s30  ;;  %v11879_v35 = vpop.permute.xlu1 %11878 }
0x50b2   :  { %v11718_v38 = vpop.xlane.xlu0 %11717 }
0x50b3   :  { %14857 = vrcp.f32 %v11718_v38 }
0x50b6   :  { %v11721_v48 = vpop.xlane.xlu0 %11720 }
0x50b7   :  { %14859 = vrcp.f32 %v11721_v48 }
0x50ba   :  { %v11957_v55 = vpop.permute.xlu0 %11956 }
0x50bd   :  { %v14858_v1 = vpop.eup %14857 }
0x50be   :  { %v11723_v27 = vmul.f32 %v14858_v1, %v14854_v54 }
0x50c0   :  { %14448 = vmatmul.mubr.msk.f32.vlgmr.msra.gmra.mrb[214].mxu1 %vm252_vm3, %v11723_v27 }
0x50c1   :  { %v14860_v53 = vpop.eup %14859  ;;  %14456 = vmatpush3.xpose.msk.msra.mxu1 %vm252_vm3, %v11881_v4  ;;  %14457 = vmatprep.mubr.msk.f32.mxu1 %vm14916_vm0, %v14915_v0 }
0x50c2   :  { %v11725_v58 = vmul.f32 %v14860_v53, %v14856_v11  ;;  %14465 = vmatprep.subr.mxu1 %v14915_v0 }
0x50c4   :  { %14453 = vmatmul.mubr.msk.f32.vlgmr.msra.gmra.mrb[218].mxu0 %vm252_vm3, %v11725_v58  ;;  %14458 = vmatmul.mubr.msk.f32.vlgmr.msra.gmra.mrb[216].mxu1 %vm252_vm3, %v11879_v35 }
0x50c5   :  { %14461 = vmatpush3.xpose.msk.msra.mxu0 %vm252_vm3, %v11959_v19  ;;  %14462 = vmatprep.mubr.msk.f32.mxu0 %vm14916_vm0, %v14915_v0 }
0x50c6   :  { %14470 = vmatprep.subr.mxu0 %v14915_v0  ;;  %14467 = vmatprep.mubr.msk.f32.mxu1 %vm14916_vm0, %v14915_v0 }
0x50c8   :  { %14463 = vmatmul.mubr.msk.f32.vlgmr.msra.gmra.mrb[220].mxu0 %vm252_vm3, %v11957_v55 }
0x50c9   :  { %14472 = vmatprep.mubr.msk.f32.mxu0 %vm14916_vm0, %v14915_v0 }
0x5193   :  { %v11798_v43 = vpop.f32.mrb[214].mxu1 }
0x5194   :  { %v14449_v41 = vpop.f32.mrb[215].mxu1 }
0x5197   :  { %v11874_v9 = vpop.f32.mrb[218].mxu0  ;;  %v11952_v57 = vpop.f32.mrb[216].mxu1 }
0x5198   :  { %v14777_v44 = vpack.i.bf16 %v11874_v9, %v11798_v43  ;;  %v14454_v59 = vpop.f32.mrb[219].mxu0  ;;  %v14459_v60 = vpop.f32.mrb[217].mxu1  ;;  %v12034_v31 = vsel %vm252_vm3, %v11952_v57, -inf }
0x5199   :  { %12035 = vmax.xlane.f32.xlu1 %v12034_v31 }
0x519b   :  { %v12030_v61 = vpop.f32.mrb[220].mxu0 }
0x519c   :  { %v14464_v15 = vpop.f32.mrb[221].mxu0  ;;  %v12037_v49 = vsel %vm252_vm3, %v12030_v61, -inf }
0x519d   :  { %12038 = vmax.xlane.f32.xlu0 %v12037_v49 }
0x51aa   :  { %12056 = vrot.lane.b32.xlu1 %v16423_v8, %s14936_s22 }
0x51ae   :  { %14773 = vrot.lane.b32.xlu1 %v14772_v29, %s16725_s29 }
0x51b2   :  { %14778 = vrot.lane.b32.xlu1 %v14777_v44, %s16726_s10 }
0x5226   :  { %v12036_v62 = vpop.xlane.xlu1 %12035 }
0x5227   :  { %v12040_v17 = vsub.f32 %v11952_v57, %v12036_v62 }
0x5229   :  { %v12042_v63 = vmul.f32 1.442695, %v12040_v17 }
0x522a   :  { %v12057_v25 = vpop.permute.xlu1 %12056  ;;  %v12039_v56 = vpop.xlane.xlu0 %12038 }
0x522b   :  { %14861 = vpow2.f32 %v12042_v63  ;;  %v12041_v28 = vsub.f32 %v12030_v61, %v12039_v56  ;;  %14466 = vmatpush3.msra.mxu1 %v12057_v25 }
0x522c   :  { %14475 = vmatprep.subr.bf16.mxu1 %v14915_v0 }
0x522d   :  { %v12044_v18 = vmul.f32 1.442695, %v12041_v28 }
0x522e   :  { %v14774_v54 = vpop.permute.xlu1 %14773 }
0x522f   :  { %14863 = vpow2.f32 %v12044_v18  ;;  %v14776_v11 = vunpack.i.h.bf16 %v14774_v54  ;;  %v14775_v40 = vunpack.i.l.bf16 %v14774_v54 }
0x5231   :  { %v12233_v1 = vsel %vm252_vm3, %v16484_v22, %v14776_v11  ;;  %v12232_v19 = vsel %vm252_vm3, %v16482_v32, %v14775_v40  ;;  %v13613_v22 = vld [vmem:[%s16703_s6 + $0x23] ss:$0 sm:$0xff] }
0x5232   :  { %v14779_v36 = vpop.permute.xlu1 %14778 }
0x5233   :  { %v14781_v38 = vunpack.i.h.bf16 %v14779_v36  ;;  %v14780_v48 = vunpack.i.l.bf16 %v14779_v36 }
0x5235   :  { %v14862_v8 = vpop.eup %14861  ;;  %v12235_v58 = vsel %vm96_vm1, %v12233_v1, %v14781_v38  ;;  %v12234_v35 = vsel %vm96_vm1, %v12232_v19, %v14780_v48 }
0x5236   :  { %v12046_v51 = vsel %vm252_vm3, %v14862_v8, 0.0 }
0x5237   :  { %12047 = vadd.xlane.f32.xlu0 %v12046_v51 }
0x5239   :  { %v14864_v20 = vpop.eup %14863 }
0x523a   :  { %v12049_v45 = vsel %vm252_vm3, %v14864_v20, 0.0 }
0x523b   :  { %12050 = vadd.xlane.f32.xlu0 %v12049_v45 }
0x5251   :  { %12132 = vrot.lane.b32.xlu0 %v16425_v52, %s14936_s22  ;;  %v14796_v52 = vld [vmem:[#allocation4 + $0xac] ss:$60 sps:$4 sm:$0xff]  }
0x52c4   :  { %v12048_v29 = vpop.xlane.xlu0 %12047 }
0x52c5   :  { %14865 = vrcp.f32 %v12048_v29 }
0x52c8   :  { %v12051_v34 = vpop.xlane.xlu0 %12050 }
0x52c9   :  { %14867 = vrcp.f32 %v12051_v34 }
0x52cc   :  { %v12133_v7 = vpop.permute.xlu0 %12132 }
0x52cd   :  { %14471 = vmatpush3.msra.mxu0 %v12133_v7 }
0x52cf   :  { %v14866_v42 = vpop.eup %14865 }
0x52d0   :  { %v12053_v10 = vmul.f32 %v14866_v42, %v14862_v8 }
0x52d2   :  { %14468 = vmatmul.mubr.msk.f32.vlgmr.msra.gmra.mrb[218].mxu1 %vm252_vm3, %v12053_v10  ;;  %v13617_v10 = vld [vmem:[%s16703_s6 + $0x24] ss:$0 sm:$0xff] }
0x52d3   :  { %v14868_v47 = vpop.eup %14867  ;;  %14479 = vmatprep.mubr.msk.bf16.mxu1 %vm14916_vm0, %v14915_v0  ;;  %14476 = vmatpush3.bf16.msra.mxu1 %v14795_v23 }
0x52d4   :  { %v12055_v5 = vmul.f32 %v14868_v47, %v14864_v20  ;;  %14477 = vmatprep.subr.bf16.mxu1 %v14915_v0 }
0x52d6   :  { %14473 = vmatmul.mubr.msk.f32.vlgmr.msra.gmra.mrb[222].mxu0 %vm252_vm3, %v12055_v5  ;;  %v13618_v5 = vld [vmem:[%s16703_s6 + $0x25] ss:$0 sm:$0xff] }
0x52d7   :  { %14478 = vmatpush3.bf16.msra.mxu1 %v14796_v52 }
0x53a5   :  { %v12128_v46 = vpop.f32.mrb[218].mxu1 }
0x53a6   :  { %v14469_v2 = vpop.f32.mrb[219].mxu1 }
0x53a9   :  { %v12204_v3 = vpop.f32.mrb[222].mxu0 }
0x53aa   :  { %v14782_v26 = vpack.i.bf16 %v12204_v3, %v12128_v46  ;;  %v14474_v6 = vpop.f32.mrb[223].mxu0 }
0x53ac   :  { %14783 = vrot.lane.b32.xlu1 %v14782_v26, %s16727_s12 }
0x541e   :  { %v14784_v4 = vpop.permute.xlu1 %14783 }
0x541f   :  { %v14786_v27 = vunpack.i.h.bf16 %v14784_v4  ;;  %v14785_v53 = vunpack.i.l.bf16 %v14784_v4 }
0x5421   :  { %v12237_v55 = vsel %vm1596_vm4, %v12235_v58, %v14786_v27  ;;  %v12236_v43 = vsel %vm1596_vm4, %v12234_v35, %v14785_v53 }
0x5422   :  { %v12238_v41 = vpack.c.bf16 %v12237_v55, %v12236_v43 }
0x5424   :  { %14480 = vmatmul.mubr.msk.bf16.vlgmr.msra.gmra.mrb[220].mxu1 %vm204_vm2, %v12238_v41 }
0x54f7   :  { %v12297_v9 = vpop.f32.mrb[220].mxu1 }
0x54f8   :  { %v12298_v57 = vadd.f32 %v13613_v22, %v12297_v9  ;;  %v14481_v32 = vpop.f32.mrb[221].mxu1 }
0x54f9   :  { %v12300_v44 = vpop.f32.mrb[222].mxu1 }
0x54fa   :  { %v12301_v59 = vadd.f32 %v13613_v22, %v12300_v44  ;;  %v14482_v60 = vpop.f32.mrb[223].mxu1  ;;  %v12304_v31 = vadd.f32 %v12298_v57, %v16411_v39 }
0x54fc   :  { %v12306_v61 = vsel %vm204_vm2, %v12304_v31, 0.0  ;;  %v12305_v15 = vadd.f32 %v12301_v59, %v16413_v50 }
0x54fd   :  { %12307 = vadd.xlane.f32.xlu0 %v12306_v61 }
0x54fe   :  { %v12309_v49 = vsel %vm204_vm2, %v12305_v15, 0.0 }
0x54ff   :  { %12310 = vadd.xlane.f32.xlu1 %v12309_v49 }
0x558a   :  { %v12308_v62 = vpop.xlane.xlu0 %12307 }
0x558b   :  { %v12312_v17 = vmul.f32 0.03125, %v12308_v62 }
0x558c   :  { %v12311_v63 = vpop.xlane.xlu1 %12310 }
0x558d   :  { %v12314_v25 = vsub.f32 %v12304_v31, %v12312_v17  ;;  %v12313_v56 = vmul.f32 0.03125, %v12311_v63 }
0x558f   :  { %v12315_v28 = vsub.f32 %v12305_v15, %v12313_v56  ;;  %v12316_v18 = vmul.f32 %v12314_v25, %v12314_v25 }
0x5591   :  { %v12318_v8 = vsel %vm204_vm2, %v12316_v18, 0.0  ;;  %v12317_v51 = vmul.f32 %v12315_v28, %v12315_v28 }
0x5592   :  { %12319 = vadd.xlane.f32.xlu0 %v12318_v8 }
0x5593   :  { %v12321_v39 = vsel %vm204_vm2, %v12317_v51, 0.0 }
0x5596   :  { %12322 = vadd.xlane.f32.xlu0 %v12321_v39 }
0x561f   :  { %v12320_v20 = vpop.xlane.xlu0 %12319 }
0x5620   :  { %v12324_v50 = vmul.f32 0.03125, %v12320_v20 }
0x5622   :  { %v12326_v45 = vadd.f32 1e-05, %v12324_v50 }
0x5623   :  { %v12323_v29 = vpop.xlane.xlu0 %12322 }
0x5624   :  { %14869 = vrsqrt.f32 %v12326_v45  ;;  %v12325_v34 = vmul.f32 0.03125, %v12323_v29 }
0x5626   :  { %v12327_v7 = vadd.f32 1e-05, %v12325_v34 }
0x5628   :  { %14871 = vrsqrt.f32 %v12327_v7 }
0x562e   :  { %v14870_v42 = vpop.eup %14869 }
0x562f   :  { %v12330_v47 = vmul.f32 %v14870_v42, %v12314_v25 }
0x5631   :  { %v12337_v23 = vmul.f32 %v13617_v10, %v12330_v47 }
0x5632   :  { %v14872_v52 = vpop.eup %14871 }
0x5633   :  { %v16604_v46 = vadd.f32 %v13618_v5, %v12337_v23  ;;  %v12331_v2 = vmul.f32 %v14872_v52, %v12315_v28 }
0x5635   :  { %v12338_v3 = vmul.f32 %v13617_v10, %v12331_v2 }
0x5637   :  { %v16606_v26 = vadd.f32 %v13618_v5, %v12338_v3 }
0x5638   :  { %14909 = dma.done.wait [#allocation3 + $0x1], 8192 }
0x5639   :  { %14910 = vsyncadd [#allocation3 + $0x1], 4294959104  ;;  %12534 = vmatprep.mubr.bf16.mxu0 %v14942_v30  ;;  %12577 = vmatprep.mubr.bf16.mxu1 %v14942_v30  ;;  %v12349_v6 = vld [vmem:[#allocation2 + $0x208] sm:$0xff]  ;;  %v12351_v54 = vld [vmem:[#allocation2 + $0x218] sm:$0xff]  ;;  %v16612_v27 = vpack.c.bf16 %v16606_v26, %v16604_v46 }
0x563a   :  { %v12348_v36 = vld [vmem:[#allocation2 + $0x200] sm:$0xff]  ;;  %12502 = vmatprep.subr.bf16.mxu0 %v12349_v6  ;;  %12545 = vmatprep.subr.bf16.mxu1 %v12351_v54  ;;  %v12350_v11 = vld [vmem:[#allocation2 + $0x210] sm:$0xff]  ;;  %v12365_v40 = vld [vmem:[#allocation2 + $0x308] sm:$0xff] }
0x563b   :  { %v12367_v38 = vld [vmem:[#allocation2 + $0x318] sm:$0xff]  ;;  %12503 = vmatpush1.bf16.msra.mxu0 %v12348_v36  ;;  %12546 = vmatpush1.bf16.msra.mxu1 %v12350_v11  ;;  %v12364_v48 = vld [vmem:[#allocation2 + $0x300] sm:$0xff]  ;;  %v12366_v4 = vld [vmem:[#allocation2 + $0x310] sm:$0xff] }
0x563c   :  { %12504 = vmatprep.subr.bf16.mxu0 %v12365_v40  ;;  %12547 = vmatprep.subr.bf16.mxu1 %v12367_v38  ;;  %v12353_v1 = vld [vmem:[#allocation2 + $0x228] sm:$0xff]  ;;  %v12355_v19 = vld [vmem:[#allocation2 + $0x238] sm:$0xff]  ;;  %v12352_v53 = vld [vmem:[#allocation2 + $0x220] sm:$0xff] }
0x563d   :  { %v12354_v58 = vld [vmem:[#allocation2 + $0x230] sm:$0xff]  ;;  %v12369_v35 = vld [vmem:[#allocation2 + $0x328] sm:$0xff]  ;;  %v12371_v55 = vld [vmem:[#allocation2 + $0x338] sm:$0xff] }
0x563e   :  { %v12368_v43 = vld [vmem:[#allocation2 + $0x320] sm:$0xff]  ;;  %v12370_v41 = vld [vmem:[#allocation2 + $0x330] sm:$0xff]  ;;  %v12357_v22 = vld [vmem:[#allocation2 + $0x248] sm:$0xff] }
0x563f   :  { %12505 = vmatpush1.bf16.msra.mxu0 %v12364_v48  ;;  %12548 = vmatpush1.bf16.msra.mxu1 %v12366_v4  ;;  %v12359_v9 = vld [vmem:[#allocation2 + $0x258] sm:$0xff]  ;;  %v12356_v57 = vld [vmem:[#allocation2 + $0x240] sm:$0xff]  ;;  %v12358_v32 = vld [vmem:[#allocation2 + $0x250] sm:$0xff] }
0x5640   :  { %12588 = vmatprep.subr.bf16.mxu0 %v12353_v1  ;;  %12631 = vmatprep.subr.bf16.mxu1 %v12355_v19  ;;  %v12373_v44 = vld [vmem:[#allocation2 + $0x348] sm:$0xff]  ;;  %v12375_v59 = vld [vmem:[#allocation2 + $0x358] sm:$0xff]  ;;  %v12372_v60 = vld [vmem:[#allocation2 + $0x340] sm:$0xff] }
0x5641   :  { %v12374_v31 = vld [vmem:[#allocation2 + $0x350] sm:$0xff]  ;;  %v12361_v61 = vld [vmem:[#allocation2 + $0x268] sm:$0xff]  ;;  %v12363_v15 = vld [vmem:[#allocation2 + $0x278] sm:$0xff] }
0x5642   :  { %13621 = vmatmul.mubr.msk.bf16.vlgmr.msra.gmra.mrb[224].mxu0 %vm204_vm2, %v16612_v27  ;;  %13622 = vmatmul.mubr.msk.bf16.vlgmr.msra.gmra.mrb[224].mxu1 %vm204_vm2, %v16612_v27  ;;  %v12360_v49 = vld [vmem:[#allocation2 + $0x260] sm:$0xff]  ;;  %v12362_v62 = vld [vmem:[#allocation2 + $0x270] sm:$0xff]  ;;  %v12377_v17 = vld [vmem:[#allocation2 + $0x368] sm:$0xff] }
0x5643   :  { %12589 = vmatpush1.bf16.msra.mxu0 %v12352_v53  ;;  %12632 = vmatpush1.bf16.msra.mxu1 %v12354_v58  ;;  %v12379_v63 = vld [vmem:[#allocation2 + $0x378] sm:$0xff]  ;;  %v12376_v25 = vld [vmem:[#allocation2 + $0x360] sm:$0xff]  ;;  %v12378_v56 = vld [vmem:[#allocation2 + $0x370] sm:$0xff] }
0x5644   :  { %12590 = vmatprep.subr.bf16.mxu0 %v12369_v35  ;;  %12633 = vmatprep.subr.bf16.mxu1 %v12371_v55  ;;  %v12381_v28 = vld [vmem:[#allocation2 + $0x288] sm:$0xff]  ;;  %v12383_v18 = vld [vmem:[#allocation2 + $0x298] sm:$0xff]  ;;  %v12380_v8 = vld [vmem:[#allocation2 + $0x280] sm:$0xff] }
0x5645   :  { %12620 = vmatprep.mubr.bf16.mxu0 %v14942_v30  ;;  %12663 = vmatprep.mubr.bf16.mxu1 %v14942_v30  ;;  %v12382_v51 = vld [vmem:[#allocation2 + $0x290] sm:$0xff]  ;;  %v12397_v39 = vld [vmem:[#allocation2 + $0x388] sm:$0xff]  ;;  %v12399_v20 = vld [vmem:[#allocation2 + $0x398] sm:$0xff] }
0x5646   :  { %v12398_v50 = vld [vmem:[#allocation2 + $0x390] sm:$0xff]  ;;  %v12385_v45 = vld [vmem:[#allocation2 + $0x2a8] sm:$0xff]  ;;  %v12387_v29 = vld [vmem:[#allocation2 + $0x2b8] sm:$0xff] }
0x5647   :  { %12591 = vmatpush1.bf16.msra.mxu0 %v12368_v43  ;;  %12634 = vmatpush1.bf16.msra.mxu1 %v12370_v41  ;;  %v13619_v34 = vld [vmem:[%s16704_s7 + $0x3] ss:$4 sm:$0xff] }
0x5648   :  { %12674 = vmatprep.subr.bf16.mxu0 %v12357_v22  ;;  %12717 = vmatprep.subr.bf16.mxu1 %v12359_v9  ;;  %v12422_v7 = vrot.slane %v13619_v34, %v15306_v16  ;;  %v12430_v42 = vrot.slane %v13619_v34, %v15308_v12  ;;  %v12426_v10 = vrot.slane %v13619_v34, %v15313_v13 }
0x5649   :  { %v12434_v47 = vrot.slane %v13619_v34, %v15315_v14  ;;  %v12442_v55 = vrot.slane %v13619_v34, %v15323_v24  ;;  %v12446_v9 = vrot.slane %v13619_v34, %v15325_v33 }
0x564a   :  { %13623 = vmatmul.mubr.msk.bf16.vlgmr.msra.gmra.mrb[228].mxu0 %vm204_vm2, %v16612_v27  ;;  %13624 = vmatmul.mubr.msk.bf16.vlgmr.msra.gmra.mrb[228].mxu1 %vm204_vm2, %v16612_v27 }
0x564b   :  { %12675 = vmatpush1.bf16.msra.mxu0 %v12356_v57  ;;  %12718 = vmatpush1.bf16.msra.mxu1 %v12358_v32 }
0x564c   :  { %12676 = vmatprep.subr.bf16.mxu0 %v12373_v44  ;;  %12719 = vmatprep.subr.bf16.mxu1 %v12375_v59  ;;  %v12450_v59 = vrot.slane %v13619_v34, %v15327_v37 }
0x564d   :  { %12706 = vmatprep.mubr.bf16.mxu0 %v14942_v30  ;;  %12749 = vmatprep.mubr.bf16.mxu1 %v14942_v30 }
0x564f   :  { %12677 = vmatpush1.bf16.msra.mxu0 %v12372_v60  ;;  %12720 = vmatpush1.bf16.msra.mxu1 %v12374_v31 }
0x5650   :  { %12760 = vmatprep.subr.bf16.mxu0 %v12361_v61  ;;  %12803 = vmatprep.subr.bf16.mxu1 %v12363_v15 }
0x5652   :  { %13625 = vmatmul.mubr.msk.bf16.vlgmr.msra.gmra.mrb[232].mxu0 %vm204_vm2, %v16612_v27  ;;  %13626 = vmatmul.mubr.msk.bf16.vlgmr.msra.gmra.mrb[232].mxu1 %vm204_vm2, %v16612_v27 }
0x5653   :  { %12761 = vmatpush1.bf16.msra.mxu0 %v12360_v49  ;;  %12804 = vmatpush1.bf16.msra.mxu1 %v12362_v62 }
0x5654   :  { %12762 = vmatprep.subr.bf16.mxu0 %v12377_v17  ;;  %12805 = vmatprep.subr.bf16.mxu1 %v12379_v63  ;;  %v12384_v17 = vld [vmem:[#allocation2 + $0x2a0] sm:$0xff]  ;;  %v12386_v63 = vld [vmem:[#allocation2 + $0x2b0] sm:$0xff] }
0x5655   :  { %12792 = vmatprep.mubr.bf16.mxu0 %v14942_v30  ;;  %12835 = vmatprep.mubr.bf16.mxu1 %v14942_v30  ;;  %v12396_v30 = vld [vmem:[#allocation2 + $0x380] sm:$0xff] }
0x5657   :  { %12763 = vmatpush1.bf16.msra.mxu0 %v12376_v25  ;;  %12806 = vmatpush1.bf16.msra.mxu1 %v12378_v56 }
0x5658   :  { %12899 = vmatprep.subr.bf16.mxu0 %v12381_v28  ;;  %12940 = vmatprep.subr.bf16.mxu1 %v12383_v18 }
0x565a   :  { %13627 = vmatmul.mubr.msk.bf16.vlgmr.msra.gmra.mrb[236].mxu0 %vm204_vm2, %v16612_v27  ;;  %13628 = vmatmul.mubr.msk.bf16.vlgmr.msra.gmra.mrb[236].mxu1 %vm204_vm2, %v16612_v27  ;;  %v12438_v27 = vrot.slane %v13619_v34, %v15321_v21 }
0x5660   :  { %12900 = vmatpush1.bf16.xpose.msra.mxu0 %v12380_v8  ;;  %12941 = vmatpush1.bf16.xpose.msra.mxu1 %v12382_v51 }
0x5661   :  { %12901 = vmatprep.subr.bf16.mxu0 %v12397_v39  ;;  %12942 = vmatprep.subr.bf16.mxu1 %v12399_v20 }
0x5668   :  { %12902 = vmatpush1.bf16.xpose.msra.mxu0 %v12396_v30  ;;  %12943 = vmatpush1.bf16.xpose.msra.mxu1 %v12398_v50  ;;  %v12401_v30 = vld [vmem:[#allocation2 + $0x3a8] sm:$0xff]  ;;  %v12403_v50 = vld [vmem:[#allocation2 + $0x3b8] sm:$0xff] }
0x5669   :  { %12981 = vmatprep.subr.bf16.mxu0 %v12385_v45  ;;  %13022 = vmatprep.subr.bf16.mxu1 %v12387_v29  ;;  %v16650_v45 = vld [vmem:[%s16704_s7 + $0x23] ss:$4 sm:$0xff] }
0x5715   :  { %v12536_v5 = vpop.f32.mrb[224].mxu0  ;;  %v12579_v23 = vpop.f32.mrb[224].mxu1 }
0x5716   :  { %v12537_v52 = vadd.f32 %v12536_v5, %v12422_v7  ;;  %v12580_v2 = vadd.f32 %v12579_v23, %v12430_v42  ;;  %v12538_v3 = vpop.f32.mrb[225].mxu0  ;;  %v12581_v6 = vpop.f32.mrb[225].mxu1 }
0x5717   :  { %v12539_v54 = vadd.f32 %v12538_v3, %v12426_v10  ;;  %v12582_v36 = vadd.f32 %v12581_v6, %v12434_v47  ;;  %v12540_v11 = vpop.f32.mrb[226].mxu0  ;;  %v12583_v40 = vpop.f32.mrb[226].mxu1 }
0x5718   :  { %v12848_v38 = vmax.f32 %v12580_v2, 0.0  ;;  %v12541_v48 = vadd.f32 %v12540_v11, %v12422_v7  ;;  %v12584_v4 = vadd.f32 %v12583_v40, %v12430_v42  ;;  %v12542_v1 = vpop.f32.mrb[227].mxu0  ;;  %v12585_v19 = vpop.f32.mrb[227].mxu1  ;;  %v12846_v43 = vmax.f32 %v12537_v52, 0.0 }
0x5719   :  { %v12849_v53 = vmax.f32 %v12582_v36, 0.0  ;;  %v12543_v58 = vadd.f32 %v12542_v1, %v12426_v10  ;;  %v12586_v35 = vadd.f32 %v12585_v19, %v12434_v47  ;;  %v12847_v57 = vmax.f32 %v12539_v54, 0.0 }
0x571a   :  { %v12862_v41 = vmax.f32 %v12541_v48, 0.0  ;;  %v12864_v22 = vmax.f32 %v12584_v4, 0.0  ;;  %v12454_v54 = vrot.slane %v16650_v45, %v15306_v16  ;;  %v12462_v36 = vrot.slane %v16650_v45, %v15308_v12 }
0x571b   :  { %v12863_v32 = vmax.f32 %v12543_v58, 0.0  ;;  %v12865_v44 = vmax.f32 %v12586_v35, 0.0  ;;  %v12466_v48 = vrot.slane %v16650_v45, %v15315_v14  ;;  %v12400_v35 = vld [vmem:[#allocation2 + $0x3a0] sm:$0xff] }
0x571c   :  { %v12878_v60 = vpack.c.bf16 %v12862_v41, %v12846_v43  ;;  %v12880_v31 = vpack.c.bf16 %v12864_v22, %v12848_v38  ;;  %v12458_v38 = vrot.slane %v16650_v45, %v15313_v13  ;;  %v12389_v22 = vld [vmem:[#allocation2 + $0x2c8] sm:$0xff] }
0x571d   :  { %v12879_v61 = vpack.c.bf16 %v12863_v32, %v12847_v57  ;;  %v12881_v15 = vpack.c.bf16 %v12865_v44, %v12849_v53  ;;  %v12622_v49 = vpop.f32.mrb[228].mxu0  ;;  %v12665_v62 = vpop.f32.mrb[228].mxu1 }
0x571e   :  { %v12623_v25 = vadd.f32 %v12622_v49, %v12438_v27  ;;  %v12624_v56 = vpop.f32.mrb[229].mxu0  ;;  %v12666_v28 = vadd.f32 %v12665_v62, %v12446_v9  ;;  %v12667_v18 = vpop.f32.mrb[229].mxu1 }
0x571f   :  { %12931 = vmatprep.mubr.bf16.mxu0 %v12879_v61  ;;  %12972 = vmatprep.mubr.bf16.mxu1 %v12881_v15  ;;  %v12625_v8 = vadd.f32 %v12624_v56, %v12442_v55  ;;  %v12626_v51 = vpop.f32.mrb[230].mxu0  ;;  %v12668_v39 = vadd.f32 %v12667_v18, %v12450_v59  ;;  %v12669_v20 = vpop.f32.mrb[230].mxu1  ;;  %v12478_v18 = vrot.slane %v16650_v45, %v15325_v33 }
0x5720   :  { %12932 = vmatmul.mubr.bf16.vlgmr.msra.gmra.mrb[240].mxu0 %v12878_v60  ;;  %12973 = vmatmul.mubr.bf16.vlgmr.msra.gmra.mrb[240].mxu1 %v12880_v31  ;;  %v12850_v29 = vmax.f32 %v12623_v25, 0.0  ;;  %v12627_v34 = vadd.f32 %v12626_v51, %v12438_v27  ;;  %v12852_v7 = vmax.f32 %v12666_v28, 0.0  ;;  %v12628_v42 = vpop.f32.mrb[231].mxu0  ;;  %v12670_v10 = vadd.f32 %v12669_v20, %v12446_v9  ;;  %v12671_v47 = vpop.f32.mrb[231].mxu1  ;;  %v12391_v9 = vld [vmem:[#allocation2 + $0x2d8] sm:$0xff] }
0x5721   :  { %12982 = vmatpush1.bf16.xpose.msra.mxu0 %v12384_v17  ;;  %13023 = vmatpush1.bf16.xpose.msra.mxu1 %v12386_v63  ;;  %v12851_v5 = vmax.f32 %v12625_v8, 0.0  ;;  %v12629_v23 = vadd.f32 %v12628_v42, %v12442_v55  ;;  %v12853_v52 = vmax.f32 %v12668_v39, 0.0  ;;  %v12672_v2 = vadd.f32 %v12671_v47, %v12450_v59  ;;  %v12402_v55 = vld [vmem:[#allocation2 + $0x3b0] sm:$0xff] }
0x5722   :  { %v12866_v3 = vmax.f32 %v12627_v34, 0.0  ;;  %v12868_v6 = vmax.f32 %v12670_v10, 0.0  ;;  %12983 = vmatprep.subr.bf16.mxu0 %v12401_v30  ;;  %13024 = vmatprep.subr.bf16.mxu1 %v12403_v50  ;;  %v12470_v28 = vrot.slane %v16650_v45, %v15321_v21  ;;  %v12474_v39 = vrot.slane %v16650_v45, %v15323_v24  ;;  %v12388_v10 = vld [vmem:[#allocation2 + $0x2c0] sm:$0xff]  ;;  %v12390_v47 = vld [vmem:[#allocation2 + $0x2d0] sm:$0xff] }
0x5723   :  { %v12867_v11 = vmax.f32 %v12629_v23, 0.0  ;;  %v12869_v40 = vmax.f32 %v12672_v2, 0.0  ;;  %v12482_v20 = vrot.slane %v16650_v45, %v15327_v37  ;;  %v12407_v2 = vld [vmem:[#allocation2 + $0x3d8] sm:$0xff] }
0x5724   :  { %v12882_v4 = vpack.c.bf16 %v12866_v3, %v12850_v29  ;;  %v12884_v1 = vpack.c.bf16 %v12868_v6, %v12852_v7 }
0x5725   :  { %v12883_v19 = vpack.c.bf16 %v12867_v11, %v12851_v5  ;;  %v12885_v27 = vpack.c.bf16 %v12869_v40, %v12853_v52  ;;  %v12708_v53 = vpop.f32.mrb[232].mxu0  ;;  %v12751_v58 = vpop.f32.mrb[232].mxu1  ;;  %v12405_v52 = vld [vmem:[#allocation2 + $0x3c8] sm:$0xff] }
0x5726   :  { %v12709_v16 = vadd.f32 %v12708_v53, %v12454_v54  ;;  %v12710_v43 = vpop.f32.mrb[233].mxu0  ;;  %v12752_v41 = vadd.f32 %v12751_v58, %v12462_v36  ;;  %v12753_v12 = vpop.f32.mrb[233].mxu1 }
0x5727   :  { %13013 = vmatprep.mubr.bf16.mxu0 %v12883_v19  ;;  %13054 = vmatprep.mubr.bf16.mxu1 %v12885_v27  ;;  %v12711_v13 = vadd.f32 %v12710_v43, %v12458_v38  ;;  %v12712_v57 = vpop.f32.mrb[234].mxu0  ;;  %v12754_v32 = vadd.f32 %v12753_v12, %v12466_v48  ;;  %v12755_v14 = vpop.f32.mrb[234].mxu1  ;;  %v12404_v12 = vld [vmem:[#allocation2 + $0x3c0] sm:$0xff] }
0x5728   :  { %v12854_v44 = vmax.f32 %v12709_v16, 0.0  ;;  %v12713_v59 = vadd.f32 %v12712_v57, %v12454_v54  ;;  %v12856_v60 = vmax.f32 %v12752_v41, 0.0  ;;  %v12714_v31 = vpop.f32.mrb[235].mxu0  ;;  %v12756_v61 = vadd.f32 %v12755_v14, %v12462_v36  ;;  %v12757_v15 = vpop.f32.mrb[235].mxu1  ;;  %v12392_v57 = vld [vmem:[#allocation2 + $0x2e0] sm:$0xff]  ;;  %v12409_v14 = vld [vmem:[#allocation2 + $0x3e8] sm:$0xff] }
0x5729   :  { %12984 = vmatpush1.bf16.xpose.msra.mxu0 %v12400_v35  ;;  %13025 = vmatpush1.bf16.xpose.msra.mxu1 %v12402_v55  ;;  %v12855_v49 = vmax.f32 %v12711_v13, 0.0  ;;  %v12715_v62 = vadd.f32 %v12714_v31, %v12458_v38  ;;  %v12857_v17 = vmax.f32 %v12754_v32, 0.0  ;;  %v12758_v63 = vadd.f32 %v12757_v15, %v12466_v48  ;;  %v12395_v13 = vld [vmem:[#allocation2 + $0x2f8] sm:$0xff]  ;;  %v12394_v32 = vld [vmem:[#allocation2 + $0x2f0] sm:$0xff]  ;;  %v13629_v31 = vld [vmem:[%s16703_s6 + $0x26] ss:$0 sm:$0xff] }
0x572a   :  { %13063 = vmatprep.subr.bf16.mxu0 %v12389_v22  ;;  %13104 = vmatprep.subr.bf16.mxu1 %v12391_v9  ;;  %v12870_v25 = vmax.f32 %v12713_v59, 0.0  ;;  %v12872_v56 = vmax.f32 %v12756_v61, 0.0  ;;  %v12406_v22 = vld [vmem:[#allocation2 + $0x3d0] sm:$0xff]  ;;  %v12393_v9 = vld [vmem:[#allocation2 + $0x2e8] sm:$0xff]  ;;  %v12408_v59 = vld [vmem:[#allocation2 + $0x3e0] sm:$0xff] }
0x572b   :  { %v12871_v8 = vmax.f32 %v12715_v62, 0.0  ;;  %v12873_v51 = vmax.f32 %v12758_v63, 0.0 }
0x572c   :  { %v12886_v30 = vpack.c.bf16 %v12870_v25, %v12854_v44  ;;  %v12888_v50 = vpack.c.bf16 %v12872_v56, %v12856_v60  ;;  %v12411_v44 = vld [vmem:[#allocation2 + $0x3f8] sm:$0xff]  ;;  %v12410_v60 = vld [vmem:[#allocation2 + $0x3f0] sm:$0xff] }
0x572d   :  { %v12887_v29 = vpack.c.bf16 %v12871_v8, %v12855_v49  ;;  %v12889_v34 = vpack.c.bf16 %v12873_v51, %v12857_v17  ;;  %v12794_v7 = vpop.f32.mrb[236].mxu0  ;;  %v12837_v42 = vpop.f32.mrb[236].mxu1 }
0x572e   :  { %v12795_v21 = vadd.f32 %v12794_v7, %v12470_v28  ;;  %v12796_v5 = vpop.f32.mrb[237].mxu0  ;;  %v12838_v23 = vadd.f32 %v12837_v42, %v12478_v18  ;;  %v12839_v33 = vpop.f32.mrb[237].mxu1 }
0x572f   :  { %v12797_v3 = vadd.f32 %v12796_v5, %v12474_v39  ;;  %v12798_v6 = vpop.f32.mrb[238].mxu0  ;;  %v12840_v24 = vadd.f32 %v12839_v33, %v12482_v20  ;;  %v12841_v54 = vpop.f32.mrb[238].mxu1 }
0x5730   :  { %13014 = vmatmul.mubr.bf16.vlgmr.msra.gmra.mrb[244].mxu0 %v12882_v4  ;;  %13055 = vmatmul.mubr.bf16.vlgmr.msra.gmra.mrb[244].mxu1 %v12884_v1  ;;  %v12858_v37 = vmax.f32 %v12795_v21, 0.0  ;;  %v12799_v45 = vadd.f32 %v12798_v6, %v12470_v28  ;;  %v12860_v36 = vmax.f32 %v12838_v23, 0.0  ;;  %v12800_v11 = vpop.f32.mrb[239].mxu0  ;;  %v12842_v40 = vadd.f32 %v12841_v54, %v12478_v18  ;;  %v12843_v38 = vpop.f32.mrb[239].mxu1 }
0x5731   :  { %13064 = vmatpush1.bf16.xpose.msra.mxu0 %v12388_v10  ;;  %13105 = vmatpush1.bf16.xpose.msra.mxu1 %v12390_v47  ;;  %v12859_v48 = vmax.f32 %v12797_v3, 0.0  ;;  %v12801_v19 = vadd.f32 %v12800_v11, %v12474_v39  ;;  %v12861_v27 = vmax.f32 %v12840_v24, 0.0  ;;  %v12844_v53 = vadd.f32 %v12843_v38, %v12482_v20 }
0x5732   :  { %13065 = vmatprep.subr.bf16.mxu0 %v12405_v52  ;;  %13106 = vmatprep.subr.bf16.mxu1 %v12407_v2  ;;  %v12874_v58 = vmax.f32 %v12799_v45, 0.0  ;;  %v12876_v35 = vmax.f32 %v12842_v40, 0.0 }
0x5733   :  { %13095 = vmatprep.mubr.bf16.mxu0 %v12887_v29  ;;  %13136 = vmatprep.mubr.bf16.mxu1 %v12889_v34  ;;  %v12875_v4 = vmax.f32 %v12801_v19, 0.0  ;;  %v12877_v1 = vmax.f32 %v12844_v53, 0.0 }
0x5734   :  { %v12890_v55 = vpack.c.bf16 %v12874_v58, %v12858_v37  ;;  %v12892_v16 = vpack.c.bf16 %v12876_v35, %v12860_v36 }
0x5735   :  { %v12891_v43 = vpack.c.bf16 %v12875_v4, %v12859_v48  ;;  %v12893_v41 = vpack.c.bf16 %v12877_v1, %v12861_v27 }
0x5739   :  { %13066 = vmatpush1.bf16.xpose.msra.mxu0 %v12404_v12  ;;  %13107 = vmatpush1.bf16.xpose.msra.mxu1 %v12406_v22 }
0x573a   :  { %13145 = vmatprep.subr.bf16.mxu0 %v12393_v9  ;;  %13186 = vmatprep.subr.bf16.mxu1 %v12395_v13 }
0x5740   :  { %13096 = vmatmul.mubr.bf16.vlgmr.msra.gmra.mrb[248].mxu0 %v12886_v30  ;;  %13137 = vmatmul.mubr.bf16.vlgmr.msra.gmra.mrb[248].mxu1 %v12888_v50 }
0x5741   :  { %13146 = vmatpush1.bf16.xpose.msra.mxu0 %v12392_v57  ;;  %13187 = vmatpush1.bf16.xpose.msra.mxu1 %v12394_v32 }
0x5742   :  { %13147 = vmatprep.subr.bf16.mxu0 %v12409_v14  ;;  %13188 = vmatprep.subr.bf16.mxu1 %v12411_v44 }
0x5743   :  { %13177 = vmatprep.mubr.bf16.mxu0 %v12891_v43  ;;  %13218 = vmatprep.mubr.bf16.mxu1 %v12893_v41 }
0x5749   :  { %13148 = vmatpush1.bf16.xpose.msra.mxu0 %v12408_v59  ;;  %13189 = vmatpush1.bf16.xpose.msra.mxu1 %v12410_v60 }
0x574a   :  { %14483 = vmatprep.subr.bf16.mxu0 %v14915_v0 }
0x5750   :  { %13178 = vmatmul.mubr.bf16.vlgmr.msra.gmra.mrb[252].mxu0 %v12890_v55  ;;  %13219 = vmatmul.mubr.bf16.vlgmr.msra.gmra.mrb[252].mxu1 %v12892_v16 }
0x5751   :  { %14487 = vmatprep.mubr.msk.bf16.mxu0 %vm14916_vm0, %v14915_v0 }
0x57f3   :  { %v12933_v61 = vpop.f32.mrb[240].mxu0  ;;  %v12974_v15 = vpop.f32.mrb[240].mxu1 }
0x57f4   :  { %v12934_v49 = vadd.f32 %v13629_v31, %v12933_v61  ;;  %v12935_v62 = vpop.f32.mrb[241].mxu0  ;;  %v12976_v17 = vpop.f32.mrb[241].mxu1  ;;  %v14874_v61 = vld [vmem:[#allocation4 + $0xb0] ss:$60 sps:$4 sm:$0xff]  }
0x57f5   :  { %v12936_v63 = vpop.f32.mrb[242].mxu0  ;;  %v12977_v25 = vpop.f32.mrb[242].mxu1 }
0x57f6   :  { %v12975_v56 = vadd.f32 %v12974_v15, %v12934_v49  ;;  %v12937_v28 = vadd.f32 %v13629_v31, %v12936_v63  ;;  %v12938_v18 = vpop.f32.mrb[243].mxu0  ;;  %v12979_v8 = vpop.f32.mrb[243].mxu1 }
0x57f7   :  { %v13630_v18 = vld [vmem:[%s16703_s6 + $0x27] ss:$0 sm:$0xff] }
0x57f8   :  { %v12978_v51 = vadd.f32 %v12977_v25, %v12937_v28 }
0x5803   :  { %v13015_v39 = vpop.f32.mrb[244].mxu0  ;;  %v13056_v20 = vpop.f32.mrb[244].mxu1 }
0x5804   :  { %v13016_v30 = vadd.f32 %v13015_v39, %v12975_v56  ;;  %v13017_v50 = vpop.f32.mrb[245].mxu0  ;;  %v13058_v29 = vpop.f32.mrb[245].mxu1 }
0x5805   :  { %v13018_v34 = vpop.f32.mrb[246].mxu0  ;;  %v13059_v7 = vpop.f32.mrb[246].mxu1 }
0x5806   :  { %v13057_v42 = vadd.f32 %v13056_v20, %v13016_v30  ;;  %v13019_v10 = vadd.f32 %v13018_v34, %v12978_v51  ;;  %v13020_v47 = vpop.f32.mrb[247].mxu0  ;;  %v13061_v21 = vpop.f32.mrb[247].mxu1  ;;  %v13632_v34 = vld [vmem:[%s16703_s6 + $0x2] ss:$0 sm:$0xff] }
0x5808   :  { %v13060_v5 = vadd.f32 %v13059_v7, %v13019_v10 }
0x5813   :  { %v13097_v23 = vpop.f32.mrb[248].mxu0  ;;  %v13138_v33 = vpop.f32.mrb[248].mxu1 }
0x5814   :  { %v13098_v52 = vadd.f32 %v13097_v23, %v13057_v42  ;;  %v13099_v2 = vpop.f32.mrb[249].mxu0  ;;  %v13140_v3 = vpop.f32.mrb[249].mxu1 }
0x5815   :  { %v13100_v6 = vpop.f32.mrb[250].mxu0  ;;  %v13141_v24 = vpop.f32.mrb[250].mxu1 }
0x5816   :  { %v13139_v54 = vadd.f32 %v13138_v33, %v13098_v52  ;;  %v13101_v37 = vadd.f32 %v13100_v6, %v13060_v5  ;;  %v13102_v45 = vpop.f32.mrb[251].mxu0  ;;  %v13143_v36 = vpop.f32.mrb[251].mxu1 }
0x5818   :  { %v13142_v11 = vadd.f32 %v13141_v24, %v13101_v37 }
0x5823   :  { %v13179_v40 = vpop.f32.mrb[252].mxu0  ;;  %v13220_v38 = vpop.f32.mrb[252].mxu1 }
0x5824   :  { %v13180_v48 = vadd.f32 %v13179_v40, %v13139_v54  ;;  %v13181_v19 = vpop.f32.mrb[253].mxu0  ;;  %v13222_v27 = vpop.f32.mrb[253].mxu1 }
0x5825   :  { %v13182_v53 = vpop.f32.mrb[254].mxu0  ;;  %v13223_v58 = vpop.f32.mrb[254].mxu1 }
0x5826   :  { %v13221_v35 = vadd.f32 %v13220_v38, %v13180_v48  ;;  %v13183_v4 = vadd.f32 %v13182_v53, %v13142_v11  ;;  %v13184_v1 = vpop.f32.mrb[255].mxu0  ;;  %v13225_v55 = vpop.f32.mrb[255].mxu1 }
0x5828   :  { %v13227_v16 = vadd.f32 %v13221_v35, %v16604_v46  ;;  %v13224_v43 = vadd.f32 %v13223_v58, %v13183_v4 }
0x582a   :  { %v13228_v41 = vadd.f32 %v13224_v43, %v16606_v26  ;;  %v13229_v12 = vsel %vm204_vm2, %v13227_v16, 0.0  ;;  %v14873_v26 = vld [vmem:[#allocation4 + $0x38] ss:$60 sps:$4 sm:$0xff]  }
0x582b   :  { %13230 = vadd.xlane.f32.xlu0 %v13229_v12  ;;  %14484 = vmatpush3.bf16.msra.mxu0 %v14873_v26 }
0x582c   :  { %v13232_v22 = vsel %vm204_vm2, %v13228_v41, 0.0  ;;  %14485 = vmatprep.subr.bf16.mxu0 %v14915_v0  ;;  %v13631_v0 = vld [vmem:[%s16703_s6 + $0x28] ss:$0 sm:$0xff] }
0x582f   :  { %13233 = vadd.xlane.f32.xlu0 %v13232_v22  ;;  %14486 = vmatpush3.bf16.msra.mxu0 %v14874_v61 }
0x58b8   :  { %v13231_v9 = vpop.xlane.xlu0 %13230 }
0x58b9   :  { %v13235_v13 = vmul.f32 0.03125, %v13231_v9 }
0x58bb   :  { %v13237_v57 = vsub.f32 %v13227_v16, %v13235_v13 }
0x58bc   :  { %v13234_v32 = vpop.xlane.xlu0 %13233 }
0x58bd   :  { %v13236_v14 = vmul.f32 0.03125, %v13234_v32  ;;  %v13239_v44 = vmul.f32 %v13237_v57, %v13237_v57 }
0x58bf   :  { %v13238_v59 = vsub.f32 %v13228_v41, %v13236_v14  ;;  %v13241_v60 = vsel %vm204_vm2, %v13239_v44, 0.0 }
0x58c0   :  { %13242 = vadd.xlane.f32.xlu1 %v13241_v60 }
0x58c1   :  { %v13240_v46 = vmul.f32 %v13238_v59, %v13238_v59 }
0x58c3   :  { %v13244_v31 = vsel %vm204_vm2, %v13240_v46, 0.0 }
0x58c4   :  { %13245 = vadd.xlane.f32.xlu1 %v13244_v31 }
0x594d   :  { %v13243_v15 = vpop.xlane.xlu1 %13242 }
0x594e   :  { %v13247_v49 = vmul.f32 0.03125, %v13243_v15 }
0x5950   :  { %v13249_v62 = vadd.f32 1e-05, %v13247_v49 }
0x5951   :  { %v13246_v17 = vpop.xlane.xlu1 %13245 }
0x5952   :  { %14875 = vrsqrt.f32 %v13249_v62  ;;  %v13248_v63 = vmul.f32 0.03125, %v13246_v17 }
0x5954   :  { %v13250_v25 = vadd.f32 1e-05, %v13248_v63 }
0x5956   :  { %14877 = vrsqrt.f32 %v13250_v25 }
0x595c   :  { %v14876_v56 = vpop.eup %14875 }
0x595d   :  { %v13253_v28 = vmul.f32 %v14876_v56, %v13237_v57 }
0x595f   :  { %v13260_v39 = vmul.f32 %v13630_v18, %v13253_v28 }
0x5960   :  { %v14878_v8 = vpop.eup %14877 }
0x5961   :  { %v13254_v51 = vmul.f32 %v14878_v8, %v13238_v59  ;;  %v13267_v30 = vadd.f32 %v13631_v0, %v13260_v39 }
0x5963   :  { %v13261_v20 = vmul.f32 %v13630_v18, %v13254_v51 }
0x5965   :  { %v13268_v50 = vadd.f32 %v13631_v0, %v13261_v20 }
0x5967   :  { %v13269_v29 = vpack.c.bf16 %v13268_v50, %v13267_v30 }
0x5969   :  { %14488 = vmatmul.mubr.msk.bf16.vlgmr.msra.gmra.mrb[0].mxu0 %vm204_vm2, %v13269_v29 }
0x5a3c   :  { %v13328_v7 = vpop.f32.mrb[0].mxu0 }
0x5a3d   :  { %v13329_v42 = vadd.f32 %v13632_v34, %v13328_v7  ;;  %v14489_v10 = vpop.f32.mrb[1].mxu0 }
0x5a3e   :  { %v13331_v47 = vpop.f32.mrb[2].mxu0 }
0x5a3f   :  { %13335 = vst [vmem:[%s16706_s9] sm:$0xff] %v13329_v42  ;;  %v13332_v21 = vadd.f32 %v13632_v34, %v13331_v47  ;;  %v14490_v5 = vpop.f32.mrb[3].mxu0 }
0x5a41   :  { %13336 = vst [vmem:[%s16706_s9 + $0x8] sm:$0xff] %v13332_v21 }
0x5a42   :  { %13341 = vsyncpa [#allocation5], 1 }
0x5a43   :  { %13342 = vsyncmov [#allocation3] }
0x5a46   :  { %s13343_s23 = vpop.sfrf %13342 }
0x5a47   :  { %p13636_p8 = scmp.ne.s32.totalorder %s13343_s23, 0 }
0x5a49   :  { %13347 = shalt.err (%p13636_p8)  }
0x5a4a   :  { %13349 = vsyncmov [#allocation3 + $0x1] }
0x5a4d   :  { %s13350_s6 = vpop.sfrf %13349 }
0x5a4e   :  { %p13637_p9 = scmp.ne.s32.totalorder %s13350_s6, 0 }
0x5a50   :  { %13354 = shalt.err (%p13637_p9)  }

</bundles_post_ra>
